<compile_context>
chip_gen: v7x
topology: tpu7x:2x2x1
jax: 0.10.0
libtpu: 0.0.40
codegen_flags: <defaults>
</compile_context>

<pallas_src>
import math
import numpy as np
import jax
import jax.numpy as jnp
from jax import lax
from jax.experimental import pallas as pl
from jax.experimental.pallas import tpu as pltpu


# ----------------------------------------------------------------------------
# in-kernel math helpers (elementwise math kept in f32)
# ----------------------------------------------------------------------------
def _erf(x):
    # Abramowitz & Stegun 7.1.26 rational approximation (max abs err ~1.5e-7),
    # matches nn.GELU()'s exact erf to float32 rounding noise.
    a1, a2, a3, a4, a5 = (0.254829592, -0.284496736, 1.421413741,
                          -1.453152027, 1.061405429)
    p = 0.3275911
    sign = jnp.where(x >= 0.0, 1.0, -1.0)
    ax = jnp.abs(x)
    # EUP approximate reciprocal frees VALU slots under the GELU chain.
    t = pl.reciprocal(1.0 + p * ax, approx=True)
    poly = ((((a5 * t + a4) * t + a3) * t + a2) * t + a1) * t
    return sign * (1.0 - poly * jnp.exp(-ax * ax))


def _gelu_exact(x):
    # nn.GELU() default (erf-based, not tanh approximation)
    return 0.5 * x * (1.0 + _erf(x * (1.0 / math.sqrt(2.0))))


# ----------------------------------------------------------------------------
# Fused kernel: per-patch standardization -> conv1(3x3) ->
#   [GN + GELU + conv3x3] x2 -> residual add -> patch-size projection conv
#   (one matmul) + (precomputed) bias/position-embedding add.
# One grid step processes T patches; activations live in the lane-dense
# layout act[t, y, x*C + c].
# ----------------------------------------------------------------------------
def _vision_embed_kernel(x_ref, qin_ref, w1_ref, b1_ref, g1w_ref, g1b_ref,
                         w2_ref, b2_ref, g2w_ref, g2b_ref,
                         w3_ref, b3_ref, qgc_ref, wp_ref, pos_ref, out_ref,
                         pad1_ref, padm_ref):
    T, P, PCin = x_ref.shape
    C = 64
    S = P * P
    PC = P * C

    # Only the two halo ROWS of each pad scratch need zeroing (the interior is
    # fully rewritten before every conv, and the left/right halo columns were
    # dropped from the layout).  Done every grid step because with megacore
    # "parallel" sharding a core may never execute step 0.
    z1 = jnp.zeros((T, 1, PCin), jnp.float32)
    zm = jnp.zeros((T, 1, PC), jnp.float32)
    pad1_ref[:, 0:1, :] = z1
    pad1_ref[:, P + 1:P + 2, :] = z1
    padm_ref[:, 0:1, :] = zm
    padm_ref[:, P + 1:P + 2, :] = zm

    def lane_tile(v):
        # (T, c) -> (T, P*c): replicate per-channel values across the P
        # x-positions that share the lane dimension.
        return jnp.concatenate([v] * P, axis=-1)

    def conv3x3(pad_ref, w_ref, b_ref):
        # 3x3 / stride-1 / pad-1 conv over T patches in the lane-dense layout.
        # One MXU matmul per kernel row dy: operand = shifted row window of the
        # padded scratch (no im2col copies), weight = banded (K, P*Cout).
        K = pad_ref.shape[2]
        acc = None
        for dy in range(3):
            op = (pad_ref[:, dy:dy + P, :]
                  .reshape(T * P, K).astype(jnp.bfloat16))
            part = jnp.dot(op, w_ref[dy], preferred_element_type=jnp.float32)
            acc = part if acc is None else acc + part
        return acc + b_ref[...]                          # (T*P, P*C) f32

    def group_norm_gelu(h, gw_ref, gb_ref):
        # GroupNorm(num_groups=32, num_channels=64, eps=1e-5) per patch +
        # exact GELU, on the lane-dense activation.  Group statistics: y-sum
        # (XLU reduce) then one small pooling matmul that folds the x-sum and
        # the channel-pair (group) sum.
        h3 = h.reshape(T, P, PC)
        sy1 = jnp.sum(h3, axis=1)                        # (T, P*C)
        sy2 = jnp.sum(h3 * h3, axis=1)                   # (T, P*C)
        gs1 = jnp.dot(sy1, qgc_ref[...], preferred_element_type=jnp.float32)
        gs2 = jnp.dot(sy2, qgc_ref[...], preferred_element_type=jnp.float32)
        inv_cnt = 1.0 / (2.0 * S)        # 2 channels per group * S pixels
        mean = gs1 * inv_cnt                             # (T, C)
        var = jnp.maximum(gs2 * inv_cnt - mean * mean, 0.0)   # biased (torch GN)
        rstd = lax.rsqrt(var + 1e-5)
        scale_c = rstd * gw_ref[...]                     # (T, C)
        shift_c = gb_ref[...] - mean * scale_c           # (T, C)
        y = (h3 * lane_tile(scale_c)[:, None, :]
             + lane_tile(shift_c)[:, None, :])
        return _gelu_exact(y)                            # (T, P, P*C)

    # ---- per-patch, per-channel standardization (f32, torch order) ----
    x3 = x_ref[...]                                      # (T, P, P*Cin)
    sy1 = jnp.sum(x3, axis=1)                            # (T, P*Cin)
    sy2 = jnp.sum(x3 * x3, axis=1)
    s1 = jnp.dot(sy1, qin_ref[...], preferred_element_type=jnp.float32)
    s2 = jnp.dot(sy2, qin_ref[...], preferred_element_type=jnp.float32)
    mean = s1 * (1.0 / S)                                # (T, Cin)
    var = jnp.maximum(s2 - S * mean * mean, 0.0) * (1.0 / (S - 1))  # unbiased
    std = jnp.sqrt(var)
    # one divide on a tiny (T, Cin) tensor, then broadcast multiplies
    scale_c = (1.0 / math.sqrt(P)) / (1e-6 + std)        # folds the /sqrt(P)
    shift_c = -mean * scale_c
    scale = lane_tile(scale_c)                           # (T, P*Cin)
    shift = lane_tile(shift_c)
    pad1_ref[:, 1:P + 1, :] = x3 * scale[:, None, :] + shift[:, None, :]

    # ---- conv1 + residual path ----
    h1 = conv3x3(pad1_ref, w1_ref, b1_ref)               # (T*P, P*C) f32
    act = group_norm_gelu(h1, g1w_ref, g1b_ref)
    padm_ref[:, 1:P + 1, :] = act
    act = conv3x3(padm_ref, w2_ref, b2_ref)
    act = group_norm_gelu(act, g2w_ref, g2b_ref)
    padm_ref[:, 1:P + 1, :] = act
    r = conv3x3(padm_ref, w3_ref, b3_ref)
    h = h1 + r                                           # (T*P, P*C) f32

    # ---- fused epilogue: projection conv (== one matmul) + pos/bias add ----
    h3 = h.reshape(T, P, PC)
    h_flat = jnp.concatenate([h3[:, y, :] for y in range(P)],
                             axis=-1).astype(jnp.bfloat16)     # (T, S*C)
    emb = jnp.dot(h_flat, wp_ref[...],
                  preferred_element_type=jnp.float32)          # (T, E)
    # lane-dense (1, T*E) output slab
    emb_flat = jnp.concatenate([emb[t:t + 1, :] for t in range(T)], axis=-1)
    out_ref[0] = emb_flat + pos_ref[0]


# ----------------------------------------------------------------------------
# glue: position ids (eval path) + full forward
# ----------------------------------------------------------------------------
def eval_position_ids(seq_len, h0, w0, vocab):
    seq_idx = jnp.arange(seq_len)
    row_idx = seq_idx // w0
    col_idx = seq_idx % w0
    col_hi = ((col_idx + 1).astype(jnp.float32) / w0 * vocab).astype(jnp.int32)
    col_lo = (col_idx.astype(jnp.float32) / w0 * vocab).astype(jnp.int32)
    row_hi = ((row_idx + 1).astype(jnp.float32) / h0 * vocab).astype(jnp.int32)
    row_lo = (row_idx.astype(jnp.float32) / h0 * vocab).astype(jnp.int32)
    row_enc = ((row_lo + row_hi).astype(jnp.float32) / 2).astype(jnp.int32)
    col_enc = ((col_lo + col_hi).astype(jnp.float32) / 2).astype(jnp.int32)
    return row_enc, col_enc


def _pick_block_patches(n_patches, target=32):
    # Largest divisor of the patch count <= target, preferring G >= 2 so the
    # "parallel" grid axis can feed both v7x TensorCores.  (A prime patch
    # count would still fall back to small T — acceptable, just slower.)
    divs = [d for d in range(1, n_patches + 1)
            if n_patches % d == 0 and d <= target]
    pref = [d for d in divs if n_patches // d >= 2]
    return max(pref) if pref else max(divs)


def vision_embedding_forward(pixel_values, pk, cfg, block_patches=None):
    # TODO(synk): training-mode per-position torch.randint sampling of position
    # ids (and dropout) is not implemented; this is the eval-mode path.
    B, Cin, H, W = pixel_values.shape
    P, E, V = cfg['patch_size'], cfg['n_embed'], cfg['pos_vocab']
    C = 64
    h0, w0 = H // P, W // P
    seq = h0 * w0
    N = B * seq

    T = block_patches or _pick_block_patches(N)
    assert N % T == 0
    G = N // T

    # einops 'b c (h p1) (w p2) -> (b h w) c p1 p2', converted to the
    # lane-dense layout patches[n, y, x*Cin + c].
    patches = (pixel_values
               .reshape(B, Cin, h0, P, w0, P)
               .transpose(0, 2, 4, 3, 5, 1)
               .reshape(N, P, P * Cin)).astype(jnp.float32)

    # Precompute (row pos-emb + col pos-emb + projection bias) as ONE
    # lane-dense (G, 1, T*E) slab.
    row_enc, col_enc = eval_position_ids(seq, h0, w0, V)
    pos = pk['row_emb'][row_enc] + pk['col_emb'][col_enc] + pk['bp'][None, :]
    pos = jnp.tile(pos, (B, 1)).reshape(G, 1, T * E).astype(jnp.float32)

    def full(shape):
        return pl.BlockSpec(shape, lambda n, _nd=len(shape): (0,) * _nd)

    grid_spec = pltpu.PrefetchScalarGridSpec(
        num_scalar_prefetch=0,
        grid=(G,),
        in_specs=[
            pl.BlockSpec((T, P, P * Cin), lambda n: (n, 0, 0)),
            full(pk['q_in'].shape),
            full(pk['w1b'].shape), full((1, P * C)),
            full((1, C)), full((1, C)),
            full(pk['w2b'].shape), full((1, P * C)),
            full((1, C)), full((1, C)),
            full(pk['w3b'].shape), full((1, P * C)),
            full(pk['q_gc'].shape),
            full(pk['wp_mat'].shape),
            pl.BlockSpec((1, 1, T * E), lambda n: (n, 0, 0)),
        ],
        out_specs=pl.BlockSpec((1, 1, T * E), lambda n: (n, 0, 0)),
        scratch_shapes=[
            pltpu.VMEM((T, P + 2, P * Cin), jnp.float32),  # conv1 pad scratch
            pltpu.VMEM((T, P + 2, P * C), jnp.float32),    # conv2/3 pad scratch
        ],
    )
    out = pl.pallas_call(
        _vision_embed_kernel,
        out_shape=jax.ShapeDtypeStruct((G, 1, T * E), jnp.float32),
        grid_spec=grid_spec,
        compiler_params=pltpu.CompilerParams(
            dimension_semantics=("parallel",),
            vmem_limit_bytes=32 * 1024 * 1024),
    )(patches, pk['q_in'],
      pk['w1b'], pk['b1l'], pk['g1w'], pk['g1b'],
      pk['w2b'], pk['b2l'], pk['g2w'], pk['g2b'],
      pk['w3b'], pk['b3l'], pk['q_gc'], pk['wp_mat'], pos)
    return out.reshape(B, seq, E)


# ----------------------------------------------------------------------------
# parameters (torch-layout copy for the reference, kernel-layout copy for Pallas)
# ----------------------------------------------------------------------------
def init_params(key, cfg):
    P, Cin = cfg['patch_size'], cfg['num_channels']
    E, V = cfg['n_embed'], cfg['pos_vocab']
    C = 64
    f32, bf16 = jnp.float32, jnp.bfloat16
    ks = jax.random.split(key, 14)
    w1 = 0.1 * jax.random.normal(ks[0], (C, Cin, 3, 3), f32)   # OIHW
    b1 = 0.1 * jax.random.normal(ks[1], (C,), f32)
    w2 = 0.05 * jax.random.normal(ks[2], (C, C, 3, 3), f32)
    b2 = 0.1 * jax.random.normal(ks[3], (C,), f32)
    w3 = 0.05 * jax.random.normal(ks[4], (C, C, 3, 3), f32)
    b3 = 0.1 * jax.random.normal(ks[5], (C,), f32)
    g1w = 1.0 + 0.1 * jax.random.normal(ks[6], (C,), f32)
    g1b = 0.1 * jax.random.normal(ks[7], (C,), f32)
    g2w = 1.0 + 0.1 * jax.random.normal(ks[8], (C,), f32)
    g2b = 0.1 * jax.random.normal(ks[9], (C,), f32)
    wp = 0.05 * jax.random.normal(ks[10], (E, C, P, P), f32)   # OIHW
    bp = 0.1 * jax.random.normal(ks[11], (E,), f32)
    row_emb = 0.2 * jax.random.normal(ks[12], (V, E), f32)
    col_emb = 0.2 * jax.random.normal(ks[13], (V, E), f32)

    def banded_conv_w(w_oihw):
        # torch (O, I, 3, 3) -> (3, P*I, P*O): one banded matrix per kernel
        # row dy mapping the lane-dense padded row window pad[t, y+dy, xin*I+c]
        # to the lane-dense output out[t, y, x*O+o].  Taps that would read the
        # (dropped) left/right zero halo simply have no rows.
        w_np = np.asarray(w_oihw, np.float32)
        cout, cin = w_np.shape[0], w_np.shape[1]
        W = np.zeros((3, P * cin, P * cout), np.float32)
        for dy in range(3):
            for x in range(P):
                for dx in range(3):
                    xin = x + dx - 1
                    if 0 <= xin < P:
                        W[dy, xin * cin:(xin + 1) * cin,
                          x * cout:(x + 1) * cout] = w_np[:, :, dy, dx].T
        return jnp.asarray(W, bf16)

    def lane_bias(b):
        # per-channel bias tiled across the P x-positions on the lane dim
        return jnp.tile(b, P).reshape(1, P * C)

    # pooling matrices over the lane-dense x-major layout:
    #  q_in  (P*Cin, Cin): per-channel sum over x
    #  q_gc  (P*C,   C)  : per-group (channel-pair) sum over x and channel
    q_in = jnp.asarray(np.tile(np.eye(Cin, dtype=np.float32), (P, 1)))
    cidx = np.arange(C)
    gmask = (cidx[:, None] // 2 == cidx[None, :] // 2).astype(np.float32)
    q_gc = jnp.asarray(np.tile(gmask, (P, 1)))

    params_torch = dict(w1=w1, b1=b1, w2=w2, b2=b2, w3=w3, b3=b3,
                        g1w=g1w, g1b=g1b, g2w=g2w, g2b=g2b,
                        wp=wp, bp=bp, row_emb=row_emb, col_emb=col_emb)
    params_kernel = dict(
        w1b=banded_conv_w(w1), b1l=lane_bias(b1),
        w2b=banded_conv_w(w2), b2l=lane_bias(b2),
        w3b=banded_conv_w(w3), b3l=lane_bias(b3),
        g1w=g1w.reshape(1, C), g1b=g1b.reshape(1, C),
        g2w=g2w.reshape(1, C), g2b=g2b.reshape(1, C),
        wp_mat=(jnp.transpose(wp, (2, 3, 1, 0))
                .reshape(P * P * C, E).astype(bf16)),
        bp=bp, row_emb=row_emb, col_emb=col_emb,
        q_in=q_in, q_gc=q_gc,
    )
    return params_torch, params_kernel


# ----------------------------------------------------------------------------
# pure-JAX f32 reference (mirrors the PyTorch module, NCHW) for a sanity check
# ----------------------------------------------------------------------------
def reference_forward(pixel_values, pt, cfg):
    B, Cin, H, W = pixel_values.shape
    P, E, V = cfg['patch_size'], cfg['n_embed'], cfg['pos_vocab']
    h0, w0 = H // P, W // P
    seq = h0 * w0

    def conv2d(x, w, b, stride=1, pad=1):
        out = lax.conv_general_dilated(
            x, w, window_strides=(stride, stride),
            padding=[(pad, pad), (pad, pad)],
            dimension_numbers=('NCHW', 'OIHW', 'NCHW'),
            precision=lax.Precision.HIGHEST)
        return out + b[None, :, None, None]

    def group_norm(x, gw, gb, groups=32, eps=1e-5):
        n, c, hh, ww = x.shape
        xg = x.reshape(n, groups, c // groups, hh, ww)
        mean = xg.mean(axis=(2, 3, 4), keepdims=True)
        var = ((xg - mean) ** 2).mean(axis=(2, 3, 4), keepdims=True)
        x = ((xg - mean) / jnp.sqrt(var + eps)).reshape(n, c, hh, ww)
        return x * gw[None, :, None, None] + gb[None, :, None, None]

    r = (pixel_values.reshape(B, Cin, h0, P, w0, P)
         .transpose(0, 2, 4, 1, 3, 5).reshape(B * seq, Cin, P, P))
    mean = r.mean(axis=(-2, -1), keepdims=True)
    var = ((r - mean) ** 2).sum(axis=(-2, -1), keepdims=True) / (P * P - 1)
    r = (r - mean) / (1e-6 + jnp.sqrt(var))
    r = r / math.sqrt(P)

    x = conv2d(r, pt['w1'], pt['b1'])
    residual = x
    x = jax.nn.gelu(group_norm(x, pt['g1w'], pt['g1b']), approximate=False)
    x = conv2d(x, pt['w2'], pt['b2'])
    x = jax.nn.gelu(group_norm(x, pt['g2w'], pt['g2b']), approximate=False)
    x = conv2d(x, pt['w3'], pt['b3'])
    x = residual + x
    x = conv2d(x, pt['wp'], pt['bp'], stride=P, pad=0)     # (N, E, 1, 1)
    emb = x.reshape(B, seq, E)

    row_enc, col_enc = eval_position_ids(seq, h0, w0, V)
    return emb + pt['row_emb'][row_enc][None] + pt['col_emb'][col_enc][None]


# ----------------------------------------------------------------------------
if __name__ == "__main__":
    cfg = dict(patch_size=8, num_channels=4, n_embed=32, pos_vocab=128)
    B, H, W = 2, 16, 16

    key = jax.random.PRNGKey(0)
    kp, kx = jax.random.split(key)
    params_torch, params_kernel = init_params(kp, cfg)
    pixels = jax.random.normal(kx, (B, cfg['num_channels'], H, W), jnp.float32)

    out = vision_embedding_forward(pixels, params_kernel, cfg)
    out = jax.block_until_ready(out)

    seq = (H // cfg['patch_size']) * (W // cfg['patch_size'])
    assert out.shape == (B, seq, cfg['n_embed']), out.shape

    ref = reference_forward(pixels, params_torch, cfg)
    err_max = float(jnp.max(jnp.abs(out - ref)))
    err_rms = float(jnp.sqrt(jnp.mean((out - ref) ** 2)) /
                    (jnp.sqrt(jnp.mean(ref ** 2)) + 1e-12))
    # Tolerances sized for bf16 MXU operands through three stacked convs plus
    # the K=4096 projection; the relative-RMS bound is the functional check.
    if not (err_max < 1.2e-1 and err_rms < 2.5e-2):
        raise AssertionError(
            f"kernel vs reference mismatch: max_abs={err_max}, rel_rms={err_rms}")

    print("KERNEL_OK")
</pallas_src>

<mosaic_0001>
module attributes {stable_mosaic.version = 11 : i64} {
  func.func @_vision_embed_kernel(%arg0: i32, %arg1: memref<4x8x32xf32, #tpu.memory_space<vmem>>, %arg2: memref<32x4xf32, #tpu.memory_space<vmem>>, %arg3: memref<3x32x512xbf16, #tpu.memory_space<vmem>>, %arg4: memref<1x512xf32, #tpu.memory_space<vmem>>, %arg5: memref<1x64xf32, #tpu.memory_space<vmem>>, %arg6: memref<1x64xf32, #tpu.memory_space<vmem>>, %arg7: memref<3x512x512xbf16, #tpu.memory_space<vmem>>, %arg8: memref<1x512xf32, #tpu.memory_space<vmem>>, %arg9: memref<1x64xf32, #tpu.memory_space<vmem>>, %arg10: memref<1x64xf32, #tpu.memory_space<vmem>>, %arg11: memref<3x512x512xbf16, #tpu.memory_space<vmem>>, %arg12: memref<1x512xf32, #tpu.memory_space<vmem>>, %arg13: memref<512x64xf32, #tpu.memory_space<vmem>>, %arg14: memref<4096x32xbf16, #tpu.memory_space<vmem>>, %arg15: memref<1x1x128xf32, #tpu.memory_space<vmem>>, %arg16: memref<1x1x128xf32, #tpu.memory_space<vmem>>, %arg17: memref<4x10x32xf32, #tpu.memory_space<vmem>>, %arg18: memref<4x10x512xf32, #tpu.memory_space<vmem>>) attributes {dimension_semantics = [#tpu.dimension_semantics<parallel>], iteration_bounds = array<i64: 2>, scalar_prefetch = 0 : i64, scratch_operands = 2 : i64, tpu.core_type = #tpu.core_type<tc>, window_params = [{transform_indices = @transform_0, window_bounds = array<i64: 4, 8, 32>}, {pipeline_mode = #tpu.pipeline_mode<synchronous>, transform_indices = @transform_1, window_bounds = array<i64: 32, 4>}, {pipeline_mode = #tpu.pipeline_mode<synchronous>, transform_indices = @transform_2, window_bounds = array<i64: 3, 32, 512>}, {pipeline_mode = #tpu.pipeline_mode<synchronous>, transform_indices = @transform_3, window_bounds = array<i64: 1, 512>}, {pipeline_mode = #tpu.pipeline_mode<synchronous>, transform_indices = @transform_4, window_bounds = array<i64: 1, 64>}, {pipeline_mode = #tpu.pipeline_mode<synchronous>, transform_indices = @transform_5, window_bounds = array<i64: 1, 64>}, {pipeline_mode = #tpu.pipeline_mode<synchronous>, transform_indices = @transform_6, window_bounds = array<i64: 3, 512, 512>}, {pipeline_mode = #tpu.pipeline_mode<synchronous>, transform_indices = @transform_7, window_bounds = array<i64: 1, 512>}, {pipeline_mode = #tpu.pipeline_mode<synchronous>, transform_indices = @transform_8, window_bounds = array<i64: 1, 64>}, {pipeline_mode = #tpu.pipeline_mode<synchronous>, transform_indices = @transform_9, window_bounds = array<i64: 1, 64>}, {pipeline_mode = #tpu.pipeline_mode<synchronous>, transform_indices = @transform_10, window_bounds = array<i64: 3, 512, 512>}, {pipeline_mode = #tpu.pipeline_mode<synchronous>, transform_indices = @transform_11, window_bounds = array<i64: 1, 512>}, {pipeline_mode = #tpu.pipeline_mode<synchronous>, transform_indices = @transform_12, window_bounds = array<i64: 512, 64>}, {pipeline_mode = #tpu.pipeline_mode<synchronous>, transform_indices = @transform_13, window_bounds = array<i64: 4096, 32>}, {transform_indices = @transform_14, window_bounds = array<i64: 1, 1, 128>}, {transform_indices = @transform_15, window_bounds = array<i64: 1, 1, 128>}]} {
    %cst = arith.constant 0.000000e+00 : f32
    %0 = vector.broadcast %cst : f32 to vector<4x1x32xf32>
    %cst_0 = arith.constant 0.000000e+00 : f32
    %1 = vector.broadcast %cst_0 : f32 to vector<4x1x512xf32>
    %c0 = arith.constant 0 : index
    %c0_1 = arith.constant 0 : index
    %c0_2 = arith.constant 0 : index
    %2 = vector.load %arg17[%c0, %c0_1, %c0_2] : memref<4x10x32xf32, #tpu.memory_space<vmem>>, vector<4x1x32xf32>
    tpu.vector_store %arg17[%c0, %c0_1, %c0_2], %0 {strides = array<i32>} : memref<4x10x32xf32, #tpu.memory_space<vmem>>, vector<4x1x32xf32>,
    %c0_3 = arith.constant 0 : index
    %c9 = arith.constant 9 : index
    %c0_4 = arith.constant 0 : index
    %3 = vector.load %arg17[%c0_3, %c9, %c0_4] : memref<4x10x32xf32, #tpu.memory_space<vmem>>, vector<4x1x32xf32>
    tpu.vector_store %arg17[%c0_3, %c9, %c0_4], %0 {strides = array<i32>} : memref<4x10x32xf32, #tpu.memory_space<vmem>>, vector<4x1x32xf32>,
    %c0_5 = arith.constant 0 : index
    %c0_6 = arith.constant 0 : index
    %c0_7 = arith.constant 0 : index
    %4 = vector.load %arg18[%c0_5, %c0_6, %c0_7] : memref<4x10x512xf32, #tpu.memory_space<vmem>>, vector<4x1x512xf32>
    tpu.vector_store %arg18[%c0_5, %c0_6, %c0_7], %1 {strides = array<i32>} : memref<4x10x512xf32, #tpu.memory_space<vmem>>, vector<4x1x512xf32>,
    %c0_8 = arith.constant 0 : index
    %c9_9 = arith.constant 9 : index
    %c0_10 = arith.constant 0 : index
    %5 = vector.load %arg18[%c0_8, %c9_9, %c0_10] : memref<4x10x512xf32, #tpu.memory_space<vmem>>, vector<4x1x512xf32>
    tpu.vector_store %arg18[%c0_8, %c9_9, %c0_10], %1 {strides = array<i32>} : memref<4x10x512xf32, #tpu.memory_space<vmem>>, vector<4x1x512xf32>,
    %c0_11 = arith.constant 0 : index
    %c0_12 = arith.constant 0 : index
    %c0_13 = arith.constant 0 : index
    %6 = vector.load %arg1[%c0_11, %c0_12, %c0_13] : memref<4x8x32xf32, #tpu.memory_space<vmem>>, vector<4x8x32xf32>
    %cst_14 = arith.constant dense<0.000000e+00> : vector<4x32xf32>
    %7 = vector.multi_reduction <add>, %6, %cst_14 [1] : vector<4x8x32xf32> to vector<4x32xf32>
    %8 = arith.mulf %6, %6 : vector<4x8x32xf32>
    %cst_15 = arith.constant dense<0.000000e+00> : vector<4x32xf32>
    %9 = vector.multi_reduction <add>, %8, %cst_15 [1] : vector<4x8x32xf32> to vector<4x32xf32>
    %c0_16 = arith.constant 0 : index
    %c0_17 = arith.constant 0 : index
    %10 = vector.load %arg2[%c0_16, %c0_17] : memref<32x4xf32, #tpu.memory_space<vmem>>, vector<32x4xf32>
    %cst_18 = arith.constant dense<0.000000e+00> : vector<4x4xf32>
    %11 = tpu.matmul %7, %10, %cst_18 {dimension_numbers = #tpu.dot_dimension_numbers<[1], [0], [0], [1], [0, 0, 1, 1], [], []>} : vector<4x32xf32>, vector<32x4xf32>, vector<4x4xf32> -> vector<4x4xf32>
    %c0_19 = arith.constant 0 : index
    %c0_20 = arith.constant 0 : index
    %12 = vector.load %arg2[%c0_19, %c0_20] : memref<32x4xf32, #tpu.memory_space<vmem>>, vector<32x4xf32>
    %cst_21 = arith.constant dense<0.000000e+00> : vector<4x4xf32>
    %13 = tpu.matmul %9, %12, %cst_21 {dimension_numbers = #tpu.dot_dimension_numbers<[1], [0], [0], [1], [0, 0, 1, 1], [], []>} : vector<4x32xf32>, vector<32x4xf32>, vector<4x4xf32> -> vector<4x4xf32>
    %cst_22 = arith.constant 1.562500e-02 : f32
    %14 = vector.broadcast %cst_22 : f32 to vector<4x4xf32>
    %15 = arith.mulf %11, %14 : vector<4x4xf32>
    %cst_23 = arith.constant 6.400000e+01 : f32
    %16 = vector.broadcast %cst_23 : f32 to vector<4x4xf32>
    %17 = arith.mulf %16, %15 : vector<4x4xf32>
    %18 = arith.mulf %17, %15 : vector<4x4xf32>
    %19 = arith.subf %13, %18 : vector<4x4xf32>
    %cst_24 = arith.constant 0.000000e+00 : f32
    %20 = vector.broadcast %cst_24 : f32 to vector<4x4xf32>
    %21 = arith.maximumf %19, %20 : vector<4x4xf32>
    %cst_25 = arith.constant 0.0158730168 : f32
    %22 = vector.broadcast %cst_25 : f32 to vector<4x4xf32>
    %23 = arith.mulf %21, %22 : vector<4x4xf32>
    %24 = math.sqrt %23 : vector<4x4xf32>
    %cst_26 = arith.constant 9.99999997E-7 : f32
    %25 = vector.broadcast %cst_26 : f32 to vector<4x4xf32>
    %26 = arith.addf %25, %24 : vector<4x4xf32>
    %cst_27 = arith.constant 0.353553385 : f32
    %27 = vector.broadcast %cst_27 : f32 to vector<4x4xf32>
    %28 = arith.divf %27, %26 : vector<4x4xf32>
    %cst_28 = arith.constant 0.000000e+00 : f32
    %29 = vector.broadcast %cst_28 : f32 to vector<4x4xf32>
    %30 = arith.subf %29, %15 : vector<4x4xf32>
    %31 = arith.mulf %30, %28 : vector<4x4xf32>
    %32 = tpu.concatenate %28, %28, %28, %28, %28, %28, %28, %28 in 1 : vector<4x4xf32>, vector<4x4xf32>, vector<4x4xf32>, vector<4x4xf32>, vector<4x4xf32>, vector<4x4xf32>, vector<4x4xf32>, vector<4x4xf32> -> vector<4x32xf32>
    %33 = tpu.concatenate %31, %31, %31, %31, %31, %31, %31, %31 in 1 : vector<4x4xf32>, vector<4x4xf32>, vector<4x4xf32>, vector<4x4xf32>, vector<4x4xf32>, vector<4x4xf32>, vector<4x4xf32>, vector<4x4xf32> -> vector<4x32xf32>
    %34 = vector.shape_cast %32 : vector<4x32xf32> to vector<4x1x32xf32>
    %35 = vector.broadcast %34 : vector<4x1x32xf32> to vector<4x8x32xf32>
    %36 = arith.mulf %6, %35 : vector<4x8x32xf32>
    %37 = vector.shape_cast %33 : vector<4x32xf32> to vector<4x1x32xf32>
    %38 = vector.broadcast %37 : vector<4x1x32xf32> to vector<4x8x32xf32>
    %39 = arith.addf %36, %38 : vector<4x8x32xf32>
    %c0_29 = arith.constant 0 : index
    %c1 = arith.constant 1 : index
    %c0_30 = arith.constant 0 : index
    %40 = vector.load %arg17[%c0_29, %c1, %c0_30] : memref<4x10x32xf32, #tpu.memory_space<vmem>>, vector<4x8x32xf32>
    tpu.vector_store %arg17[%c0_29, %c1, %c0_30], %39 {strides = array<i32>} : memref<4x10x32xf32, #tpu.memory_space<vmem>>, vector<4x8x32xf32>,
    %c0_31 = arith.constant 0 : index
    %c0_32 = arith.constant 0 : index
    %c0_33 = arith.constant 0 : index
    %41 = vector.load %arg17[%c0_31, %c0_32, %c0_33] : memref<4x10x32xf32, #tpu.memory_space<vmem>>, vector<4x8x32xf32>
    %42 = vector.shape_cast %41 : vector<4x8x32xf32> to vector<32x32xf32>
    %43 = arith.truncf %42 : vector<32x32xf32> to vector<32x32xbf16>
    %c0_34 = arith.constant 0 : index
    %c0_35 = arith.constant 0 : index
    %c0_36 = arith.constant 0 : index
    %44 = vector.load %arg3[%c0_34, %c0_35, %c0_36] : memref<3x32x512xbf16, #tpu.memory_space<vmem>>, vector<1x32x512xbf16>
    %45 = vector.shape_cast %44 : vector<1x32x512xbf16> to vector<32x512xbf16>
    %cst_37 = arith.constant dense<0.000000e+00> : vector<32x512xf32>
    %46 = tpu.matmul %43, %45, %cst_37 {dimension_numbers = #tpu.dot_dimension_numbers<[1], [0], [0], [1], [0, 0, 1, 1], [], []>} : vector<32x32xbf16>, vector<32x512xbf16>, vector<32x512xf32> -> vector<32x512xf32>
    %c0_38 = arith.constant 0 : index
    %c1_39 = arith.constant 1 : index
    %c0_40 = arith.constant 0 : index
    %47 = vector.load %arg17[%c0_38, %c1_39, %c0_40] : memref<4x10x32xf32, #tpu.memory_space<vmem>>, vector<4x8x32xf32>
    %48 = vector.shape_cast %47 : vector<4x8x32xf32> to vector<32x32xf32>
    %49 = arith.truncf %48 : vector<32x32xf32> to vector<32x32xbf16>
    %c1_41 = arith.constant 1 : index
    %c0_42 = arith.constant 0 : index
    %c0_43 = arith.constant 0 : index
    %50 = vector.load %arg3[%c1_41, %c0_42, %c0_43] : memref<3x32x512xbf16, #tpu.memory_space<vmem>>, vector<1x32x512xbf16>
    %51 = vector.shape_cast %50 : vector<1x32x512xbf16> to vector<32x512xbf16>
    %cst_44 = arith.constant dense<0.000000e+00> : vector<32x512xf32>
    %52 = tpu.matmul %49, %51, %cst_44 {dimension_numbers = #tpu.dot_dimension_numbers<[1], [0], [0], [1], [0, 0, 1, 1], [], []>} : vector<32x32xbf16>, vector<32x512xbf16>, vector<32x512xf32> -> vector<32x512xf32>
    %53 = arith.addf %46, %52 : vector<32x512xf32>
    %c0_45 = arith.constant 0 : index
    %c2 = arith.constant 2 : index
    %c0_46 = arith.constant 0 : index
    %54 = vector.load %arg17[%c0_45, %c2, %c0_46] : memref<4x10x32xf32, #tpu.memory_space<vmem>>, vector<4x8x32xf32>
    %55 = vector.shape_cast %54 : vector<4x8x32xf32> to vector<32x32xf32>
    %56 = arith.truncf %55 : vector<32x32xf32> to vector<32x32xbf16>
    %c2_47 = arith.constant 2 : index
    %c0_48 = arith.constant 0 : index
    %c0_49 = arith.constant 0 : index
    %57 = vector.load %arg3[%c2_47, %c0_48, %c0_49] : memref<3x32x512xbf16, #tpu.memory_space<vmem>>, vector<1x32x512xbf16>
    %58 = vector.shape_cast %57 : vector<1x32x512xbf16> to vector<32x512xbf16>
    %cst_50 = arith.constant dense<0.000000e+00> : vector<32x512xf32>
    %59 = tpu.matmul %56, %58, %cst_50 {dimension_numbers = #tpu.dot_dimension_numbers<[1], [0], [0], [1], [0, 0, 1, 1], [], []>} : vector<32x32xbf16>, vector<32x512xbf16>, vector<32x512xf32> -> vector<32x512xf32>
    %60 = arith.addf %53, %59 : vector<32x512xf32>
    %c0_51 = arith.constant 0 : index
    %c0_52 = arith.constant 0 : index
    %61 = vector.load %arg4[%c0_51, %c0_52] : memref<1x512xf32, #tpu.memory_space<vmem>>, vector<1x512xf32>
    %62 = vector.broadcast %61 : vector<1x512xf32> to vector<32x512xf32>
    %63 = arith.addf %60, %62 : vector<32x512xf32>
    %64 = vector.shape_cast %63 : vector<32x512xf32> to vector<4x8x512xf32>
    %cst_53 = arith.constant dense<0.000000e+00> : vector<4x512xf32>
    %65 = vector.multi_reduction <add>, %64, %cst_53 [1] : vector<4x8x512xf32> to vector<4x512xf32>
    %66 = arith.mulf %64, %64 : vector<4x8x512xf32>
    %cst_54 = arith.constant dense<0.000000e+00> : vector<4x512xf32>
    %67 = vector.multi_reduction <add>, %66, %cst_54 [1] : vector<4x8x512xf32> to vector<4x512xf32>
    %c0_55 = arith.constant 0 : index
    %c0_56 = arith.constant 0 : index
    %68 = vector.load %arg13[%c0_55, %c0_56] : memref<512x64xf32, #tpu.memory_space<vmem>>, vector<512x64xf32>
    %cst_57 = arith.constant dense<0.000000e+00> : vector<4x64xf32>
    %69 = tpu.matmul %65, %68, %cst_57 {dimension_numbers = #tpu.dot_dimension_numbers<[1], [0], [0], [1], [0, 0, 1, 1], [], []>} : vector<4x512xf32>, vector<512x64xf32>, vector<4x64xf32> -> vector<4x64xf32>
    %c0_58 = arith.constant 0 : index
    %c0_59 = arith.constant 0 : index
    %70 = vector.load %arg13[%c0_58, %c0_59] : memref<512x64xf32, #tpu.memory_space<vmem>>, vector<512x64xf32>
    %cst_60 = arith.constant dense<0.000000e+00> : vector<4x64xf32>
    %71 = tpu.matmul %67, %70, %cst_60 {dimension_numbers = #tpu.dot_dimension_numbers<[1], [0], [0], [1], [0, 0, 1, 1], [], []>} : vector<4x512xf32>, vector<512x64xf32>, vector<4x64xf32> -> vector<4x64xf32>
    %cst_61 = arith.constant 7.812500e-03 : f32
    %72 = vector.broadcast %cst_61 : f32 to vector<4x64xf32>
    %73 = arith.mulf %69, %72 : vector<4x64xf32>
    %cst_62 = arith.constant 7.812500e-03 : f32
    %74 = vector.broadcast %cst_62 : f32 to vector<4x64xf32>
    %75 = arith.mulf %71, %74 : vector<4x64xf32>
    %76 = arith.mulf %73, %73 : vector<4x64xf32>
    %77 = arith.subf %75, %76 : vector<4x64xf32>
    %cst_63 = arith.constant 0.000000e+00 : f32
    %78 = vector.broadcast %cst_63 : f32 to vector<4x64xf32>
    %79 = arith.maximumf %77, %78 : vector<4x64xf32>
    %cst_64 = arith.constant 9.99999974E-6 : f32
    %80 = vector.broadcast %cst_64 : f32 to vector<4x64xf32>
    %81 = arith.addf %79, %80 : vector<4x64xf32>
    %82 = math.rsqrt %81 : vector<4x64xf32>
    %c0_65 = arith.constant 0 : index
    %c0_66 = arith.constant 0 : index
    %83 = vector.load %arg5[%c0_65, %c0_66] : memref<1x64xf32, #tpu.memory_space<vmem>>, vector<1x64xf32>
    %84 = vector.broadcast %83 : vector<1x64xf32> to vector<4x64xf32>
    %85 = arith.mulf %82, %84 : vector<4x64xf32>
    %c0_67 = arith.constant 0 : index
    %c0_68 = arith.constant 0 : index
    %86 = vector.load %arg6[%c0_67, %c0_68] : memref<1x64xf32, #tpu.memory_space<vmem>>, vector<1x64xf32>
    %87 = arith.mulf %73, %85 : vector<4x64xf32>
    %88 = vector.broadcast %86 : vector<1x64xf32> to vector<4x64xf32>
    %89 = arith.subf %88, %87 : vector<4x64xf32>
    %90 = tpu.concatenate %85, %85, %85, %85, %85, %85, %85, %85 in 1 : vector<4x64xf32>, vector<4x64xf32>, vector<4x64xf32>, vector<4x64xf32>, vector<4x64xf32>, vector<4x64xf32>, vector<4x64xf32>, vector<4x64xf32> -> vector<4x512xf32>
    %91 = vector.shape_cast %90 : vector<4x512xf32> to vector<4x1x512xf32>
    %92 = vector.broadcast %91 : vector<4x1x512xf32> to vector<4x8x512xf32>
    %93 = arith.mulf %64, %92 : vector<4x8x512xf32>
    %94 = tpu.concatenate %89, %89, %89, %89, %89, %89, %89, %89 in 1 : vector<4x64xf32>, vector<4x64xf32>, vector<4x64xf32>, vector<4x64xf32>, vector<4x64xf32>, vector<4x64xf32>, vector<4x64xf32>, vector<4x64xf32> -> vector<4x512xf32>
    %95 = vector.shape_cast %94 : vector<4x512xf32> to vector<4x1x512xf32>
    %96 = vector.broadcast %95 : vector<4x1x512xf32> to vector<4x8x512xf32>
    %97 = arith.addf %93, %96 : vector<4x8x512xf32>
    %cst_69 = arith.constant 5.000000e-01 : f32
    %98 = vector.broadcast %cst_69 : f32 to vector<4x8x512xf32>
    %99 = arith.mulf %98, %97 : vector<4x8x512xf32>
    %cst_70 = arith.constant 0.707106769 : f32
    %100 = vector.broadcast %cst_70 : f32 to vector<4x8x512xf32>
    %101 = arith.mulf %97, %100 : vector<4x8x512xf32>
    %cst_71 = arith.constant 0.000000e+00 : f32
    %102 = vector.broadcast %cst_71 : f32 to vector<4x8x512xf32>
    %103 = arith.cmpf oge, %101, %102 : vector<4x8x512xf32>
    %cst_72 = arith.constant 1.000000e+00 : f32
    %cst_73 = arith.constant -1.000000e+00 : f32
    %104 = vector.broadcast %cst_72 : f32 to vector<4x8x512xf32>
    %105 = vector.broadcast %cst_73 : f32 to vector<4x8x512xf32>
    %106 = arith.select %103, %104, %105 : vector<4x8x512xi1>, vector<4x8x512xf32>
    %107 = math.absf %101 : vector<4x8x512xf32>
    %cst_74 = arith.constant 0.327591091 : f32
    %108 = vector.broadcast %cst_74 : f32 to vector<4x8x512xf32>
    %109 = arith.mulf %108, %107 : vector<4x8x512xf32>
    %cst_75 = arith.constant 1.000000e+00 : f32
    %110 = vector.broadcast %cst_75 : f32 to vector<4x8x512xf32>
    %111 = arith.addf %110, %109 : vector<4x8x512xf32>
    %112 = tpu.reciprocal %111 {approx = true} : vector<4x8x512xf32> -> vector<4x8x512xf32>
    %cst_76 = arith.constant 1.06140542 : f32
    %113 = vector.broadcast %cst_76 : f32 to vector<4x8x512xf32>
    %114 = arith.mulf %113, %112 : vector<4x8x512xf32>
    %cst_77 = arith.constant -1.45315206 : f32
    %115 = vector.broadcast %cst_77 : f32 to vector<4x8x512xf32>
    %116 = arith.addf %114, %115 : vector<4x8x512xf32>
    %117 = arith.mulf %116, %112 : vector<4x8x512xf32>
    %cst_78 = arith.constant 1.42141378 : f32
    %118 = vector.broadcast %cst_78 : f32 to vector<4x8x512xf32>
    %119 = arith.addf %117, %118 : vector<4x8x512xf32>
    %120 = arith.mulf %119, %112 : vector<4x8x512xf32>
    %cst_79 = arith.constant -0.284496725 : f32
    %121 = vector.broadcast %cst_79 : f32 to vector<4x8x512xf32>
    %122 = arith.addf %120, %121 : vector<4x8x512xf32>
    %123 = arith.mulf %122, %112 : vector<4x8x512xf32>
    %cst_80 = arith.constant 0.254829586 : f32
    %124 = vector.broadcast %cst_80 : f32 to vector<4x8x512xf32>
    %125 = arith.addf %123, %124 : vector<4x8x512xf32>
    %126 = arith.mulf %125, %112 : vector<4x8x512xf32>
    %cst_81 = arith.constant 0.000000e+00 : f32
    %127 = vector.broadcast %cst_81 : f32 to vector<4x8x512xf32>
    %128 = arith.subf %127, %107 : vector<4x8x512xf32>
    %129 = arith.mulf %128, %107 : vector<4x8x512xf32>
    %130 = math.exp %129 : vector<4x8x512xf32>
    %131 = arith.mulf %126, %130 : vector<4x8x512xf32>
    %cst_82 = arith.constant 1.000000e+00 : f32
    %132 = vector.broadcast %cst_82 : f32 to vector<4x8x512xf32>
    %133 = arith.subf %132, %131 : vector<4x8x512xf32>
    %134 = arith.mulf %106, %133 : vector<4x8x512xf32>
    %cst_83 = arith.constant 1.000000e+00 : f32
    %135 = vector.broadcast %cst_83 : f32 to vector<4x8x512xf32>
    %136 = arith.addf %135, %134 : vector<4x8x512xf32>
    %137 = arith.mulf %99, %136 : vector<4x8x512xf32>
    %c0_84 = arith.constant 0 : index
    %c1_85 = arith.constant 1 : index
    %c0_86 = arith.constant 0 : index
    %138 = vector.load %arg18[%c0_84, %c1_85, %c0_86] : memref<4x10x512xf32, #tpu.memory_space<vmem>>, vector<4x8x512xf32>
    tpu.vector_store %arg18[%c0_84, %c1_85, %c0_86], %137 {strides = array<i32>} : memref<4x10x512xf32, #tpu.memory_space<vmem>>, vector<4x8x512xf32>,
    %c0_87 = arith.constant 0 : index
    %c0_88 = arith.constant 0 : index
    %c0_89 = arith.constant 0 : index
    %139 = vector.load %arg18[%c0_87, %c0_88, %c0_89] : memref<4x10x512xf32, #tpu.memory_space<vmem>>, vector<4x8x512xf32>
    %140 = vector.shape_cast %139 : vector<4x8x512xf32> to vector<32x512xf32>
    %141 = arith.truncf %140 : vector<32x512xf32> to vector<32x512xbf16>
    %c0_90 = arith.constant 0 : index
    %c0_91 = arith.constant 0 : index
    %c0_92 = arith.constant 0 : index
    %142 = vector.load %arg7[%c0_90, %c0_91, %c0_92] : memref<3x512x512xbf16, #tpu.memory_space<vmem>>, vector<1x512x512xbf16>
    %143 = vector.shape_cast %142 : vector<1x512x512xbf16> to vector<512x512xbf16>
    %cst_93 = arith.constant dense<0.000000e+00> : vector<32x512xf32>
    %144 = tpu.matmul %141, %143, %cst_93 {dimension_numbers = #tpu.dot_dimension_numbers<[1], [0], [0], [1], [0, 0, 1, 1], [], []>} : vector<32x512xbf16>, vector<512x512xbf16>, vector<32x512xf32> -> vector<32x512xf32>
    %c0_94 = arith.constant 0 : index
    %c1_95 = arith.constant 1 : index
    %c0_96 = arith.constant 0 : index
    %145 = vector.load %arg18[%c0_94, %c1_95, %c0_96] : memref<4x10x512xf32, #tpu.memory_space<vmem>>, vector<4x8x512xf32>
    %146 = vector.shape_cast %145 : vector<4x8x512xf32> to vector<32x512xf32>
    %147 = arith.truncf %146 : vector<32x512xf32> to vector<32x512xbf16>
    %c1_97 = arith.constant 1 : index
    %c0_98 = arith.constant 0 : index
    %c0_99 = arith.constant 0 : index
    %148 = vector.load %arg7[%c1_97, %c0_98, %c0_99] : memref<3x512x512xbf16, #tpu.memory_space<vmem>>, vector<1x512x512xbf16>
    %149 = vector.shape_cast %148 : vector<1x512x512xbf16> to vector<512x512xbf16>
    %cst_100 = arith.constant dense<0.000000e+00> : vector<32x512xf32>
    %150 = tpu.matmul %147, %149, %cst_100 {dimension_numbers = #tpu.dot_dimension_numbers<[1], [0], [0], [1], [0, 0, 1, 1], [], []>} : vector<32x512xbf16>, vector<512x512xbf16>, vector<32x512xf32> -> vector<32x512xf32>
    %151 = arith.addf %144, %150 : vector<32x512xf32>
    %c0_101 = arith.constant 0 : index
    %c2_102 = arith.constant 2 : index
    %c0_103 = arith.constant 0 : index
    %152 = vector.load %arg18[%c0_101, %c2_102, %c0_103] : memref<4x10x512xf32, #tpu.memory_space<vmem>>, vector<4x8x512xf32>
    %153 = vector.shape_cast %152 : vector<4x8x512xf32> to vector<32x512xf32>
    %154 = arith.truncf %153 : vector<32x512xf32> to vector<32x512xbf16>
    %c2_104 = arith.constant 2 : index
    %c0_105 = arith.constant 0 : index
    %c0_106 = arith.constant 0 : index
    %155 = vector.load %arg7[%c2_104, %c0_105, %c0_106] : memref<3x512x512xbf16, #tpu.memory_space<vmem>>, vector<1x512x512xbf16>
    %156 = vector.shape_cast %155 : vector<1x512x512xbf16> to vector<512x512xbf16>
    %cst_107 = arith.constant dense<0.000000e+00> : vector<32x512xf32>
    %157 = tpu.matmul %154, %156, %cst_107 {dimension_numbers = #tpu.dot_dimension_numbers<[1], [0], [0], [1], [0, 0, 1, 1], [], []>} : vector<32x512xbf16>, vector<512x512xbf16>, vector<32x512xf32> -> vector<32x512xf32>
    %158 = arith.addf %151, %157 : vector<32x512xf32>
    %c0_108 = arith.constant 0 : index
    %c0_109 = arith.constant 0 : index
    %159 = vector.load %arg8[%c0_108, %c0_109] : memref<1x512xf32, #tpu.memory_space<vmem>>, vector<1x512xf32>
    %160 = vector.broadcast %159 : vector<1x512xf32> to vector<32x512xf32>
    %161 = arith.addf %158, %160 : vector<32x512xf32>
    %162 = vector.shape_cast %161 : vector<32x512xf32> to vector<4x8x512xf32>
    %cst_110 = arith.constant dense<0.000000e+00> : vector<4x512xf32>
    %163 = vector.multi_reduction <add>, %162, %cst_110 [1] : vector<4x8x512xf32> to vector<4x512xf32>
    %164 = arith.mulf %162, %162 : vector<4x8x512xf32>
    %cst_111 = arith.constant dense<0.000000e+00> : vector<4x512xf32>
    %165 = vector.multi_reduction <add>, %164, %cst_111 [1] : vector<4x8x512xf32> to vector<4x512xf32>
    %c0_112 = arith.constant 0 : index
    %c0_113 = arith.constant 0 : index
    %166 = vector.load %arg13[%c0_112, %c0_113] : memref<512x64xf32, #tpu.memory_space<vmem>>, vector<512x64xf32>
    %cst_114 = arith.constant dense<0.000000e+00> : vector<4x64xf32>
    %167 = tpu.matmul %163, %166, %cst_114 {dimension_numbers = #tpu.dot_dimension_numbers<[1], [0], [0], [1], [0, 0, 1, 1], [], []>} : vector<4x512xf32>, vector<512x64xf32>, vector<4x64xf32> -> vector<4x64xf32>
    %c0_115 = arith.constant 0 : index
    %c0_116 = arith.constant 0 : index
    %168 = vector.load %arg13[%c0_115, %c0_116] : memref<512x64xf32, #tpu.memory_space<vmem>>, vector<512x64xf32>
    %cst_117 = arith.constant dense<0.000000e+00> : vector<4x64xf32>
    %169 = tpu.matmul %165, %168, %cst_117 {dimension_numbers = #tpu.dot_dimension_numbers<[1], [0], [0], [1], [0, 0, 1, 1], [], []>} : vector<4x512xf32>, vector<512x64xf32>, vector<4x64xf32> -> vector<4x64xf32>
    %cst_118 = arith.constant 7.812500e-03 : f32
    %170 = vector.broadcast %cst_118 : f32 to vector<4x64xf32>
    %171 = arith.mulf %167, %170 : vector<4x64xf32>
    %cst_119 = arith.constant 7.812500e-03 : f32
    %172 = vector.broadcast %cst_119 : f32 to vector<4x64xf32>
    %173 = arith.mulf %169, %172 : vector<4x64xf32>
    %174 = arith.mulf %171, %171 : vector<4x64xf32>
    %175 = arith.subf %173, %174 : vector<4x64xf32>
    %cst_120 = arith.constant 0.000000e+00 : f32
    %176 = vector.broadcast %cst_120 : f32 to vector<4x64xf32>
    %177 = arith.maximumf %175, %176 : vector<4x64xf32>
    %cst_121 = arith.constant 9.99999974E-6 : f32
    %178 = vector.broadcast %cst_121 : f32 to vector<4x64xf32>
    %179 = arith.addf %177, %178 : vector<4x64xf32>
    %180 = math.rsqrt %179 : vector<4x64xf32>
    %c0_122 = arith.constant 0 : index
    %c0_123 = arith.constant 0 : index
    %181 = vector.load %arg9[%c0_122, %c0_123] : memref<1x64xf32, #tpu.memory_space<vmem>>, vector<1x64xf32>
    %182 = vector.broadcast %181 : vector<1x64xf32> to vector<4x64xf32>
    %183 = arith.mulf %180, %182 : vector<4x64xf32>
    %c0_124 = arith.constant 0 : index
    %c0_125 = arith.constant 0 : index
    %184 = vector.load %arg10[%c0_124, %c0_125] : memref<1x64xf32, #tpu.memory_space<vmem>>, vector<1x64xf32>
    %185 = arith.mulf %171, %183 : vector<4x64xf32>
    %186 = vector.broadcast %184 : vector<1x64xf32> to vector<4x64xf32>
    %187 = arith.subf %186, %185 : vector<4x64xf32>
    %188 = tpu.concatenate %183, %183, %183, %183, %183, %183, %183, %183 in 1 : vector<4x64xf32>, vector<4x64xf32>, vector<4x64xf32>, vector<4x64xf32>, vector<4x64xf32>, vector<4x64xf32>, vector<4x64xf32>, vector<4x64xf32> -> vector<4x512xf32>
    %189 = vector.shape_cast %188 : vector<4x512xf32> to vector<4x1x512xf32>
    %190 = vector.broadcast %189 : vector<4x1x512xf32> to vector<4x8x512xf32>
    %191 = arith.mulf %162, %190 : vector<4x8x512xf32>
    %192 = tpu.concatenate %187, %187, %187, %187, %187, %187, %187, %187 in 1 : vector<4x64xf32>, vector<4x64xf32>, vector<4x64xf32>, vector<4x64xf32>, vector<4x64xf32>, vector<4x64xf32>, vector<4x64xf32>, vector<4x64xf32> -> vector<4x512xf32>
    %193 = vector.shape_cast %192 : vector<4x512xf32> to vector<4x1x512xf32>
    %194 = vector.broadcast %193 : vector<4x1x512xf32> to vector<4x8x512xf32>
    %195 = arith.addf %191, %194 : vector<4x8x512xf32>
    %cst_126 = arith.constant 5.000000e-01 : f32
    %196 = vector.broadcast %cst_126 : f32 to vector<4x8x512xf32>
    %197 = arith.mulf %196, %195 : vector<4x8x512xf32>
    %cst_127 = arith.constant 0.707106769 : f32
    %198 = vector.broadcast %cst_127 : f32 to vector<4x8x512xf32>
    %199 = arith.mulf %195, %198 : vector<4x8x512xf32>
    %cst_128 = arith.constant 0.000000e+00 : f32
    %200 = vector.broadcast %cst_128 : f32 to vector<4x8x512xf32>
    %201 = arith.cmpf oge, %199, %200 : vector<4x8x512xf32>
    %cst_129 = arith.constant 1.000000e+00 : f32
    %cst_130 = arith.constant -1.000000e+00 : f32
    %202 = vector.broadcast %cst_129 : f32 to vector<4x8x512xf32>
    %203 = vector.broadcast %cst_130 : f32 to vector<4x8x512xf32>
    %204 = arith.select %201, %202, %203 : vector<4x8x512xi1>, vector<4x8x512xf32>
    %205 = math.absf %199 : vector<4x8x512xf32>
    %cst_131 = arith.constant 0.327591091 : f32
    %206 = vector.broadcast %cst_131 : f32 to vector<4x8x512xf32>
    %207 = arith.mulf %206, %205 : vector<4x8x512xf32>
    %cst_132 = arith.constant 1.000000e+00 : f32
    %208 = vector.broadcast %cst_132 : f32 to vector<4x8x512xf32>
    %209 = arith.addf %208, %207 : vector<4x8x512xf32>
    %210 = tpu.reciprocal %209 {approx = true} : vector<4x8x512xf32> -> vector<4x8x512xf32>
    %cst_133 = arith.constant 1.06140542 : f32
    %211 = vector.broadcast %cst_133 : f32 to vector<4x8x512xf32>
    %212 = arith.mulf %211, %210 : vector<4x8x512xf32>
    %cst_134 = arith.constant -1.45315206 : f32
    %213 = vector.broadcast %cst_134 : f32 to vector<4x8x512xf32>
    %214 = arith.addf %212, %213 : vector<4x8x512xf32>
    %215 = arith.mulf %214, %210 : vector<4x8x512xf32>
    %cst_135 = arith.constant 1.42141378 : f32
    %216 = vector.broadcast %cst_135 : f32 to vector<4x8x512xf32>
    %217 = arith.addf %215, %216 : vector<4x8x512xf32>
    %218 = arith.mulf %217, %210 : vector<4x8x512xf32>
    %cst_136 = arith.constant -0.284496725 : f32
    %219 = vector.broadcast %cst_136 : f32 to vector<4x8x512xf32>
    %220 = arith.addf %218, %219 : vector<4x8x512xf32>
    %221 = arith.mulf %220, %210 : vector<4x8x512xf32>
    %cst_137 = arith.constant 0.254829586 : f32
    %222 = vector.broadcast %cst_137 : f32 to vector<4x8x512xf32>
    %223 = arith.addf %221, %222 : vector<4x8x512xf32>
    %224 = arith.mulf %223, %210 : vector<4x8x512xf32>
    %cst_138 = arith.constant 0.000000e+00 : f32
    %225 = vector.broadcast %cst_138 : f32 to vector<4x8x512xf32>
    %226 = arith.subf %225, %205 : vector<4x8x512xf32>
    %227 = arith.mulf %226, %205 : vector<4x8x512xf32>
    %228 = math.exp %227 : vector<4x8x512xf32>
    %229 = arith.mulf %224, %228 : vector<4x8x512xf32>
    %cst_139 = arith.constant 1.000000e+00 : f32
    %230 = vector.broadcast %cst_139 : f32 to vector<4x8x512xf32>
    %231 = arith.subf %230, %229 : vector<4x8x512xf32>
    %232 = arith.mulf %204, %231 : vector<4x8x512xf32>
    %cst_140 = arith.constant 1.000000e+00 : f32
    %233 = vector.broadcast %cst_140 : f32 to vector<4x8x512xf32>
    %234 = arith.addf %233, %232 : vector<4x8x512xf32>
    %235 = arith.mulf %197, %234 : vector<4x8x512xf32>
    %c0_141 = arith.constant 0 : index
    %c1_142 = arith.constant 1 : index
    %c0_143 = arith.constant 0 : index
    %236 = vector.load %arg18[%c0_141, %c1_142, %c0_143] : memref<4x10x512xf32, #tpu.memory_space<vmem>>, vector<4x8x512xf32>
    tpu.vector_store %arg18[%c0_141, %c1_142, %c0_143], %235 {strides = array<i32>} : memref<4x10x512xf32, #tpu.memory_space<vmem>>, vector<4x8x512xf32>,
    %c0_144 = arith.constant 0 : index
    %c0_145 = arith.constant 0 : index
    %c0_146 = arith.constant 0 : index
    %237 = vector.load %arg18[%c0_144, %c0_145, %c0_146] : memref<4x10x512xf32, #tpu.memory_space<vmem>>, vector<4x8x512xf32>
    %238 = vector.shape_cast %237 : vector<4x8x512xf32> to vector<32x512xf32>
    %239 = arith.truncf %238 : vector<32x512xf32> to vector<32x512xbf16>
    %c0_147 = arith.constant 0 : index
    %c0_148 = arith.constant 0 : index
    %c0_149 = arith.constant 0 : index
    %240 = vector.load %arg11[%c0_147, %c0_148, %c0_149] : memref<3x512x512xbf16, #tpu.memory_space<vmem>>, vector<1x512x512xbf16>
    %241 = vector.shape_cast %240 : vector<1x512x512xbf16> to vector<512x512xbf16>
    %cst_150 = arith.constant dense<0.000000e+00> : vector<32x512xf32>
    %242 = tpu.matmul %239, %241, %cst_150 {dimension_numbers = #tpu.dot_dimension_numbers<[1], [0], [0], [1], [0, 0, 1, 1], [], []>} : vector<32x512xbf16>, vector<512x512xbf16>, vector<32x512xf32> -> vector<32x512xf32>
    %c0_151 = arith.constant 0 : index
    %c1_152 = arith.constant 1 : index
    %c0_153 = arith.constant 0 : index
    %243 = vector.load %arg18[%c0_151, %c1_152, %c0_153] : memref<4x10x512xf32, #tpu.memory_space<vmem>>, vector<4x8x512xf32>
    %244 = vector.shape_cast %243 : vector<4x8x512xf32> to vector<32x512xf32>
    %245 = arith.truncf %244 : vector<32x512xf32> to vector<32x512xbf16>
    %c1_154 = arith.constant 1 : index
    %c0_155 = arith.constant 0 : index
    %c0_156 = arith.constant 0 : index
    %246 = vector.load %arg11[%c1_154, %c0_155, %c0_156] : memref<3x512x512xbf16, #tpu.memory_space<vmem>>, vector<1x512x512xbf16>
    %247 = vector.shape_cast %246 : vector<1x512x512xbf16> to vector<512x512xbf16>
    %cst_157 = arith.constant dense<0.000000e+00> : vector<32x512xf32>
    %248 = tpu.matmul %245, %247, %cst_157 {dimension_numbers = #tpu.dot_dimension_numbers<[1], [0], [0], [1], [0, 0, 1, 1], [], []>} : vector<32x512xbf16>, vector<512x512xbf16>, vector<32x512xf32> -> vector<32x512xf32>
    %249 = arith.addf %242, %248 : vector<32x512xf32>
    %c0_158 = arith.constant 0 : index
    %c2_159 = arith.constant 2 : index
    %c0_160 = arith.constant 0 : index
    %250 = vector.load %arg18[%c0_158, %c2_159, %c0_160] : memref<4x10x512xf32, #tpu.memory_space<vmem>>, vector<4x8x512xf32>
    %251 = vector.shape_cast %250 : vector<4x8x512xf32> to vector<32x512xf32>
    %252 = arith.truncf %251 : vector<32x512xf32> to vector<32x512xbf16>
    %c2_161 = arith.constant 2 : index
    %c0_162 = arith.constant 0 : index
    %c0_163 = arith.constant 0 : index
    %253 = vector.load %arg11[%c2_161, %c0_162, %c0_163] : memref<3x512x512xbf16, #tpu.memory_space<vmem>>, vector<1x512x512xbf16>
    %254 = vector.shape_cast %253 : vector<1x512x512xbf16> to vector<512x512xbf16>
    %cst_164 = arith.constant dense<0.000000e+00> : vector<32x512xf32>
    %255 = tpu.matmul %252, %254, %cst_164 {dimension_numbers = #tpu.dot_dimension_numbers<[1], [0], [0], [1], [0, 0, 1, 1], [], []>} : vector<32x512xbf16>, vector<512x512xbf16>, vector<32x512xf32> -> vector<32x512xf32>
    %256 = arith.addf %249, %255 : vector<32x512xf32>
    %c0_165 = arith.constant 0 : index
    %c0_166 = arith.constant 0 : index
    %257 = vector.load %arg12[%c0_165, %c0_166] : memref<1x512xf32, #tpu.memory_space<vmem>>, vector<1x512xf32>
    %258 = vector.broadcast %257 : vector<1x512xf32> to vector<32x512xf32>
    %259 = arith.addf %256, %258 : vector<32x512xf32>
    %260 = arith.addf %63, %259 : vector<32x512xf32>
    %261 = vector.shape_cast %260 : vector<32x512xf32> to vector<4x8x512xf32>
    %262 = vector.extract_strided_slice %261 {offsets = [0, 0, 0], sizes = [4, 1, 512], strides = [1, 1, 1]} : vector<4x8x512xf32> to vector<4x1x512xf32>
    %263 = vector.shape_cast %262 : vector<4x1x512xf32> to vector<4x512xf32>
    %264 = vector.extract_strided_slice %261 {offsets = [0, 1, 0], sizes = [4, 1, 512], strides = [1, 1, 1]} : vector<4x8x512xf32> to vector<4x1x512xf32>
    %265 = vector.shape_cast %264 : vector<4x1x512xf32> to vector<4x512xf32>
    %266 = vector.extract_strided_slice %261 {offsets = [0, 2, 0], sizes = [4, 1, 512], strides = [1, 1, 1]} : vector<4x8x512xf32> to vector<4x1x512xf32>
    %267 = vector.shape_cast %266 : vector<4x1x512xf32> to vector<4x512xf32>
    %268 = vector.extract_strided_slice %261 {offsets = [0, 3, 0], sizes = [4, 1, 512], strides = [1, 1, 1]} : vector<4x8x512xf32> to vector<4x1x512xf32>
    %269 = vector.shape_cast %268 : vector<4x1x512xf32> to vector<4x512xf32>
    %270 = vector.extract_strided_slice %261 {offsets = [0, 4, 0], sizes = [4, 1, 512], strides = [1, 1, 1]} : vector<4x8x512xf32> to vector<4x1x512xf32>
    %271 = vector.shape_cast %270 : vector<4x1x512xf32> to vector<4x512xf32>
    %272 = vector.extract_strided_slice %261 {offsets = [0, 5, 0], sizes = [4, 1, 512], strides = [1, 1, 1]} : vector<4x8x512xf32> to vector<4x1x512xf32>
    %273 = vector.shape_cast %272 : vector<4x1x512xf32> to vector<4x512xf32>
    %274 = vector.extract_strided_slice %261 {offsets = [0, 6, 0], sizes = [4, 1, 512], strides = [1, 1, 1]} : vector<4x8x512xf32> to vector<4x1x512xf32>
    %275 = vector.shape_cast %274 : vector<4x1x512xf32> to vector<4x512xf32>
    %276 = vector.extract_strided_slice %261 {offsets = [0, 7, 0], sizes = [4, 1, 512], strides = [1, 1, 1]} : vector<4x8x512xf32> to vector<4x1x512xf32>
    %277 = vector.shape_cast %276 : vector<4x1x512xf32> to vector<4x512xf32>
    %278 = tpu.concatenate %263, %265, %267, %269, %271, %273, %275, %277 in 1 : vector<4x512xf32>, vector<4x512xf32>, vector<4x512xf32>, vector<4x512xf32>, vector<4x512xf32>, vector<4x512xf32>, vector<4x512xf32>, vector<4x512xf32> -> vector<4x4096xf32>
    %279 = arith.truncf %278 : vector<4x4096xf32> to vector<4x4096xbf16>
    %c0_167 = arith.constant 0 : index
    %c0_168 = arith.constant 0 : index
    %280 = vector.load %arg14[%c0_167, %c0_168] : memref<4096x32xbf16, #tpu.memory_space<vmem>>, vector<4096x32xbf16>
    %cst_169 = arith.constant dense<0.000000e+00> : vector<4x32xf32>
    %281 = tpu.matmul %279, %280, %cst_169 {dimension_numbers = #tpu.dot_dimension_numbers<[1], [0], [0], [1], [0, 0, 1, 1], [], []>} : vector<4x4096xbf16>, vector<4096x32xbf16>, vector<4x32xf32> -> vector<4x32xf32>
    %282 = vector.extract_strided_slice %281 {offsets = [0, 0], sizes = [1, 32], strides = [1, 1]} : vector<4x32xf32> to vector<1x32xf32>
    %283 = vector.extract_strided_slice %281 {offsets = [1, 0], sizes = [1, 32], strides = [1, 1]} : vector<4x32xf32> to vector<1x32xf32>
    %284 = vector.extract_strided_slice %281 {offsets = [2, 0], sizes = [1, 32], strides = [1, 1]} : vector<4x32xf32> to vector<1x32xf32>
    %285 = vector.extract_strided_slice %281 {offsets = [3, 0], sizes = [1, 32], strides = [1, 1]} : vector<4x32xf32> to vector<1x32xf32>
    %286 = tpu.concatenate %282, %283, %284, %285 in 1 : vector<1x32xf32>, vector<1x32xf32>, vector<1x32xf32>, vector<1x32xf32> -> vector<1x128xf32>
    %c0_170 = arith.constant 0 : index
    %c0_171 = arith.constant 0 : index
    %c0_172 = arith.constant 0 : index
    %287 = vector.load %arg15[%c0_170, %c0_171, %c0_172] : memref<1x1x128xf32, #tpu.memory_space<vmem>>, vector<1x1x128xf32>
    %288 = vector.shape_cast %287 : vector<1x1x128xf32> to vector<1x128xf32>
    %289 = arith.addf %286, %288 : vector<1x128xf32>
    %c0_173 = arith.constant 0 : index
    %c0_174 = arith.constant 0 : index
    %c0_175 = arith.constant 0 : index
    %290 = vector.load %arg16[%c0_173, %c0_174, %c0_175] : memref<1x1x128xf32, #tpu.memory_space<vmem>>, vector<1x1x128xf32>
    %291 = vector.shape_cast %290 : vector<1x1x128xf32> to vector<1x128xf32>
    %292 = vector.shape_cast %289 : vector<1x128xf32> to vector<1x1x128xf32>
    tpu.vector_store %arg16[%c0_173, %c0_174, %c0_175], %292 {strides = array<i32>} : memref<1x1x128xf32, #tpu.memory_space<vmem>>, vector<1x1x128xf32>,
    return
  }
  func.func @transform_0(%arg0: i32) -> (i32, i32, i32) {
    %c0_i32 = arith.constant 0 : i32
    %c0_i32_0 = arith.constant 0 : i32
    %c0_i32_1 = arith.constant 0 : i32
    return %arg0, %c0_i32, %c0_i32_0 : i32, i32, i32
  }
  func.func @transform_1(%arg0: i32) -> (i32, i32) {
    %c0_i32 = arith.constant 0 : i32
    %c0_i32_0 = arith.constant 0 : i32
    %c0_i32_1 = arith.constant 0 : i32
    return %c0_i32, %c0_i32_0 : i32, i32
  }
  func.func @transform_2(%arg0: i32) -> (i32, i32, i32) {
    %c0_i32 = arith.constant 0 : i32
    %c0_i32_0 = arith.constant 0 : i32
    %c0_i32_1 = arith.constant 0 : i32
    %c0_i32_2 = arith.constant 0 : i32
    return %c0_i32, %c0_i32_0, %c0_i32_1 : i32, i32, i32
  }
  func.func @transform_3(%arg0: i32) -> (i32, i32) {
    %c0_i32 = arith.constant 0 : i32
    %c0_i32_0 = arith.constant 0 : i32
    %c0_i32_1 = arith.constant 0 : i32
    return %c0_i32, %c0_i32_0 : i32, i32
  }
  func.func @transform_4(%arg0: i32) -> (i32, i32) {
    %c0_i32 = arith.constant 0 : i32
    %c0_i32_0 = arith.constant 0 : i32
    %c0_i32_1 = arith.constant 0 : i32
    return %c0_i32, %c0_i32_0 : i32, i32
  }
  func.func @transform_5(%arg0: i32) -> (i32, i32) {
    %c0_i32 = arith.constant 0 : i32
    %c0_i32_0 = arith.constant 0 : i32
    %c0_i32_1 = arith.constant 0 : i32
    return %c0_i32, %c0_i32_0 : i32, i32
  }
  func.func @transform_6(%arg0: i32) -> (i32, i32, i32) {
    %c0_i32 = arith.constant 0 : i32
    %c0_i32_0 = arith.constant 0 : i32
    %c0_i32_1 = arith.constant 0 : i32
    %c0_i32_2 = arith.constant 0 : i32
    return %c0_i32, %c0_i32_0, %c0_i32_1 : i32, i32, i32
  }
  func.func @transform_7(%arg0: i32) -> (i32, i32) {
    %c0_i32 = arith.constant 0 : i32
    %c0_i32_0 = arith.constant 0 : i32
    %c0_i32_1 = arith.constant 0 : i32
    return %c0_i32, %c0_i32_0 : i32, i32
  }
  func.func @transform_8(%arg0: i32) -> (i32, i32) {
    %c0_i32 = arith.constant 0 : i32
    %c0_i32_0 = arith.constant 0 : i32
    %c0_i32_1 = arith.constant 0 : i32
    return %c0_i32, %c0_i32_0 : i32, i32
  }
  func.func @transform_9(%arg0: i32) -> (i32, i32) {
    %c0_i32 = arith.constant 0 : i32
    %c0_i32_0 = arith.constant 0 : i32
    %c0_i32_1 = arith.constant 0 : i32
    return %c0_i32, %c0_i32_0 : i32, i32
  }
  func.func @transform_10(%arg0: i32) -> (i32, i32, i32) {
    %c0_i32 = arith.constant 0 : i32
    %c0_i32_0 = arith.constant 0 : i32
    %c0_i32_1 = arith.constant 0 : i32
    %c0_i32_2 = arith.constant 0 : i32
    return %c0_i32, %c0_i32_0, %c0_i32_1 : i32, i32, i32
  }
  func.func @transform_11(%arg0: i32) -> (i32, i32) {
    %c0_i32 = arith.constant 0 : i32
    %c0_i32_0 = arith.constant 0 : i32
    %c0_i32_1 = arith.constant 0 : i32
    return %c0_i32, %c0_i32_0 : i32, i32
  }
  func.func @transform_12(%arg0: i32) -> (i32, i32) {
    %c0_i32 = arith.constant 0 : i32
    %c0_i32_0 = arith.constant 0 : i32
    %c0_i32_1 = arith.constant 0 : i32
    return %c0_i32, %c0_i32_0 : i32, i32
  }
  func.func @transform_13(%arg0: i32) -> (i32, i32) {
    %c0_i32 = arith.constant 0 : i32
    %c0_i32_0 = arith.constant 0 : i32
    %c0_i32_1 = arith.constant 0 : i32
    return %c0_i32, %c0_i32_0 : i32, i32
  }
  func.func @transform_14(%arg0: i32) -> (i32, i32, i32) {
    %c0_i32 = arith.constant 0 : i32
    %c0_i32_0 = arith.constant 0 : i32
    %c0_i32_1 = arith.constant 0 : i32
    return %arg0, %c0_i32, %c0_i32_0 : i32, i32, i32
  }
  func.func @transform_15(%arg0: i32) -> (i32, i32, i32) {
    %c0_i32 = arith.constant 0 : i32
    %c0_i32_0 = arith.constant 0 : i32
    %c0_i32_1 = arith.constant 0 : i32
    return %arg0, %c0_i32, %c0_i32_0 : i32, i32, i32
  }
}

</mosaic_0001>

<bundles_post_ra>
// kernel: tpu_custom_call.1
= control target key start
LH: loop header
LB: loop body
LE: loop exit
PB: predicated region body
PF: predicated region fallthrough
CT: control target
= control target key end

     0   :  { %s23107_s0 = inlined_call_operand.vmem [shape: f32[8,8,32], index: 0, kind: input, shape index: {}]   ;;  %s23108_s1 = inlined_call_operand.vmem [shape: f32[32,4], index: 1, kind: input, shape index: {}]   ;;  %s23109_s2 = inlined_call_operand.vmem [shape: bf16[3,32,512], index: 2, kind: input, shape index: {}]   ;;  %s23110_s3 = inlined_call_operand.vmem [shape: f32[1,512], index: 3, kind: input, shape index: {}]   ;;  %s23111_s4 = inlined_call_operand.vmem [shape: f32[1,64], index: 4, kind: input, shape index: {}]   ;;  %s23112_s5 = inlined_call_operand.vmem [shape: f32[1,64], index: 5, kind: input, shape index: {}]   ;;  %s23113_s6 = inlined_call_operand.vmem [shape: bf16[3,512,512], index: 6, kind: input, shape index: {}]   ;;  %s23114_s7 = inlined_call_operand.vmem [shape: f32[1,512], index: 7, kind: input, shape index: {}]   ;;  %s23115_s8 = inlined_call_operand.vmem [shape: f32[1,64], index: 8, kind: input, shape index: {}]   ;;  %s23116_s9 = inlined_call_operand.vmem [shape: f32[1,64], index: 9, kind: input, shape index: {}]   ;;  %s23117_s10 = inlined_call_operand.hbm [shape: bf16[3,512,512], index: 10, kind: input, shape index: {}]   ;;  %s23118_s11 = inlined_call_operand.vmem [shape: f32[1,512], index: 11, kind: input, shape index: {}]   ;;  %s23119_s12 = inlined_call_operand.vmem [shape: f32[512,64], index: 12, kind: input, shape index: {}]   ;;  %s23120_s13 = inlined_call_operand.vmem [shape: bf16[4096,32], index: 13, kind: input, shape index: {}]   ;;  %s23121_s14 = inlined_call_operand.vmem [shape: f32[2,1,128], index: 14, kind: input, shape index: {}]   ;;  %s23122_s15 = inlined_call_operand.hbm [shape: f32[2,1,128], index: 15, kind: output, shape index: {}]  }
   0x1   :  { %23241 = sst [smem:[#allocation69_spill]] %s23107_s0 }
   0x2   :  { %20 = vsyncpa [#allocation5], 0 }
   0x3   :  { %21 = vsyncpa [#allocation6], 0 }
   0x4   :  { %23 = vsyncpa [#allocation6 + $0x1], 0  ;;  %s18322_s18 = smov 0   ;;  %s18324_s19 = smov 0  }
   0x5   :  { %s18326_s20 = smov 0   ;;  %s18328_s21 = smov 0  }
   0x6 LB: > { %23242 = sst [smem:[#allocation10_spill]] %s18208_s18  ;;  %s18343_s22 = sadd.s32 4294967295, %s18220_s21   ;;  %s18220_s21 = sphi %s18328_s21, %s23688_s21   ;;  %s18216_s20 = sphi %s18326_s20, %s23693_s20   ;;  %s18212_s19 = sphi %s18324_s19, %s23692_s19   ;;  %s18208_s18 = sphi %s18322_s18, %s23691_s18  }
   0x7   : > { %23243 = sst [smem:[#allocation11_spill]] %s18216_s20  ;;  %s14001_s23 = sadd.s32 4294967294, %s18220_s21  }
   0x8   : > { %s18347_s24 = sadd.s32 1, %s18220_s21   ;;  %s361_s25 = sadd.s32 1, %s18216_s20 }
   0x9   : > { %23244 = sst [smem:[#allocation12_spill]] %s18347_s24  ;;  %s358_s26 = ssub.s32 %s18220_s21, %s18347_s24 }
   0xa   : > { %p371_p0 = scmp.ne.s32.totalorder %s18216_s20, %s18212_s19  ;;  %p359_p1 = scmp.eq.s32.totalorder %s358_s26, 0 }
   0xb   : > { %p372_p2 = scmp.eq.s32.totalorder %s18343_s22, 1  ;;  %p377_p3 = scmp.ne.s32.totalorder %s18212_s19, %s18208_s18 }
   0xc   : > { %p378_p4 = scmp.eq.s32.totalorder %s14001_s23, 1  ;;  %p14002_p7 = scmp.ge.s32.totalorder %s18220_s21, 1 }
   0xd   : > { %s18358_s27 = scalar_select %p359_p1, %s18216_s20, %s361_s25  }
   0xe   : > { %p18360_p5 = por %p372_p2, %p371_p0  ;;  %p18364_p6 = por %p378_p4, %p377_p3 }
   0xf   : > { %23245 = sst [smem:[#allocation13_spill]] %s18358_s27  ;;  %p385_p8 = scmp.lt.s32.totalorder %s18220_s21, 3 }
  0x10   : > { %s23246_s28 = scalar_select %p18360_p5, 1, 0 }
  0x11   : > { %s23247_s29 = scalar_select %p18364_p6, 1, 0 }
  0x12   : > { %p23128_p9 = scmp.eq.s32.totalorder %s18343_s22, 0  ;;  %p18371_p10 = pnand %p14002_p7, %p385_p8 }
  0x13   : > { %23248 = sst [smem:[#allocation14_spill]] %s23247_s29  ;;  %s18222_s16 = smov [#allocation4]  }
  0x14   : > { %s23249_s30 = scalar_select %p18371_p10, 1, 0 }
  0x15   : > { %s424_s17 = sshll.u32 %s18222_s16, 4  ;;  %p16480_p11 = pneg %p18371_p10  ;;  %s425_s17 = int_to_ptr.vmem [resolvable:$true] %s424_s17 }
  0x16   : > { %s18126_s27 = scalar_lea.hbm %s23117_s10, 49152 }
  0x17   : > { %p18379_p12 = pnand %p23128_p9, %p16480_p11  ;;  %p18127_p13 = scmp.ne.s32.totalorder %s23117_s10, %s18126_s27 }
  0x18   : > { %p18133_p3 = scmp.lt.u32.totalorder %s18126_s27, %s23117_s10 }
  0x19   : > { %p18128_p0 = pneg %p18379_p12 }
  0x1b   : > { %p18129_p1 = pnand %p18128_p0, %p18127_p13 }
  0x1d   : > { %p18130_p2 = pneg %p18129_p1 }
  0x1f   : > { %p18135_p4 = pnand %p18133_p3, %p18130_p2 }
  0x21   : > { %18138 = shalt.err (!%p18135_p4)
}
  0x22   : > { %s18139_s18 = scalar_lea.vmem %s425_s17, 49152  ;;  %p18147_p9 = scmp.lt.s32.totalorder %s425_s17, %s425_s17 }
  0x23   : > { %p18140_p7 = scmp.ne.s32.totalorder %s425_s17, %s18139_s18  ;;  %p18148_p6 = scmp.lt.s32.totalorder %s18139_s18, %s18139_s18 }
  0x25   : > { %p18142_p8 = pnand %p18140_p7, %p18128_p0  ;;  %p18149_p5 = por %p18148_p6, %p18147_p9 }
  0x27   : > { %p18143_p11 = pneg %p18142_p8 }
  0x29   : > { %p18150_p10 = pnand %p18149_p5, %p18143_p11 }
  0x2b   : > { %18153 = shalt.err (!%p18150_p10)
}
  0x2c   : > { %s18223_s20 = smov 256   ;;  %s18224_s24 = smov 16  }
  0x2d   : > { %16483 = dma.hbm_to_vmem [thread:$0]  (!%p18379_p12), %s23117_s10, 49152, %s425_s17, [#allocation5], %s18223_s20, %s18223_s20, %s18224_s24  }
  0x2e   : > { %p23251_p13 = scmp.ne.s32.totalorder %s23249_s30, 0 }
  0x30   : > { %464 = sbr.rel (%p23251_p13) target bundleno = 3586 (0xe02), region = 80 }
  0x37   : > { %p23252_p1 = scmp.eq.s32.totalorder %s18343_s22, 0 }
  0x39   : > { %18199 = dma.done.wait (%p23252_p1), [#allocation5], 49152   ;;  %p23253_p0 = pmov %p23252_p1 }
  0x3a   : > { %s14007_s18 = sshll.u32 %s18343_s22, 2  ;;  %v18225_v0 = vmov 0.0|0.0   ;;  %vm18226_vm0 = vmmov 0   ;;  %v23131_v1 = vmov 0.0   ;;  %s23254_s0 = sld [smem:[#allocation69_spill]]  ;;  %vm23191_vm1 = vcmask 261120  }
  0x3b   : > { %18201 = vsyncadd (%p23253_p0), [#allocation5], 4294918144  ;;  %16014 = vmatprep.subr.bf16.mxu0 %v18225_v0  ;;  %16020 = vmatprep.subr.bf16.mxu1 %v18225_v0  ;;  %p515_p5 = scmp.lt.s32.totalorder %s14007_s18, 7  ;;  %v625_v2 = vld [vmem:[%s23108_s1] sm:$0xff]  ;;  %v626_v3 = vld [vmem:[%s23108_s1 + $0x8] sm:$0xff]  ;;  %vm23236_vm2 = vcmask 1041409  }
  0x3c   : > { %16000 = vmatprep.mubr.msk.f32.mxu0 %vm18226_vm0, %v23131_v1  ;;  %16011 = vmatprep.mubr.msk.f32.mxu1 %vm18226_vm0, %v23131_v1  ;;  %v627_v4 = vld [vmem:[%s23108_s1 + $0x10] sm:$0xff]  ;;  %v16015_v5 = vpack.c.bf16 %v626_v3, %v625_v2  ;;  %v628_v6 = vld [vmem:[%s23108_s1 + $0x18] sm:$0xff]  ;;  %vm23235_vm3 = vcmask 1042434   ;;  %vm23193_vm4 = vcmask 1043459   ;;  %s18228_s29 = smov 12   ;;  %s18229_s30 = smov 4  }
  0x3d   : > { %s23695_s18 = smov (!%p515_p5, %s14007_s18), 7  ;;  %v16018_v9 = vpack.c.bf16 %v628_v6, %v627_v4  ;;  %s18230_s23 = smov 8   ;;  %vm524_vm7 = vcmask 253952   ;;  %vm830_vm8 = vcmask 31744   ;;  %vm832_vm9 = vcmask 64512  }
  0x3e   : > { %s14008_s27 = sshll.u32 %s23695_s18, 3  ;;  %16016 = vmatpush3.bf16.msra.mxu0 %v16015_v5  ;;  %16022 = vmatpush3.bf16.msra.mxu1 %v16015_v5  ;;  %s18231_s16 = smov 16   ;;  %525 = vst.msk [vmem:[#allocation2] sm:$0x1] %vm524_vm7, %v23131_v1  ;;  %526 = vst.msk [vmem:[#allocation2 + $0x10] sm:$0x1] %vm524_vm7, %v23131_v1 }
  0x3f   : > { %16017 = vmatprep.subr.bf16.mxu0 %v18225_v0  ;;  %16023 = vmatprep.subr.bf16.mxu1 %v18225_v0  ;;  %s18232_s20 = smov 20   ;;  %s18233_s24 = smov 24   ;;  %527 = vst.msk [vmem:[#allocation2 + $0x20] sm:$0x1] %vm524_vm7, %v23131_v1  ;;  %528 = vst.msk [vmem:[#allocation2 + $0x30] sm:$0x1] %vm524_vm7, %v23131_v1 }
  0x40   : > { %s18411_s17 = scalar_lea.vmem %s23254_s0, %s14008_s27  ;;  %s18234_s25 = smov 28   ;;  %529 = vst.msk [vmem:[#allocation2 + $0x9] sm:$0x1] %vm524_vm7, %v23131_v1  ;;  %530 = vst.msk [vmem:[#allocation2 + $0x19] sm:$0x1] %vm524_vm7, %v23131_v1  ;;  %vm834_vm10 = vcmask 97280  }
  0x41   : > { %v560_v7 = vld [vmem:[%s18411_s17] sm:$0xff]  ;;  %v561_v8 = vld [vmem:[%s18411_s17 + $0x8] sm:$0xff]  ;;  %v562_v10 = vld [vmem:[%s18411_s17 + $0x10] sm:$0xff]  ;;  %531 = vst.msk [vmem:[#allocation2 + $0x29] sm:$0x1] %vm524_vm7, %v23131_v1  ;;  %vm836_vm11 = vcmask 130048  }
  0x42   : > { %v563_v11 = vld [vmem:[%s18411_s17 + $0x18] sm:$0xff]  ;;  %v565_v12 = vsel %vm23191_vm1, %v560_v7, 0.0  ;;  %v572_v13 = vsel %vm23191_vm1, %v561_v8, 0.0  ;;  %v593_v14 = vmul.f32 %v560_v7, %v560_v7  ;;  %v579_v17 = vsel %vm23191_vm1, %v562_v10, 0.0  ;;  %16019 = vmatpush3.bf16.msra.mxu0 %v16018_v9  ;;  %16025 = vmatpush3.bf16.msra.mxu1 %v16018_v9  ;;  %532 = vst.msk [vmem:[#allocation2 + $0x39] sm:$0x1] %vm524_vm7, %v23131_v1 }
  0x43   : > { %v566_v15 = vrot.slane %v565_v12, 4  ;;  %v573_v16 = vrot.slane %v572_v13, 4  ;;  %v586_v18 = vsel %vm23191_vm1, %v563_v11, 0.0  ;;  %v580_v19 = vrot.slane %v579_v17, 4  ;;  %p520_p6 = scmp.lt.s32.totalorder %s18343_s22, 1  ;;  %p23684_p10 = scmp.ne.s32.totalorder %s23246_s28, 0 }
  0x44   : > { %v587_v20 = vrot.slane %v586_v18, 4  ;;  %v594_v21 = vmul.f32 %v561_v8, %v561_v8  ;;  %v595_v22 = vmul.f32 %v562_v10, %v562_v10  ;;  %v596_v25 = vmul.f32 %v563_v11, %v563_v11 }
  0x45   : > { %v567_v23 = vadd.f32 %v566_v15, %v565_v12  ;;  %v574_v24 = vadd.f32 %v573_v16, %v572_v13  ;;  %v597_v26 = vsel %vm23191_vm1, %v593_v14, 0.0  ;;  %v581_v27 = vadd.f32 %v580_v19, %v579_v17 }
  0x46   : > { %v588_v28 = vadd.f32 %v587_v20, %v586_v18  ;;  %v598_v29 = vrot.slane %v597_v26, 4  ;;  %v604_v30 = vsel %vm23191_vm1, %v594_v21, 0.0  ;;  %v611_v34 = vsel %vm23191_vm1, %v595_v22, 0.0 }
  0x47   : > { %v568_v31 = vrot.slane %v567_v23, 2  ;;  %v575_v32 = vrot.slane %v574_v24, 2  ;;  %v605_v33 = vrot.slane %v604_v30, 4  ;;  %v582_v35 = vrot.slane %v581_v27, 2 }
  0x48   : > { %v589_v36 = vrot.slane %v588_v28, 2  ;;  %v599_v37 = vadd.f32 %v598_v29, %v597_v26  ;;  %v612_v38 = vrot.slane %v611_v34, 4  ;;  %v618_v42 = vsel %vm23191_vm1, %v596_v25, 0.0 }
  0x49   : > { %v569_v39 = vadd.f32 %v568_v31, %v567_v23  ;;  %v576_v40 = vadd.f32 %v575_v32, %v574_v24  ;;  %v606_v41 = vadd.f32 %v605_v33, %v604_v30  ;;  %v583_v43 = vadd.f32 %v582_v35, %v581_v27  ;;  %v16544_v35 = vld [vmem:[%s23109_s2 + $0x44] ss:$16 sps:$4 sm:$0xff]  }
  0x4a   : > { %v590_v44 = vadd.f32 %v589_v36, %v588_v28  ;;  %v600_v45 = vrot.slane %v599_v37, 2  ;;  %v613_v46 = vadd.f32 %v612_v38, %v611_v34  ;;  %v619_v50 = vrot.slane %v618_v42, 4  ;;  %v16547_v36 = vld [vmem:[%s23109_s2 + $0x4c] ss:$16 sps:$4 sm:$0xff]   ;;  %v16545_v38 = vld [vmem:[%s23109_s2 + $0x48] ss:$16 sps:$4 sm:$0xff]   ;;  %1050 = vmatprep.subr.bf16.mxu0 %v16544_v35 }
  0x4b   : > { %v570_v47 = vrot.slane %v569_v39, 1  ;;  %v577_v48 = vrot.slane %v576_v40, 1  ;;  %v607_v49 = vrot.slane %v606_v41, 2  ;;  %v584_v51 = vrot.slane %v583_v43, 1  ;;  %1103 = vmatprep.subr.bf16.mxu1 %v16547_v36  ;;  %v18123_v36 = vld [vmem:[%s18411_s17 + $0x8] sm:$0xff] }
  0x4c   : > { %v591_v52 = vrot.slane %v590_v44, 1  ;;  %v601_v53 = vadd.f32 %v600_v45, %v599_v37  ;;  %v614_v54 = vrot.slane %v613_v46, 2  ;;  %v620_v58 = vadd.f32 %v619_v50, %v618_v42  ;;  %v16542_v37 = vld [vmem:[%s23109_s2 + $0x40] ss:$16 sps:$4 sm:$0xff]   ;;  %v16551_v42 = vld [vmem:[%s23109_s2 + $0x68] ss:$16 sps:$4 sm:$0xff]  }
  0x4d   : > { %v571_v55 = vadd.f32 %v570_v47, %v569_v39  ;;  %v578_v56 = vadd.f32 %v577_v48, %v576_v40  ;;  %v608_v57 = vadd.f32 %v607_v49, %v606_v41  ;;  %v585_v59 = vadd.f32 %v584_v51, %v583_v43  ;;  %v16550_v39 = vld [vmem:[%s23109_s2 + $0x64] ss:$16 sps:$4 sm:$0xff]   ;;  %v16553_v40 = vld [vmem:[%s23109_s2 + $0x6c] ss:$16 sps:$4 sm:$0xff]   ;;  %v16548_v41 = vld [vmem:[%s23109_s2 + $0x60] ss:$16 sps:$4 sm:$0xff]  }
  0x4e   : > { %v592_v60 = vadd.f32 %v591_v52, %v590_v44  ;;  %v602_v61 = vrot.slane %v601_v53, 1  ;;  %v615_v62 = vadd.f32 %v614_v54, %v613_v46  ;;  %v621_v2 = vrot.slane %v620_v58, 2  ;;  %v16556_v43 = vld [vmem:[%s23109_s2 + $0x4] ss:$16 sps:$4 sm:$0xff]   ;;  %v16559_v44 = vld [vmem:[%s23109_s2 + $0xc] ss:$16 sps:$4 sm:$0xff]  }
  0x4f   : > { %v634_v63 = vsel %vm23236_vm2, %v578_v56, %v571_v55  ;;  %v609_v0 = vrot.slane %v608_v57, 1  ;;  %v18235_v45 = vmov 0   ;;  %v23133_v46 = vlaneseq }
  0x50   : > { %v636_v3 = vsel %vm23235_vm3, %v585_v59, %v634_v63  ;;  %v603_v4 = vadd.f32 %v602_v61, %v601_v53  ;;  %v616_v5 = vrot.slane %v615_v62, 1  ;;  %v622_v8 = vadd.f32 %v621_v2, %v620_v58 }
  0x51   : > { %v638_v6 = vsel %vm23193_vm4, %v592_v60, %v636_v3  ;;  %v610_v7 = vadd.f32 %v609_v0, %v608_v57  ;;  %v18505_v47 = vshrl.u32 %v23133_v46, 7  ;;  %vm838_vm12 = vcmask 162816  }
  0x52   : > { %16001 = vmatmul.mubr.msk.f32.vlgmr.msra.gmra.mrb[0].mxu0 %vm23191_vm1, %v638_v6  ;;  %v617_v9 = vadd.f32 %v616_v5, %v615_v62  ;;  %v623_v10 = vrot.slane %v622_v8, 1  ;;  %vm840_vm13 = vcmask 195584   ;;  %vm842_vm14 = vcmask 228352  }
  0x53   : > { %v715_v11 = vsel %vm23236_vm2, %v610_v7, %v603_v4  ;;  %1051 = vmatpush1.bf16.msra.mxu0 %v16542_v37  ;;  %1082 = vmatprep.mubr.bf16.mxu0 %v18235_v45  ;;  %v18508_v48 = vsub.s32 0, %v18505_v47  ;;  %v18236_v55 = vmov 1966171168   ;;  %vm23192_vm15 = vcmask 523264  }
  0x54   : > { %v716_v12 = vsel %vm23235_vm3, %v617_v9, %v715_v11  ;;  %v624_v13 = vadd.f32 %v623_v10, %v622_v8  ;;  %1052 = vmatprep.subr.bf16.mxu0 %v16550_v39  ;;  %v875_v56 = vunpack.c.l.s4 %v18236_v55  ;;  %v16557_v55 = vld [vmem:[%s23109_s2 + $0x8] ss:$16 sps:$4 sm:$0xff]  }
  0x55   : > { %23255 = vst [vmem:[#allocation15_spill] sm:$0xff] %v18508_v48 }
  0x56   : > { %v717_v14 = vsel %vm23193_vm4, %v624_v13, %v716_v12  ;;  %v876_v61 = vunpack.c.0.s8 %v875_v56 }
  0x57   : > { %16012 = vmatmul.mubr.msk.f32.vlgmr.msra.gmra.mrb[0].mxu1 %vm23191_vm1, %v717_v14  ;;  %1053 = vmatpush1.bf16.msra.mxu0 %v16548_v41 }
  0x58   : > { %1104 = vmatpush1.bf16.msra.mxu1 %v16545_v38  ;;  %1135 = vmatprep.mubr.bf16.mxu1 %v18235_v45  ;;  %v18516_v3 = vsub.s32 %v876_v61, %v18505_v47  ;;  %v18124_v38 = vld [vmem:[%s18411_s17 + $0x10] sm:$0xff]  ;;  %v16563_v61 = vld [vmem:[%s23109_s2 + $0x28] ss:$16 sps:$4 sm:$0xff]  }
  0x59   : > { %1105 = vmatprep.subr.bf16.mxu1 %v16553_v40  ;;  %1202 = vmatprep.subr.bf16.mxu0 %v16556_v43 }
  0x5a   : > { %23256 = vst [vmem:[#allocation16_spill] sm:$0xff] %v18516_v3 }
  0x5c   : > { %1106 = vmatpush1.bf16.msra.mxu1 %v16551_v42 }
  0x5d   : > { %1255 = vmatprep.subr.bf16.mxu1 %v16559_v44  ;;  %v18125_v44 = vld [vmem:[%s18411_s17 + $0x18] sm:$0xff] }
 0x125   : > { %v707_v15 = vpop.f32.mrb[0].mxu0 }
 0x126   : > { %v790_v16 = vmul.f32 0.015625, %v707_v15  ;;  %v16002_v17 = vpop.f32.mrb[1].mxu0 }
 0x128   : > { %v791_v18 = vmul.f32 64.0, %v790_v16  ;;  %v806_v33 = vsub.f32 0.0, %v790_v16 }
 0x12a   : > { %v792_v19 = vmul.f32 %v791_v18, %v790_v16  ;;  %v786_v20 = vpop.f32.mrb[0].mxu1 }
 0x12b   : > { %v16013_v22 = vpop.f32.mrb[1].mxu1 }
 0x12c   : > { %v793_v21 = vsub.f32 %v786_v20, %v792_v19 }
 0x12e   : > { %v794_v23 = vmax.f32 %v793_v21, 0.0 }
 0x130   : > { %v795_v24 = vmul.f32 0.015873017, %v794_v23 }
 0x132   : > { %17986 = vrsqrt.f32 %v795_v24  ;;  %vm798_vm5 = vcmp.eq.f32.partialorder %v795_v24, inf  ;;  %v801_v27 = vand.u32 2147483648, %v795_v24  ;;  %vm800_vm6 = vcmp.eq.f32.partialorder %v795_v24, 0.0 }
 0x13c   : > { %v17987_v25 = vpop.eup %17986 }
 0x13d   : > { %v797_v26 = vmul.f32 %v17987_v25, %v795_v24 }
 0x13f   : > { %v799_v28 = vsel %vm798_vm5, %v795_v24, %v797_v26 }
 0x140   : > { %v802_v29 = vsel %vm800_vm6, %v801_v27, %v799_v28 }
 0x141   : > { %v803_v30 = vadd.f32 1e-06, %v802_v29 }
 0x143   : > { %17988 = vrcp.f32 %v803_v30  ;;  %v18122_v30 = vld [vmem:[%s18411_s17] sm:$0xff] }
 0x14d   : > { %v17989_v31 = vpop.eup %17988 }
 0x14e   : > { %v18445_v32 = vmul.f32 0.35355338, %v17989_v31 }
 0x150   : > { %815 = vrot.lane.b32.xlu1 %v18445_v32, %s18228_s29  ;;  %809 = vrot.lane.b32.xlu0 %v18445_v32, %s18229_s30  ;;  %v18450_v34 = vmul.f32 %v806_v33, %v18445_v32 }
 0x154   : > { %812 = vrot.lane.b32.xlu0 %v18445_v32, %s18230_s23  ;;  %845 = vrot.lane.b32.xlu1 %v18450_v34, %s18229_s30  ;;  %s18240_s30 = smov 96  }
 0x158   : > { %818 = vrot.lane.b32.xlu0 %v18445_v32, %s18231_s16  ;;  %848 = vrot.lane.b32.xlu1 %v18450_v34, %s18230_s23  ;;  %s521_s23 = scalar_select %p520_p6, %s18343_s22, 1 }
 0x15a   : > { %s522_s26 = scalar_lea.vmem %s23121_s14, %s521_s23  ;;  %s18241_s23 = smov [#allocation7]  }
 0x15c   : > { %821 = vrot.lane.b32.xlu0 %v18445_v32, %s18232_s20  ;;  %851 = vrot.lane.b32.xlu1 %v18450_v34, %s18228_s29  ;;  %s18239_s29 = smov 32  }
 0x160   : > { %824 = vrot.lane.b32.xlu0 %v18445_v32, %s18233_s24  ;;  %854 = vrot.lane.b32.xlu1 %v18450_v34, %s18231_s16  ;;  %s18237_s16 = smov 64  }
 0x164   : > { %827 = vrot.lane.b32.xlu0 %v18445_v32, %s18234_s25  ;;  %857 = vrot.lane.b32.xlu1 %v18450_v34, %s18232_s20  ;;  %s512_s20 = sand.u32 1, %s18212_s19  }
 0x165   : > { %s513_s18 = scalar_lea.vmem [#allocation7], %s512_s20 }
 0x166   : > { %s13925_s0 = sshll.u32 %s513_s18, 4  ;;  %s23067_s0 = int_to_ptr.vmem [resolvable:$true] %s13925_s0 }
 0x168   : > { %860 = vrot.lane.b32.xlu0 %v18450_v34, %s18233_s24  ;;  %863 = vrot.lane.b32.xlu1 %v18450_v34, %s18234_s25  ;;  %s18158_s24 = sshll.u32 %s18241_s23, 4  ;;  %s18159_s24 = int_to_ptr.vmem [resolvable:$false] %s18158_s24 }
 0x169   : > { %s18160_s25 = scalar_lea.vmem %s18159_s24, 32  ;;  %p18161_p3 = scmp.lt.s32.totalorder %s23067_s0, %s18159_s24 }
 0x1c2   : > { %v816_v49 = vpop.permute.xlu1 %815  ;;  %v810_v50 = vpop.permute.xlu0 %809 }
 0x1c3   : > { %v831_v59 = vsel %vm830_vm8, %v18445_v32, %v810_v50 }
 0x1c6   : > { %v813_v51 = vpop.permute.xlu0 %812  ;;  %v846_v52 = vpop.permute.xlu1 %845 }
 0x1c7   : > { %v833_v60 = vsel %vm832_vm9, %v831_v59, %v813_v51  ;;  %v866_v5 = vsel %vm830_vm8, %v18450_v34, %v846_v52  ;;  %v16560_v59 = vld [vmem:[%s23109_s2 + $0x20] ss:$16 sps:$4 sm:$0xff]  }
 0x1c8   : > { %v835_v0 = vsel %vm834_vm10, %v833_v60, %v816_v49  ;;  %v16562_v60 = vld [vmem:[%s23109_s2 + $0x24] ss:$16 sps:$4 sm:$0xff]  }
 0x1ca   : > { %v819_v53 = vpop.permute.xlu0 %818  ;;  %v849_v54 = vpop.permute.xlu1 %848 }
 0x1cb   : > { %v837_v2 = vsel %vm836_vm11, %v835_v0, %v819_v53  ;;  %v867_v9 = vsel %vm832_vm9, %v866_v5, %v849_v54  ;;  %v16554_v54 = vld [vmem:[%s23109_s2] ss:$16 sps:$4 sm:$0xff]   ;;  %v16571_v0 = vld [vmem:[%s23109_s2 + $0x8c] ss:$16 sps:$4 sm:$0xff]  }
 0x1ce   : > { %v822_v57 = vpop.permute.xlu0 %821  ;;  %v852_v58 = vpop.permute.xlu1 %851 }
 0x1cf   : > { %v839_v4 = vsel %vm838_vm12, %v837_v2, %v822_v57  ;;  %v868_v11 = vsel %vm834_vm10, %v867_v9, %v852_v58 }
 0x1d2   : > { %v825_v62 = vpop.permute.xlu0 %824  ;;  %v855_v63 = vpop.permute.xlu1 %854 }
 0x1d3   : > { %v841_v6 = vsel %vm840_vm13, %v839_v4, %v825_v62  ;;  %v869_v13 = vsel %vm836_vm11, %v868_v11, %v855_v63  ;;  %v16565_v62 = vld [vmem:[%s23109_s2 + $0x2c] ss:$16 sps:$4 sm:$0xff]   ;;  %v16568_v63 = vld [vmem:[%s23109_s2 + $0x84] ss:$16 sps:$4 sm:$0xff]  }
 0x1d4   : > { %v16577_v11 = vld [vmem:[%s23109_s2 + $0xac] ss:$16 sps:$4 sm:$0xff]  }
 0x1d6   : > { %v828_v7 = vpop.permute.xlu0 %827  ;;  %v858_v8 = vpop.permute.xlu1 %857 }
 0x1d7   : > { %v843_v10 = vsel %vm842_vm14, %v841_v6, %v828_v7  ;;  %v870_v16 = vsel %vm838_vm12, %v869_v13, %v858_v8  ;;  %v16566_v7 = vld [vmem:[%s23109_s2 + $0x80] ss:$16 sps:$4 sm:$0xff]   ;;  %v16569_v8 = vld [vmem:[%s23109_s2 + $0x88] ss:$16 sps:$4 sm:$0xff]  }
 0x1d8   : > { %v880_v12 = vrot.slane %v843_v10, %v18516_v3  ;;  %v16574_v10 = vld [vmem:[%s23109_s2 + $0xa4] ss:$16 sps:$4 sm:$0xff]   ;;  %v1754_v13 = vld [vmem:[%s23119_s12 + $0x88] sm:$0xff] }
 0x1da   : > { %v881_v14 = vcombine.high %v880_v12, %v880_v12  ;;  %v888_v15 = vrot.slane %v880_v12, %v18516_v3  ;;  %v861_v17 = vpop.permute.xlu0 %860  ;;  %v864_v18 = vpop.permute.xlu1 %863  ;;  %v1753_v12 = vld [vmem:[%s23119_s12 + $0x80] sm:$0xff] }
 0x1db   : > { %v871_v19 = vsel %vm840_vm13, %v870_v16, %v861_v17  ;;  %v16572_v17 = vld [vmem:[%s23109_s2 + $0xa0] ss:$16 sps:$4 sm:$0xff]  }
 0x1dc   : > { %v895_v20 = vrot.slane %v881_v14, %v18516_v3  ;;  %v896_v21 = vcombine.high %v888_v15, %v888_v15  ;;  %v901_v22 = vrot.slane %v888_v15, %v18508_v48  ;;  %v872_v23 = vsel %vm842_vm14, %v871_v19, %v864_v18  ;;  %v1785_v14 = vld [vmem:[%s23119_s12 + $0x180] sm:$0xff]  ;;  %v1786_v15 = vld [vmem:[%s23119_s12 + $0x188] sm:$0xff] }
 0x1dd   : > { %v929_v24 = vrot.slane %v872_v23, %v18516_v3  ;;  %v16575_v18 = vld [vmem:[%s23109_s2 + $0xa8] ss:$16 sps:$4 sm:$0xff]  }
 0x1de   : > { %v897_v25 = vcombine.high %v895_v20, %v895_v20  ;;  %v905_v26 = vrot.slane %v895_v20, %v18508_v48  ;;  %v909_v27 = vrot.slane %v896_v21, %v18508_v48  ;;  %v918_v31 = vmul.f32 %v18122_v30, %v901_v22  ;;  %v1756_v30 = vld [vmem:[%s23119_s12 + $0x98] sm:$0xff] }
 0x1df   : > { %v930_v28 = vcombine.high %v929_v24, %v929_v24  ;;  %v937_v29 = vrot.slane %v929_v24, %v18516_v3  ;;  %v18617_v20 = vpack.c.bf16 %v1754_v13, %v1753_v12  ;;  %v18619_v21 = vpack.c.bf16 %v1786_v15, %v1785_v14  ;;  %v1737_v24 = vld [vmem:[%s23119_s12] sm:$0xff]  ;;  %v1762_v14 = vld [vmem:[%s23119_s12 + $0xc8] sm:$0xff] }
 0x1e0   : > { %v913_v32 = vrot.slane %v897_v25, %v18508_v48  ;;  %v919_v37 = vmul.f32 %v18123_v36, %v905_v26  ;;  %v920_v39 = vmul.f32 %v18124_v38, %v909_v27  ;;  %v1738_v25 = vld [vmem:[%s23119_s12 + $0x8] sm:$0xff]  ;;  %v1769_v26 = vld [vmem:[%s23119_s12 + $0x100] sm:$0xff] }
 0x1e1   : > { %v944_v33 = vrot.slane %v930_v28, %v18516_v3  ;;  %v945_v34 = vcombine.high %v937_v29, %v937_v29  ;;  %v950_v35 = vrot.slane %v937_v29, %v18508_v48  ;;  %v1770_v28 = vld [vmem:[%s23119_s12 + $0x108] sm:$0xff]  ;;  %v1755_v29 = vld [vmem:[%s23119_s12 + $0x90] sm:$0xff]  ;;  %v1761_v13 = vld [vmem:[%s23119_s12 + $0xc0] sm:$0xff] }
 0x1e2   : > { %v921_v49 = vmul.f32 %v18125_v44, %v913_v32  ;;  %v1788_v32 = vld [vmem:[%s23119_s12 + $0x198] sm:$0xff]  ;;  %v18653_v36 = vpack.c.bf16 %v1770_v28, %v1769_v26  ;;  %v1793_v15 = vld [vmem:[%s23119_s12 + $0x1c0] sm:$0xff] }
 0x1e3   : > { %v946_v40 = vcombine.high %v944_v33, %v944_v33  ;;  %v954_v41 = vrot.slane %v944_v33, %v18508_v48  ;;  %v958_v42 = vrot.slane %v945_v34, %v18508_v48  ;;  %v967_v43 = vadd.f32 %v950_v35, %v918_v31  ;;  %v1787_v31 = vld [vmem:[%s23119_s12 + $0x190] sm:$0xff]  ;;  %v1764_v28 = vld [vmem:[%s23119_s12 + $0xd8] sm:$0xff] }
 0x1e4   : > { %v18651_v35 = vpack.c.bf16 %v1738_v25, %v1737_v24  ;;  %v18657_v38 = vpack.c.bf16 %v1788_v32, %v1787_v31  ;;  %v1777_v24 = vld [vmem:[%s23119_s12 + $0x140] sm:$0xff]  ;;  %v1778_v25 = vld [vmem:[%s23119_s12 + $0x148] sm:$0xff]  ;;  %v1796_v31 = vld [vmem:[%s23119_s12 + $0x1d8] sm:$0xff] }
 0x1e5   : > { %v962_v50 = vrot.slane %v946_v40, %v18508_v48  ;;  %v968_v51 = vadd.f32 %v954_v41, %v919_v37  ;;  %v969_v52 = vadd.f32 %v958_v42, %v920_v39  ;;  %971 = vst.msk [vmem:[#allocation2 + $0x1] sm:$0xff] %vm23191_vm1, %v967_v43  ;;  %v18655_v37 = vpack.c.bf16 %v1756_v30, %v1755_v29  ;;  %v1739_v42 = vld [vmem:[%s23119_s12 + $0x10] sm:$0xff] }
 0x1e6   : > { %v1771_v43 = vld [vmem:[%s23119_s12 + $0x110] sm:$0xff]  ;;  %v18790_v26 = vpack.c.bf16 %v1778_v25, %v1777_v24  ;;  %v1491_v24 = vld [vmem:[%s23110_s3] sm:$0xf]  ;;  %v18912_v25 = vsub.s32 1, %v18505_v47 }
 0x1e7   : > { %v970_v53 = vadd.f32 %v962_v50, %v921_v49  ;;  %972 = vst.msk [vmem:[#allocation2 + $0x11] sm:$0xff] %vm23191_vm1, %v968_v51  ;;  %973 = vst.msk [vmem:[#allocation2 + $0x21] sm:$0xff] %vm23191_vm1, %v969_v52  ;;  %v1772_v49 = vld [vmem:[%s23119_s12 + $0x118] sm:$0xff]  ;;  %v1757_v51 = vld [vmem:[%s23119_s12 + $0xa0] sm:$0xff] }
 0x1e8   : > { %v18683_v50 = vpack.c.bf16 %v1772_v49, %v1771_v43  ;;  %v1758_v52 = vld [vmem:[%s23119_s12 + $0xa8] sm:$0xff]  ;;  %23263 = vst [vmem:[#allocation23_spill] sm:$0xff] %v18790_v26  ;;  %v1795_v29 = vld [vmem:[%s23119_s12 + $0x1d0] sm:$0xff]  ;;  %v1797_v49 = vld [vmem:[%s23119_s12 + $0x1e0] sm:$0xff] }
 0x1e9   : > { %974 = vst.msk [vmem:[#allocation2 + $0x31] sm:$0xff] %vm23191_vm1, %v970_v53  ;;  %v1789_v53 = vld [vmem:[%s23119_s12 + $0x1a0] sm:$0xff]  ;;  %v1747_v32 = vld [vmem:[%s23119_s12 + $0x50] sm:$0xff]  ;;  %v1766_v43 = vld [vmem:[%s23119_s12 + $0xe8] sm:$0xff] }
 0x1ea   : > { %23277 = vst [vmem:[#allocation37_spill] sm:$0xff] %v18912_v25 }
 0x1ec   : > { %v989_v56 = vld [vmem:[#allocation2 + $0x1] sm:$0xff] }
 0x1ed   : > { %v975_v9 = vld [vmem:[#allocation2] sm:$0xff] }
 0x1ee   : > { %v990_v57 = vld [vmem:[#allocation2 + $0x11] sm:$0xff]  ;;  %v991_v4 = vld [vmem:[#allocation2 + $0x21] sm:$0xff] }
 0x1ef   : > { %v993_v58 = vpack.c.bf16 %v990_v57, %v989_v56  ;;  %v976_v6 = vld [vmem:[#allocation2 + $0x10] sm:$0xff]  ;;  %v977_v22 = vld [vmem:[#allocation2 + $0x20] sm:$0xff]  ;;  %v1742_v57 = vld [vmem:[%s23119_s12 + $0x28] sm:$0xff] }
 0x1f0   : > { %v992_v2 = vld [vmem:[#allocation2 + $0x31] sm:$0xff]  ;;  %v979_v16 = vpack.c.bf16 %v976_v6, %v975_v9  ;;  %v1308_v33 = vld [vmem:[#allocation2 + $0x2] sm:$0xff] }
 0x1f1   : > { %14027 = vmatmul.mubr.msk.bf16.vlgmr.msra.gmra.mrb[4].mxu0 %vm23191_vm1, %v993_v58  ;;  %14029 = vmatmul.mubr.msk.bf16.vlgmr.msra.gmra.mrb[4].mxu1 %vm23191_vm1, %v993_v58  ;;  %v994_v5 = vpack.c.bf16 %v992_v2, %v991_v4  ;;  %v978_v19 = vld [vmem:[#allocation2 + $0x30] sm:$0xff]  ;;  %v1310_v40 = vld [vmem:[#allocation2 + $0x22] sm:$0xff] }
 0x1f2   : > { %1203 = vmatpush1.bf16.msra.mxu0 %v16554_v54  ;;  %1256 = vmatpush1.bf16.msra.mxu1 %v16557_v55  ;;  %v980_v23 = vpack.c.bf16 %v978_v19, %v977_v22  ;;  %v1309_v27 = vld [vmem:[#allocation2 + $0x12] sm:$0xff]  ;;  %v18696_v54 = vpack.c.bf16 %v1758_v52, %v1757_v51  ;;  %v1790_v55 = vld [vmem:[%s23119_s12 + $0x1a8] sm:$0xff]  ;;  %v1741_v56 = vld [vmem:[%s23119_s12 + $0x20] sm:$0xff] }
 0x1f3   : > { %1092 = vmatprep.mubr.bf16.mxu0 %v18235_v45  ;;  %1145 = vmatprep.mubr.bf16.mxu1 %v18235_v45  ;;  %v1312_v34 = vpack.c.bf16 %v1309_v27, %v1308_v33  ;;  %v1311_v39 = vld [vmem:[#allocation2 + $0x32] sm:$0xff]  ;;  %v18707_v58 = vpack.c.bf16 %v1790_v55, %v1789_v53  ;;  %v1746_v19 = vld [vmem:[%s23119_s12 + $0x48] sm:$0xff]  ;;  %v1749_v53 = vld [vmem:[%s23119_s12 + $0x60] sm:$0xff] }
 0x1f4   : > { %1204 = vmatprep.subr.bf16.mxu0 %v16562_v60  ;;  %1257 = vmatprep.subr.bf16.mxu1 %v16565_v62  ;;  %v1313_v41 = vpack.c.bf16 %v1311_v39, %v1310_v40  ;;  %v1773_v60 = vld [vmem:[%s23119_s12 + $0x120] sm:$0xff]  ;;  %v1791_v2 = vld [vmem:[%s23119_s12 + $0x1b0] sm:$0xff]  ;;  %v1748_v33 = vld [vmem:[%s23119_s12 + $0x58] sm:$0xff] }
 0x1f5   : > { %v1743_v6 = vld [vmem:[%s23119_s12 + $0x30] sm:$0xff]  ;;  %v18817_v39 = vpack.c.bf16 %v1748_v33, %v1747_v32  ;;  %v1798_v52 = vld [vmem:[%s23119_s12 + $0x1e8] sm:$0xff] }
 0x1f6   : > { %1205 = vmatpush1.bf16.msra.mxu0 %v16560_v59  ;;  %1258 = vmatpush1.bf16.msra.mxu1 %v16563_v61  ;;  %v18709_v59 = vpack.c.bf16 %v1742_v57, %v1741_v56  ;;  %v1774_v61 = vld [vmem:[%s23119_s12 + $0x128] sm:$0xff]  ;;  %v1763_v27 = vld [vmem:[%s23119_s12 + $0xd0] sm:$0xff]  ;;  %v18851_v56 = vpack.c.bf16 %v1798_v52, %v1797_v49 }
 0x1f7   : > { %1369 = vmatprep.subr.bf16.mxu0 %v16568_v63  ;;  %1422 = vmatprep.subr.bf16.mxu1 %v16571_v0  ;;  %v18718_v62 = vpack.c.bf16 %v1774_v61, %v1773_v60  ;;  %v1759_v63 = vld [vmem:[%s23119_s12 + $0xb0] sm:$0xff]  ;;  %v1760_v0 = vld [vmem:[%s23119_s12 + $0xb8] sm:$0xff]  ;;  %v18804_v30 = vpack.c.bf16 %v1764_v28, %v1763_v27  ;;  %23266 = vst [vmem:[#allocation26_spill] sm:$0xff] %v18817_v39  ;;  %v1750_v55 = vld [vmem:[%s23119_s12 + $0x68] sm:$0xff]  ;;  %v18915_v27 = vsub.s32 3, %v18505_v47 }
 0x1f8   : > { %v18732_v4 = vpack.c.bf16 %v1760_v0, %v1759_v63  ;;  %v1779_v40 = vld [vmem:[%s23119_s12 + $0x150] sm:$0xff]  ;;  %23269 = vst [vmem:[#allocation29_spill] sm:$0xff] %v18851_v56  ;;  %v18853_v57 = vpack.c.bf16 %v1750_v55, %v1749_v53  ;;  %v1781_v60 = vld [vmem:[%s23119_s12 + $0x160] sm:$0xff]  ;;  %v1782_v61 = vld [vmem:[%s23119_s12 + $0x168] sm:$0xff]  ;;  %v18918_v28 = vrot.slane %v1491_v24, %v18508_v48 }
 0x1f9   : > { %14028 = vmatmul.mubr.msk.bf16.gmra.mrb[8].mxu0 %vm23191_vm1, %v994_v5  ;;  %14030 = vmatmul.mubr.msk.bf16.gmra.mrb[8].mxu1 %vm23191_vm1, %v994_v5  ;;  %v1792_v5 = vld [vmem:[%s23119_s12 + $0x1b8] sm:$0xff]  ;;  %23264 = vst [vmem:[#allocation24_spill] sm:$0xff] %v18804_v30  ;;  %v1767_v63 = vld [vmem:[%s23119_s12 + $0xf0] sm:$0xff]  ;;  %v18865_v0 = vpack.c.bf16 %v1782_v61, %v1781_v60  ;;  %23278 = vst [vmem:[#allocation38_spill] sm:$0xff] %v18915_v27 }
 0x1fa   : > { %1234 = vmatprep.mubr.bf16.mxu0 %v18235_v45  ;;  %1287 = vmatprep.mubr.bf16.mxu1 %v18235_v45  ;;  %23270 = vst [vmem:[#allocation30_spill] sm:$0xff] %v18853_v57 }
 0x1fb   : > { %23271 = vst [vmem:[#allocation31_spill] sm:$0xff] %v18865_v0 }
 0x201   : > { %14039 = vmatmul.mubr.msk.bf16.vlgmr.msra.gmra.mrb[4].mxu0 %vm23191_vm1, %v979_v16  ;;  %14041 = vmatmul.mubr.msk.bf16.vlgmr.msra.gmra.mrb[4].mxu1 %vm23191_vm1, %v979_v16  ;;  %v18768_v16 = vpack.c.bf16 %v1762_v14, %v1761_v13  ;;  %v1752_v13 = vld [vmem:[%s23119_s12 + $0x78] sm:$0xff]  ;;  %v1783_v14 = vld [vmem:[%s23119_s12 + $0x170] sm:$0xff] }
 0x202   : > { %1370 = vmatpush1.bf16.msra.mxu0 %v16566_v7  ;;  %1423 = vmatpush1.bf16.msra.mxu1 %v16569_v8  ;;  %v1744_v7 = vld [vmem:[%s23119_s12 + $0x38] sm:$0xff]  ;;  %v18743_v8 = vpack.c.bf16 %v1792_v5, %v1791_v2  ;;  %v1799_v5 = vld [vmem:[%s23119_s12 + $0x1f0] sm:$0xff] }
 0x203   : > { %1244 = vmatprep.mubr.bf16.mxu0 %v18235_v45  ;;  %1297 = vmatprep.mubr.bf16.mxu1 %v18235_v45  ;;  %v18745_v9 = vpack.c.bf16 %v1744_v7, %v1743_v6  ;;  %23260 = vst [vmem:[#allocation20_spill] sm:$0xff] %v18768_v16  ;;  %v1768_v2 = vld [vmem:[%s23119_s12 + $0xf8] sm:$0xff] }
 0x204   : > { %1371 = vmatprep.subr.bf16.mxu0 %v16574_v10  ;;  %1424 = vmatprep.subr.bf16.mxu1 %v16577_v11  ;;  %23257 = vst [vmem:[#allocation17_spill] sm:$0xff] %v18743_v8  ;;  %v1775_v10 = vld [vmem:[%s23119_s12 + $0x130] sm:$0xff]  ;;  %v1776_v11 = vld [vmem:[%s23119_s12 + $0x138] sm:$0xff]  ;;  %v18877_v7 = vpack.c.bf16 %v1768_v2, %v1767_v63 }
 0x205   : > { %23258 = vst [vmem:[#allocation18_spill] sm:$0xff] %v18745_v9  ;;  %v18754_v12 = vpack.c.bf16 %v1776_v11, %v1775_v10  ;;  %v1800_v6 = vld [vmem:[%s23119_s12 + $0x1f8] sm:$0xff]  ;;  %v1751_v11 = vld [vmem:[%s23119_s12 + $0x70] sm:$0xff] }
 0x206   : > { %1372 = vmatpush1.bf16.msra.mxu0 %v16572_v17  ;;  %1425 = vmatpush1.bf16.msra.mxu1 %v16575_v18  ;;  %v1794_v17 = vld [vmem:[%s23119_s12 + $0x1c8] sm:$0xff]  ;;  %v1745_v18 = vld [vmem:[%s23119_s12 + $0x40] sm:$0xff]  ;;  %23272 = vst [vmem:[#allocation32_spill] sm:$0xff] %v18877_v7  ;;  %v18879_v10 = vpack.c.bf16 %v1800_v6, %v1799_v5 }
 0x207   : > { %16027 = vmatprep.subr.bf16.mxu0 %v18617_v20  ;;  %16059 = vmatprep.subr.bf16.mxu1 %v18619_v21  ;;  %23259 = vst [vmem:[#allocation19_spill] sm:$0xff] %v18754_v12  ;;  %v18779_v22 = vpack.c.bf16 %v1794_v17, %v1793_v15  ;;  %v18891_v15 = vpack.c.bf16 %v1752_v13, %v1751_v11  ;;  %v1784_v17 = vld [vmem:[%s23119_s12 + $0x178] sm:$0xff] }
 0x208   : > { %23273 = vst [vmem:[#allocation33_spill] sm:$0xff] %v18879_v10 }
 0x209   : > { %14040 = vmatmul.mubr.msk.bf16.gmra.mrb[8].mxu0 %vm23191_vm1, %v980_v23  ;;  %14042 = vmatmul.mubr.msk.bf16.gmra.mrb[8].mxu1 %vm23191_vm1, %v980_v23  ;;  %23261 = vst [vmem:[#allocation21_spill] sm:$0xff] %v18779_v22  ;;  %v18781_v23 = vpack.c.bf16 %v1746_v19, %v1745_v18  ;;  %23274 = vst [vmem:[#allocation34_spill] sm:$0xff] %v18891_v15  ;;  %v18898_v18 = vpack.c.bf16 %v1784_v17, %v1783_v14  ;;  %v18906_v19 = vsub.s32 2, %v18505_v47 }
 0x20a   : > { %1401 = vmatprep.mubr.bf16.mxu0 %v18235_v45  ;;  %1454 = vmatprep.mubr.bf16.mxu1 %v18235_v45 }
 0x20b   : > { %23262 = vst [vmem:[#allocation22_spill] sm:$0xff] %v18781_v23  ;;  %23275 = vst [vmem:[#allocation35_spill] sm:$0xff] %v18898_v18 }
 0x20c   : > { %23276 = vst [vmem:[#allocation36_spill] sm:$0xff] %v18906_v19 }
 0x211   : > { %14059 = vmatmul.mubr.msk.bf16.vlgmr.msra.gmra.mrb[4].mxu0 %vm23191_vm1, %v1312_v34  ;;  %14061 = vmatmul.mubr.msk.bf16.vlgmr.msra.gmra.mrb[4].mxu1 %vm23191_vm1, %v1312_v34  ;;  %v18815_v34 = vpack.c.bf16 %v1796_v31, %v1795_v29  ;;  %v18927_v29 = vrot.slane %v1491_v24, %v18915_v27 }
 0x212   : > { %1411 = vmatprep.mubr.bf16.mxu0 %v18235_v45  ;;  %1464 = vmatprep.mubr.bf16.mxu1 %v18235_v45  ;;  %v1740_v45 = vld [vmem:[%s23119_s12 + $0x18] sm:$0xff] }
 0x213   : > { %16029 = vmatpush3.bf16.msra.mxu0 %v18651_v35  ;;  %16061 = vmatpush3.bf16.msra.mxu1 %v18653_v36  ;;  %v18678_v44 = vpack.c.bf16 %v1740_v45, %v1739_v42  ;;  %23265 = vst [vmem:[#allocation25_spill] sm:$0xff] %v18815_v34  ;;  %v1765_v45 = vld [vmem:[%s23119_s12 + $0xe0] sm:$0xff] }
 0x214   : > { %16031 = vmatprep.subr.bf16.mxu0 %v18655_v37  ;;  %16063 = vmatprep.subr.bf16.mxu1 %v18657_v38  ;;  %v18839_v51 = vpack.c.bf16 %v1766_v43, %v1765_v45 }
 0x216   : > { %23268 = vst [vmem:[#allocation28_spill] sm:$0xff] %v18839_v51 }
 0x217   : > { %16033 = vmatpush3.bf16.msra.mxu0 %v18678_v44  ;;  %16065 = vmatpush3.bf16.msra.mxu1 %v18683_v50 }
 0x218   : > { %16035 = vmatprep.subr.bf16.mxu0 %v18696_v54  ;;  %16067 = vmatprep.subr.bf16.mxu1 %v18707_v58 }
 0x219   : > { %14060 = vmatmul.mubr.msk.bf16.gmra.mrb[8].mxu0 %vm23191_vm1, %v1313_v41  ;;  %14062 = vmatmul.mubr.msk.bf16.gmra.mrb[8].mxu1 %vm23191_vm1, %v1313_v41  ;;  %v1780_v41 = vld [vmem:[%s23119_s12 + $0x158] sm:$0xff] }
 0x21a   : > { %v18826_v42 = vpack.c.bf16 %v1780_v41, %v1779_v40 }
 0x21b   : > { %16037 = vmatpush3.bf16.msra.mxu0 %v18709_v59  ;;  %16069 = vmatpush3.bf16.msra.mxu1 %v18718_v62 }
 0x21c   : > { %16039 = vmatprep.subr.bf16.mxu0 %v18732_v4  ;;  %16071 = vmatprep.subr.bf16.mxu1 %v18743_v8  ;;  %23267 = vst [vmem:[#allocation27_spill] sm:$0xff] %v18826_v42 }
 0x21f   : > { %16041 = vmatpush3.bf16.msra.mxu0 %v18745_v9  ;;  %16073 = vmatpush3.bf16.msra.mxu1 %v18754_v12 }
 0x220   : > { %16043 = vmatprep.subr.bf16.mxu0 %v18768_v16  ;;  %16075 = vmatprep.subr.bf16.mxu1 %v18779_v22 }
 0x223   : > { %16045 = vmatpush3.bf16.msra.mxu0 %v18781_v23  ;;  %16077 = vmatpush3.bf16.msra.mxu1 %v18790_v26 }
 0x224   : > { %16047 = vmatprep.subr.bf16.mxu0 %v18804_v30  ;;  %16079 = vmatprep.subr.bf16.mxu1 %v18815_v34 }
 0x227   : > { %16049 = vmatpush3.bf16.msra.mxu0 %v18817_v39  ;;  %16081 = vmatpush3.bf16.msra.mxu1 %v18826_v42 }
 0x228   : > { %16051 = vmatprep.subr.bf16.mxu0 %v18839_v51  ;;  %16083 = vmatprep.subr.bf16.mxu1 %v18851_v56 }
 0x22b   : > { %16053 = vmatpush3.bf16.msra.mxu0 %v18853_v57  ;;  %16085 = vmatpush3.bf16.msra.mxu1 %v18865_v0 }
 0x22c   : > { %16055 = vmatprep.subr.bf16.mxu0 %v18877_v7  ;;  %16087 = vmatprep.subr.bf16.mxu1 %v18879_v10 }
 0x22f   : > { %16057 = vmatpush3.bf16.msra.mxu0 %v18891_v15  ;;  %16089 = vmatpush3.bf16.msra.mxu1 %v18898_v18 }
 0x230   : > { %16091 = vmatprep.subr.bf16.mxu0 %v18617_v20  ;;  %16123 = vmatprep.subr.bf16.mxu1 %v18619_v21  ;;  %v18921_v20 = vrot.slane %v1491_v24, %v18906_v19  ;;  %v18924_v21 = vrot.slane %v1491_v24, %v18912_v25 }
 0x2e4   : > { %v1403_v31 = vpop.f32.mrb[4].mxu0  ;;  %v1456_v32 = vpop.f32.mrb[4].mxu1 }
 0x2e5   : > { %v18930_v33 = vadd.f32 %v18918_v28, %v1403_v31  ;;  %v18933_v47 = vadd.f32 %v18921_v20, %v1456_v32  ;;  %v1405_v40 = vpop.f32.mrb[5].mxu0  ;;  %v1458_v41 = vpop.f32.mrb[5].mxu1 }
 0x2e6   : > { %v18936_v45 = vadd.f32 %v18924_v21, %v1405_v40  ;;  %v18939_v43 = vadd.f32 %v18927_v29, %v1458_v41  ;;  %v1407_v49 = vpop.f32.mrb[6].mxu0  ;;  %v1460_v52 = vpop.f32.mrb[6].mxu1 }
 0x2e7   : > { %23279 = vst [vmem:[#allocation39_spill] sm:$0xff] %v18930_v33  ;;  %23280 = vst [vmem:[#allocation40_spill] sm:$0xff] %v18933_v47  ;;  %v1529_v53 = vrot.slane %v18930_v33, 4  ;;  %v1625_v55 = vmul.f32 %v18930_v33, %v18930_v33  ;;  %v1541_v60 = vrot.slane %v18933_v47, 4  ;;  %v18947_v61 = vmul.f32 %v18933_v47, %v18933_v47  ;;  %v1409_v63 = vpop.f32.mrb[7].mxu0  ;;  %v1462_v2 = vpop.f32.mrb[7].mxu1 }
 0x2e8   : > { %23281 = vst [vmem:[#allocation41_spill] sm:$0xff] %v18936_v45  ;;  %23282 = vst [vmem:[#allocation42_spill] sm:$0xff] %v18939_v43  ;;  %v1535_v5 = vrot.slane %v18936_v45, 4  ;;  %v18954_v13 = vmul.f32 %v18936_v45, %v18936_v45  ;;  %v1547_v14 = vrot.slane %v18939_v43, 4  ;;  %v18963_v32 = vmul.f32 %v18939_v43, %v18939_v43 }
 0x2e9   : > { %v1530_v6 = vadd.f32 %v1529_v53, %v18930_v33  ;;  %v1542_v11 = vadd.f32 %v1541_v60, %v18933_v47  ;;  %v1641_v17 = vrot.slane %v1625_v55, 4  ;;  %v18966_v40 = vadd.f32 %v18918_v28, %v1407_v49 }
 0x2ea   : > { %v18959_v31 = vadd.f32 %v1535_v5, %v18936_v45  ;;  %v18969_v41 = vadd.f32 %v18921_v20, %v1460_v52  ;;  %v18972_v53 = vadd.f32 %v18924_v21, %v1409_v63  ;;  %v18975_v60 = vadd.f32 %v18927_v29, %v1462_v2 }
 0x2eb   : > { %23283 = vst [vmem:[#allocation43_spill] sm:$0xff] %v18966_v40  ;;  %v1531_v5 = vrot.slane %v1530_v6, 2  ;;  %v1543_v24 = vrot.slane %v1542_v11, 2  ;;  %v18979_v45 = vadd.f32 %v1547_v14, %v18939_v43  ;;  %v1553_v52 = vrot.slane %v18966_v40, 4 }
 0x2ec   : > { %23284 = vst [vmem:[#allocation44_spill] sm:$0xff] %v18969_v41  ;;  %23285 = vst [vmem:[#allocation45_spill] sm:$0xff] %v18972_v53  ;;  %v1413_v1 = vpop.f32.mrb[8].mxu0  ;;  %v1466_v46 = vpop.f32.mrb[8].mxu1  ;;  %v1629_v63 = vmul.f32 %v18966_v40, %v18966_v40  ;;  %v1565_v27 = vrot.slane %v18969_v41, 4  ;;  %v18987_v2 = vmul.f32 %v18969_v41, %v18969_v41  ;;  %v1559_v47 = vrot.slane %v18972_v53, 4 }
 0x2ed   : > { %23286 = vst [vmem:[#allocation46_spill] sm:$0xff] %v18975_v60  ;;  %v1415_v49 = vpop.f32.mrb[9].mxu0  ;;  %v1468_v33 = vpop.f32.mrb[9].mxu1  ;;  %v18992_v14 = vmul.f32 %v18972_v53, %v18972_v53  ;;  %v18995_v43 = vadd.f32 %v18918_v28, %v1413_v1  ;;  %v18998_v48 = vadd.f32 %v18921_v20, %v1466_v46  ;;  %v1554_v10 = vadd.f32 %v1553_v52, %v18966_v40 }
 0x2ee   : > { %v1417_v19 = vpop.f32.mrb[10].mxu0  ;;  %v1470_v25 = vpop.f32.mrb[10].mxu1  ;;  %v1566_v15 = vadd.f32 %v1565_v27, %v18969_v41  ;;  %v1571_v0 = vrot.slane %v18975_v60, 4  ;;  %v19005_v7 = vmul.f32 %v18975_v60, %v18975_v60  ;;  %v19007_v56 = vadd.f32 %v1531_v5, %v1530_v6 }
 0x2ef   : > { %23287 = vst [vmem:[#allocation47_spill] sm:$0xff] %v18995_v43  ;;  %23288 = vst [vmem:[#allocation48_spill] sm:$0xff] %v18998_v48  ;;  %v1419_v3 = vpop.f32.mrb[11].mxu0  ;;  %v1472_v18 = vpop.f32.mrb[11].mxu1  ;;  %v19009_v57 = vadd.f32 %v1641_v17, %v1625_v55  ;;  %v1665_v46 = vrot.slane %v1629_v63, 4  ;;  %v19012_v42 = vadd.f32 %v1543_v24, %v1542_v11  ;;  %v1555_v51 = vrot.slane %v1554_v10, 2 }
 0x2f0   : > { %v1567_v34 = vrot.slane %v1566_v15, 2  ;;  %v1560_v27 = vadd.f32 %v1559_v47, %v18972_v53  ;;  %v1577_v40 = vrot.slane %v18995_v43, 4  ;;  %v1589_v6 = vrot.slane %v18998_v48, 4 }
 0x2f1   : > { %23289 = vst [vmem:[#allocation49_spill] sm:$0xff] %v19009_v57  ;;  %v1572_v55 = vadd.f32 %v1571_v0, %v18975_v60  ;;  %v19022_v5 = vadd.f32 %v18924_v21, %v1415_v49  ;;  %v19025_v11 = vadd.f32 %v18927_v29, %v1468_v33  ;;  %v19027_v24 = vadd.f32 %v1665_v46, %v1629_v63 }
 0x2f2   : > { %v1578_v47 = vadd.f32 %v1577_v40, %v18995_v43  ;;  %v19032_v52 = vmul.f32 %v18995_v43, %v18995_v43  ;;  %v19035_v1 = vadd.f32 %v1589_v6, %v18998_v48  ;;  %v1556_v0 = vadd.f32 %v1555_v51, %v1554_v10 }
 0x2f3   : > { %23290 = vst [vmem:[#allocation50_spill] sm:$0xff] %v19022_v5  ;;  %23291 = vst [vmem:[#allocation51_spill] sm:$0xff] %v19025_v11  ;;  %v19037_v41 = vadd.f32 %v1567_v34, %v1566_v15  ;;  %v1583_v49 = vrot.slane %v19022_v5, 4  ;;  %v19042_v33 = vmul.f32 %v19022_v5, %v19022_v5  ;;  %v1595_v63 = vrot.slane %v19025_v11, 4 }
 0x2f4   : > { %v19047_v40 = vmul.f32 %v19025_v11, %v19025_v11  ;;  %v19050_v46 = vadd.f32 %v18918_v28, %v1417_v19  ;;  %v19053_v6 = vadd.f32 %v18921_v20, %v1470_v25  ;;  %v1579_v34 = vrot.slane %v1578_v47, 2 }
 0x2f5   : > { %v19056_v51 = vadd.f32 %v18924_v21, %v1419_v3  ;;  %v1537_v10 = vrot.slane %v18959_v31, 2  ;;  %v1561_v15 = vrot.slane %v1560_v27, 2  ;;  %v19063_v53 = vadd.f32 %v18927_v29, %v1472_v18 }
 0x2f6   : > { %23292 = vst [vmem:[#allocation52_spill] sm:$0xff] %v19050_v46  ;;  %23293 = vst [vmem:[#allocation53_spill] sm:$0xff] %v19053_v6  ;;  %v1601_v43 = vrot.slane %v19050_v46, 4  ;;  %v1613_v60 = vrot.slane %v19053_v6, 4  ;;  %v1584_v28 = vadd.f32 %v1583_v49, %v19022_v5  ;;  %v1549_v17 = vrot.slane %v18979_v45, 2 }
 0x2f7   : > { %23294 = vst [vmem:[#allocation54_spill] sm:$0xff] %v19056_v51  ;;  %23295 = vst [vmem:[#allocation55_spill] sm:$0xff] %v19063_v53  ;;  %v1538_v19 = vadd.f32 %v1537_v10, %v18959_v31  ;;  %v1562_v25 = vadd.f32 %v1561_v15, %v1560_v27  ;;  %v1607_v3 = vrot.slane %v19056_v51, 4  ;;  %v1573_v39 = vrot.slane %v1572_v55, 2 }
 0x2f8   : > { %v1602_v20 = vadd.f32 %v1601_v43, %v19050_v46  ;;  %v19070_v21 = vadd.f32 %v1613_v60, %v19053_v6  ;;  %v1585_v22 = vrot.slane %v1584_v28, 2  ;;  %v1550_v29 = vadd.f32 %v1549_v17, %v18979_v45 }
 0x2f9   : > { %v1539_v26 = vrot.slane %v1538_v19, 1  ;;  %v1563_v30 = vrot.slane %v1562_v25, 1  ;;  %v1608_v18 = vadd.f32 %v1607_v3, %v19056_v51  ;;  %v1574_v31 = vadd.f32 %v1573_v39, %v1572_v55 }
 0x2fa   : > { %v1596_v27 = vadd.f32 %v1595_v63, %v19025_v11  ;;  %v1619_v49 = vrot.slane %v19063_v53, 4  ;;  %v1586_v15 = vadd.f32 %v1585_v22, %v1584_v28  ;;  %v1551_v5 = vrot.slane %v1550_v29, 1 }
 0x2fb   : > { %v1540_v10 = vadd.f32 %v1539_v26, %v1538_v19  ;;  %v1564_v43 = vadd.f32 %v1563_v30, %v1562_v25  ;;  %v1609_v60 = vrot.slane %v1608_v18, 2  ;;  %v1575_v23 = vrot.slane %v1574_v31, 1 }
 0x2fc   : > { %v1597_v12 = vrot.slane %v1596_v27, 2  ;;  %v1620_v16 = vadd.f32 %v1619_v49, %v19063_v53  ;;  %v1587_v8 = vrot.slane %v1586_v15, 1  ;;  %v1533_v45 = vrot.slane %v19007_v56, 1 }
 0x2fd   : > { %v1610_v57 = vadd.f32 %v1609_v60, %v1608_v18  ;;  %v1820_v3 = vsel %vm23236_vm2, %v1564_v43, %v1540_v10  ;;  %v1552_v39 = vadd.f32 %v1551_v5, %v1550_v29  ;;  %v1576_v55 = vadd.f32 %v1575_v23, %v1574_v31 }
 0x2fe   : > { %v1598_v17 = vadd.f32 %v1597_v12, %v1596_v27  ;;  %v1621_v63 = vrot.slane %v1620_v16, 2  ;;  %v1588_v11 = vadd.f32 %v1587_v8, %v1586_v15  ;;  %v1534_v22 = vadd.f32 %v1533_v45, %v19007_v56 }
 0x2ff   : > { %v1611_v26 = vrot.slane %v1610_v57, 1  ;;  %v1557_v30 = vrot.slane %v1556_v0, 1  ;;  %v1826_v28 = vsel %vm23236_vm2, %v1576_v55, %v1552_v39  ;;  %v1580_v49 = vadd.f32 %v1579_v34, %v1578_v47 }
 0x300   : > { %v1599_v19 = vrot.slane %v1598_v17, 1  ;;  %v1622_v25 = vadd.f32 %v1621_v63, %v1620_v16  ;;  %v1821_v18 = vsel %vm23235_vm3, %v1588_v11, %v1820_v3  ;;  %v1603_v43 = vrot.slane %v1602_v20, 2 }
 0x301   : > { %v1612_v9 = vadd.f32 %v1611_v26, %v1610_v57  ;;  %v1558_v10 = vadd.f32 %v1557_v30, %v1556_v0  ;;  %v1581_v23 = vrot.slane %v1580_v49, 1  ;;  %v1545_v12 = vrot.slane %v19012_v42, 1 }
 0x302   : > { %v1600_v60 = vadd.f32 %v1599_v19, %v1598_v17  ;;  %v1623_v5 = vrot.slane %v1622_v25, 1  ;;  %v1604_v29 = vadd.f32 %v1603_v43, %v1602_v20  ;;  %v1569_v16 = vrot.slane %v19037_v41, 1 }
 0x303   : > { %v1822_v8 = vsel %vm23193_vm4, %v1612_v9, %v1821_v18  ;;  %v1817_v56 = vsel %vm23236_vm2, %v1558_v10, %v1534_v22  ;;  %v1582_v47 = vadd.f32 %v1581_v23, %v1580_v49  ;;  %v1546_v11 = vadd.f32 %v1545_v12, %v19012_v42 }
 0x304   : > { %1897 = vmatprep.mubr.f32.mxu0 %v1822_v8  ;;  %v1624_v31 = vadd.f32 %v1623_v5, %v1622_v25  ;;  %v1827_v57 = vsel %vm23235_vm3, %v1600_v60, %v1826_v28  ;;  %v1605_v0 = vrot.slane %v1604_v29, 1  ;;  %v1570_v34 = vadd.f32 %v1569_v16, %v19037_v41 }
 0x305   : > { %v23296_v27 = vrot.slane %v19035_v1, 2  ;;  %v1615_v9 = vrot.slane %v19070_v21, 2  ;;  %v1818_v3 = vsel %vm23235_vm3, %v1582_v47, %v1817_v56  ;;  %v1638_v45 = vmul.f32 %v19056_v51, %v19056_v51 }
 0x306   : > { %v1828_v20 = vsel %vm23193_vm4, %v1624_v31, %v1827_v57  ;;  %v23297_v39 = vrot.slane %v18954_v13, 4  ;;  %v1606_v55 = vadd.f32 %v1605_v0, %v1604_v29  ;;  %v23298_v26 = vrot.slane %v18992_v14, 4 }
 0x307   : > { %v1592_v15 = vadd.f32 %v23296_v27, %v19035_v1  ;;  %1967 = vmatprep.mubr.f32.mxu1 %v1828_v20  ;;  %v1616_v17 = vadd.f32 %v1615_v9, %v19070_v21  ;;  %v1823_v1 = vsel %vm23236_vm2, %v1570_v34, %v1546_v11  ;;  %v1695_v30 = vrot.slane %v19042_v33, 4 }
 0x308   : > { %v1648_v42 = vadd.f32 %v23297_v39, %v18954_v13  ;;  %v1672_v22 = vadd.f32 %v23298_v26, %v18992_v14  ;;  %v1719_v19 = vrot.slane %v1638_v45, 4  ;;  %v1819_v25 = vsel %vm23193_vm4, %v1606_v55, %v1818_v3 }
 0x309   : > { %v1593_v41 = vrot.slane %v1592_v15, 1  ;;  %v1617_v49 = vrot.slane %v1616_v17, 1  ;;  %v1640_v13 = vmul.f32 %v19063_v53, %v19063_v53  ;;  %1898 = vmatmul.mubr.f32.vlgmr.msra.gmra.mrb[2].mxu0 %v1819_v25  ;;  %v1696_v10 = vadd.f32 %v1695_v30, %v19042_v33 }
 0x30a   : > { %v1649_v63 = vrot.slane %v1648_v42, 2  ;;  %v1673_v21 = vrot.slane %v1672_v22, 2  ;;  %v1720_v43 = vadd.f32 %v1719_v19, %v1638_v45  ;;  %16093 = vmatpush3.bf16.msra.mxu0 %v18651_v35  ;;  %v23299_v14 = vrot.slane %v18963_v32, 4 }
 0x30b   : > { %v1594_v28 = vadd.f32 %v1593_v41, %v1592_v15  ;;  %v1618_v60 = vadd.f32 %v1617_v49, %v1616_v17  ;;  %v23300_v12 = vrot.slane %v19005_v7, 4  ;;  %v1697_v16 = vrot.slane %v1696_v10, 2  ;;  %16095 = vmatprep.subr.bf16.mxu0 %v18655_v37 }
 0x30c   : > { %v1650_v18 = vadd.f32 %v1649_v63, %v1648_v42  ;;  %v1660_v23 = vadd.f32 %v23299_v14, %v18963_v32  ;;  %v1674_v56 = vadd.f32 %v1673_v21, %v1672_v22  ;;  %v1721_v31 = vrot.slane %v1720_v43, 2 }
 0x30d   : > { %v1824_v5 = vsel %vm23235_vm3, %v1594_v28, %v1823_v1  ;;  %v1684_v8 = vadd.f32 %v23300_v12, %v19005_v7  ;;  %v1707_v35 = vrot.slane %v19047_v40, 4  ;;  %v1635_v11 = vmul.f32 %v18998_v48, %v18998_v48 }
 0x30e   : > { %v1651_v29 = vrot.slane %v1650_v18, 1  ;;  %v1825_v33 = vsel %vm23193_vm4, %v1618_v60, %v1824_v5  ;;  %v1661_v57 = vrot.slane %v1660_v23, 2  ;;  %v1675_v32 = vrot.slane %v1674_v56, 1  ;;  %16097 = vmatpush3.bf16.msra.mxu0 %v18678_v44  ;;  %v23304_v60 = vld [vmem:[#allocation49_spill] sm:$0xff] }
 0x30f   : > { %v1685_v47 = vrot.slane %v1684_v8, 2  ;;  %1968 = vmatmul.mubr.f32.vlgmr.msra.gmra.mrb[2].mxu1 %v1825_v33  ;;  %v1698_v0 = vadd.f32 %v1697_v16, %v1696_v10  ;;  %v1722_v34 = vadd.f32 %v1721_v31, %v1720_v43  ;;  %v1708_v15 = vadd.f32 %v1707_v35, %v19047_v40  ;;  %16099 = vmatprep.subr.bf16.mxu0 %v18696_v54  ;;  %v23307_v35 = vld [vmem:[#allocation19_spill] sm:$0xff] }
 0x310   : > { %16125 = vmatpush3.bf16.msra.mxu1 %v18653_v36  ;;  %v1662_v7 = vadd.f32 %v1661_v57, %v1660_v23  ;;  %v1731_v37 = vrot.slane %v1640_v13, 4  ;;  %v1689_v9 = vrot.slane %v19032_v52, 4  ;;  %v1676_v20 = vadd.f32 %v1675_v32, %v1674_v56  ;;  %v23305_v23 = vld [vmem:[#allocation17_spill] sm:$0xff]  ;;  %v23308_v32 = vld [vmem:[#allocation22_spill] sm:$0xff] }
 0x311   : > { %v1686_v27 = vadd.f32 %v1685_v47, %v1684_v8  ;;  %v1699_v3 = vrot.slane %v1698_v0, 1  ;;  %v1723_v45 = vrot.slane %v1722_v34, 1  ;;  %16127 = vmatprep.subr.bf16.mxu1 %v18657_v38  ;;  %v1652_v39 = vadd.f32 %v1651_v29, %v1650_v18 }
 0x312   : > { %v1709_v55 = vrot.slane %v1708_v15, 2  ;;  %v1732_v36 = vadd.f32 %v1731_v37, %v1640_v13  ;;  %v1637_v41 = vmul.f32 %v19050_v46, %v19050_v46  ;;  %v1663_v1 = vrot.slane %v1662_v7, 1  ;;  %16101 = vmatpush3.bf16.msra.mxu0 %v18709_v59 }
 0x313   : > { %v1687_v42 = vrot.slane %v1686_v27, 1  ;;  %v1700_v40 = vadd.f32 %v1699_v3, %v1698_v0  ;;  %v1724_v17 = vadd.f32 %v1723_v45, %v1722_v34  ;;  %v23301_v44 = vrot.slane %v18987_v2, 4  ;;  %16103 = vmatprep.subr.bf16.mxu0 %v18732_v4  ;;  %v23311_v45 = vld [vmem:[#allocation23_spill] sm:$0xff] }
 0x314   : > { %v1992_v26 = vsel %vm23236_vm2, %v1676_v20, %v1652_v39  ;;  %v1710_v22 = vadd.f32 %v1709_v55, %v1708_v15  ;;  %v1733_v38 = vrot.slane %v1732_v36, 2  ;;  %16129 = vmatpush3.bf16.msra.mxu1 %v18683_v50  ;;  %v1701_v54 = vrot.slane %v1635_v11, 4  ;;  %v23312_v39 = vld [vmem:[#allocation26_spill] sm:$0xff] }
 0x315   : > { %v1678_v63 = vadd.f32 %v23301_v44, %v18987_v2  ;;  %v1993_v30 = vsel %vm23235_vm3, %v1700_v40, %v1992_v26  ;;  %v1688_v19 = vadd.f32 %v1687_v42, %v1686_v27  ;;  %16131 = vmatprep.subr.bf16.mxu1 %v18707_v58  ;;  %v1690_v25 = vadd.f32 %v1689_v9, %v19032_v52  ;;  %v23303_v52 = vld [vmem:[#allocation18_spill] sm:$0xff]  ;;  %v23310_v27 = vld [vmem:[#allocation24_spill] sm:$0xff] }
 0x316   : > { %v1994_v2 = vsel %vm23193_vm4, %v1724_v17, %v1993_v30  ;;  %v1711_v28 = vrot.slane %v1710_v22, 1  ;;  %v1734_v49 = vadd.f32 %v1733_v38, %v1732_v36  ;;  %v1667_v13 = vrot.slane %v19027_v24, 2  ;;  %16105 = vmatpush3.bf16.msra.mxu0 %v23303_v52  ;;  %v23314_v40 = vld [vmem:[#allocation28_spill] sm:$0xff]  ;;  %v23315_v38 = vld [vmem:[#allocation27_spill] sm:$0xff] }
 0x317   : > { %v23302_v50 = vrot.slane %v18947_v61, 4  ;;  %2069 = vmatprep.mubr.f32.mxu0 %v1994_v2  ;;  %v1664_v18 = vadd.f32 %v1663_v1, %v1662_v7  ;;  %v1691_v21 = vrot.slane %v1690_v25, 2  ;;  %v1713_v10 = vrot.slane %v1637_v41, 4  ;;  %v23318_v2 = vld [vmem:[#allocation32_spill] sm:$0xff] }
 0x318   : > { %v1639_v58 = vmul.f32 %v19053_v6, %v19053_v6  ;;  %v1712_v4 = vadd.f32 %v1711_v28, %v1710_v22  ;;  %v1735_v43 = vrot.slane %v1734_v49, 1  ;;  %16133 = vmatpush3.bf16.msra.mxu1 %v18718_v62  ;;  %v1643_v5 = vrot.slane %v23304_v60, 2 }
 0x319   : > { %v1654_v59 = vadd.f32 %v23302_v50, %v18947_v61  ;;  %v1998_v14 = vsel %vm23236_vm2, %v1688_v19, %v1664_v18  ;;  %16135 = vmatprep.subr.bf16.mxu1 %v23305_v23  ;;  %v23306_v61 = vld [vmem:[#allocation20_spill] sm:$0xff]  ;;  %v1714_v12 = vadd.f32 %v1713_v10, %v1637_v41  ;;  %v1702_v8 = vadd.f32 %v1701_v54, %v1635_v11  ;;  %v23309_v11 = vld [vmem:[#allocation21_spill] sm:$0xff]  ;;  %v23316_v54 = vld [vmem:[#allocation30_spill] sm:$0xff] }
 0x31a   : > { %16107 = vmatprep.subr.bf16.mxu0 %v23306_v61  ;;  %v1736_v29 = vadd.f32 %v1735_v43, %v1734_v49  ;;  %v1999_v56 = vsel %vm23235_vm3, %v1712_v4, %v1998_v14  ;;  %v1668_v16 = vadd.f32 %v1667_v13, %v19027_v24  ;;  %v1679_v31 = vrot.slane %v1678_v63, 2  ;;  %v23313_v41 = vld [vmem:[#allocation25_spill] sm:$0xff]  ;;  %v23320_v10 = vld [vmem:[#allocation34_spill] sm:$0xff]  ;;  %v23322_v14 = vld [vmem:[#allocation35_spill] sm:$0xff] }
 0x31b   : > { %v1692_v33 = vadd.f32 %v1691_v21, %v1690_v25  ;;  %v1715_v62 = vrot.slane %v1714_v12, 2  ;;  %v1703_v57 = vrot.slane %v1702_v8, 2  ;;  %16109 = vmatpush3.bf16.msra.mxu0 %v23308_v32  ;;  %v1644_v0 = vadd.f32 %v1643_v5, %v23304_v60  ;;  %v23317_v25 = vld [vmem:[#allocation29_spill] sm:$0xff]  ;;  %v23319_v21 = vld [vmem:[#allocation31_spill] sm:$0xff] }
 0x31c   : > { %v2000_v47 = vsel %vm23193_vm4, %v1736_v29, %v1999_v56  ;;  %16137 = vmatpush3.bf16.msra.mxu1 %v23307_v35  ;;  %v1655_v34 = vrot.slane %v1654_v59, 2  ;;  %v1725_v7 = vrot.slane %v1639_v58, 4  ;;  %16111 = vmatprep.subr.bf16.mxu0 %v23310_v27  ;;  %v1669_v24 = vrot.slane %v1668_v16, 1  ;;  %v23321_v4 = vld [vmem:[#allocation33_spill] sm:$0xff] }
 0x31d   : > { %2139 = vmatprep.mubr.f32.mxu1 %v2000_v47  ;;  %16139 = vmatprep.subr.bf16.mxu1 %v23309_v11  ;;  %v1716_v15 = vadd.f32 %v1715_v62, %v1714_v12  ;;  %v1680_v37 = vadd.f32 %v1679_v31, %v1678_v63  ;;  %v1693_v20 = vrot.slane %v1692_v33, 1  ;;  %v1704_v3 = vadd.f32 %v1703_v57, %v1702_v8 }
 0x31e   : > { %v1726_v9 = vadd.f32 %v1725_v7, %v1639_v58  ;;  %v1645_v42 = vrot.slane %v1644_v0, 1  ;;  %v1656_v55 = vadd.f32 %v1655_v34, %v1654_v59  ;;  %v1670_v17 = vadd.f32 %v1669_v24, %v1668_v16 }
 0x31f   : > { %16113 = vmatpush3.bf16.msra.mxu0 %v23312_v39  ;;  %v1717_v1 = vrot.slane %v1716_v15, 1  ;;  %v1681_v44 = vrot.slane %v1680_v37, 1  ;;  %v1694_v22 = vadd.f32 %v1693_v20, %v1692_v33  ;;  %v1705_v63 = vrot.slane %v1704_v3, 1 }
 0x320   : > { %16141 = vmatpush3.bf16.msra.mxu1 %v23311_v45  ;;  %v1727_v36 = vrot.slane %v1726_v9, 2  ;;  %16115 = vmatprep.subr.bf16.mxu0 %v23314_v40  ;;  %v1646_v30 = vadd.f32 %v1645_v42, %v1644_v0  ;;  %v1657_v19 = vrot.slane %v1656_v55, 1  ;;  %v16580_v42 = vld [vmem:[%s23113_s6 + $0x404] ss:$16 sps:$4 sm:$0xff]  }
 0x321   : > { %16143 = vmatprep.subr.bf16.mxu1 %v23313_v41  ;;  %v1718_v28 = vadd.f32 %v1717_v1, %v1716_v15  ;;  %v1682_v13 = vadd.f32 %v1681_v44, %v1680_v37  ;;  %v1706_v18 = vadd.f32 %v1705_v63, %v1704_v3  ;;  %v14063_v37 = vld [vmem:[%s23111_s4] ss:$0 sm:$0xff]  ;;  %v16581_v41 = vld [vmem:[%s23113_s6 + $0x408] ss:$16 sps:$4 sm:$0xff]   ;;  %v16586_v40 = vld [vmem:[%s23113_s6 + $0x424] ss:$16 sps:$4 sm:$0xff]  }
 0x322   : > { %v1728_v26 = vadd.f32 %v1727_v36, %v1726_v9  ;;  %v1989_v49 = vsel %vm23236_vm2, %v1670_v17, %v1646_v30  ;;  %v1658_v58 = vadd.f32 %v1657_v19, %v1656_v55  ;;  %v14064_v3 = vld [vmem:[%s23112_s5] ss:$0 sm:$0xff]  ;;  %v16583_v55 = vld [vmem:[%s23113_s6 + $0x40c] ss:$16 sps:$4 sm:$0xff]   ;;  %v16587_v44 = vld [vmem:[%s23113_s6 + $0x428] ss:$16 sps:$4 sm:$0xff]  }
 0x323   : > { %16117 = vmatpush3.bf16.msra.mxu0 %v23316_v54  ;;  %v1990_v59 = vsel %vm23235_vm3, %v1694_v22, %v1989_v49  ;;  %v16578_v36 = vld [vmem:[%s23113_s6 + $0x400] ss:$16 sps:$4 sm:$0xff]   ;;  %v16589_v17 = vld [vmem:[%s23113_s6 + $0x42c] ss:$16 sps:$4 sm:$0xff]   ;;  %v16598_v54 = vld [vmem:[%s23113_s6 + $0x464] ss:$16 sps:$4 sm:$0xff]  }
 0x324   : > { %16145 = vmatpush3.bf16.msra.mxu1 %v23315_v38  ;;  %16119 = vmatprep.subr.bf16.mxu0 %v23318_v2  ;;  %v1729_v50 = vrot.slane %v1728_v26, 1  ;;  %v1991_v43 = vsel %vm23193_vm4, %v1718_v28, %v1990_v59  ;;  %v1995_v60 = vsel %vm23236_vm2, %v1682_v13, %v1658_v58  ;;  %v16584_v1 = vld [vmem:[%s23113_s6 + $0x420] ss:$16 sps:$4 sm:$0xff]   ;;  %v16595_v22 = vld [vmem:[%s23113_s6 + $0x44c] ss:$16 sps:$4 sm:$0xff]  }
 0x325   : > { %16147 = vmatprep.subr.bf16.mxu1 %v23317_v25  ;;  %v1996_v5 = vsel %vm23235_vm3, %v1706_v18, %v1995_v60  ;;  %v16590_v63 = vld [vmem:[%s23113_s6 + $0x440] ss:$16 sps:$4 sm:$0xff]   ;;  %v16593_v38 = vld [vmem:[%s23113_s6 + $0x448] ss:$16 sps:$4 sm:$0xff]   ;;  %v16601_v30 = vld [vmem:[%s23113_s6 + $0x46c] ss:$16 sps:$4 sm:$0xff]  }
 0x326   : > { %v1730_v52 = vadd.f32 %v1729_v50, %v1728_v26  ;;  %v16592_v26 = vld [vmem:[%s23113_s6 + $0x444] ss:$16 sps:$4 sm:$0xff]   ;;  %v16596_v19 = vld [vmem:[%s23113_s6 + $0x460] ss:$16 sps:$4 sm:$0xff]   ;;  %v16599_v25 = vld [vmem:[%s23113_s6 + $0x468] ss:$16 sps:$4 sm:$0xff]  }
 0x327   : > { %16121 = vmatpush3.bf16.msra.mxu0 %v23320_v10  ;;  %v16604_v2 = vld [vmem:[%s23113_s6 + $0x484] ss:$16 sps:$4 sm:$0xff]   ;;  %v16607_v28 = vld [vmem:[%s23113_s6 + $0x48c] ss:$16 sps:$4 sm:$0xff]   ;;  %v16602_v49 = vld [vmem:[%s23113_s6 + $0x480] ss:$16 sps:$4 sm:$0xff]  }
 0x328   : > { %16149 = vmatpush3.bf16.msra.mxu1 %v23319_v21  ;;  %v1997_v23 = vsel %vm23193_vm4, %v1730_v52, %v1996_v5  ;;  %3980 = vmatprep.subr.bf16.mxu0 %v16580_v42  ;;  %v16605_v13 = vld [vmem:[%s23113_s6 + $0x488] ss:$16 sps:$4 sm:$0xff]   ;;  %v16610_v59 = vld [vmem:[%s23113_s6 + $0x4a4] ss:$16 sps:$4 sm:$0xff]   ;;  %v16613_v18 = vld [vmem:[%s23113_s6 + $0x4ac] ss:$16 sps:$4 sm:$0xff]  }
 0x329   : > { %16151 = vmatprep.subr.bf16.mxu1 %v23321_v4  ;;  %v16608_v10 = vld [vmem:[%s23113_s6 + $0x4a0] ss:$16 sps:$4 sm:$0xff]   ;;  %v16611_v58 = vld [vmem:[%s23113_s6 + $0x4a8] ss:$16 sps:$4 sm:$0xff]   ;;  %v16616_v5 = vld [vmem:[%s23113_s6 + $0x4c4] ss:$16 sps:$4 sm:$0xff]  }
 0x32a   : > { %2070 = vmatmul.mubr.f32.vlgmr.msra.gmra.mrb[12].mxu0 %v1991_v43  ;;  %v23323_v43 = vld [vmem:[#allocation16_spill] sm:$0xff]  ;;  %v23327_v42 = vld [vmem:[#allocation38_spill] sm:$0xff] }
 0x32b   : > { %3981 = vmatpush1.bf16.msra.mxu0 %v16578_v36 }
 0x32c   : > { %16153 = vmatpush3.bf16.msra.mxu1 %v23322_v14  ;;  %3982 = vmatprep.subr.bf16.mxu0 %v16586_v40  ;;  %v16619_v14 = vld [vmem:[%s23113_s6 + $0x4cc] ss:$16 sps:$4 sm:$0xff]   ;;  %v16635_v40 = vld [vmem:[%s23113_s6 + $0x528] ss:$16 sps:$4 sm:$0xff]  }
 0x32d   : > { %4086 = vmatprep.subr.bf16.mxu1 %v16583_v55 }
 0x32f   : > { %2140 = vmatmul.mubr.f32.vlgmr.msra.gmra.mrb[12].mxu1 %v1997_v23  ;;  %3983 = vmatpush1.bf16.msra.mxu0 %v16584_v1  ;;  %v16614_v23 = vld [vmem:[%s23113_s6 + $0x4c0] ss:$16 sps:$4 sm:$0xff]  }
 0x330   : > { %4087 = vmatpush1.bf16.msra.mxu1 %v16581_v41  ;;  %3984 = vmatprep.subr.bf16.mxu0 %v16592_v26  ;;  %v16632_v41 = vld [vmem:[%s23113_s6 + $0x520] ss:$16 sps:$4 sm:$0xff]  }
 0x331   : > { %4088 = vmatprep.subr.bf16.mxu1 %v16589_v17 }
 0x333   : > { %3985 = vmatpush1.bf16.msra.mxu0 %v16590_v63 }
 0x334   : > { %4089 = vmatpush1.bf16.msra.mxu1 %v16587_v44  ;;  %3986 = vmatprep.subr.bf16.mxu0 %v16598_v54 }
 0x335   : > { %4090 = vmatprep.subr.bf16.mxu1 %v16595_v22 }
 0x337   : > { %3987 = vmatpush1.bf16.msra.mxu0 %v16596_v19 }
 0x338   : > { %4091 = vmatpush1.bf16.msra.mxu1 %v16593_v38  ;;  %3988 = vmatprep.subr.bf16.mxu0 %v16604_v2 }
 0x339   : > { %4092 = vmatprep.subr.bf16.mxu1 %v16601_v30  ;;  %v16640_v30 = vld [vmem:[%s23113_s6 + $0x544] ss:$16 sps:$4 sm:$0xff]  }
 0x33b   : > { %3989 = vmatpush1.bf16.msra.mxu0 %v16602_v49  ;;  %v16638_v49 = vld [vmem:[%s23113_s6 + $0x540] ss:$16 sps:$4 sm:$0xff]  }
 0x33c   : > { %4093 = vmatpush1.bf16.msra.mxu1 %v16599_v25  ;;  %3990 = vmatprep.subr.bf16.mxu0 %v16610_v59 }
 0x33d   : > { %4094 = vmatprep.subr.bf16.mxu1 %v16607_v28 }
 0x33f   : > { %3991 = vmatpush1.bf16.msra.mxu0 %v16608_v10  ;;  %v23328_v10 = vld [vmem:[#allocation39_spill] sm:$0xff] }
 0x340   : > { %4095 = vmatpush1.bf16.msra.mxu1 %v16605_v13  ;;  %3992 = vmatprep.subr.bf16.mxu0 %v16616_v5  ;;  %v16643_v13 = vld [vmem:[%s23113_s6 + $0x54c] ss:$16 sps:$4 sm:$0xff]  }
 0x341   : > { %4096 = vmatprep.subr.bf16.mxu1 %v16613_v18 }
 0x343   : > { %3993 = vmatpush1.bf16.msra.mxu0 %v16614_v23 }
 0x344   : > { %4097 = vmatpush1.bf16.msra.mxu1 %v16611_v58 }
 0x345   : > { %4098 = vmatprep.subr.bf16.mxu1 %v16619_v14  ;;  %v23331_v14 = vld [vmem:[#allocation42_spill] sm:$0xff] }
 0x3dc   : > { %v15392_v61 = vpop.f32.mrb[2].mxu0 }
 0x3dd   : > { %v15393_v12 = vpop.f32.mrb[3].mxu0 }
 0x3de   : > { %v15394_v8 = vadd.f32 %v15393_v12, %v15392_v61  ;;  %v16617_v61 = vld [vmem:[%s23113_s6 + $0x4c8] ss:$16 sps:$4 sm:$0xff]  }
 0x3df   : > { %4099 = vmatpush1.bf16.msra.mxu1 %v16617_v61  ;;  %v16646_v61 = vld [vmem:[%s23113_s6 + $0x564] ss:$16 sps:$4 sm:$0xff]  }
 0x3e2   : > { %v15427_v29 = vpop.f32.mrb[2].mxu1 }
 0x3e3   : > { %v15428_v56 = vpop.f32.mrb[3].mxu1 }
 0x3e4   : > { %v15429_v16 = vadd.f32 %v15428_v56, %v15427_v29  ;;  %v16622_v56 = vld [vmem:[%s23113_s6 + $0x4e4] ss:$16 sps:$4 sm:$0xff]  }
 0x3e5   : > { %3994 = vmatprep.subr.bf16.mxu0 %v16622_v56 }
 0x3e6   : > { %v1970_v31 = vadd.f32 %v15429_v16, %v15394_v8  ;;  %v16625_v16 = vld [vmem:[%s23113_s6 + $0x4ec] ss:$16 sps:$4 sm:$0xff]  }
 0x3e7   : > { %4100 = vmatprep.subr.bf16.mxu1 %v16625_v16  ;;  %v23334_v16 = vld [vmem:[#allocation44_spill] sm:$0xff] }
 0x3e8   : > { %v2145_v32 = vmul.f32 0.0078125, %v1970_v31  ;;  %v16620_v31 = vld [vmem:[%s23113_s6 + $0x4e0] ss:$16 sps:$4 sm:$0xff]  }
 0x3e9   : > { %3995 = vmatpush1.bf16.msra.mxu0 %v16620_v31 }
 0x3ea   : > { %v2147_v7 = vmul.f32 %v2145_v32, %v2145_v32 }
 0x3fd   : > { %v15462_v33 = vpop.f32.mrb[12].mxu0 }
 0x3fe   : > { %v15463_v62 = vpop.f32.mrb[13].mxu0 }
 0x3ff   : > { %v15464_v57 = vadd.f32 %v15463_v62, %v15462_v33  ;;  %v16623_v33 = vld [vmem:[%s23113_s6 + $0x4e8] ss:$16 sps:$4 sm:$0xff]  }
 0x400   : > { %4101 = vmatpush1.bf16.msra.mxu1 %v16623_v33  ;;  %v23335_v33 = vld [vmem:[#allocation46_spill] sm:$0xff] }
 0x402   : > { %v15497_v47 = vpop.f32.mrb[12].mxu1 }
 0x403   : > { %v15498_v35 = vpop.f32.mrb[13].mxu1 }
 0x404   : > { %v15499_v0 = vadd.f32 %v15498_v35, %v15497_v47  ;;  %v16628_v35 = vld [vmem:[%s23113_s6 + $0x504] ss:$16 sps:$4 sm:$0xff]  }
 0x405   : > { %3996 = vmatprep.subr.bf16.mxu0 %v16628_v35 }
 0x406   : > { %v2142_v34 = vadd.f32 %v15499_v0, %v15464_v57  ;;  %v16626_v0 = vld [vmem:[%s23113_s6 + $0x500] ss:$16 sps:$4 sm:$0xff]  }
 0x407   : > { %3997 = vmatpush1.bf16.msra.mxu0 %v16626_v0 }
 0x408   : > { %v2146_v11 = vmul.f32 0.0078125, %v2142_v34  ;;  %v16629_v34 = vld [vmem:[%s23113_s6 + $0x508] ss:$16 sps:$4 sm:$0xff]  }
 0x40a   : > { %v2148_v27 = vsub.f32 %v2146_v11, %v2147_v7 }
 0x40c   : > { %v2149_v24 = vmax.f32 %v2148_v27, 0.0 }
 0x40e   : > { %v2150_v15 = vadd.f32 1e-05, %v2149_v24  ;;  %v23324_v24 = vld [vmem:[#allocation15_spill] sm:$0xff] }
 0x410   : > { %17990 = vrsqrt.f32 %v2150_v15 }
 0x41a   : > { %v17991_v9 = vpop.eup %17990 }
 0x41b   : > { %v2159_v20 = vmul.f32 %v17991_v9, %v14063_v37  ;;  %v16634_v37 = vld [vmem:[%s23113_s6 + $0x524] ss:$16 sps:$4 sm:$0xff]   ;;  %v16637_v9 = vld [vmem:[%s23113_s6 + $0x52c] ss:$16 sps:$4 sm:$0xff]  }
 0x41c   : > { %3998 = vmatprep.subr.bf16.mxu0 %v16634_v37 }
 0x41d   : > { %2170 = vrot.lane.b32.xlu0 %v2159_v20, %s18237_s16  ;;  %v2161_v45 = vmul.f32 %v2159_v20, %v2145_v32  ;;  %v16631_v32 = vld [vmem:[%s23113_s6 + $0x50c] ss:$16 sps:$4 sm:$0xff]   ;;  %3999 = vmatpush1.bf16.msra.mxu0 %v16632_v41 }
 0x41e   : > { %4102 = vmatprep.subr.bf16.mxu1 %v16631_v32  ;;  %4000 = vmatprep.subr.bf16.mxu0 %v16640_v30  ;;  %v23337_v32 = vld [vmem:[#allocation50_spill] sm:$0xff] }
 0x41f   : > { %v19188_v39 = vsub.f32 %v14064_v3, %v2161_v45  ;;  %v23326_v45 = vld [vmem:[#allocation36_spill] sm:$0xff]  ;;  %4103 = vmatpush1.bf16.msra.mxu1 %v16629_v34 }
 0x420   : > { %4104 = vmatprep.subr.bf16.mxu1 %v16637_v9 }
 0x421   : > { %2299 = vrot.lane.b32.xlu1 %v19188_v39, %s18237_s16  ;;  %4001 = vmatpush1.bf16.msra.mxu0 %v16638_v49 }
 0x422   : > { %4002 = vmatprep.subr.bf16.mxu0 %v16646_v61 }
 0x423   : > { %4105 = vmatpush1.bf16.msra.mxu1 %v16635_v40 }
 0x424   : > { %4106 = vmatprep.subr.bf16.mxu1 %v16643_v13 }
 0x48f   : > { %v2171_v50 = vpop.permute.xlu0 %2170 }
 0x490   : > { %v2174_v21 = vsel %vm23192_vm15, %v2159_v20, %v2171_v50  ;;  %v23325_v20 = vld [vmem:[#allocation37_spill] sm:$0xff] }
 0x491   : > { %v2176_v4 = vcombine.low %v2174_v21, %v2174_v21  ;;  %v16641_v21 = vld [vmem:[%s23113_s6 + $0x548] ss:$16 sps:$4 sm:$0xff]  }
 0x492   : > { %4107 = vmatpush1.bf16.msra.mxu1 %v16641_v21 }
 0x493   : > { %v2183_v52 = vrot.slane %v2176_v4, %v23323_v43  ;;  %v2300_v60 = vpop.permute.xlu1 %2299  ;;  %v23329_v4 = vld [vmem:[#allocation41_spill] sm:$0xff] }
 0x494   : > { %v2302_v8 = vsel %vm23192_vm15, %v19188_v39, %v2300_v60  ;;  %v23330_v60 = vld [vmem:[#allocation40_spill] sm:$0xff] }
 0x495   : > { %v2184_v12 = vcombine.low %v2183_v52, %v2183_v52  ;;  %v2185_v29 = vcombine.high %v2183_v52, %v2183_v52  ;;  %v2304_v62 = vcombine.low %v2302_v8, %v2302_v8 }
 0x497   : > { %v2192_v57 = vrot.slane %v2184_v12, %v23323_v43  ;;  %v2199_v47 = vrot.slane %v2185_v29, %v23323_v43  ;;  %v2311_v7 = vrot.slane %v2304_v62, %v23323_v43  ;;  %v23332_v12 = vld [vmem:[#allocation43_spill] sm:$0xff]  ;;  %v23333_v29 = vld [vmem:[#allocation45_spill] sm:$0xff] }
 0x499   : > { %v2200_v11 = vcombine.high %v2192_v57, %v2192_v57  ;;  %v2201_v27 = vcombine.high %v2199_v47, %v2199_v47  ;;  %v2205_v15 = vrot.slane %v2192_v57, %v23324_v24  ;;  %v2209_v3 = vrot.slane %v2192_v57, %v23325_v20 }
 0x49a   : > { %v2213_v39 = vrot.slane %v2192_v57, %v23326_v45  ;;  %v2217_v55 = vrot.slane %v2192_v57, %v23327_v42  ;;  %v2221_v36 = vrot.slane %v2199_v47, %v23324_v24  ;;  %v2225_v17 = vrot.slane %v2199_v47, %v23325_v20  ;;  %v16649_v57 = vld [vmem:[%s23113_s6 + $0x56c] ss:$16 sps:$4 sm:$0xff]  }
 0x49b   : > { %v2229_v1 = vrot.slane %v2199_v47, %v23326_v45  ;;  %v2312_v44 = vcombine.low %v2311_v7, %v2311_v7  ;;  %v2313_v26 = vcombine.high %v2311_v7, %v2311_v7  ;;  %v2233_v22 = vrot.slane %v2199_v47, %v23327_v42  ;;  %v23336_v47 = vld [vmem:[#allocation47_spill] sm:$0xff]  ;;  %4108 = vmatprep.subr.bf16.mxu1 %v16649_v57  ;;  %v16661_v57 = vld [vmem:[%s23113_s6 + $0x5ac] ss:$16 sps:$4 sm:$0xff]  }
 0x49c   : > { %v2237_v63 = vrot.slane %v2200_v11, %v23324_v24  ;;  %v2241_v38 = vrot.slane %v2200_v11, %v23325_v20  ;;  %v2245_v54 = vrot.slane %v2200_v11, %v23326_v45  ;;  %v2249_v19 = vrot.slane %v2200_v11, %v23327_v42  ;;  %v16644_v11 = vld [vmem:[%s23113_s6 + $0x560] ss:$16 sps:$4 sm:$0xff]  }
 0x49d   : > { %v2253_v25 = vrot.slane %v2201_v27, %v23324_v24  ;;  %v2257_v2 = vrot.slane %v2201_v27, %v23325_v20  ;;  %v19337_v28 = vrot.slane %v2312_v44, %v23323_v43  ;;  %v2261_v50 = vrot.slane %v2201_v27, %v23326_v45  ;;  %4003 = vmatpush1.bf16.msra.mxu0 %v16644_v11 }
 0x49e   : > { %v2265_v59 = vrot.slane %v2201_v27, %v23327_v42  ;;  %v19348_v18 = vrot.slane %v2313_v26, %v23323_v43  ;;  %v2282_v58 = vmul.f32 %v2205_v15, %v23328_v10  ;;  %v2283_v52 = vmul.f32 %v2209_v3, %v23329_v4  ;;  %v23338_v27 = vld [vmem:[#allocation51_spill] sm:$0xff] }
 0x49f   : > { %v2284_v5 = vmul.f32 %v2213_v39, %v23330_v60  ;;  %v2285_v23 = vmul.f32 %v2217_v55, %v23331_v14  ;;  %v2286_v8 = vmul.f32 %v2221_v36, %v23332_v12  ;;  %v2287_v56 = vmul.f32 %v2225_v17, %v23333_v29  ;;  %v16647_v39 = vld [vmem:[%s23113_s6 + $0x568] ss:$16 sps:$4 sm:$0xff]   ;;  %v16652_v17 = vld [vmem:[%s23113_s6 + $0x584] ss:$16 sps:$4 sm:$0xff]  }
 0x4a0   : > { %v2288_v31 = vmul.f32 %v2229_v1, %v23334_v16  ;;  %v2289_v62 = vmul.f32 %v2233_v22, %v23335_v33  ;;  %v2290_v35 = vmul.f32 %v2237_v63, %v23336_v47  ;;  %v2291_v0 = vmul.f32 %v2241_v38, %v23337_v32  ;;  %v16655_v1 = vld [vmem:[%s23113_s6 + $0x58c] ss:$16 sps:$4 sm:$0xff]   ;;  %4109 = vmatpush1.bf16.msra.mxu1 %v16647_v39 }
 0x4a1   : > { %v2292_v34 = vmul.f32 %v2245_v54, %v18998_v48  ;;  %v2328_v7 = vcombine.high %v19337_v28, %v19337_v28  ;;  %v2293_v15 = vmul.f32 %v2249_v19, %v23338_v27  ;;  %v2294_v37 = vmul.f32 %v2253_v25, %v19050_v46  ;;  %v16650_v25 = vld [vmem:[%s23113_s6 + $0x580] ss:$16 sps:$4 sm:$0xff]   ;;  %4004 = vmatprep.subr.bf16.mxu0 %v16652_v17 }
 0x4a2   : > { %v2295_v9 = vmul.f32 %v2257_v2, %v19056_v51  ;;  %v2329_v3 = vcombine.high %v19348_v18, %v19348_v18  ;;  %v2296_v55 = vmul.f32 %v2261_v50, %v19053_v6  ;;  %v2297_v36 = vmul.f32 %v2265_v59, %v19063_v53  ;;  %v16653_v50 = vld [vmem:[%s23113_s6 + $0x588] ss:$16 sps:$4 sm:$0xff]   ;;  %v16658_v59 = vld [vmem:[%s23113_s6 + $0x5a4] ss:$16 sps:$4 sm:$0xff]   ;;  %4110 = vmatprep.subr.bf16.mxu1 %v16655_v1 }
 0x4a3   : > { %v2333_v41 = vrot.slane %v19337_v28, %v23324_v24  ;;  %v2337_v40 = vrot.slane %v19337_v28, %v23325_v20  ;;  %v2341_v44 = vrot.slane %v19337_v28, %v23326_v45  ;;  %v2345_v26 = vrot.slane %v19337_v28, %v23327_v42  ;;  %4005 = vmatpush1.bf16.msra.mxu0 %v16650_v25  ;;  %v16665_v1 = vld [vmem:[%s23113_s6 + $0x5c8] ss:$16 sps:$4 sm:$0xff]  }
 0x4a4   : > { %v2349_v22 = vrot.slane %v19348_v18, %v23324_v24  ;;  %v2353_v63 = vrot.slane %v19348_v18, %v23325_v20  ;;  %v2357_v38 = vrot.slane %v19348_v18, %v23326_v45  ;;  %v2361_v54 = vrot.slane %v19348_v18, %v23327_v42  ;;  %4111 = vmatpush1.bf16.msra.mxu1 %v16653_v50 }
 0x4a5   : > { %v2365_v30 = vrot.slane %v2328_v7, %v23324_v24  ;;  %v2369_v19 = vrot.slane %v2328_v7, %v23325_v20  ;;  %v2373_v2 = vrot.slane %v2328_v7, %v23326_v45  ;;  %v2377_v28 = vrot.slane %v2328_v7, %v23327_v42  ;;  %4006 = vmatprep.subr.bf16.mxu0 %v16658_v59  ;;  %v16671_v59 = vld [vmem:[%s23113_s6 + $0x5e8] ss:$16 sps:$4 sm:$0xff]  }
 0x4a6   : > { %v2381_v49 = vrot.slane %v2329_v3, %v23324_v24  ;;  %v2385_v13 = vrot.slane %v2329_v3, %v23325_v20  ;;  %v2389_v18 = vrot.slane %v2329_v3, %v23326_v45  ;;  %v2393_v21 = vrot.slane %v2329_v3, %v23327_v42  ;;  %v16656_v3 = vld [vmem:[%s23113_s6 + $0x5a0] ss:$16 sps:$4 sm:$0xff]   ;;  %4112 = vmatprep.subr.bf16.mxu1 %v16661_v57 }
 0x4a7   : > { %v2410_v61 = vadd.f32 %v2333_v41, %v2282_v58  ;;  %v2411_v7 = vadd.f32 %v2337_v40, %v2283_v52  ;;  %v2412_v11 = vadd.f32 %v2341_v44, %v2284_v5  ;;  %v2413_v39 = vadd.f32 %v2345_v26, %v2285_v23  ;;  %v16659_v52 = vld [vmem:[%s23113_s6 + $0x5a8] ss:$16 sps:$4 sm:$0xff]   ;;  %v16664_v5 = vld [vmem:[%s23113_s6 + $0x5c4] ss:$16 sps:$4 sm:$0xff]   ;;  %4007 = vmatpush1.bf16.msra.mxu0 %v16656_v3 }
 0x4a8   : > { %v2414_v53 = vadd.f32 %v2349_v22, %v2286_v8  ;;  %v2415_v51 = vadd.f32 %v2353_v63, %v2287_v56  ;;  %v2416_v6 = vadd.f32 %v2357_v38, %v2288_v31  ;;  %v2417_v46 = vadd.f32 %v2361_v54, %v2289_v62  ;;  %v16667_v62 = vld [vmem:[%s23113_s6 + $0x5cc] ss:$16 sps:$4 sm:$0xff]   ;;  %4113 = vmatpush1.bf16.msra.mxu1 %v16659_v52  ;;  %v16670_v38 = vld [vmem:[%s23113_s6 + $0x5e4] ss:$16 sps:$4 sm:$0xff]  }
 0x4a9   : > { %v2418_v27 = vadd.f32 %v2365_v30, %v2290_v35  ;;  %v2419_v58 = vadd.f32 %v2369_v19, %v2291_v0  ;;  %v2420_v41 = vadd.f32 %v2373_v2, %v2292_v34  ;;  %v2421_v17 = vadd.f32 %v2377_v28, %v2293_v15  ;;  %4008 = vmatprep.subr.bf16.mxu0 %v16664_v5  ;;  %v16668_v2 = vld [vmem:[%s23113_s6 + $0x5e0] ss:$16 sps:$4 sm:$0xff]   ;;  %v16673_v28 = vld [vmem:[%s23113_s6 + $0x5ec] ss:$16 sps:$4 sm:$0xff]  }
 0x4aa   : > { %v2422_v23 = vadd.f32 %v2381_v49, %v2294_v37  ;;  %v2423_v8 = vadd.f32 %v2385_v13, %v2295_v9  ;;  %v2424_v56 = vadd.f32 %v2389_v18, %v2296_v55  ;;  %v2425_v31 = vadd.f32 %v2393_v21, %v2297_v36  ;;  %v16662_v37 = vld [vmem:[%s23113_s6 + $0x5c0] ss:$16 sps:$4 sm:$0xff]   ;;  %4114 = vmatprep.subr.bf16.mxu1 %v16667_v62  ;;  %v16676_v18 = vld [vmem:[%s23113_s6 + $0x604] ss:$16 sps:$4 sm:$0xff]   ;;  %v16679_v52 = vld [vmem:[%s23113_s6 + $0x60c] ss:$16 sps:$4 sm:$0xff]  }
 0x4ab   : > { %v19439_v35 = vmul.f32 0.5, %v2410_v61  ;;  %v19441_v0 = vmul.f32 0.5, %v2411_v7  ;;  %v19443_v34 = vmul.f32 0.5, %v2412_v11  ;;  %v19445_v15 = vmul.f32 0.5, %v2413_v39  ;;  %4009 = vmatpush1.bf16.msra.mxu0 %v16662_v37 }
 0x4ac   : > { %v19450_v9 = vmul.f32 0.5, %v2414_v53  ;;  %v19452_v55 = vmul.f32 0.5, %v2415_v51  ;;  %v19454_v36 = vmul.f32 0.5, %v2416_v6  ;;  %v19456_v40 = vmul.f32 0.5, %v2417_v46  ;;  %4115 = vmatpush1.bf16.msra.mxu1 %v16665_v1  ;;  %4010 = vmatprep.subr.bf16.mxu0 %v16670_v38 }
 0x4ad   : > { %23339 = vst [vmem:[#allocation18_spill] sm:$0xff] %v19439_v35  ;;  %23340 = vst [vmem:[#allocation49_spill] sm:$0xff] %v19441_v0  ;;  %v19461_v44 = vmul.f32 0.5, %v2418_v27  ;;  %v19463_v26 = vmul.f32 0.5, %v2419_v58  ;;  %v19465_v22 = vmul.f32 0.5, %v2420_v41  ;;  %v19467_v63 = vmul.f32 0.5, %v2421_v17  ;;  %4116 = vmatprep.subr.bf16.mxu1 %v16673_v28 }
 0x4ae   : > { %23341 = vst [vmem:[#allocation17_spill] sm:$0xff] %v19443_v34  ;;  %23342 = vst [vmem:[#allocation20_spill] sm:$0xff] %v19445_v15  ;;  %v19472_v54 = vmul.f32 0.5, %v2422_v23  ;;  %v19474_v30 = vmul.f32 0.5, %v2423_v8  ;;  %v19476_v19 = vmul.f32 0.5, %v2424_v56  ;;  %v19478_v25 = vmul.f32 0.5, %v2425_v31 }
 0x4af   : > { %23343 = vst [vmem:[#allocation19_spill] sm:$0xff] %v19450_v9  ;;  %23344 = vst [vmem:[#allocation22_spill] sm:$0xff] %v19452_v55  ;;  %v2442_v49 = vmul.f32 0.70710677, %v2410_v61  ;;  %v2443_v13 = vmul.f32 0.70710677, %v2411_v7  ;;  %4011 = vmatpush1.bf16.msra.mxu0 %v16668_v2 }
 0x4b0   : > { %23345 = vst [vmem:[#allocation21_spill] sm:$0xff] %v19454_v36  ;;  %23346 = vst [vmem:[#allocation24_spill] sm:$0xff] %v19456_v40  ;;  %v2444_v50 = vmul.f32 0.70710677, %v2412_v11  ;;  %v2445_v21 = vmul.f32 0.70710677, %v2413_v39  ;;  %4117 = vmatpush1.bf16.msra.mxu1 %v16671_v59  ;;  %4033 = vmatprep.subr.bf16.mxu0 %v16676_v18 }
 0x4b1   : > { %23347 = vst [vmem:[#allocation23_spill] sm:$0xff] %v19461_v44  ;;  %23348 = vst [vmem:[#allocation26_spill] sm:$0xff] %v19463_v26  ;;  %v2446_v57 = vmul.f32 0.70710677, %v2414_v53  ;;  %v2447_v3 = vmul.f32 0.70710677, %v2415_v51  ;;  %4139 = vmatprep.subr.bf16.mxu1 %v16679_v52 }
 0x4b2   : > { %23349 = vst [vmem:[#allocation25_spill] sm:$0xff] %v19465_v22  ;;  %23350 = vst [vmem:[#allocation28_spill] sm:$0xff] %v19467_v63  ;;  %v2448_v5 = vmul.f32 0.70710677, %v2416_v6  ;;  %v2449_v61 = vmul.f32 0.70710677, %v2417_v46 }
 0x4b3   : > { %23351 = vst [vmem:[#allocation27_spill] sm:$0xff] %v19472_v54  ;;  %23352 = vst [vmem:[#allocation30_spill] sm:$0xff] %v19474_v30  ;;  %v2450_v7 = vmul.f32 0.70710677, %v2418_v27  ;;  %v2451_v11 = vmul.f32 0.70710677, %v2419_v58 }
 0x4b4   : > { %23353 = vst [vmem:[#allocation29_spill] sm:$0xff] %v19476_v19  ;;  %23354 = vst [vmem:[#allocation32_spill] sm:$0xff] %v19478_v25  ;;  %v2452_v62 = vmul.f32 0.70710677, %v2420_v41  ;;  %v2453_v32 = vmul.f32 0.70710677, %v2421_v17 }
 0x4b5   : > { %v2454_v48 = vmul.f32 0.70710677, %v2422_v23  ;;  %v19495_v47 = vmul.f32 0.70710677, %v2423_v8  ;;  %v19497_v39 = vmul.f32 0.70710677, %v2424_v56 }
 0x4b6   : > { %v19499_v53 = vmul.f32 0.70710677, %v2425_v31  ;;  %vm2458_vm0 = vcmp.ge.f32.partialorder %v2442_v49, 0.0  ;;  %vm2459_vm5 = vcmp.ge.f32.partialorder %v2443_v13, 0.0  ;;  %vm2460_vm6 = vcmp.ge.f32.partialorder %v2444_v50, 0.0 }
 0x4b7   : > { %vm2461_vm7 = vcmp.ge.f32.partialorder %v2445_v21, 0.0  ;;  %vm2462_vm8 = vcmp.ge.f32.partialorder %v2446_v57, 0.0  ;;  %vm2463_vm9 = vcmp.ge.f32.partialorder %v2447_v3, 0.0  ;;  %vm2464_vm10 = vcmp.ge.f32.partialorder %v2448_v5, 0.0 }
 0x4b8   : > { %vm2465_vm11 = vcmp.ge.f32.partialorder %v2449_v61, 0.0  ;;  %vm2466_vm12 = vcmp.ge.f32.partialorder %v2450_v7, 0.0  ;;  %vm2467_vm13 = vcmp.ge.f32.partialorder %v2451_v11, 0.0  ;;  %vm2468_vm14 = vcmp.ge.f32.partialorder %v2452_v62, 0.0 }
 0x4b9   : > { %vm2469_vm1 = vcmp.ge.f32.partialorder %v2453_v32, 0.0  ;;  %vm2470_vm15 = vcmp.ge.f32.partialorder %v2454_v48, 0.0  ;;  %v23194_v46 = vmov -1.0   ;;  %vm2471_vm4 = vcmp.ge.f32.partialorder %v19495_v47, 0.0 }
 0x4ba   : > { %v19503_v6 = vsel %vm2458_vm0, 1.0, %v23194_v46  ;;  %v19507_v51 = vsel %vm2459_vm5, 1.0, %v23194_v46  ;;  %v19512_v27 = vsel %vm2460_vm6, 1.0, %v23194_v46  ;;  %v19516_v58 = vsel %vm2461_vm7, 1.0, %v23194_v46 }
 0x4bb   : > { %23355 = vst [vmem:[#allocation31_spill] sm:$0xff] %v19503_v6  ;;  %23356 = vst [vmem:[#allocation34_spill] sm:$0xff] %v19507_v51  ;;  %v19520_v41 = vsel %vm2462_vm8, 1.0, %v23194_v46  ;;  %v19524_v17 = vsel %vm2463_vm9, 1.0, %v23194_v46  ;;  %vm2472_vm0 = vcmp.ge.f32.partialorder %v19497_v39, 0.0  ;;  %v19529_v23 = vsel %vm2464_vm10, 1.0, %v23194_v46 }
 0x4bc   : > { %23357 = vst [vmem:[#allocation33_spill] sm:$0xff] %v19512_v27  ;;  %23358 = vst [vmem:[#allocation35_spill] sm:$0xff] %v19516_v58  ;;  %v19533_v8 = vsel %vm2465_vm11, 1.0, %v23194_v46  ;;  %v19537_v56 = vsel %vm2466_vm12, 1.0, %v23194_v46  ;;  %v19541_v31 = vsel %vm2467_vm13, 1.0, %v23194_v46  ;;  %vm2473_vm5 = vcmp.ge.f32.partialorder %v19499_v53, 0.0 }
 0x4bd   : > { %23359 = vst [vmem:[#allocation56_spill] sm:$0xff] %v19520_v41  ;;  %23360 = vst [vmem:[#allocation57_spill] sm:$0xff] %v19524_v17  ;;  %v19546_v37 = vsel %vm2468_vm14, 1.0, %v23194_v46  ;;  %v19550_v1 = vsel %vm2469_vm1, 1.0, %v23194_v46  ;;  %v19552_v38 = vand.u32 2147483647, %v2442_v49 }
 0x4be   : > { %23361 = vst [vmem:[#allocation58_spill] sm:$0xff] %v19529_v23  ;;  %23362 = vst [vmem:[#allocation59_spill] sm:$0xff] %v19533_v8  ;;  %v19554_v2 = vand.u32 2147483647, %v2443_v13  ;;  %v19556_v28 = vand.u32 2147483647, %v2444_v50 }
 0x4bf   : > { %23363 = vst [vmem:[#allocation60_spill] sm:$0xff] %v19537_v56  ;;  %23364 = vst [vmem:[#allocation61_spill] sm:$0xff] %v19541_v31  ;;  %v19558_v59 = vand.u32 2147483647, %v2445_v21  ;;  %v19560_v18 = vand.u32 2147483647, %v2446_v57 }
 0x4c0   : > { %23365 = vst [vmem:[#allocation62_spill] sm:$0xff] %v19546_v37  ;;  %23366 = vst [vmem:[#allocation63_spill] sm:$0xff] %v19550_v1  ;;  %v19562_v52 = vand.u32 2147483647, %v2447_v3  ;;  %v19564_v33 = vand.u32 2147483647, %v2448_v5 }
 0x4c1   : > { %v19566_v29 = vand.u32 2147483647, %v2449_v61  ;;  %v19568_v16 = vand.u32 2147483647, %v2450_v7  ;;  %v19570_v46 = vand.u32 2147483647, %v2451_v11 }
 0x4c2   : > { %v19572_v49 = vand.u32 2147483647, %v2452_v62  ;;  %v19574_v13 = vand.u32 2147483647, %v2453_v32  ;;  %v19576_v50 = vand.u32 2147483647, %v2454_v48 }
 0x4c3   : > { %v2506_v21 = vmul.f32 0.3275911, %v19552_v38  ;;  %v19580_v57 = vand.u32 2147483647, %v19495_v47  ;;  %v19583_v3 = vand.u32 2147483647, %v19497_v39 }
 0x4c4   : > { %v2507_v5 = vmul.f32 0.3275911, %v19554_v2  ;;  %v19587_v61 = vand.u32 2147483647, %v19499_v53  ;;  %v2508_v7 = vmul.f32 0.3275911, %v19556_v28 }
 0x4c5   : > { %v2509_v32 = vmul.f32 0.3275911, %v19558_v59  ;;  %v2510_v11 = vmul.f32 0.3275911, %v19560_v18  ;;  %v2511_v62 = vmul.f32 0.3275911, %v19562_v52 }
 0x4c6   : > { %v2512_v12 = vmul.f32 0.3275911, %v19564_v33  ;;  %v23367_v14 = vmov -1.0   ;;  %v2513_v60 = vmul.f32 0.3275911, %v19566_v29  ;;  %v2522_v43 = vadd.f32 1.0, %v2506_v21 }
 0x4c7   : > { %v19596_v4 = vsel %vm2470_vm15, 1.0, %v23367_v14  ;;  %v2514_v10 = vmul.f32 0.3275911, %v19568_v16  ;;  %v19603_v42 = vsel %vm2471_vm4, 1.0, %v23367_v14  ;;  %v2515_v20 = vmul.f32 0.3275911, %v19570_v46 }
 0x4c8   : > { %23368 = vst [vmem:[#allocation64_spill] sm:$0xff] %v19596_v4  ;;  %23369 = vst [vmem:[#allocation65_spill] sm:$0xff] %v19603_v42  ;;  %v2516_v45 = vmul.f32 0.3275911, %v19572_v49  ;;  %v2523_v24 = vadd.f32 1.0, %v2507_v5  ;;  %v19610_v48 = vsel %vm2472_vm0, 1.0, %v23367_v14  ;;  %17992 = vrcp.f32 %v2522_v43 }
 0x4c9   : > { %23370 = vst [vmem:[#allocation66_spill] sm:$0xff] %v19610_v48  ;;  %v2517_v25 = vmul.f32 0.3275911, %v19574_v13  ;;  %v2518_v19 = vmul.f32 0.3275911, %v19576_v50  ;;  %v2524_v21 = vadd.f32 1.0, %v2508_v7 }
 0x4ca   : > { %v19617_v47 = vsel %vm2473_vm5, 1.0, %v23367_v14  ;;  %v2519_v30 = vmul.f32 0.3275911, %v19580_v57  ;;  %v2520_v54 = vmul.f32 0.3275911, %v19583_v3  ;;  %v2525_v5 = vadd.f32 1.0, %v2509_v32 }
 0x4cb   : > { %23371 = vst [vmem:[#allocation67_spill] sm:$0xff] %v19617_v47  ;;  %v2521_v63 = vmul.f32 0.3275911, %v19587_v61  ;;  %v2526_v39 = vadd.f32 1.0, %v2510_v11  ;;  %v2527_v22 = vadd.f32 1.0, %v2511_v62  ;;  %v2528_v26 = vadd.f32 1.0, %v2512_v12 }
 0x4cc   : > { %v2529_v44 = vadd.f32 1.0, %v2513_v60  ;;  %v2530_v40 = vadd.f32 1.0, %v2514_v10  ;;  %17994 = vrcp.f32 %v2523_v24  ;;  %v2531_v7 = vadd.f32 1.0, %v2515_v20 }
 0x4cd   : > { %v2532_v36 = vadd.f32 1.0, %v2516_v45  ;;  %v2533_v55 = vadd.f32 1.0, %v2517_v25  ;;  %17996 = vrcp.f32 %v2524_v21  ;;  %v2534_v53 = vadd.f32 1.0, %v2518_v19 }
 0x4ce   : > { %v2535_v14 = vadd.f32 1.0, %v2519_v30  ;;  %v2536_v47 = vadd.f32 1.0, %v2520_v54  ;;  %17998 = vrcp.f32 %v2525_v5  ;;  %v2537_v48 = vadd.f32 1.0, %v2521_v63 }
 0x4cf   : > { %18000 = vrcp.f32 %v2526_v39  ;;  %v2698_v32 = vsub.f32 0.0, %v19552_v38  ;;  %v2699_v11 = vsub.f32 0.0, %v19554_v2  ;;  %v2700_v43 = vsub.f32 0.0, %v19556_v28 }
 0x4d0   : > { %18002 = vrcp.f32 %v2527_v22  ;;  %v2701_v10 = vsub.f32 0.0, %v19558_v59  ;;  %v2702_v24 = vsub.f32 0.0, %v19560_v18  ;;  %v2703_v20 = vsub.f32 0.0, %v19562_v52 }
 0x4d1   : > { %18004 = vrcp.f32 %v2528_v26  ;;  %v2704_v45 = vsub.f32 0.0, %v19564_v33  ;;  %v2705_v60 = vsub.f32 0.0, %v19566_v29  ;;  %v2706_v12 = vsub.f32 0.0, %v19568_v16 }
 0x4d2   : > { %18006 = vrcp.f32 %v2529_v44  ;;  %v2707_v63 = vsub.f32 0.0, %v19570_v46  ;;  %v2708_v22 = vsub.f32 0.0, %v19572_v49  ;;  %v2709_v54 = vsub.f32 0.0, %v19574_v13  ;;  %v19639_v62 = vpop.eup %17992 }
 0x4d3   : > { %18008 = vrcp.f32 %v2530_v40  ;;  %v2710_v30 = vsub.f32 0.0, %v19576_v50  ;;  %v2711_v26 = vsub.f32 0.0, %v19580_v57  ;;  %v2714_v44 = vmul.f32 %v2698_v32, %v19552_v38 }
 0x4d4   : > { %18010 = vrcp.f32 %v2531_v7  ;;  %v2715_v21 = vmul.f32 %v2699_v11, %v19554_v2  ;;  %v2716_v40 = vmul.f32 %v2700_v43, %v19556_v28  ;;  %v2717_v5 = vmul.f32 %v2701_v10, %v19558_v59 }
 0x4d5   : > { %18012 = vrcp.f32 %v2532_v36  ;;  %v2554_v7 = vmul.f32 1.0614054, %v19639_v62  ;;  %v2718_v19 = vmul.f32 %v2702_v24, %v19560_v18  ;;  %v2719_v25 = vmul.f32 %v2703_v20, %v19562_v52 }
 0x4d6   : > { %v19644_v39 = vpop.eup %17994  ;;  %18014 = vrcp.f32 %v2533_v55  ;;  %v2720_v38 = vmul.f32 %v2704_v45, %v19564_v33  ;;  %v19654_v2 = vmul.f32 %v2705_v60, %v19566_v29  ;;  %v19660_v18 = vmul.f32 %v2706_v12, %v19568_v16 }
 0x4d7   : > { %v19649_v9 = vpop.eup %17996  ;;  %18016 = vrcp.f32 %v2534_v53  ;;  %v2555_v36 = vmul.f32 1.0614054, %v19644_v39  ;;  %v2570_v59 = vadd.f32 -1.4531521, %v2554_v7  ;;  %v19665_v32 = vmul.f32 %v2707_v63, %v19570_v46 }
 0x4d8   : > { %v19656_v28 = vpop.eup %17998  ;;  %18018 = vrcp.f32 %v2535_v14  ;;  %v2556_v55 = vmul.f32 1.0614054, %v19649_v9  ;;  %v19668_v33 = vmul.f32 %v2708_v22, %v19572_v49  ;;  %v2730_v11 = vmul.f32 1.442695, %v2714_v44 }
 0x4d9   : > { %v19662_v52 = vpop.eup %18000  ;;  %18020 = vrcp.f32 %v2536_v47  ;;  %v2571_v53 = vadd.f32 -1.4531521, %v2555_v36  ;;  %v2557_v14 = vmul.f32 1.0614054, %v19656_v28  ;;  %v19673_v43 = vmul.f32 1.442695, %v2715_v21 }
 0x4da   : > { %v19670_v29 = vpop.eup %18002  ;;  %18022 = vrcp.f32 %v2537_v48  ;;  %v2558_v10 = vmul.f32 1.0614054, %v19662_v52  ;;  %v2586_v47 = vmul.f32 %v19639_v62, %v2570_v59  ;;  %v19679_v24 = vmul.f32 1.442695, %v2716_v40 }
 0x4db   : > { %v19675_v16 = vpop.eup %18004  ;;  %v19681_v46 = vmul.f32 1.442695, %v2717_v5  ;;  %v2559_v20 = vmul.f32 1.0614054, %v19670_v29  ;;  %v2572_v48 = vadd.f32 -1.4531521, %v2556_v55  ;;  %v2587_v45 = vmul.f32 %v19644_v39, %v2571_v53 }
 0x4dc   : > { %v19683_v49 = vpop.eup %18006  ;;  %v19687_v60 = vmul.f32 1.442695, %v2718_v19  ;;  %v2560_v63 = vmul.f32 1.0614054, %v19675_v16  ;;  %v19694_v44 = vmul.f32 %v2709_v54, %v19574_v13  ;;  %v19696_v21 = vmul.f32 1.442695, %v2719_v25 }
 0x4dd   : > { %v19689_v12 = vpop.eup %18008  ;;  %v2561_v22 = vmul.f32 1.0614054, %v19683_v49  ;;  %v2573_v7 = vadd.f32 -1.4531521, %v2557_v14  ;;  %v19702_v36 = vmul.f32 %v2710_v30, %v19576_v50  ;;  %v19704_v19 = vmul.f32 1.442695, %v2720_v38 }
 0x4de   : > { %v19698_v40 = vpop.eup %18010  ;;  %v2562_v5 = vmul.f32 1.0614054, %v19689_v12  ;;  %v2574_v53 = vadd.f32 -1.4531521, %v2558_v10  ;;  %v2602_v42 = vadd.f32 1.4214138, %v2586_v47  ;;  %v19710_v13 = vmul.f32 %v2711_v26, %v19580_v57 }
 0x4df   : > { %v19706_v55 = vpop.eup %18012  ;;  %v2563_v59 = vmul.f32 1.0614054, %v19698_v40  ;;  %v2575_v15 = vadd.f32 -1.4531521, %v2559_v20  ;;  %v2588_v14 = vmul.f32 %v19649_v9, %v2572_v48  ;;  %v2603_v50 = vadd.f32 1.4214138, %v2587_v45 }
 0x4e0   : > { %v19712_v54 = vpop.eup %18014  ;;  %v2564_v25 = vmul.f32 1.0614054, %v19706_v55  ;;  %v2576_v4 = vadd.f32 -1.4531521, %v2560_v63  ;;  %v2577_v1 = vadd.f32 -1.4531521, %v2561_v22  ;;  %18024 = vpow2.f32 %v2730_v11 }
 0x4e1   : > { %v19716_v30 = vpop.eup %18016  ;;  %v2565_v38 = vmul.f32 1.0614054, %v19712_v54  ;;  %v23372_v10 = vsub.f32 0.0, %v19583_v3  ;;  %v2578_v37 = vadd.f32 -1.4531521, %v2562_v5  ;;  %v2589_v63 = vmul.f32 %v19656_v28, %v2573_v7 }
 0x4e2   : > { %v19724_v57 = vpop.eup %18018  ;;  %v2566_v26 = vmul.f32 1.0614054, %v19716_v30  ;;  %v2579_v20 = vadd.f32 -1.4531521, %v2563_v59  ;;  %v2580_v31 = vadd.f32 -1.4531521, %v2564_v25  ;;  %v2590_v8 = vmul.f32 %v19662_v52, %v2574_v53 }
 0x4e3   : > { %v19722_v47 = vmul.f32 %v23372_v10, %v19583_v3  ;;  %v19727_v48 = vpop.eup %18020  ;;  %v2567_v45 = vmul.f32 1.0614054, %v19724_v57  ;;  %v2581_v56 = vadd.f32 -1.4531521, %v2565_v38  ;;  %v2604_v23 = vadd.f32 1.4214138, %v2588_v14 }
 0x4e4   : > { %v19731_v22 = vpop.eup %18022  ;;  %v2568_v3 = vmul.f32 1.0614054, %v19727_v48  ;;  %v2582_v10 = vadd.f32 -1.4531521, %v2566_v26  ;;  %v2591_v11 = vmul.f32 %v19670_v29, %v2575_v15  ;;  %v2592_v17 = vmul.f32 %v19675_v16, %v2576_v4 }
 0x4e5   : > { %23373 = vst [vmem:[#allocation68_spill] sm:$0xff] %v19722_v47  ;;  %v2569_v5 = vmul.f32 1.0614054, %v19731_v22  ;;  %v2583_v59 = vadd.f32 -1.4531521, %v2567_v45  ;;  %v2593_v25 = vmul.f32 %v19683_v49, %v2577_v1  ;;  %v2594_v7 = vmul.f32 %v19689_v12, %v2578_v37 }
 0x4e6   : > { %v2584_v41 = vadd.f32 -1.4531521, %v2568_v3  ;;  %v2595_v38 = vmul.f32 %v19698_v40, %v2579_v20  ;;  %v2596_v26 = vmul.f32 %v19706_v55, %v2580_v31  ;;  %v2597_v53 = vmul.f32 %v19712_v54, %v2581_v56 }
 0x4e7   : > { %v2585_v58 = vadd.f32 -1.4531521, %v2569_v5  ;;  %v2598_v14 = vmul.f32 %v19716_v30, %v2582_v10  ;;  %v2599_v45 = vmul.f32 %v19724_v57, %v2583_v59  ;;  %v2605_v34 = vadd.f32 1.4214138, %v2589_v63 }
 0x4e8   : > { %v2600_v15 = vmul.f32 %v19727_v48, %v2584_v41  ;;  %v2606_v4 = vadd.f32 1.4214138, %v2590_v8  ;;  %v2607_v1 = vadd.f32 1.4214138, %v2591_v11  ;;  %v2608_v0 = vadd.f32 1.4214138, %v2592_v17 }
 0x4e9   : > { %v2601_v3 = vmul.f32 %v19731_v22, %v2585_v58  ;;  %v2618_v37 = vmul.f32 %v19639_v62, %v2602_v42  ;;  %v2609_v20 = vadd.f32 1.4214138, %v2593_v25  ;;  %v2610_v5 = vadd.f32 1.4214138, %v2594_v7 }
 0x4ea   : > { %v2611_v35 = vadd.f32 1.4214138, %v2595_v38  ;;  %v2619_v31 = vmul.f32 %v19644_v39, %v2603_v50  ;;  %v2612_v56 = vadd.f32 1.4214138, %v2596_v26  ;;  %v2613_v27 = vadd.f32 1.4214138, %v2597_v53  ;;  %v19750_v51 = vpop.eup %18024 }
 0x4eb   : > { %v2614_v10 = vadd.f32 1.4214138, %v2598_v14  ;;  %v2620_v59 = vmul.f32 %v19649_v9, %v2604_v23  ;;  %v2615_v41 = vadd.f32 1.4214138, %v2599_v45  ;;  %v2616_v8 = vadd.f32 1.4214138, %v2600_v15 }
 0x4ec   : > { %v2617_v63 = vadd.f32 1.4214138, %v2601_v3  ;;  %v2621_v58 = vmul.f32 %v19656_v28, %v2605_v34  ;;  %v2622_v17 = vmul.f32 %v19662_v52, %v2606_v4  ;;  %v2623_v42 = vmul.f32 %v19670_v29, %v2607_v1 }
 0x4ed   : > { %v2624_v11 = vmul.f32 %v19675_v16, %v2608_v0  ;;  %v2634_v25 = vadd.f32 -0.28449672, %v2618_v37  ;;  %v2625_v50 = vmul.f32 %v19683_v49, %v2609_v20  ;;  %v2626_v7 = vmul.f32 %v19689_v12, %v2610_v5 }
 0x4ee   : > { %v2627_v23 = vmul.f32 %v19698_v40, %v2611_v35  ;;  %v2635_v38 = vadd.f32 -0.28449672, %v2619_v31  ;;  %v2628_v26 = vmul.f32 %v19706_v55, %v2612_v56  ;;  %v2629_v53 = vmul.f32 %v19712_v54, %v2613_v27 }
 0x4ef   : > { %v2630_v34 = vmul.f32 %v19716_v30, %v2614_v10  ;;  %v2636_v14 = vadd.f32 -0.28449672, %v2620_v59  ;;  %v2631_v45 = vmul.f32 %v19724_v57, %v2615_v41  ;;  %v2632_v15 = vmul.f32 %v19727_v48, %v2616_v8 }
 0x4f0   : > { %v2633_v0 = vmul.f32 %v19731_v22, %v2617_v63  ;;  %v2637_v4 = vadd.f32 -0.28449672, %v2621_v58  ;;  %v2638_v3 = vadd.f32 -0.28449672, %v2622_v17  ;;  %v2639_v1 = vadd.f32 -0.28449672, %v2623_v42 }
 0x4f1   : > { %v2640_v37 = vadd.f32 -0.28449672, %v2624_v11  ;;  %v2650_v35 = vmul.f32 %v19639_v62, %v2634_v25  ;;  %v2641_v20 = vadd.f32 -0.28449672, %v2625_v50  ;;  %v2642_v5 = vadd.f32 -0.28449672, %v2626_v7 }
 0x4f2   : > { %v2643_v31 = vadd.f32 -0.28449672, %v2627_v23  ;;  %v2651_v27 = vmul.f32 %v19644_v39, %v2635_v38  ;;  %v2644_v56 = vadd.f32 -0.28449672, %v2628_v26  ;;  %v2645_v10 = vadd.f32 -0.28449672, %v2629_v53 }
 0x4f3   : > { %v2646_v59 = vadd.f32 -0.28449672, %v2630_v34  ;;  %v2652_v41 = vmul.f32 %v19649_v9, %v2636_v14  ;;  %v2647_v6 = vadd.f32 -0.28449672, %v2631_v45  ;;  %v2648_v8 = vadd.f32 -0.28449672, %v2632_v15 }
 0x4f4   : > { %v2649_v47 = vadd.f32 -0.28449672, %v2633_v0  ;;  %v2653_v63 = vmul.f32 %v19656_v28, %v2637_v4  ;;  %v2654_v58 = vmul.f32 %v19662_v52, %v2638_v3  ;;  %v2655_v17 = vmul.f32 %v19670_v29, %v2639_v1 }
 0x4f5   : > { %v2656_v42 = vmul.f32 %v19675_v16, %v2640_v37  ;;  %18026 = vpow2.f32 %v19673_v43  ;;  %v2657_v11 = vmul.f32 %v19683_v49, %v2641_v20  ;;  %v2658_v25 = vmul.f32 %v19689_v12, %v2642_v5 }
 0x4f6   : > { %v2659_v50 = vmul.f32 %v19698_v40, %v2643_v31  ;;  %18028 = vpow2.f32 %v19679_v24  ;;  %v2660_v7 = vmul.f32 %v19706_v55, %v2644_v56  ;;  %v2661_v23 = vmul.f32 %v19712_v54, %v2645_v10 }
 0x4f7   : > { %v2662_v38 = vmul.f32 %v19716_v30, %v2646_v59  ;;  %v2666_v26 = vadd.f32 0.2548296, %v2650_v35  ;;  %v2663_v53 = vmul.f32 %v19724_v57, %v2647_v6  ;;  %v2664_v34 = vmul.f32 %v19727_v48, %v2648_v8 }
 0x4f8   : > { %v2667_v43 = vadd.f32 0.2548296, %v2651_v27  ;;  %v2668_v14 = vadd.f32 0.2548296, %v2652_v41  ;;  %v2665_v45 = vmul.f32 %v19731_v22, %v2649_v47  ;;  %v2669_v15 = vadd.f32 0.2548296, %v2653_v63 }
 0x4f9   : > { %v2670_v0 = vadd.f32 0.2548296, %v2654_v58  ;;  %v2671_v4 = vadd.f32 0.2548296, %v2655_v17  ;;  %v2672_v3 = vadd.f32 0.2548296, %v2656_v42  ;;  %v2682_v6 = vmul.f32 %v19639_v62, %v2666_v26 }
 0x4fa   : > { %v2673_v24 = vadd.f32 0.2548296, %v2657_v11  ;;  %v2674_v1 = vadd.f32 0.2548296, %v2658_v25  ;;  %v23374_v37 = vsub.f32 0.0, %v19587_v61  ;;  %v2683_v47 = vmul.f32 %v19644_v39, %v2667_v43 }
 0x4fb   : > { %v2675_v5 = vadd.f32 0.2548296, %v2659_v50  ;;  %v2676_v35 = vadd.f32 0.2548296, %v2660_v7  ;;  %v2677_v31 = vadd.f32 0.2548296, %v2661_v23  ;;  %v2684_v41 = vmul.f32 %v19649_v9, %v2668_v14 }
 0x4fc   : > { %v2729_v20 = vmul.f32 %v23374_v37, %v19587_v61  ;;  %v2678_v56 = vadd.f32 0.2548296, %v2662_v38  ;;  %v19787_v27 = vadd.f32 0.2548296, %v2663_v53  ;;  %v19789_v10 = vadd.f32 0.2548296, %v2664_v34 }
 0x4fd   : > { %v19792_v59 = vadd.f32 0.2548296, %v2665_v45  ;;  %18030 = vpow2.f32 %v19681_v46  ;;  %v2744_v61 = vmul.f32 1.442695, %v19654_v2  ;;  %v2685_v8 = vmul.f32 %v19656_v28, %v2669_v15  ;;  %v23379_v50 = vld [vmem:[#allocation34_spill] sm:$0xff]  ;;  %v23380_v23 = vld [vmem:[#allocation33_spill] sm:$0xff] }
 0x4fe   : > { %v2686_v63 = vmul.f32 %v19662_v52, %v2670_v0  ;;  %18032 = vpow2.f32 %v19687_v60  ;;  %v2746_v62 = vmul.f32 1.442695, %v19660_v18  ;;  %v2687_v17 = vmul.f32 %v19670_v29, %v2671_v4  ;;  %v23382_v37 = vld [vmem:[#allocation49_spill] sm:$0xff] }
 0x4ff   : > { %v18027_v58 = vpop.eup %18026  ;;  %v2688_v39 = vmul.f32 %v19675_v16, %v2672_v3  ;;  %18034 = vpow2.f32 %v19696_v21  ;;  %v2748_v9 = vmul.f32 1.442695, %v19665_v32  ;;  %v19806_v2 = vmul.f32 %v19683_v49, %v2673_v24  ;;  %v23381_v3 = vld [vmem:[#allocation18_spill] sm:$0xff] }
 0x500   : > { %v18029_v46 = vpop.eup %18028  ;;  %18036 = vpow2.f32 %v19704_v19  ;;  %v2750_v28 = vmul.f32 1.442695, %v19668_v33  ;;  %v2762_v52 = vmul.f32 %v19750_v51, %v2682_v6  ;;  %v2752_v18 = vmul.f32 1.442695, %v19694_v44  ;;  %v23377_v33 = vld [vmem:[#allocation68_spill] sm:$0xff] }
 0x501   : > { %18038 = vpow2.f32 %v2744_v61  ;;  %v2763_v29 = vmul.f32 %v18027_v58, %v2683_v47  ;;  %v2764_v60 = vmul.f32 %v18029_v46, %v2684_v41  ;;  %v2754_v16 = vmul.f32 1.442695, %v19702_v36  ;;  %v23378_v36 = vld [vmem:[#allocation31_spill] sm:$0xff] }
 0x502   : > { %18040 = vpow2.f32 %v2746_v62  ;;  %v2778_v21 = vsub.f32 1.0, %v2762_v52  ;;  %v23375_v32 = vlaneseq  ;;  %v2756_v49 = vmul.f32 1.442695, %v19710_v13  ;;  %v23384_v46 = vld [vmem:[#allocation35_spill] sm:$0xff]  ;;  %v23385_v52 = vld [vmem:[#allocation56_spill] sm:$0xff] }
 0x503   : > { %18042 = vpow2.f32 %v2748_v9  ;;  %v2779_v42 = vsub.f32 1.0, %v2763_v29  ;;  %v2780_v19 = vsub.f32 1.0, %v2764_v60  ;;  %v23376_v11 = vmov 0.0   ;;  %v23386_v29 = vld [vmem:[#allocation57_spill] sm:$0xff] }
 0x504   : > { %vm535_vm1 = vcmp.lt.s32.totalorder %v23375_v32, 512  ;;  %v2690_v51 = vmul.f32 %v19689_v12, %v2674_v1  ;;  %18044 = vpow2.f32 %v2750_v28  ;;  %v2758_v44 = vmul.f32 1.442695, %v23377_v33  ;;  %v23388_v33 = vld [vmem:[#allocation59_spill] sm:$0xff] }
 0x505   : > { %537 = vst.msk [vmem:[#allocation3] ss:$8 sm:$0xf] %vm535_vm1, %v23376_v11  ;;  %540 = vst.msk [vmem:[#allocation3 + $0x40] ss:$8 sm:$0xf] %vm535_vm1, %v23376_v11  ;;  %v2794_v13 = vmul.f32 %v2778_v21, %v23378_v36  ;;  %18046 = vpow2.f32 %v2752_v18  ;;  %v2795_v7 = vmul.f32 %v2779_v42, %v23379_v50  ;;  %v2796_v38 = vmul.f32 %v2780_v19, %v23380_v23 }
 0x506   : > { %543 = vst.msk [vmem:[#allocation3 + $0x80] ss:$8 sm:$0xf] %vm535_vm1, %v23376_v11  ;;  %546 = vst.msk [vmem:[#allocation3 + $0xc0] ss:$8 sm:$0xf] %vm535_vm1, %v23376_v11  ;;  %v2691_v26 = vmul.f32 %v19698_v40, %v2675_v5  ;;  %v2692_v53 = vmul.f32 %v19706_v55, %v2676_v35  ;;  %18048 = vpow2.f32 %v2754_v16  ;;  %v2693_v12 = vmul.f32 %v19712_v54, %v2677_v31 }
 0x507   : > { %549 = vst.msk [vmem:[#allocation3 + $0x21] ss:$8 sm:$0xf] %vm535_vm1, %v23376_v11  ;;  %552 = vst.msk [vmem:[#allocation3 + $0x61] ss:$8 sm:$0xf] %vm535_vm1, %v23376_v11  ;;  %v18031_v43 = vpop.eup %18030  ;;  %18050 = vpow2.f32 %v2756_v49  ;;  %v2694_v0 = vmul.f32 %v19716_v30, %v2678_v56  ;;  %v2695_v54 = vmul.f32 %v19724_v57, %v19787_v27  ;;  %v2697_v27 = vmul.f32 %v19731_v22, %v19792_v59 }
 0x508   : > { %555 = vst.msk [vmem:[#allocation3 + $0xa1] ss:$8 sm:$0xf] %vm535_vm1, %v23376_v11  ;;  %558 = vst.msk [vmem:[#allocation3 + $0xe1] ss:$8 sm:$0xf] %vm535_vm1, %v23376_v11  ;;  %v18033_v15 = vpop.eup %18032  ;;  %18052 = vpow2.f32 %v2758_v44  ;;  %v2765_v4 = vmul.f32 %v18031_v43, %v2685_v8 }
 0x509   : > { %v2760_v25 = vmul.f32 1.442695, %v2729_v20  ;;  %v2810_v34 = vadd.f32 1.0, %v2794_v13  ;;  %v2811_v14 = vadd.f32 1.0, %v2795_v7  ;;  %v2812_v45 = vadd.f32 1.0, %v2796_v38  ;;  %v18035_v1 = vpop.eup %18034  ;;  %v23383_v20 = vld [vmem:[#allocation17_spill] sm:$0xff] }
 0x50a   : > { %v2766_v40 = vmul.f32 %v18033_v15, %v2686_v63  ;;  %v18037_v35 = vpop.eup %18036  ;;  %v2767_v31 = vmul.f32 %v18035_v1, %v2687_v17  ;;  %v2781_v6 = vsub.f32 1.0, %v2765_v4  ;;  %v2696_v63 = vmul.f32 %v19727_v48, %v19789_v10  ;;  %v23387_v42 = vld [vmem:[#allocation58_spill] sm:$0xff]  ;;  %v23389_v7 = vld [vmem:[#allocation60_spill] sm:$0xff] }
 0x50b   : > { %v2826_v24 = vmul.f32 %v2810_v34, %v23381_v3  ;;  %18054 = vpow2.f32 %v2760_v25  ;;  %v2827_v55 = vmul.f32 %v2811_v14, %v23382_v37  ;;  %v2828_v5 = vmul.f32 %v2812_v45, %v23383_v20  ;;  %v18039_v41 = vpop.eup %18038 }
 0x50c   : > { %v2768_v30 = vmul.f32 %v18037_v35, %v2688_v39  ;;  %v2782_v56 = vsub.f32 1.0, %v2766_v40  ;;  %v18041_v62 = vpop.eup %18040  ;;  %v2769_v58 = vmul.f32 %v18039_v41, %v19806_v2  ;;  %v2783_v9 = vsub.f32 1.0, %v2767_v31  ;;  %v23393_v35 = vld [vmem:[#allocation64_spill] sm:$0xff] }
 0x50d   : > { %v2858_v47 = vrot.slane %v2826_v24, 7  ;;  %v2859_v61 = vrot.slane %v2827_v55, 7  ;;  %v2860_v8 = vrot.slane %v2828_v5, 7  ;;  %v2797_v28 = vmul.f32 %v2781_v6, %v23384_v46  ;;  %v18043_v57 = vpop.eup %18042  ;;  %v23392_v55 = vld [vmem:[#allocation63_spill] sm:$0xff]  ;;  %v23398_v46 = vld [vmem:[#allocation22_spill] sm:$0xff] }
 0x50e   : > { %v2770_v17 = vmul.f32 %v18041_v62, %v2690_v51  ;;  %v2784_v39 = vsub.f32 1.0, %v2768_v30  ;;  %v2798_v18 = vmul.f32 %v2782_v56, %v23385_v52  ;;  %v18045_v48 = vpop.eup %18044  ;;  %v2771_v10 = vmul.f32 %v18043_v57, %v2691_v26  ;;  %v23395_v30 = vld [vmem:[#allocation65_spill] sm:$0xff] }
 0x50f   : > { %2890 = vst [vmem:[#allocation3] sm:$0xfe] %v2858_v47  ;;  %2894 = vst [vmem:[#allocation3 + $0x20] sm:$0x1] %v2858_v47  ;;  %v2785_v2 = vsub.f32 1.0, %v2769_v58  ;;  %v2799_v60 = vmul.f32 %v2783_v9, %v23386_v29  ;;  %v2813_v16 = vadd.f32 1.0, %v2797_v28  ;;  %v18047_v21 = vpop.eup %18046  ;;  %v2772_v32 = vmul.f32 %v18045_v48, %v2692_v53 }
 0x510   : > { %2891 = vst [vmem:[#allocation3 + $0x8] sm:$0xfe] %v2859_v61  ;;  %2892 = vst [vmem:[#allocation3 + $0x10] sm:$0xfe] %v2860_v8  ;;  %v2786_v49 = vsub.f32 1.0, %v2770_v17  ;;  %v2800_v19 = vmul.f32 %v2784_v39, %v23387_v42  ;;  %v2814_v22 = vadd.f32 1.0, %v2798_v18  ;;  %v18049_v59 = vpop.eup %18048  ;;  %v2773_v11 = vmul.f32 %v18047_v21, %v2693_v12 }
 0x511   : > { %2895 = vst [vmem:[#allocation3 + $0x28] sm:$0x1] %v2859_v61  ;;  %2896 = vst [vmem:[#allocation3 + $0x30] sm:$0x1] %v2860_v8  ;;  %v2787_v51 = vsub.f32 1.0, %v2771_v10  ;;  %v2801_v44 = vmul.f32 %v2785_v2, %v23388_v33  ;;  %v2815_v36 = vadd.f32 1.0, %v2799_v60  ;;  %v18051_v13 = vpop.eup %18050  ;;  %v2774_v25 = vmul.f32 %v18049_v59, %v2694_v0 }
 0x512   : > { %v2788_v50 = vsub.f32 1.0, %v2772_v32  ;;  %v2802_v23 = vmul.f32 %v2786_v49, %v23389_v7  ;;  %v2816_v38 = vadd.f32 1.0, %v2800_v19  ;;  %v18053_v26 = vpop.eup %18052  ;;  %v2775_v34 = vmul.f32 %v18051_v13, %v2695_v54  ;;  %v23390_v53 = vld [vmem:[#allocation61_spill] sm:$0xff]  ;;  %v23391_v12 = vld [vmem:[#allocation62_spill] sm:$0xff]  ;;  %v23394_v54 = vld [vmem:[#allocation20_spill] sm:$0xff] }
 0x513   : > { %v2789_v43 = vsub.f32 1.0, %v2773_v11  ;;  %v2803_v14 = vmul.f32 %v2787_v51, %v23390_v53  ;;  %v2817_v45 = vadd.f32 1.0, %v2801_v44  ;;  %v2776_v4 = vmul.f32 %v18053_v26, %v2696_v63  ;;  %v23396_v8 = vld [vmem:[#allocation19_spill] sm:$0xff]  ;;  %v23397_v63 = vld [vmem:[#allocation66_spill] sm:$0xff]  ;;  %v23399_v57 = vld [vmem:[#allocation21_spill] sm:$0xff] }
 0x514   : > { %v2790_v3 = vsub.f32 1.0, %v2774_v25  ;;  %v2804_v24 = vmul.f32 %v2788_v50, %v23391_v12  ;;  %v2818_v1 = vadd.f32 1.0, %v2802_v23  ;;  %v2791_v37 = vsub.f32 1.0, %v2775_v34  ;;  %v23400_v17 = vld [vmem:[#allocation67_spill] sm:$0xff]  ;;  %v23401_v18 = vld [vmem:[#allocation24_spill] sm:$0xff]  ;;  %v23403_v60 = vld [vmem:[#allocation26_spill] sm:$0xff] }
 0x515   : > { %v18055_v15 = vpop.eup %18054  ;;  %v2805_v0 = vmul.f32 %v2789_v43, %v23392_v55  ;;  %v2819_v20 = vadd.f32 1.0, %v2803_v14  ;;  %v2792_v5 = vsub.f32 1.0, %v2776_v4  ;;  %v2829_v47 = vmul.f32 %v2813_v16, %v23394_v54  ;;  %v23402_v10 = vld [vmem:[#allocation23_spill] sm:$0xff]  ;;  %v23404_v21 = vld [vmem:[#allocation25_spill] sm:$0xff]  ;;  %v23405_v49 = vld [vmem:[#allocation28_spill] sm:$0xff] }
 0x516   : > { %v2777_v40 = vmul.f32 %v18055_v15, %v2697_v27  ;;  %v2806_v31 = vmul.f32 %v2790_v3, %v23393_v35  ;;  %v2820_v6 = vadd.f32 1.0, %v2804_v24  ;;  %v2807_v56 = vmul.f32 %v2791_v37, %v23395_v30  ;;  %v23407_v11 = vld [vmem:[#allocation30_spill] sm:$0xff]  ;;  %v23408_v44 = vld [vmem:[#allocation29_spill] sm:$0xff]  ;;  %v23409_v7 = vld [vmem:[#allocation32_spill] sm:$0xff] }
 0x517   : > { %v2821_v61 = vadd.f32 1.0, %v2805_v0  ;;  %v2830_v62 = vmul.f32 %v2814_v22, %v23396_v8  ;;  %v2808_v58 = vmul.f32 %v2792_v5, %v23397_v63  ;;  %v2831_v28 = vmul.f32 %v2815_v36, %v23398_v46  ;;  %v23406_v22 = vld [vmem:[#allocation27_spill] sm:$0xff] }
 0x518   : > { %v2793_v41 = vsub.f32 1.0, %v2777_v40  ;;  %v2822_v9 = vadd.f32 1.0, %v2806_v31  ;;  %v2832_v27 = vmul.f32 %v2816_v38, %v23399_v57  ;;  %v2823_v52 = vadd.f32 1.0, %v2807_v56  ;;  %v3075_v3 = vld [vmem:[#allocation3 + $0x8] sm:$0xfe] }
 0x519   : > { %v2833_v48 = vmul.f32 %v2817_v45, %v23401_v18  ;;  %v2834_v2 = vmul.f32 %v2818_v1, %v23402_v10  ;;  %v2824_v29 = vadd.f32 1.0, %v2808_v58  ;;  %v2835_v16 = vmul.f32 %v2819_v20, %v23403_v60  ;;  %v3079_v12 = vld [vmem:[#allocation3 + $0x28] sm:$0x1]  ;;  %v3074_v24 = vld [vmem:[#allocation3] sm:$0xfe] }
 0x51a   : > { %v2809_v39 = vmul.f32 %v2793_v41, %v23400_v17  ;;  %v2836_v32 = vmul.f32 %v2820_v6, %v23404_v21  ;;  %v2837_v42 = vmul.f32 %v2821_v61, %v23405_v49  ;;  %v2838_v59 = vmul.f32 %v2822_v9, %v23406_v22  ;;  %v3078_v1 = vld [vmem:[#allocation3 + $0x20] sm:$0x1]  ;;  %v16677_v56 = vld [vmem:[%s23113_s6 + $0x608] ss:$16 sps:$4 sm:$0xff]   ;;  %v16682_v10 = vld [vmem:[%s23113_s6 + $0x624] ss:$16 sps:$4 sm:$0xff]  }
 0x51b   : > { %v2839_v51 = vmul.f32 %v2823_v52, %v23407_v11  ;;  %v2861_v33 = vrot.slane %v2829_v47, 7  ;;  %v2840_v36 = vmul.f32 %v2824_v29, %v23408_v44  ;;  %v2862_v13 = vrot.slane %v2830_v62, 7  ;;  %v16674_v30 = vld [vmem:[%s23113_s6 + $0x600] ss:$16 sps:$4 sm:$0xff]  }
 0x51c   : > { %v2825_v19 = vadd.f32 1.0, %v2809_v39  ;;  %v2863_v25 = vrot.slane %v2831_v28, 7  ;;  %v2864_v50 = vrot.slane %v2832_v27, 7  ;;  %v2865_v38 = vrot.slane %v2833_v48, 7 }
 0x51d   : > { %v2866_v26 = vrot.slane %v2834_v2, 7  ;;  %v2867_v34 = vrot.slane %v2835_v16, 7  ;;  %2893 = vst [vmem:[#allocation3 + $0x18] sm:$0xfe] %v2861_v33  ;;  %2897 = vst [vmem:[#allocation3 + $0x38] sm:$0x1] %v2861_v33 }
 0x51e   : > { %v2841_v23 = vmul.f32 %v2825_v19, %v23409_v7  ;;  %v2868_v43 = vrot.slane %v2836_v32, 7  ;;  %v2869_v53 = vrot.slane %v2837_v42, 7  ;;  %v2870_v14 = vrot.slane %v2838_v59, 7  ;;  %2898 = vst [vmem:[#allocation3 + $0x40] sm:$0xfe] %v2862_v13 }
 0x51f   : > { %v2871_v45 = vrot.slane %v2839_v51, 7  ;;  %2899 = vst [vmem:[#allocation3 + $0x48] sm:$0xfe] %v2863_v25  ;;  %2900 = vst [vmem:[#allocation3 + $0x50] sm:$0xfe] %v2864_v50  ;;  %v2872_v15 = vrot.slane %v2840_v36, 7 }
 0x520   : > { %2902 = vst [vmem:[#allocation3 + $0x60] sm:$0x1] %v2862_v13  ;;  %2903 = vst [vmem:[#allocation3 + $0x68] sm:$0x1] %v2863_v25  ;;  %v2873_v4 = vrot.slane %v2841_v23, 7  ;;  %v3142_v40 = vrot.slane %v3075_v3, 1 }
 0x521   : > { %2904 = vst [vmem:[#allocation3 + $0x70] sm:$0x1] %v2864_v50  ;;  %2901 = vst [vmem:[#allocation3 + $0x58] sm:$0xfe] %v2865_v38  ;;  %v3143_v37 = vrot.slane %v3079_v12, 1  ;;  %vm3138_vm4 = vcmask 1046528  }
 0x522   : > { %2905 = vst [vmem:[#allocation3 + $0x78] sm:$0x1] %v2865_v38  ;;  %2906 = vst [vmem:[#allocation3 + $0x80] sm:$0xfe] %v2866_v26  ;;  %v3139_v55 = vrot.slane %v3074_v24, 1  ;;  %v3140_v0 = vrot.slane %v3078_v1, 1 }
 0x523   : > { %2907 = vst [vmem:[#allocation3 + $0x88] sm:$0xfe] %v2867_v34  ;;  %2910 = vst [vmem:[#allocation3 + $0xa0] sm:$0x1] %v2866_v26  ;;  %v3144_v31 = vsel %vm3138_vm4, %v3142_v40, %v3143_v37  ;;  %v16685_v2 = vld [vmem:[%s23113_s6 + $0x62c] ss:$16 sps:$4 sm:$0xff]  }
 0x524   : > { %2911 = vst [vmem:[#allocation3 + $0xa8] sm:$0x1] %v2867_v34  ;;  %2908 = vst [vmem:[#allocation3 + $0x90] sm:$0xfe] %v2868_v43  ;;  %v3141_v61 = vsel %vm3138_vm4, %v3139_v55, %v3140_v0  ;;  %v3077_v27 = vld [vmem:[#allocation3 + $0x18] sm:$0xfe] }
 0x525   : > { %2909 = vst [vmem:[#allocation3 + $0x98] sm:$0xfe] %v2869_v53  ;;  %2912 = vst [vmem:[#allocation3 + $0xb0] sm:$0x1] %v2868_v43  ;;  %v3082_v35 = vld [vmem:[#allocation3 + $0x40] sm:$0xfe] }
 0x526   : > { %2913 = vst [vmem:[#allocation3 + $0xb8] sm:$0x1] %v2869_v53  ;;  %2914 = vst [vmem:[#allocation3 + $0xc0] sm:$0xfe] %v2870_v14  ;;  %v3083_v20 = vld [vmem:[#allocation3 + $0x48] sm:$0xfe] }
 0x527   : > { %2915 = vst [vmem:[#allocation3 + $0xc8] sm:$0xfe] %v2871_v45  ;;  %2918 = vst [vmem:[#allocation3 + $0xe0] sm:$0x1] %v2870_v14  ;;  %v3087_v5 = vld [vmem:[#allocation3 + $0x68] sm:$0x1] }
 0x528   : > { %2919 = vst [vmem:[#allocation3 + $0xe8] sm:$0x1] %v2871_v45  ;;  %2916 = vst [vmem:[#allocation3 + $0xd0] sm:$0xfe] %v2872_v15  ;;  %v3154_v6 = vrot.slane %v3083_v20, 1  ;;  %v3155_v54 = vrot.slane %v3087_v5, 1 }
 0x529   : > { %2917 = vst [vmem:[#allocation3 + $0xd8] sm:$0xfe] %v2873_v4  ;;  %2920 = vst [vmem:[#allocation3 + $0xf0] sm:$0x1] %v2872_v15  ;;  %v3086_v47 = vld [vmem:[#allocation3 + $0x60] sm:$0x1] }
 0x52a   : > { %2921 = vst [vmem:[#allocation3 + $0xf8] sm:$0x1] %v2873_v4  ;;  %v3151_v41 = vrot.slane %v3082_v35, 1  ;;  %v3152_v8 = vrot.slane %v3086_v47, 1  ;;  %v3091_v62 = vld [vmem:[#allocation3 + $0x88] sm:$0xfe]  ;;  %v3156_v58 = vsel %vm3138_vm4, %v3154_v6, %v3155_v54 }
 0x52b   : > { %v3095_v63 = vld [vmem:[#allocation3 + $0xa8] sm:$0x1]  ;;  %v3166_v28 = vrot.slane %v3091_v62, 1  ;;  %v3081_v17 = vld [vmem:[#allocation3 + $0x38] sm:$0x1]  ;;  %v3204_v39 = vpack.c.bf16 %v3156_v58, %v3144_v31  ;;  %v3148_v25 = vrot.slane %v3077_v27, 1 }
 0x52c   : > { %v3167_v57 = vrot.slane %v3095_v63, 1  ;;  %v3153_v52 = vsel %vm3138_vm4, %v3151_v41, %v3152_v8  ;;  %v3090_v29 = vld [vmem:[#allocation3 + $0x80] sm:$0xfe]  ;;  %v3094_v60 = vld [vmem:[#allocation3 + $0xa0] sm:$0x1]  ;;  %v3149_v50 = vrot.slane %v3081_v17, 1 }
 0x52d   : > { %v3203_v16 = vpack.c.bf16 %v3153_v52, %v3141_v61  ;;  %v3098_v32 = vld [vmem:[#allocation3 + $0xc0] sm:$0xfe]  ;;  %v3163_v42 = vrot.slane %v3090_v29, 1  ;;  %v3164_v19 = vrot.slane %v3094_v60, 1  ;;  %4012 = vmatprep.mubr.bf16.mxu0 %v3204_v39  ;;  %4118 = vmatprep.mubr.bf16.mxu1 %v3204_v39  ;;  %v3085_v51 = vld [vmem:[#allocation3 + $0x58] sm:$0xfe] }
 0x52e   : > { %v3099_v9 = vld [vmem:[#allocation3 + $0xc8] sm:$0xfe]  ;;  %v3168_v21 = vsel %vm3138_vm4, %v3166_v28, %v3167_v57  ;;  %v3102_v49 = vld [vmem:[#allocation3 + $0xe0] sm:$0x1]  ;;  %v3175_v59 = vrot.slane %v3098_v32, 1  ;;  %v3160_v7 = vrot.slane %v3085_v51, 1  ;;  %v3150_v45 = vsel %vm3138_vm4, %v3148_v25, %v3149_v50 }
 0x52f   : > { %v3103_v46 = vld [vmem:[#allocation3 + $0xe8] sm:$0x1]  ;;  %v3178_v18 = vrot.slane %v3099_v9, 1  ;;  %v3176_v11 = vrot.slane %v3102_v49, 1  ;;  %v3089_v33 = vld [vmem:[#allocation3 + $0x78] sm:$0x1]  ;;  %4013 = vmatmul.mubr.bf16.vlgmr.msra.gmra.mrb[16].mxu0 %v3203_v16  ;;  %4119 = vmatmul.mubr.bf16.vlgmr.msra.gmra.mrb[16].mxu1 %v3203_v16  ;;  %v3165_v34 = vsel %vm3138_vm4, %v3163_v42, %v3164_v19 }
 0x530   : > { %v3179_v48 = vrot.slane %v3103_v46, 1  ;;  %v16680_v36 = vld [vmem:[%s23113_s6 + $0x620] ss:$16 sps:$4 sm:$0xff]   ;;  %4034 = vmatpush1.bf16.msra.mxu0 %v16674_v30  ;;  %4140 = vmatpush1.bf16.msra.mxu1 %v16677_v56  ;;  %v16683_v13 = vld [vmem:[%s23113_s6 + $0x628] ss:$16 sps:$4 sm:$0xff]   ;;  %v3161_v23 = vrot.slane %v3089_v33, 1 }
 0x531   : > { %v16688_v38 = vld [vmem:[%s23113_s6 + $0x644] ss:$16 sps:$4 sm:$0xff]   ;;  %v16691_v26 = vld [vmem:[%s23113_s6 + $0x64c] ss:$16 sps:$4 sm:$0xff]   ;;  %4035 = vmatprep.subr.bf16.mxu0 %v16682_v10  ;;  %4141 = vmatprep.subr.bf16.mxu1 %v16685_v2  ;;  %v3177_v43 = vsel %vm3138_vm4, %v3175_v59, %v3176_v11  ;;  %v16686_v53 = vld [vmem:[%s23113_s6 + $0x640] ss:$16 sps:$4 sm:$0xff]  }
 0x532   : > { %v3180_v22 = vsel %vm3138_vm4, %v3178_v18, %v3179_v48  ;;  %v16689_v14 = vld [vmem:[%s23113_s6 + $0x648] ss:$16 sps:$4 sm:$0xff]   ;;  %v3162_v15 = vsel %vm3138_vm4, %v3160_v7, %v3161_v23  ;;  %v3207_v4 = vpack.c.bf16 %v3177_v43, %v3165_v34  ;;  %v16694_v3 = vld [vmem:[%s23113_s6 + $0x664] ss:$16 sps:$4 sm:$0xff]   ;;  %v16697_v12 = vld [vmem:[%s23113_s6 + $0x66c] ss:$16 sps:$4 sm:$0xff]  }
 0x533   : > { %v3208_v44 = vpack.c.bf16 %v3180_v22, %v3168_v21  ;;  %v3206_v24 = vpack.c.bf16 %v3162_v15, %v3150_v45  ;;  %v16692_v1 = vld [vmem:[%s23113_s6 + $0x660] ss:$16 sps:$4 sm:$0xff]   ;;  %v16695_v40 = vld [vmem:[%s23113_s6 + $0x668] ss:$16 sps:$4 sm:$0xff]   ;;  %v16700_v37 = vld [vmem:[%s23113_s6 + $0x684] ss:$16 sps:$4 sm:$0xff]  }
 0x534   : > { %4036 = vmatpush1.bf16.msra.mxu0 %v16680_v36  ;;  %4142 = vmatpush1.bf16.msra.mxu1 %v16683_v13  ;;  %v16703_v55 = vld [vmem:[%s23113_s6 + $0x68c] ss:$16 sps:$4 sm:$0xff]   ;;  %v16698_v0 = vld [vmem:[%s23113_s6 + $0x680] ss:$16 sps:$4 sm:$0xff]   ;;  %v16701_v20 = vld [vmem:[%s23113_s6 + $0x688] ss:$16 sps:$4 sm:$0xff]  }
 0x535   : > { %4022 = vmatprep.mubr.bf16.mxu0 %v3208_v44  ;;  %4128 = vmatprep.mubr.bf16.mxu1 %v3208_v44  ;;  %v16706_v5 = vld [vmem:[%s23113_s6 + $0x6a4] ss:$16 sps:$4 sm:$0xff]   ;;  %v16709_v35 = vld [vmem:[%s23113_s6 + $0x6ac] ss:$16 sps:$4 sm:$0xff]   ;;  %v16704_v31 = vld [vmem:[%s23113_s6 + $0x6a0] ss:$16 sps:$4 sm:$0xff]  }
 0x536   : > { %4037 = vmatprep.subr.bf16.mxu0 %v16688_v38  ;;  %4143 = vmatprep.subr.bf16.mxu1 %v16691_v26  ;;  %v16707_v6 = vld [vmem:[%s23113_s6 + $0x6a8] ss:$16 sps:$4 sm:$0xff]   ;;  %v16712_v54 = vld [vmem:[%s23113_s6 + $0x6c4] ss:$16 sps:$4 sm:$0xff]   ;;  %v16715_v47 = vld [vmem:[%s23113_s6 + $0x6cc] ss:$16 sps:$4 sm:$0xff]  }
 0x537   : > { %4023 = vmatmul.mubr.bf16.gmra.mrb[20].mxu0 %v3207_v4  ;;  %4129 = vmatmul.mubr.bf16.gmra.mrb[20].mxu1 %v3207_v4  ;;  %v16710_v41 = vld [vmem:[%s23113_s6 + $0x6c0] ss:$16 sps:$4 sm:$0xff]   ;;  %v16713_v30 = vld [vmem:[%s23113_s6 + $0x6c8] ss:$16 sps:$4 sm:$0xff]   ;;  %v16718_v56 = vld [vmem:[%s23113_s6 + $0x6e4] ss:$16 sps:$4 sm:$0xff]  }
 0x538   : > { %4038 = vmatpush1.bf16.msra.mxu0 %v16686_v53  ;;  %4144 = vmatpush1.bf16.msra.mxu1 %v16689_v14  ;;  %v16721_v61 = vld [vmem:[%s23113_s6 + $0x6ec] ss:$16 sps:$4 sm:$0xff]   ;;  %v16716_v8 = vld [vmem:[%s23113_s6 + $0x6e0] ss:$16 sps:$4 sm:$0xff]   ;;  %v16719_v62 = vld [vmem:[%s23113_s6 + $0x6e8] ss:$16 sps:$4 sm:$0xff]  }
 0x539   : > { %4065 = vmatprep.mubr.bf16.mxu0 %v3206_v24  ;;  %4171 = vmatprep.mubr.bf16.mxu1 %v3206_v24  ;;  %v16724_v63 = vld [vmem:[%s23113_s6 + $0x704] ss:$16 sps:$4 sm:$0xff]   ;;  %v16727_v58 = vld [vmem:[%s23113_s6 + $0x70c] ss:$16 sps:$4 sm:$0xff]   ;;  %v16722_v9 = vld [vmem:[%s23113_s6 + $0x700] ss:$16 sps:$4 sm:$0xff]  }
 0x53a   : > { %4039 = vmatprep.subr.bf16.mxu0 %v16694_v3  ;;  %4145 = vmatprep.subr.bf16.mxu1 %v16697_v12  ;;  %v16725_v46 = vld [vmem:[%s23113_s6 + $0x708] ss:$16 sps:$4 sm:$0xff]   ;;  %v16730_v28 = vld [vmem:[%s23113_s6 + $0x724] ss:$16 sps:$4 sm:$0xff]   ;;  %v16733_v57 = vld [vmem:[%s23113_s6 + $0x72c] ss:$16 sps:$4 sm:$0xff]  }
 0x53b   : > { %v16728_v27 = vld [vmem:[%s23113_s6 + $0x720] ss:$16 sps:$4 sm:$0xff]   ;;  %v16731_v17 = vld [vmem:[%s23113_s6 + $0x728] ss:$16 sps:$4 sm:$0xff]   ;;  %v16736_v39 = vld [vmem:[%s23113_s6 + $0x744] ss:$16 sps:$4 sm:$0xff]  }
 0x53c   : > { %4040 = vmatpush1.bf16.msra.mxu0 %v16692_v1  ;;  %4146 = vmatpush1.bf16.msra.mxu1 %v16695_v40  ;;  %v16739_v52 = vld [vmem:[%s23113_s6 + $0x74c] ss:$16 sps:$4 sm:$0xff]   ;;  %v16734_v18 = vld [vmem:[%s23113_s6 + $0x740] ss:$16 sps:$4 sm:$0xff]   ;;  %v16737_v48 = vld [vmem:[%s23113_s6 + $0x748] ss:$16 sps:$4 sm:$0xff]  }
 0x53d   : > { %4041 = vmatprep.subr.bf16.mxu0 %v16700_v37  ;;  %4147 = vmatprep.subr.bf16.mxu1 %v16703_v55  ;;  %v16742_v10 = vld [vmem:[%s23113_s6 + $0x764] ss:$16 sps:$4 sm:$0xff]   ;;  %v16745_v2 = vld [vmem:[%s23113_s6 + $0x76c] ss:$16 sps:$4 sm:$0xff]   ;;  %v16740_v29 = vld [vmem:[%s23113_s6 + $0x760] ss:$16 sps:$4 sm:$0xff]  }
 0x53e   : > { %v16743_v60 = vld [vmem:[%s23113_s6 + $0x768] ss:$16 sps:$4 sm:$0xff]   ;;  %v16748_v16 = vld [vmem:[%s23113_s6 + $0x784] ss:$16 sps:$4 sm:$0xff]   ;;  %v16751_v21 = vld [vmem:[%s23113_s6 + $0x78c] ss:$16 sps:$4 sm:$0xff]  }
 0x53f   : > { %v16746_v32 = vld [vmem:[%s23113_s6 + $0x780] ss:$16 sps:$4 sm:$0xff]   ;;  %v16749_v49 = vld [vmem:[%s23113_s6 + $0x788] ss:$16 sps:$4 sm:$0xff]   ;;  %v16754_v42 = vld [vmem:[%s23113_s6 + $0x7a4] ss:$16 sps:$4 sm:$0xff]  }
 0x540   : > { %4042 = vmatpush1.bf16.msra.mxu0 %v16698_v0  ;;  %4148 = vmatpush1.bf16.msra.mxu1 %v16701_v20  ;;  %v16757_v19 = vld [vmem:[%s23113_s6 + $0x7ac] ss:$16 sps:$4 sm:$0xff]   ;;  %v16752_v22 = vld [vmem:[%s23113_s6 + $0x7a0] ss:$16 sps:$4 sm:$0xff]   ;;  %v16755_v59 = vld [vmem:[%s23113_s6 + $0x7a8] ss:$16 sps:$4 sm:$0xff]  }
 0x541   : > { %4043 = vmatprep.subr.bf16.mxu0 %v16706_v5  ;;  %4149 = vmatprep.subr.bf16.mxu1 %v16709_v35  ;;  %v16760_v11 = vld [vmem:[%s23113_s6 + $0x7c4] ss:$16 sps:$4 sm:$0xff]   ;;  %v16763_v51 = vld [vmem:[%s23113_s6 + $0x7cc] ss:$16 sps:$4 sm:$0xff]   ;;  %v16758_v33 = vld [vmem:[%s23113_s6 + $0x7c0] ss:$16 sps:$4 sm:$0xff]  }
 0x542   : > { %v16761_v44 = vld [vmem:[%s23113_s6 + $0x7c8] ss:$16 sps:$4 sm:$0xff]   ;;  %v3076_v36 = vld [vmem:[#allocation3 + $0x10] sm:$0xfe]  ;;  %v3080_v13 = vld [vmem:[#allocation3 + $0x30] sm:$0x1] }
 0x543   : > { %v3084_v25 = vld [vmem:[#allocation3 + $0x50] sm:$0xfe]  ;;  %v3088_v50 = vld [vmem:[#allocation3 + $0x70] sm:$0x1]  ;;  %v3093_v7 = vld [vmem:[#allocation3 + $0x98] sm:$0xfe] }
 0x544   : > { %4044 = vmatpush1.bf16.msra.mxu0 %v16704_v31  ;;  %4150 = vmatpush1.bf16.msra.mxu1 %v16707_v6  ;;  %v3097_v23 = vld [vmem:[#allocation3 + $0xb8] sm:$0x1]  ;;  %v3101_v38 = vld [vmem:[#allocation3 + $0xd8] sm:$0xfe]  ;;  %v16766_v34 = vld [vmem:[%s23113_s6 + $0x7e4] ss:$16 sps:$4 sm:$0xff]  }
 0x545   : > { %4045 = vmatprep.subr.bf16.mxu0 %v16712_v54  ;;  %4151 = vmatprep.subr.bf16.mxu1 %v16715_v47  ;;  %v3105_v26 = vld [vmem:[#allocation3 + $0xf8] sm:$0x1]  ;;  %v16769_v43 = vld [vmem:[%s23113_s6 + $0x7ec] ss:$16 sps:$4 sm:$0xff]   ;;  %v3145_v53 = vrot.slane %v3076_v36, 1  ;;  %v3146_v14 = vrot.slane %v3080_v13, 1 }
 0x546   : > { %v3157_v45 = vrot.slane %v3084_v25, 1  ;;  %v3158_v15 = vrot.slane %v3088_v50, 1  ;;  %v3172_v4 = vrot.slane %v3093_v7, 1  ;;  %v3173_v3 = vrot.slane %v3097_v23, 1  ;;  %v16764_v1 = vld [vmem:[%s23113_s6 + $0x7e0] ss:$16 sps:$4 sm:$0xff]  }
 0x547   : > { %v3184_v12 = vrot.slane %v3101_v38, 1  ;;  %v3185_v24 = vrot.slane %v3105_v26, 1  ;;  %v16767_v40 = vld [vmem:[%s23113_s6 + $0x7e8] ss:$16 sps:$4 sm:$0xff]   ;;  %v16772_v37 = vld [vmem:[%s23113_s6 + $0x4] ss:$16 sps:$4 sm:$0xff]   ;;  %v3147_v0 = vsel %vm3138_vm4, %v3145_v53, %v3146_v14 }
 0x548   : > { %4046 = vmatpush1.bf16.msra.mxu0 %v16710_v41  ;;  %4152 = vmatpush1.bf16.msra.mxu1 %v16713_v30  ;;  %v16775_v55 = vld [vmem:[%s23113_s6 + $0xc] ss:$16 sps:$4 sm:$0xff]   ;;  %v3159_v20 = vsel %vm3138_vm4, %v3157_v45, %v3158_v15  ;;  %v3092_v5 = vld [vmem:[#allocation3 + $0x90] sm:$0xfe]  ;;  %v3174_v35 = vsel %vm3138_vm4, %v3172_v4, %v3173_v3  ;;  %v3096_v6 = vld [vmem:[#allocation3 + $0xb0] sm:$0x1] }
 0x549   : > { %4047 = vmatprep.subr.bf16.mxu0 %v16718_v56  ;;  %4153 = vmatprep.subr.bf16.mxu1 %v16721_v61  ;;  %v3186_v31 = vsel %vm3138_vm4, %v3184_v12, %v3185_v24  ;;  %v3100_v54 = vld [vmem:[#allocation3 + $0xd0] sm:$0xfe]  ;;  %v3104_v47 = vld [vmem:[#allocation3 + $0xf0] sm:$0x1]  ;;  %v3205_v30 = vpack.c.bf16 %v3159_v20, %v3147_v0  ;;  %v16773_v56 = vld [vmem:[%s23113_s6 + $0x8] ss:$16 sps:$4 sm:$0xff]  }
 0x54a   : > { %v16770_v41 = vld [vmem:[%s23113_s6] ss:$16 sps:$4 sm:$0xff]   ;;  %v16778_v61 = vld [vmem:[%s23113_s6 + $0x24] ss:$16 sps:$4 sm:$0xff]   ;;  %v16811_v13 = vld [vmem:[%s23113_s6 + $0xcc] ss:$16 sps:$4 sm:$0xff]  }
 0x54b   : > { %v16808_v36 = vld [vmem:[%s23113_s6 + $0xc4] ss:$16 sps:$4 sm:$0xff]   ;;  %v16806_v25 = vld [vmem:[%s23113_s6 + $0xc0] ss:$16 sps:$4 sm:$0xff]   ;;  %v16809_v50 = vld [vmem:[%s23113_s6 + $0xc8] ss:$16 sps:$4 sm:$0xff]  }
 0x54c   : > { %4048 = vmatpush1.bf16.msra.mxu0 %v16716_v8  ;;  %4154 = vmatpush1.bf16.msra.mxu1 %v16719_v62  ;;  %v3169_v8 = vrot.slane %v3092_v5, 1  ;;  %v3210_v62 = vpack.c.bf16 %v3186_v31, %v3174_v35  ;;  %v16814_v7 = vld [vmem:[%s23113_s6 + $0xe4] ss:$16 sps:$4 sm:$0xff]   ;;  %v16817_v23 = vld [vmem:[%s23113_s6 + $0xec] ss:$16 sps:$4 sm:$0xff]   ;;  %vm5108_vm15 = vcmask 1045504  }
 0x54d   : > { %4049 = vmatprep.subr.bf16.mxu0 %v16724_v63  ;;  %4155 = vmatprep.subr.bf16.mxu1 %v16727_v58  ;;  %v16781_v63 = vld [vmem:[%s23113_s6 + $0x2c] ss:$16 sps:$4 sm:$0xff]   ;;  %v3170_v58 = vrot.slane %v3096_v6, 1  ;;  %v16812_v38 = vld [vmem:[%s23113_s6 + $0xe0] ss:$16 sps:$4 sm:$0xff]   ;;  %vm23449_vm6 = vcmask 1043459  }
 0x54e   : > { %v16815_v26 = vld [vmem:[%s23113_s6 + $0xe8] ss:$16 sps:$4 sm:$0xff]   ;;  %v16818_v53 = vld [vmem:[%s23113_s6 + $0x100] ss:$16 sps:$4 sm:$0xff]   ;;  %v16826_v45 = vld [vmem:[%s23113_s6 + $0x124] ss:$16 sps:$4 sm:$0xff]  }
 0x54f   : > { %v16821_v14 = vld [vmem:[%s23113_s6 + $0x108] ss:$16 sps:$4 sm:$0xff]   ;;  %v16829_v15 = vld [vmem:[%s23113_s6 + $0x12c] ss:$16 sps:$4 sm:$0xff]   ;;  %v16824_v4 = vld [vmem:[%s23113_s6 + $0x120] ss:$16 sps:$4 sm:$0xff]  }
 0x550   : > { %4050 = vmatpush1.bf16.msra.mxu0 %v16722_v9  ;;  %4156 = vmatpush1.bf16.msra.mxu1 %v16725_v46  ;;  %v3181_v9 = vrot.slane %v3100_v54, 1  ;;  %v3182_v46 = vrot.slane %v3104_v47, 1  ;;  %v16827_v3 = vld [vmem:[%s23113_s6 + $0x128] ss:$16 sps:$4 sm:$0xff]   ;;  %v16832_v12 = vld [vmem:[%s23113_s6 + $0x144] ss:$16 sps:$4 sm:$0xff]   ;;  %vm23450_vm7 = vmmov %vm23449_vm6 }
 0x551   : > { %4051 = vmatprep.subr.bf16.mxu0 %v16730_v28  ;;  %4157 = vmatprep.subr.bf16.mxu1 %v16733_v57  ;;  %v16776_v28 = vld [vmem:[%s23113_s6 + $0x20] ss:$16 sps:$4 sm:$0xff]   ;;  %v16779_v57 = vld [vmem:[%s23113_s6 + $0x28] ss:$16 sps:$4 sm:$0xff]   ;;  %v16835_v24 = vld [vmem:[%s23113_s6 + $0x14c] ss:$16 sps:$4 sm:$0xff]  }
 0x552   : > { %v16836_v0 = vld [vmem:[%s23113_s6 + $0x160] ss:$16 sps:$4 sm:$0xff]   ;;  %v16839_v20 = vld [vmem:[%s23113_s6 + $0x168] ss:$16 sps:$4 sm:$0xff]   ;;  %v16844_v5 = vld [vmem:[%s23113_s6 + $0x184] ss:$16 sps:$4 sm:$0xff]  }
 0x553   : > { %v16847_v35 = vld [vmem:[%s23113_s6 + $0x18c] ss:$16 sps:$4 sm:$0xff]   ;;  %v16842_v31 = vld [vmem:[%s23113_s6 + $0x180] ss:$16 sps:$4 sm:$0xff]   ;;  %v16845_v6 = vld [vmem:[%s23113_s6 + $0x188] ss:$16 sps:$4 sm:$0xff]  }
 0x554   : > { %4052 = vmatpush1.bf16.msra.mxu0 %v16728_v27  ;;  %4158 = vmatpush1.bf16.msra.mxu1 %v16731_v17  ;;  %v3171_v27 = vsel %vm3138_vm4, %v3169_v8, %v3170_v58  ;;  %v3183_v17 = vsel %vm3138_vm4, %v3181_v9, %v3182_v46  ;;  %v16850_v54 = vld [vmem:[%s23113_s6 + $0x1a4] ss:$16 sps:$4 sm:$0xff]   ;;  %v16853_v47 = vld [vmem:[%s23113_s6 + $0x1ac] ss:$16 sps:$4 sm:$0xff]   ;;  %v16854_v8 = vld [vmem:[%s23113_s6 + $0x1c0] ss:$16 sps:$4 sm:$0xff]  }
 0x555   : > { %4053 = vmatprep.subr.bf16.mxu0 %v16736_v39  ;;  %4159 = vmatprep.subr.bf16.mxu1 %v16739_v52  ;;  %v16784_v39 = vld [vmem:[%s23113_s6 + $0x44] ss:$16 sps:$4 sm:$0xff]   ;;  %v16787_v52 = vld [vmem:[%s23113_s6 + $0x4c] ss:$16 sps:$4 sm:$0xff]   ;;  %v16860_v9 = vld [vmem:[%s23113_s6 + $0x1e0] ss:$16 sps:$4 sm:$0xff]  }
 0x556   : > { %v16865_v58 = vld [vmem:[%s23113_s6 + $0x1ec] ss:$16 sps:$4 sm:$0xff]   ;;  %v16863_v46 = vld [vmem:[%s23113_s6 + $0x1e8] ss:$16 sps:$4 sm:$0xff]   ;;  %vm23451_vm8 = vmmov %vm23449_vm6  ;;  %vm23480_vm14 = vcmask 523264  }
 0x557   : > { %vm23452_vm9 = vmmov %vm23449_vm6 }
 0x558   : > { %4054 = vmatpush1.bf16.msra.mxu0 %v16734_v18  ;;  %4160 = vmatpush1.bf16.msra.mxu1 %v16737_v48  ;;  %v2923_v18 = vld [vmem:[#allocation3 + $0x8] sm:$0xff]  ;;  %vm23454_vm10 = vmmov %vm23449_vm6 }
 0x559   : > { %4055 = vmatprep.subr.bf16.mxu0 %v16742_v10  ;;  %4161 = vmatprep.subr.bf16.mxu1 %v16745_v2  ;;  %v2927_v48 = vld [vmem:[#allocation3 + $0x48] sm:$0xff]  ;;  %v3209_v10 = vpack.c.bf16 %v3183_v17, %v3171_v27  ;;  %v16782_v2 = vld [vmem:[%s23113_s6 + $0x40] ss:$16 sps:$4 sm:$0xff]   ;;  %vm23458_vm11 = vmmov %vm23449_vm6 }
 0x55a   : > { %v2922_v27 = vld [vmem:[#allocation3] sm:$0xff]  ;;  %vm23478_vm12 = vmmov %vm23449_vm6 }
 0x55b   : > { %v2926_v17 = vld [vmem:[#allocation3 + $0x40] sm:$0xff]  ;;  %vm23479_vm13 = vmmov %vm23449_vm6 }
 0x55c   : > { %4056 = vmatpush1.bf16.msra.mxu0 %v16740_v29  ;;  %4162 = vmatpush1.bf16.msra.mxu1 %v16743_v60  ;;  %v16785_v29 = vld [vmem:[%s23113_s6 + $0x48] ss:$16 sps:$4 sm:$0xff]   ;;  %v2939_v60 = vpack.c.bf16 %v2927_v48, %v2923_v18  ;;  %v16866_v18 = vld [vmem:[%s23113_s6 + $0x200] ss:$16 sps:$4 sm:$0xff]   ;;  %v2938_v48 = vpack.c.bf16 %v2926_v17, %v2922_v27  ;;  %vm23482_vm0 = vmmov %vm23480_vm14 }
 0x55d   : > { %4057 = vmatprep.subr.bf16.mxu0 %v16748_v16  ;;  %4163 = vmatprep.subr.bf16.mxu1 %v16751_v21  ;;  %v16790_v16 = vld [vmem:[%s23113_s6 + $0x64] ss:$16 sps:$4 sm:$0xff]   ;;  %v16793_v21 = vld [vmem:[%s23113_s6 + $0x6c] ss:$16 sps:$4 sm:$0xff]   ;;  %v16944_v27 = vld [vmem:[%s23113_s6 + $0x3a0] ss:$16 sps:$4 sm:$0xff]  }
 0x55e   : > { %v16947_v17 = vld [vmem:[%s23113_s6 + $0x3a8] ss:$16 sps:$4 sm:$0xff]  }
 0x560   : > { %4058 = vmatpush1.bf16.msra.mxu0 %v16746_v32  ;;  %4164 = vmatpush1.bf16.msra.mxu1 %v16749_v49  ;;  %v16788_v32 = vld [vmem:[%s23113_s6 + $0x60] ss:$16 sps:$4 sm:$0xff]   ;;  %v16791_v49 = vld [vmem:[%s23113_s6 + $0x68] ss:$16 sps:$4 sm:$0xff]  }
 0x561   : > { %4059 = vmatprep.subr.bf16.mxu0 %v16754_v42  ;;  %4165 = vmatprep.subr.bf16.mxu1 %v16757_v19  ;;  %v16796_v42 = vld [vmem:[%s23113_s6 + $0x84] ss:$16 sps:$4 sm:$0xff]   ;;  %v16799_v19 = vld [vmem:[%s23113_s6 + $0x8c] ss:$16 sps:$4 sm:$0xff]  }
 0x564   : > { %4060 = vmatpush1.bf16.msra.mxu0 %v16752_v22  ;;  %4166 = vmatpush1.bf16.msra.mxu1 %v16755_v59  ;;  %v16794_v22 = vld [vmem:[%s23113_s6 + $0x80] ss:$16 sps:$4 sm:$0xff]   ;;  %v16797_v59 = vld [vmem:[%s23113_s6 + $0x88] ss:$16 sps:$4 sm:$0xff]  }
 0x565   : > { %4061 = vmatprep.subr.bf16.mxu0 %v16760_v11  ;;  %4167 = vmatprep.subr.bf16.mxu1 %v16763_v51  ;;  %v16802_v11 = vld [vmem:[%s23113_s6 + $0xa4] ss:$16 sps:$4 sm:$0xff]   ;;  %v16805_v51 = vld [vmem:[%s23113_s6 + $0xac] ss:$16 sps:$4 sm:$0xff]  }
 0x568   : > { %4062 = vmatpush1.bf16.msra.mxu0 %v16758_v33  ;;  %4168 = vmatpush1.bf16.msra.mxu1 %v16761_v44  ;;  %v16800_v33 = vld [vmem:[%s23113_s6 + $0xa0] ss:$16 sps:$4 sm:$0xff]   ;;  %v16803_v44 = vld [vmem:[%s23113_s6 + $0xa8] ss:$16 sps:$4 sm:$0xff]  }
 0x569   : > { %4063 = vmatprep.subr.bf16.mxu0 %v16766_v34  ;;  %4169 = vmatprep.subr.bf16.mxu1 %v16769_v43  ;;  %v16820_v34 = vld [vmem:[%s23113_s6 + $0x104] ss:$16 sps:$4 sm:$0xff]   ;;  %v16823_v43 = vld [vmem:[%s23113_s6 + $0x10c] ss:$16 sps:$4 sm:$0xff]  }
 0x56c   : > { %4064 = vmatpush1.bf16.msra.mxu0 %v16764_v1  ;;  %4170 = vmatpush1.bf16.msra.mxu1 %v16767_v40  ;;  %v16830_v1 = vld [vmem:[%s23113_s6 + $0x140] ss:$16 sps:$4 sm:$0xff]   ;;  %v16833_v40 = vld [vmem:[%s23113_s6 + $0x148] ss:$16 sps:$4 sm:$0xff]  }
 0x56d   : > { %4832 = vmatprep.subr.bf16.mxu0 %v16772_v37  ;;  %4938 = vmatprep.subr.bf16.mxu1 %v16775_v55  ;;  %v16838_v37 = vld [vmem:[%s23113_s6 + $0x164] ss:$16 sps:$4 sm:$0xff]   ;;  %v16841_v55 = vld [vmem:[%s23113_s6 + $0x16c] ss:$16 sps:$4 sm:$0xff]  }
 0x56f   : > { %4066 = vmatmul.mubr.bf16.vlgmr.msra.gmra.mrb[16].mxu0 %v3205_v30  ;;  %4172 = vmatmul.mubr.bf16.vlgmr.msra.gmra.mrb[16].mxu1 %v3205_v30  ;;  %v16851_v30 = vld [vmem:[%s23113_s6 + $0x1a8] ss:$16 sps:$4 sm:$0xff]  }
 0x570   : > { %4075 = vmatprep.mubr.bf16.mxu0 %v3210_v62  ;;  %4181 = vmatprep.mubr.bf16.mxu1 %v3210_v62  ;;  %v16857_v62 = vld [vmem:[%s23113_s6 + $0x1c8] ss:$16 sps:$4 sm:$0xff]  }
 0x571   : > { %4833 = vmatpush1.bf16.msra.mxu0 %v16770_v41  ;;  %4939 = vmatpush1.bf16.msra.mxu1 %v16773_v56  ;;  %v16848_v41 = vld [vmem:[%s23113_s6 + $0x1a0] ss:$16 sps:$4 sm:$0xff]   ;;  %v16856_v56 = vld [vmem:[%s23113_s6 + $0x1c4] ss:$16 sps:$4 sm:$0xff]  }
 0x572   : > { %4834 = vmatprep.subr.bf16.mxu0 %v16778_v61  ;;  %4940 = vmatprep.subr.bf16.mxu1 %v16781_v63  ;;  %v16859_v61 = vld [vmem:[%s23113_s6 + $0x1cc] ss:$16 sps:$4 sm:$0xff]   ;;  %v16862_v63 = vld [vmem:[%s23113_s6 + $0x1e4] ss:$16 sps:$4 sm:$0xff]  }
 0x575   : > { %4835 = vmatpush1.bf16.msra.mxu0 %v16776_v28  ;;  %4941 = vmatpush1.bf16.msra.mxu1 %v16779_v57  ;;  %v16868_v28 = vld [vmem:[%s23113_s6 + $0x204] ss:$16 sps:$4 sm:$0xff]   ;;  %v16871_v57 = vld [vmem:[%s23113_s6 + $0x20c] ss:$16 sps:$4 sm:$0xff]  }
 0x576   : > { %4836 = vmatprep.subr.bf16.mxu0 %v16784_v39  ;;  %4942 = vmatprep.subr.bf16.mxu1 %v16787_v52  ;;  %v2931_v39 = vld [vmem:[#allocation3 + $0x88] sm:$0xff] }
 0x577   : > { %4076 = vmatmul.mubr.bf16.gmra.mrb[20].mxu0 %v3209_v10  ;;  %4182 = vmatmul.mubr.bf16.gmra.mrb[20].mxu1 %v3209_v10  ;;  %v2935_v52 = vld [vmem:[#allocation3 + $0xc8] sm:$0xff] }
 0x578   : > { %4864 = vmatprep.mubr.bf16.mxu0 %v2939_v60  ;;  %4970 = vmatprep.mubr.bf16.mxu1 %v2939_v60  ;;  %v16869_v10 = vld [vmem:[%s23113_s6 + $0x208] ss:$16 sps:$4 sm:$0xff]   ;;  %v16877_v60 = vld [vmem:[%s23113_s6 + $0x22c] ss:$16 sps:$4 sm:$0xff]  }
 0x579   : > { %4837 = vmatpush1.bf16.msra.mxu0 %v16782_v2  ;;  %4943 = vmatpush1.bf16.msra.mxu1 %v16785_v29  ;;  %v2943_v2 = vpack.c.bf16 %v2935_v52, %v2931_v39  ;;  %v16874_v29 = vld [vmem:[%s23113_s6 + $0x224] ss:$16 sps:$4 sm:$0xff]   ;;  %v16955_v52 = vld [vmem:[%s23113_s6 + $0x3cc] ss:$16 sps:$4 sm:$0xff]  }
 0x57a   : > { %4838 = vmatprep.subr.bf16.mxu0 %v16790_v16  ;;  %4944 = vmatprep.subr.bf16.mxu1 %v16793_v21  ;;  %v16872_v16 = vld [vmem:[%s23113_s6 + $0x220] ss:$16 sps:$4 sm:$0xff]   ;;  %v16875_v21 = vld [vmem:[%s23113_s6 + $0x228] ss:$16 sps:$4 sm:$0xff]   ;;  %v16952_v39 = vld [vmem:[%s23113_s6 + $0x3c4] ss:$16 sps:$4 sm:$0xff]  }
 0x57d   : > { %4839 = vmatpush1.bf16.msra.mxu0 %v16788_v32  ;;  %4945 = vmatpush1.bf16.msra.mxu1 %v16791_v49  ;;  %v16880_v32 = vld [vmem:[%s23113_s6 + $0x244] ss:$16 sps:$4 sm:$0xff]  }
 0x57e   : > { %4840 = vmatprep.subr.bf16.mxu0 %v16796_v42  ;;  %4946 = vmatprep.subr.bf16.mxu1 %v16799_v19  ;;  %v2930_v49 = vld [vmem:[#allocation3 + $0x80] sm:$0xff]  ;;  %v16883_v19 = vld [vmem:[%s23113_s6 + $0x24c] ss:$16 sps:$4 sm:$0xff]  }
 0x57f   : > { %v2934_v42 = vld [vmem:[#allocation3 + $0xc0] sm:$0xff] }
 0x581   : > { %4841 = vmatpush1.bf16.msra.mxu0 %v16794_v22  ;;  %4947 = vmatpush1.bf16.msra.mxu1 %v16797_v59  ;;  %v2925_v22 = vld [vmem:[#allocation3 + $0x18] sm:$0xff] }
 0x582   : > { %4842 = vmatprep.subr.bf16.mxu0 %v16802_v11  ;;  %4948 = vmatprep.subr.bf16.mxu1 %v16805_v51  ;;  %v2929_v59 = vld [vmem:[#allocation3 + $0x58] sm:$0xff]  ;;  %v16878_v11 = vld [vmem:[%s23113_s6 + $0x240] ss:$16 sps:$4 sm:$0xff]   ;;  %v2942_v51 = vpack.c.bf16 %v2934_v42, %v2930_v49 }
 0x583   : > { %v16967_v49 = vld [vmem:[%s23113_s6 + $0x80c] ss:$16 sps:$4 sm:$0xff]  }
 0x584   : > { %v2933_v42 = vld [vmem:[#allocation3 + $0x98] sm:$0xff] }
 0x585   : > { %4843 = vmatpush1.bf16.msra.mxu0 %v16800_v33  ;;  %4949 = vmatpush1.bf16.msra.mxu1 %v16803_v44  ;;  %v16881_v33 = vld [vmem:[%s23113_s6 + $0x248] ss:$16 sps:$4 sm:$0xff]   ;;  %v2941_v44 = vpack.c.bf16 %v2929_v59, %v2925_v22 }
 0x586   : > { %4844 = vmatprep.subr.bf16.mxu0 %v16808_v36  ;;  %4950 = vmatprep.subr.bf16.mxu1 %v16811_v13  ;;  %v16886_v36 = vld [vmem:[%s23113_s6 + $0x264] ss:$16 sps:$4 sm:$0xff]   ;;  %v16889_v13 = vld [vmem:[%s23113_s6 + $0x26c] ss:$16 sps:$4 sm:$0xff]   ;;  %v5049_v59 = vld [vmem:[#allocation3 + $0x28] sm:$0x3] }
 0x587   : > { %v5045_v22 = vld [vmem:[#allocation3 + $0x8] sm:$0xfc] }
 0x589   : > { %4845 = vmatpush1.bf16.msra.mxu0 %v16806_v25  ;;  %4951 = vmatpush1.bf16.msra.mxu1 %v16809_v50  ;;  %v16884_v25 = vld [vmem:[%s23113_s6 + $0x260] ss:$16 sps:$4 sm:$0xff]   ;;  %v16887_v50 = vld [vmem:[%s23113_s6 + $0x268] ss:$16 sps:$4 sm:$0xff]  }
 0x58a   : > { %4846 = vmatprep.subr.bf16.mxu0 %v16814_v7  ;;  %4952 = vmatprep.subr.bf16.mxu1 %v16817_v23  ;;  %v16892_v7 = vld [vmem:[%s23113_s6 + $0x284] ss:$16 sps:$4 sm:$0xff]   ;;  %v16895_v23 = vld [vmem:[%s23113_s6 + $0x28c] ss:$16 sps:$4 sm:$0xff]  }
 0x58d   : > { %4847 = vmatpush1.bf16.msra.mxu0 %v16812_v38  ;;  %4953 = vmatpush1.bf16.msra.mxu1 %v16815_v26  ;;  %v16890_v38 = vld [vmem:[%s23113_s6 + $0x280] ss:$16 sps:$4 sm:$0xff]   ;;  %v16893_v26 = vld [vmem:[%s23113_s6 + $0x288] ss:$16 sps:$4 sm:$0xff]  }
 0x58e   : > { %4848 = vmatprep.subr.bf16.mxu0 %v16820_v34  ;;  %4954 = vmatprep.subr.bf16.mxu1 %v16823_v43  ;;  %v16898_v34 = vld [vmem:[%s23113_s6 + $0x2a4] ss:$16 sps:$4 sm:$0xff]   ;;  %v16901_v43 = vld [vmem:[%s23113_s6 + $0x2ac] ss:$16 sps:$4 sm:$0xff]  }
 0x591   : > { %4849 = vmatpush1.bf16.msra.mxu0 %v16818_v53  ;;  %4955 = vmatpush1.bf16.msra.mxu1 %v16821_v14  ;;  %v16896_v53 = vld [vmem:[%s23113_s6 + $0x2a0] ss:$16 sps:$4 sm:$0xff]   ;;  %v16899_v14 = vld [vmem:[%s23113_s6 + $0x2a8] ss:$16 sps:$4 sm:$0xff]  }
 0x592   : > { %4850 = vmatprep.subr.bf16.mxu0 %v16826_v45  ;;  %4956 = vmatprep.subr.bf16.mxu1 %v16829_v15  ;;  %v16904_v45 = vld [vmem:[%s23113_s6 + $0x2c4] ss:$16 sps:$4 sm:$0xff]   ;;  %v16907_v15 = vld [vmem:[%s23113_s6 + $0x2cc] ss:$16 sps:$4 sm:$0xff]  }
 0x595   : > { %4851 = vmatpush1.bf16.msra.mxu0 %v16824_v4  ;;  %4957 = vmatpush1.bf16.msra.mxu1 %v16827_v3  ;;  %v16902_v4 = vld [vmem:[%s23113_s6 + $0x2c0] ss:$16 sps:$4 sm:$0xff]   ;;  %v16905_v3 = vld [vmem:[%s23113_s6 + $0x2c8] ss:$16 sps:$4 sm:$0xff]  }
 0x596   : > { %4852 = vmatprep.subr.bf16.mxu0 %v16832_v12  ;;  %4958 = vmatprep.subr.bf16.mxu1 %v16835_v24  ;;  %v16910_v12 = vld [vmem:[%s23113_s6 + $0x2e4] ss:$16 sps:$4 sm:$0xff]   ;;  %v16913_v24 = vld [vmem:[%s23113_s6 + $0x2ec] ss:$16 sps:$4 sm:$0xff]  }
 0x599   : > { %4853 = vmatpush1.bf16.msra.mxu0 %v16830_v1  ;;  %4959 = vmatpush1.bf16.msra.mxu1 %v16833_v40  ;;  %v16908_v1 = vld [vmem:[%s23113_s6 + $0x2e0] ss:$16 sps:$4 sm:$0xff]   ;;  %v16911_v40 = vld [vmem:[%s23113_s6 + $0x2e8] ss:$16 sps:$4 sm:$0xff]  }
 0x59a   : > { %4854 = vmatprep.subr.bf16.mxu0 %v16838_v37  ;;  %4960 = vmatprep.subr.bf16.mxu1 %v16841_v55  ;;  %v16916_v37 = vld [vmem:[%s23113_s6 + $0x304] ss:$16 sps:$4 sm:$0xff]   ;;  %v16919_v55 = vld [vmem:[%s23113_s6 + $0x30c] ss:$16 sps:$4 sm:$0xff]  }
 0x59d   : > { %4855 = vmatpush1.bf16.msra.mxu0 %v16836_v0  ;;  %4961 = vmatpush1.bf16.msra.mxu1 %v16839_v20  ;;  %v16914_v0 = vld [vmem:[%s23113_s6 + $0x300] ss:$16 sps:$4 sm:$0xff]   ;;  %v16917_v20 = vld [vmem:[%s23113_s6 + $0x308] ss:$16 sps:$4 sm:$0xff]  }
 0x59e   : > { %4856 = vmatprep.subr.bf16.mxu0 %v16844_v5  ;;  %4962 = vmatprep.subr.bf16.mxu1 %v16847_v35  ;;  %v16922_v5 = vld [vmem:[%s23113_s6 + $0x324] ss:$16 sps:$4 sm:$0xff]   ;;  %v16925_v35 = vld [vmem:[%s23113_s6 + $0x32c] ss:$16 sps:$4 sm:$0xff]  }
 0x5a1   : > { %4857 = vmatpush1.bf16.msra.mxu0 %v16842_v31  ;;  %4963 = vmatpush1.bf16.msra.mxu1 %v16845_v6  ;;  %v16920_v31 = vld [vmem:[%s23113_s6 + $0x320] ss:$16 sps:$4 sm:$0xff]   ;;  %v16923_v6 = vld [vmem:[%s23113_s6 + $0x328] ss:$16 sps:$4 sm:$0xff]  }
 0x5a2   : > { %4858 = vmatprep.subr.bf16.mxu0 %v16850_v54  ;;  %4964 = vmatprep.subr.bf16.mxu1 %v16853_v47  ;;  %v16928_v54 = vld [vmem:[%s23113_s6 + $0x344] ss:$16 sps:$4 sm:$0xff]   ;;  %v16931_v47 = vld [vmem:[%s23113_s6 + $0x34c] ss:$16 sps:$4 sm:$0xff]  }
 0x5a5   : > { %4859 = vmatpush1.bf16.msra.mxu0 %v16848_v41  ;;  %4965 = vmatpush1.bf16.msra.mxu1 %v16851_v30  ;;  %v16926_v41 = vld [vmem:[%s23113_s6 + $0x340] ss:$16 sps:$4 sm:$0xff]   ;;  %v16929_v30 = vld [vmem:[%s23113_s6 + $0x348] ss:$16 sps:$4 sm:$0xff]  }
 0x5a6   : > { %4860 = vmatprep.subr.bf16.mxu0 %v16856_v56  ;;  %4966 = vmatprep.subr.bf16.mxu1 %v16859_v61  ;;  %v16934_v56 = vld [vmem:[%s23113_s6 + $0x364] ss:$16 sps:$4 sm:$0xff]   ;;  %v16937_v61 = vld [vmem:[%s23113_s6 + $0x36c] ss:$16 sps:$4 sm:$0xff]  }
 0x5a9   : > { %4861 = vmatpush1.bf16.msra.mxu0 %v16854_v8  ;;  %4967 = vmatpush1.bf16.msra.mxu1 %v16857_v62  ;;  %v16932_v8 = vld [vmem:[%s23113_s6 + $0x360] ss:$16 sps:$4 sm:$0xff]   ;;  %v16935_v62 = vld [vmem:[%s23113_s6 + $0x368] ss:$16 sps:$4 sm:$0xff]  }
 0x5aa   : > { %4862 = vmatprep.subr.bf16.mxu0 %v16862_v63  ;;  %4968 = vmatprep.subr.bf16.mxu1 %v16865_v58  ;;  %v16940_v63 = vld [vmem:[%s23113_s6 + $0x384] ss:$16 sps:$4 sm:$0xff]   ;;  %v16943_v58 = vld [vmem:[%s23113_s6 + $0x38c] ss:$16 sps:$4 sm:$0xff]  }
 0x5ad   : > { %4863 = vmatpush1.bf16.msra.mxu0 %v16860_v9  ;;  %4969 = vmatpush1.bf16.msra.mxu1 %v16863_v46  ;;  %v16938_v9 = vld [vmem:[%s23113_s6 + $0x380] ss:$16 sps:$4 sm:$0xff]   ;;  %v16941_v46 = vld [vmem:[%s23113_s6 + $0x388] ss:$16 sps:$4 sm:$0xff]  }
 0x5ae   : > { %4885 = vmatprep.subr.bf16.mxu0 %v16868_v28  ;;  %4991 = vmatprep.subr.bf16.mxu1 %v16871_v57  ;;  %v16946_v28 = vld [vmem:[%s23113_s6 + $0x3a4] ss:$16 sps:$4 sm:$0xff]   ;;  %v16949_v57 = vld [vmem:[%s23113_s6 + $0x3ac] ss:$16 sps:$4 sm:$0xff]  }
 0x5b0   : > { %4865 = vmatmul.mubr.bf16.vlgmr.msra.gmra.mrb[16].mxu0 %v2938_v48  ;;  %4971 = vmatmul.mubr.bf16.vlgmr.msra.gmra.mrb[16].mxu1 %v2938_v48  ;;  %v16953_v48 = vld [vmem:[%s23113_s6 + $0x3c8] ss:$16 sps:$4 sm:$0xff]  }
 0x5b1   : > { %4874 = vmatprep.mubr.bf16.mxu0 %v2943_v2  ;;  %4886 = vmatpush1.bf16.msra.mxu0 %v16866_v18  ;;  %v16950_v18 = vld [vmem:[%s23113_s6 + $0x3c0] ss:$16 sps:$4 sm:$0xff]  }
 0x5b2   : > { %4980 = vmatprep.mubr.bf16.mxu1 %v2943_v2  ;;  %4992 = vmatpush1.bf16.msra.mxu1 %v16869_v10  ;;  %v16958_v10 = vld [vmem:[%s23113_s6 + $0x3e4] ss:$16 sps:$4 sm:$0xff]   ;;  %v16961_v2 = vld [vmem:[%s23113_s6 + $0x3ec] ss:$16 sps:$4 sm:$0xff]  }
 0x5b3   : > { %4887 = vmatprep.subr.bf16.mxu0 %v16874_v29  ;;  %4993 = vmatprep.subr.bf16.mxu1 %v16877_v60  ;;  %v16956_v29 = vld [vmem:[%s23113_s6 + $0x3e0] ss:$16 sps:$4 sm:$0xff]   ;;  %v16959_v60 = vld [vmem:[%s23113_s6 + $0x3e8] ss:$16 sps:$4 sm:$0xff]  }
 0x5b5   : > { %4888 = vmatpush1.bf16.msra.mxu0 %v16872_v16  ;;  %v16964_v16 = vld [vmem:[%s23113_s6 + $0x804] ss:$16 sps:$4 sm:$0xff]  }
 0x5b6   : > { %4994 = vmatpush1.bf16.msra.mxu1 %v16875_v21  ;;  %4889 = vmatprep.subr.bf16.mxu0 %v16880_v32  ;;  %v2924_v21 = vld [vmem:[#allocation3 + $0x10] sm:$0xff] }
 0x5b7   : > { %4995 = vmatprep.subr.bf16.mxu1 %v16883_v19  ;;  %v2928_v32 = vld [vmem:[#allocation3 + $0x50] sm:$0xff]  ;;  %v2937_v19 = vld [vmem:[#allocation3 + $0xd8] sm:$0xff] }
 0x5b8   : > { %4875 = vmatmul.mubr.bf16.gmra.mrb[20].mxu0 %v2942_v51  ;;  %4981 = vmatmul.mubr.bf16.gmra.mrb[20].mxu1 %v2942_v51  ;;  %v5057_v51 = vld [vmem:[#allocation3 + $0x68] sm:$0x3] }
 0x5b9   : > { %4890 = vmatpush1.bf16.msra.mxu0 %v16878_v11  ;;  %4917 = vmatprep.mubr.bf16.mxu0 %v2941_v44  ;;  %v5053_v11 = vld [vmem:[#allocation3 + $0x48] sm:$0xfc] }
 0x5ba   : > { %4996 = vmatpush1.bf16.msra.mxu1 %v16881_v33  ;;  %5023 = vmatprep.mubr.bf16.mxu1 %v2941_v44  ;;  %v2940_v33 = vpack.c.bf16 %v2928_v32, %v2924_v21  ;;  %v16962_v44 = vld [vmem:[%s23113_s6 + $0x800] ss:$16 sps:$4 sm:$0xff]   ;;  %v17033_v21 = vld [vmem:[%s23113_s6 + $0x96c] ss:$16 sps:$4 sm:$0xff]  }
 0x5bb   : > { %4891 = vmatprep.subr.bf16.mxu0 %v16886_v36  ;;  %4997 = vmatprep.subr.bf16.mxu1 %v16889_v13  ;;  %v16965_v36 = vld [vmem:[%s23113_s6 + $0x808] ss:$16 sps:$4 sm:$0xff]   ;;  %v2945_v13 = vpack.c.bf16 %v2937_v19, %v2933_v42  ;;  %v17028_v32 = vld [vmem:[%s23113_s6 + $0x960] ss:$16 sps:$4 sm:$0xff]   ;;  %v17036_v42 = vld [vmem:[%s23113_s6 + $0x984] ss:$16 sps:$4 sm:$0xff]  }
 0x5bc   : > { %v17039_v19 = vld [vmem:[%s23113_s6 + $0x98c] ss:$16 sps:$4 sm:$0xff]  }
 0x5bd   : > { %4892 = vmatpush1.bf16.msra.mxu0 %v16884_v25  ;;  %v16970_v25 = vld [vmem:[%s23113_s6 + $0x824] ss:$16 sps:$4 sm:$0xff]  }
 0x5be   : > { %4998 = vmatpush1.bf16.msra.mxu1 %v16887_v50  ;;  %4893 = vmatprep.subr.bf16.mxu0 %v16892_v7  ;;  %v16973_v50 = vld [vmem:[%s23113_s6 + $0x82c] ss:$16 sps:$4 sm:$0xff]   ;;  %v5112_v7 = vrot.slane %v5045_v22, 2  ;;  %v17034_v22 = vld [vmem:[%s23113_s6 + $0x980] ss:$16 sps:$4 sm:$0xff]  }
 0x5bf   : > { %4999 = vmatprep.subr.bf16.mxu1 %v16895_v23  ;;  %v5113_v23 = vrot.slane %v5049_v59, 2  ;;  %v17037_v59 = vld [vmem:[%s23113_s6 + $0x988] ss:$16 sps:$4 sm:$0xff]  }
 0x5c1   : > { %4894 = vmatpush1.bf16.msra.mxu0 %v16890_v38  ;;  %v5124_v38 = vrot.slane %v5053_v11, 2  ;;  %v17042_v11 = vld [vmem:[%s23113_s6 + $0x9a4] ss:$16 sps:$4 sm:$0xff]  }
 0x5c2   : > { %5000 = vmatpush1.bf16.msra.mxu1 %v16893_v26  ;;  %4895 = vmatprep.subr.bf16.mxu0 %v16898_v34  ;;  %v5125_v26 = vrot.slane %v5057_v51, 2  ;;  %v16968_v34 = vld [vmem:[%s23113_s6 + $0x820] ss:$16 sps:$4 sm:$0xff]   ;;  %v17045_v51 = vld [vmem:[%s23113_s6 + $0x9ac] ss:$16 sps:$4 sm:$0xff]  }
 0x5c3   : > { %5001 = vmatprep.subr.bf16.mxu1 %v16901_v43  ;;  %v2932_v43 = vld [vmem:[#allocation3 + $0x90] sm:$0xff] }
 0x5c5   : > { %4896 = vmatpush1.bf16.msra.mxu0 %v16896_v53  ;;  %v16971_v53 = vld [vmem:[%s23113_s6 + $0x828] ss:$16 sps:$4 sm:$0xff]  }
 0x5c6   : > { %5002 = vmatpush1.bf16.msra.mxu1 %v16899_v14  ;;  %4897 = vmatprep.subr.bf16.mxu0 %v16904_v45  ;;  %v2936_v14 = vld [vmem:[#allocation3 + $0xd0] sm:$0xff] }
 0x5c7   : > { %5003 = vmatprep.subr.bf16.mxu1 %v16907_v15  ;;  %v16976_v45 = vld [vmem:[%s23113_s6 + $0x844] ss:$16 sps:$4 sm:$0xff]   ;;  %v16979_v15 = vld [vmem:[%s23113_s6 + $0x84c] ss:$16 sps:$4 sm:$0xff]  }
 0x5c9   : > { %4898 = vmatpush1.bf16.msra.mxu0 %v16902_v4  ;;  %v5114_v4 = vsel %vm5108_vm15, %v5112_v7, %v5113_v23  ;;  %v5052_v7 = vld [vmem:[#allocation3 + $0x40] sm:$0xfc]  ;;  %v5056_v23 = vld [vmem:[#allocation3 + $0x60] sm:$0x3] }
 0x5ca   : > { %5004 = vmatpush1.bf16.msra.mxu1 %v16905_v3  ;;  %4899 = vmatprep.subr.bf16.mxu0 %v16910_v12  ;;  %v5126_v3 = vsel %vm5108_vm15, %v5124_v38, %v5125_v26  ;;  %v2944_v12 = vpack.c.bf16 %v2936_v14, %v2932_v43  ;;  %v5061_v38 = vld [vmem:[#allocation3 + $0x88] sm:$0xfc]  ;;  %v5065_v26 = vld [vmem:[#allocation3 + $0xa8] sm:$0x3] }
 0x5cb   : > { %5005 = vmatprep.subr.bf16.mxu1 %v16913_v24  ;;  %v16974_v24 = vld [vmem:[%s23113_s6 + $0x840] ss:$16 sps:$4 sm:$0xff]   ;;  %v5069_v43 = vld [vmem:[#allocation3 + $0xc8] sm:$0xfc] }
 0x5cc   : > { %v17049_v14 = vld [vmem:[%s23113_s6 + $0x9c8] ss:$16 sps:$4 sm:$0xff]  }
 0x5cd   : > { %4900 = vmatpush1.bf16.msra.mxu0 %v16908_v1  ;;  %v16977_v1 = vld [vmem:[%s23113_s6 + $0x848] ss:$16 sps:$4 sm:$0xff]  }
 0x5ce   : > { %5006 = vmatpush1.bf16.msra.mxu1 %v16911_v40  ;;  %4901 = vmatprep.subr.bf16.mxu0 %v16916_v37  ;;  %v5174_v40 = vpack.c.bf16 %v5126_v3, %v5114_v4  ;;  %v16982_v37 = vld [vmem:[%s23113_s6 + $0x864] ss:$16 sps:$4 sm:$0xff]  }
 0x5cf   : > { %5007 = vmatprep.subr.bf16.mxu1 %v16919_v55  ;;  %v16985_v55 = vld [vmem:[%s23113_s6 + $0x86c] ss:$16 sps:$4 sm:$0xff]  }
 0x5d1   : > { %4902 = vmatpush1.bf16.msra.mxu0 %v16914_v0  ;;  %v16980_v0 = vld [vmem:[%s23113_s6 + $0x860] ss:$16 sps:$4 sm:$0xff]  }
 0x5d2   : > { %5008 = vmatpush1.bf16.msra.mxu1 %v16917_v20  ;;  %4903 = vmatprep.subr.bf16.mxu0 %v16922_v5  ;;  %v16983_v20 = vld [vmem:[%s23113_s6 + $0x868] ss:$16 sps:$4 sm:$0xff]   ;;  %v16988_v5 = vld [vmem:[%s23113_s6 + $0x884] ss:$16 sps:$4 sm:$0xff]  }
 0x5d3   : > { %5009 = vmatprep.subr.bf16.mxu1 %v16925_v35  ;;  %v16991_v35 = vld [vmem:[%s23113_s6 + $0x88c] ss:$16 sps:$4 sm:$0xff]  }
 0x5d5   : > { %4904 = vmatpush1.bf16.msra.mxu0 %v16920_v31  ;;  %v16986_v31 = vld [vmem:[%s23113_s6 + $0x880] ss:$16 sps:$4 sm:$0xff]  }
 0x5d6   : > { %5010 = vmatpush1.bf16.msra.mxu1 %v16923_v6  ;;  %4905 = vmatprep.subr.bf16.mxu0 %v16928_v54  ;;  %v16989_v6 = vld [vmem:[%s23113_s6 + $0x888] ss:$16 sps:$4 sm:$0xff]   ;;  %v16994_v54 = vld [vmem:[%s23113_s6 + $0x8a4] ss:$16 sps:$4 sm:$0xff]  }
 0x5d7   : > { %5011 = vmatprep.subr.bf16.mxu1 %v16931_v47  ;;  %v16997_v47 = vld [vmem:[%s23113_s6 + $0x8ac] ss:$16 sps:$4 sm:$0xff]  }
 0x5d9   : > { %4906 = vmatpush1.bf16.msra.mxu0 %v16926_v41  ;;  %v16992_v41 = vld [vmem:[%s23113_s6 + $0x8a0] ss:$16 sps:$4 sm:$0xff]  }
 0x5da   : > { %5012 = vmatpush1.bf16.msra.mxu1 %v16929_v30  ;;  %4907 = vmatprep.subr.bf16.mxu0 %v16934_v56  ;;  %v16995_v30 = vld [vmem:[%s23113_s6 + $0x8a8] ss:$16 sps:$4 sm:$0xff]   ;;  %v17000_v56 = vld [vmem:[%s23113_s6 + $0x8c4] ss:$16 sps:$4 sm:$0xff]  }
 0x5db   : > { %5013 = vmatprep.subr.bf16.mxu1 %v16937_v61  ;;  %v17003_v61 = vld [vmem:[%s23113_s6 + $0x8cc] ss:$16 sps:$4 sm:$0xff]  }
 0x5dd   : > { %4908 = vmatpush1.bf16.msra.mxu0 %v16932_v8  ;;  %v16998_v8 = vld [vmem:[%s23113_s6 + $0x8c0] ss:$16 sps:$4 sm:$0xff]  }
 0x5de   : > { %5014 = vmatpush1.bf16.msra.mxu1 %v16935_v62  ;;  %4909 = vmatprep.subr.bf16.mxu0 %v16940_v63  ;;  %v17001_v62 = vld [vmem:[%s23113_s6 + $0x8c8] ss:$16 sps:$4 sm:$0xff]   ;;  %v17006_v63 = vld [vmem:[%s23113_s6 + $0x8e4] ss:$16 sps:$4 sm:$0xff]  }
 0x5df   : > { %5015 = vmatprep.subr.bf16.mxu1 %v16943_v58  ;;  %v17009_v58 = vld [vmem:[%s23113_s6 + $0x8ec] ss:$16 sps:$4 sm:$0xff]  }
 0x5e1   : > { %4910 = vmatpush1.bf16.msra.mxu0 %v16938_v9  ;;  %v17004_v9 = vld [vmem:[%s23113_s6 + $0x8e0] ss:$16 sps:$4 sm:$0xff]  }
 0x5e2   : > { %5016 = vmatpush1.bf16.msra.mxu1 %v16941_v46  ;;  %4911 = vmatprep.subr.bf16.mxu0 %v16946_v28  ;;  %v17007_v46 = vld [vmem:[%s23113_s6 + $0x8e8] ss:$16 sps:$4 sm:$0xff]   ;;  %v17012_v28 = vld [vmem:[%s23113_s6 + $0x904] ss:$16 sps:$4 sm:$0xff]  }
 0x5e3   : > { %5017 = vmatprep.subr.bf16.mxu1 %v16949_v57  ;;  %v17015_v57 = vld [vmem:[%s23113_s6 + $0x90c] ss:$16 sps:$4 sm:$0xff]  }
 0x5e5   : > { %4912 = vmatpush1.bf16.msra.mxu0 %v16944_v27  ;;  %v17010_v27 = vld [vmem:[%s23113_s6 + $0x900] ss:$16 sps:$4 sm:$0xff]  }
 0x5e6   : > { %5018 = vmatpush1.bf16.msra.mxu1 %v16947_v17  ;;  %4913 = vmatprep.subr.bf16.mxu0 %v16952_v39  ;;  %v17013_v17 = vld [vmem:[%s23113_s6 + $0x908] ss:$16 sps:$4 sm:$0xff]   ;;  %v17018_v39 = vld [vmem:[%s23113_s6 + $0x924] ss:$16 sps:$4 sm:$0xff]  }
 0x5e7   : > { %5019 = vmatprep.subr.bf16.mxu1 %v16955_v52  ;;  %v17021_v52 = vld [vmem:[%s23113_s6 + $0x92c] ss:$16 sps:$4 sm:$0xff]  }
 0x5e9   : > { %4914 = vmatpush1.bf16.msra.mxu0 %v16950_v18  ;;  %v17016_v18 = vld [vmem:[%s23113_s6 + $0x920] ss:$16 sps:$4 sm:$0xff]  }
 0x5ea   : > { %5020 = vmatpush1.bf16.msra.mxu1 %v16953_v48  ;;  %4915 = vmatprep.subr.bf16.mxu0 %v16958_v10  ;;  %v17019_v48 = vld [vmem:[%s23113_s6 + $0x928] ss:$16 sps:$4 sm:$0xff]   ;;  %v17024_v10 = vld [vmem:[%s23113_s6 + $0x944] ss:$16 sps:$4 sm:$0xff]  }
 0x5eb   : > { %5021 = vmatprep.subr.bf16.mxu1 %v16961_v2  ;;  %v17027_v2 = vld [vmem:[%s23113_s6 + $0x94c] ss:$16 sps:$4 sm:$0xff]  }
 0x5ed   : > { %4916 = vmatpush1.bf16.msra.mxu0 %v16956_v29  ;;  %v17022_v29 = vld [vmem:[%s23113_s6 + $0x940] ss:$16 sps:$4 sm:$0xff]  }
 0x5ee   : > { %5022 = vmatpush1.bf16.msra.mxu1 %v16959_v60  ;;  %5950 = vmatprep.subr.bf16.mxu0 %v16964_v16  ;;  %v17025_v60 = vld [vmem:[%s23113_s6 + $0x948] ss:$16 sps:$4 sm:$0xff]   ;;  %v17030_v16 = vld [vmem:[%s23113_s6 + $0x964] ss:$16 sps:$4 sm:$0xff]  }
 0x5ef   : > { %6056 = vmatprep.subr.bf16.mxu1 %v16967_v49  ;;  %v17031_v49 = vld [vmem:[%s23113_s6 + $0x968] ss:$16 sps:$4 sm:$0xff]  }
 0x5f0   : > { %4918 = vmatmul.mubr.bf16.vlgmr.msra.gmra.mrb[16].mxu0 %v2940_v33 }
 0x5f1   : > { %5024 = vmatmul.mubr.bf16.vlgmr.msra.gmra.mrb[16].mxu1 %v2940_v33  ;;  %4927 = vmatprep.mubr.bf16.mxu0 %v2945_v13  ;;  %v17040_v33 = vld [vmem:[%s23113_s6 + $0x9a0] ss:$16 sps:$4 sm:$0xff]  }
 0x5f2   : > { %5033 = vmatprep.mubr.bf16.mxu1 %v2945_v13  ;;  %5951 = vmatpush1.bf16.msra.mxu0 %v16962_v44  ;;  %v17043_v44 = vld [vmem:[%s23113_s6 + $0x9a8] ss:$16 sps:$4 sm:$0xff]   ;;  %v5044_v13 = vld [vmem:[#allocation3] sm:$0xfc] }
 0x5f3   : > { %6057 = vmatpush1.bf16.msra.mxu1 %v16965_v36  ;;  %5952 = vmatprep.subr.bf16.mxu0 %v16970_v25  ;;  %v17048_v36 = vld [vmem:[%s23113_s6 + $0x9c4] ss:$16 sps:$4 sm:$0xff]   ;;  %v17051_v25 = vld [vmem:[%s23113_s6 + $0x9cc] ss:$16 sps:$4 sm:$0xff]   ;;  %v5109_v4 = vrot.slane %v5044_v13, 2 }
 0x5f4   : > { %6058 = vmatprep.subr.bf16.mxu1 %v16973_v50  ;;  %v5048_v50 = vld [vmem:[#allocation3 + $0x20] sm:$0x3]  ;;  %v17081_v13 = vld [vmem:[%s23113_s6 + $0xa6c] ss:$16 sps:$4 sm:$0xff]  }
 0x5f5   : > { %v5110_v3 = vrot.slane %v5048_v50, 2  ;;  %v17079_v50 = vld [vmem:[%s23113_s6 + $0xa68] ss:$16 sps:$4 sm:$0xff]  }
 0x5f6   : > { %5953 = vmatpush1.bf16.msra.mxu0 %v16968_v34  ;;  %v17046_v34 = vld [vmem:[%s23113_s6 + $0x9c0] ss:$16 sps:$4 sm:$0xff]  }
 0x5f7   : > { %6059 = vmatpush1.bf16.msra.mxu1 %v16971_v53  ;;  %5954 = vmatprep.subr.bf16.mxu0 %v16976_v45  ;;  %v5073_v53 = vld [vmem:[#allocation3 + $0xe8] sm:$0x3]  ;;  %v17054_v45 = vld [vmem:[%s23113_s6 + $0x9e4] ss:$16 sps:$4 sm:$0xff]  }
 0x5f8   : > { %4928 = vmatmul.mubr.bf16.gmra.mrb[20].mxu0 %v2944_v12  ;;  %6060 = vmatprep.subr.bf16.mxu1 %v16979_v15  ;;  %v17057_v15 = vld [vmem:[%s23113_s6 + $0x9ec] ss:$16 sps:$4 sm:$0xff]  }
 0x5f9   : > { %5034 = vmatmul.mubr.bf16.gmra.mrb[20].mxu1 %v2944_v12  ;;  %5982 = vmatprep.mubr.bf16.mxu0 %v5174_v40  ;;  %v5121_v12 = vrot.slane %v5052_v7, 2  ;;  %v17084_v7 = vld [vmem:[%s23113_s6 + $0xa84] ss:$16 sps:$4 sm:$0xff]  }
 0x5fa   : > { %5955 = vmatpush1.bf16.msra.mxu0 %v16974_v24  ;;  %6088 = vmatprep.mubr.bf16.mxu1 %v5174_v40  ;;  %v5122_v24 = vrot.slane %v5056_v23, 2  ;;  %v5137_v40 = vrot.slane %v5065_v26, 2  ;;  %v17087_v23 = vld [vmem:[%s23113_s6 + $0xa8c] ss:$16 sps:$4 sm:$0xff]   ;;  %v17085_v26 = vld [vmem:[%s23113_s6 + $0xa88] ss:$16 sps:$4 sm:$0xff]  }
 0x5fb   : > { %6061 = vmatpush1.bf16.msra.mxu1 %v16977_v1  ;;  %5956 = vmatprep.subr.bf16.mxu0 %v16982_v37  ;;  %v5136_v1 = vrot.slane %v5061_v38, 2  ;;  %v5148_v37 = vrot.slane %v5069_v43, 2  ;;  %v17082_v38 = vld [vmem:[%s23113_s6 + $0xa80] ss:$16 sps:$4 sm:$0xff]   ;;  %v17093_v43 = vld [vmem:[%s23113_s6 + $0xaac] ss:$16 sps:$4 sm:$0xff]  }
 0x5fc   : > { %6062 = vmatprep.subr.bf16.mxu1 %v16985_v55  ;;  %v5149_v55 = vrot.slane %v5073_v53, 2  ;;  %v17088_v53 = vld [vmem:[%s23113_s6 + $0xaa0] ss:$16 sps:$4 sm:$0xff]  }
 0x5fe   : > { %5957 = vmatpush1.bf16.msra.mxu0 %v16980_v0  ;;  %v17052_v0 = vld [vmem:[%s23113_s6 + $0x9e0] ss:$16 sps:$4 sm:$0xff]  }
 0x5ff   : > { %6063 = vmatpush1.bf16.msra.mxu1 %v16983_v20  ;;  %5958 = vmatprep.subr.bf16.mxu0 %v16988_v5  ;;  %v17055_v20 = vld [vmem:[%s23113_s6 + $0x9e8] ss:$16 sps:$4 sm:$0xff]   ;;  %v17060_v5 = vld [vmem:[%s23113_s6 + $0xa04] ss:$16 sps:$4 sm:$0xff]  }
 0x600   : > { %6064 = vmatprep.subr.bf16.mxu1 %v16991_v35  ;;  %v5111_v35 = vsel %vm5108_vm15, %v5109_v4, %v5110_v3  ;;  %v17094_v4 = vld [vmem:[%s23113_s6 + $0xac0] ss:$16 sps:$4 sm:$0xff]   ;;  %v17097_v3 = vld [vmem:[%s23113_s6 + $0xac8] ss:$16 sps:$4 sm:$0xff]  }
 0x602   : > { %5959 = vmatpush1.bf16.msra.mxu0 %v16986_v31  ;;  %v5123_v31 = vsel %vm5108_vm15, %v5121_v12, %v5122_v24  ;;  %v17102_v12 = vld [vmem:[%s23113_s6 + $0xae4] ss:$16 sps:$4 sm:$0xff]   ;;  %v17105_v24 = vld [vmem:[%s23113_s6 + $0xaec] ss:$16 sps:$4 sm:$0xff]  }
 0x603   : > { %6065 = vmatpush1.bf16.msra.mxu1 %v16989_v6  ;;  %5960 = vmatprep.subr.bf16.mxu0 %v16994_v54  ;;  %v17063_v6 = vld [vmem:[%s23113_s6 + $0xa0c] ss:$16 sps:$4 sm:$0xff]   ;;  %v5060_v54 = vld [vmem:[#allocation3 + $0x80] sm:$0xfc] }
 0x604   : > { %6066 = vmatprep.subr.bf16.mxu1 %v16997_v47  ;;  %v5064_v47 = vld [vmem:[#allocation3 + $0xa0] sm:$0x3] }
 0x606   : > { %5961 = vmatpush1.bf16.msra.mxu0 %v16992_v41  ;;  %v5138_v41 = vsel %vm5108_vm15, %v5136_v1, %v5137_v40  ;;  %v17100_v1 = vld [vmem:[%s23113_s6 + $0xae0] ss:$16 sps:$4 sm:$0xff]   ;;  %v17103_v40 = vld [vmem:[%s23113_s6 + $0xae8] ss:$16 sps:$4 sm:$0xff]  }
 0x607   : > { %6067 = vmatpush1.bf16.msra.mxu1 %v16995_v30  ;;  %5962 = vmatprep.subr.bf16.mxu0 %v17000_v56  ;;  %v5150_v30 = vsel %vm5108_vm15, %v5148_v37, %v5149_v55  ;;  %v5068_v56 = vld [vmem:[#allocation3 + $0xc0] sm:$0xfc]  ;;  %v17111_v55 = vld [vmem:[%s23113_s6 + $0xb0c] ss:$16 sps:$4 sm:$0xff]  }
 0x608   : > { %6068 = vmatprep.subr.bf16.mxu1 %v17003_v61  ;;  %v5072_v61 = vld [vmem:[#allocation3 + $0xe0] sm:$0x3]  ;;  %v17108_v37 = vld [vmem:[%s23113_s6 + $0xb04] ss:$16 sps:$4 sm:$0xff]  }
 0x60a   : > { %5963 = vmatpush1.bf16.msra.mxu0 %v16998_v8  ;;  %v5047_v8 = vld [vmem:[#allocation3 + $0x18] sm:$0xfc] }
 0x60b   : > { %6069 = vmatpush1.bf16.msra.mxu1 %v17001_v62  ;;  %5964 = vmatprep.subr.bf16.mxu0 %v17006_v63  ;;  %v5051_v62 = vld [vmem:[#allocation3 + $0x38] sm:$0x3]  ;;  %v5055_v63 = vld [vmem:[#allocation3 + $0x58] sm:$0xfc] }
 0x60c   : > { %6070 = vmatprep.subr.bf16.mxu1 %v17009_v58  ;;  %v5059_v58 = vld [vmem:[#allocation3 + $0x78] sm:$0x3] }
 0x60e   : > { %5965 = vmatpush1.bf16.msra.mxu0 %v17004_v9  ;;  %v5173_v9 = vpack.c.bf16 %v5123_v31, %v5111_v35  ;;  %v17117_v35 = vld [vmem:[%s23113_s6 + $0xb2c] ss:$16 sps:$4 sm:$0xff]   ;;  %v17112_v31 = vld [vmem:[%s23113_s6 + $0xb20] ss:$16 sps:$4 sm:$0xff]  }
 0x60f   : > { %6071 = vmatpush1.bf16.msra.mxu1 %v17007_v46  ;;  %5966 = vmatprep.subr.bf16.mxu0 %v17012_v28  ;;  %v17058_v46 = vld [vmem:[%s23113_s6 + $0xa00] ss:$16 sps:$4 sm:$0xff]   ;;  %v5133_v28 = vrot.slane %v5060_v54, 2  ;;  %v17120_v54 = vld [vmem:[%s23113_s6 + $0xb44] ss:$16 sps:$4 sm:$0xff]  }
 0x610   : > { %6072 = vmatprep.subr.bf16.mxu1 %v17015_v57  ;;  %v5134_v57 = vrot.slane %v5064_v47, 2  ;;  %v17123_v47 = vld [vmem:[%s23113_s6 + $0xb4c] ss:$16 sps:$4 sm:$0xff]  }
 0x612   : > { %5967 = vmatpush1.bf16.msra.mxu0 %v17010_v27  ;;  %v17061_v27 = vld [vmem:[%s23113_s6 + $0xa08] ss:$16 sps:$4 sm:$0xff]  }
 0x613   : > { %6073 = vmatpush1.bf16.msra.mxu1 %v17013_v17  ;;  %5968 = vmatprep.subr.bf16.mxu0 %v17018_v39  ;;  %v5178_v17 = vpack.c.bf16 %v5150_v30, %v5138_v41  ;;  %v17066_v39 = vld [vmem:[%s23113_s6 + $0xa24] ss:$16 sps:$4 sm:$0xff]   ;;  %v17118_v41 = vld [vmem:[%s23113_s6 + $0xb40] ss:$16 sps:$4 sm:$0xff]   ;;  %v17121_v30 = vld [vmem:[%s23113_s6 + $0xb48] ss:$16 sps:$4 sm:$0xff]  }
 0x614   : > { %6074 = vmatprep.subr.bf16.mxu1 %v17021_v52  ;;  %v5145_v52 = vrot.slane %v5068_v56, 2  ;;  %v17126_v56 = vld [vmem:[%s23113_s6 + $0xb64] ss:$16 sps:$4 sm:$0xff]  }
 0x616   : > { %5969 = vmatpush1.bf16.msra.mxu0 %v17016_v18  ;;  %v5146_v18 = vrot.slane %v5072_v61, 2  ;;  %v17129_v61 = vld [vmem:[%s23113_s6 + $0xb6c] ss:$16 sps:$4 sm:$0xff]  }
 0x617   : > { %6075 = vmatpush1.bf16.msra.mxu1 %v17019_v48  ;;  %5970 = vmatprep.subr.bf16.mxu0 %v17024_v10  ;;  %v17069_v48 = vld [vmem:[%s23113_s6 + $0xa2c] ss:$16 sps:$4 sm:$0xff]   ;;  %v5118_v10 = vrot.slane %v5047_v8, 2  ;;  %v17124_v8 = vld [vmem:[%s23113_s6 + $0xb60] ss:$16 sps:$4 sm:$0xff]  }
 0x618   : > { %6076 = vmatprep.subr.bf16.mxu1 %v17027_v2  ;;  %v5119_v2 = vrot.slane %v5051_v62, 2  ;;  %v17127_v62 = vld [vmem:[%s23113_s6 + $0xb68] ss:$16 sps:$4 sm:$0xff]  }
 0x61a   : > { %5971 = vmatpush1.bf16.msra.mxu0 %v17022_v29  ;;  %v5130_v29 = vrot.slane %v5055_v63, 2  ;;  %v17132_v63 = vld [vmem:[%s23113_s6 + $0xb84] ss:$16 sps:$4 sm:$0xff]  }
 0x61b   : > { %6077 = vmatpush1.bf16.msra.mxu1 %v17025_v60  ;;  %5972 = vmatprep.subr.bf16.mxu0 %v17030_v16  ;;  %v5131_v60 = vrot.slane %v5059_v58, 2  ;;  %v17064_v16 = vld [vmem:[%s23113_s6 + $0xa20] ss:$16 sps:$4 sm:$0xff]   ;;  %v17135_v58 = vld [vmem:[%s23113_s6 + $0xb8c] ss:$16 sps:$4 sm:$0xff]  }
 0x61c   : > { %6078 = vmatprep.subr.bf16.mxu1 %v17033_v21  ;;  %v17067_v21 = vld [vmem:[%s23113_s6 + $0xa28] ss:$16 sps:$4 sm:$0xff]  }
 0x61e   : > { %5973 = vmatpush1.bf16.msra.mxu0 %v17028_v32  ;;  %v5135_v32 = vsel %vm5108_vm15, %v5133_v28, %v5134_v57  ;;  %v17138_v28 = vld [vmem:[%s23113_s6 + $0xba4] ss:$16 sps:$4 sm:$0xff]   ;;  %v17141_v57 = vld [vmem:[%s23113_s6 + $0xbac] ss:$16 sps:$4 sm:$0xff]  }
 0x61f   : > { %6079 = vmatpush1.bf16.msra.mxu1 %v17031_v49  ;;  %5974 = vmatprep.subr.bf16.mxu0 %v17036_v42  ;;  %v5147_v49 = vsel %vm5108_vm15, %v5145_v52, %v5146_v18  ;;  %v17072_v42 = vld [vmem:[%s23113_s6 + $0xa44] ss:$16 sps:$4 sm:$0xff]   ;;  %v17139_v52 = vld [vmem:[%s23113_s6 + $0xba8] ss:$16 sps:$4 sm:$0xff]  }
 0x620   : > { %6080 = vmatprep.subr.bf16.mxu1 %v17039_v19  ;;  %v17075_v19 = vld [vmem:[%s23113_s6 + $0xa4c] ss:$16 sps:$4 sm:$0xff]   ;;  %v17144_v18 = vld [vmem:[%s23113_s6 + $0xbc4] ss:$16 sps:$4 sm:$0xff]  }
 0x622   : > { %5975 = vmatpush1.bf16.msra.mxu0 %v17034_v22  ;;  %v5120_v22 = vsel %vm5108_vm15, %v5118_v10, %v5119_v2  ;;  %v5054_v10 = vld [vmem:[#allocation3 + $0x50] sm:$0xfc]  ;;  %v5058_v2 = vld [vmem:[#allocation3 + $0x70] sm:$0x3] }
 0x623   : > { %6081 = vmatpush1.bf16.msra.mxu1 %v17037_v59  ;;  %5976 = vmatprep.subr.bf16.mxu0 %v17042_v11  ;;  %v5132_v59 = vsel %vm5108_vm15, %v5130_v29, %v5131_v60  ;;  %v5177_v11 = vpack.c.bf16 %v5147_v49, %v5135_v32  ;;  %v17142_v32 = vld [vmem:[%s23113_s6 + $0xbc0] ss:$16 sps:$4 sm:$0xff]   ;;  %v5071_v49 = vld [vmem:[#allocation3 + $0xd8] sm:$0xfc] }
 0x624   : > { %6082 = vmatprep.subr.bf16.mxu1 %v17045_v51  ;;  %v17070_v51 = vld [vmem:[%s23113_s6 + $0xa40] ss:$16 sps:$4 sm:$0xff]  }
 0x626   : > { %5977 = vmatpush1.bf16.msra.mxu0 %v17040_v33  ;;  %v17073_v33 = vld [vmem:[%s23113_s6 + $0xa48] ss:$16 sps:$4 sm:$0xff]  }
 0x627   : > { %6083 = vmatpush1.bf16.msra.mxu1 %v17043_v44  ;;  %5978 = vmatprep.subr.bf16.mxu0 %v17048_v36  ;;  %v5176_v44 = vpack.c.bf16 %v5132_v59, %v5120_v22  ;;  %v17078_v36 = vld [vmem:[%s23113_s6 + $0xa64] ss:$16 sps:$4 sm:$0xff]   ;;  %v5127_v59 = vrot.slane %v5054_v10, 2 }
 0x628   : > { %6084 = vmatprep.subr.bf16.mxu1 %v17051_v25  ;;  %v17076_v25 = vld [vmem:[%s23113_s6 + $0xa60] ss:$16 sps:$4 sm:$0xff]   ;;  %v17150_v22 = vld [vmem:[%s23113_s6 + $0xbe4] ss:$16 sps:$4 sm:$0xff]  }
 0x62a   : > { %5979 = vmatpush1.bf16.msra.mxu0 %v17046_v34  ;;  %v17090_v34 = vld [vmem:[%s23113_s6 + $0xaa4] ss:$16 sps:$4 sm:$0xff]  }
 0x62b   : > { %6085 = vmatpush1.bf16.msra.mxu1 %v17049_v14  ;;  %5980 = vmatprep.subr.bf16.mxu0 %v17054_v45  ;;  %v17091_v14 = vld [vmem:[%s23113_s6 + $0xaa8] ss:$16 sps:$4 sm:$0xff]   ;;  %v17096_v45 = vld [vmem:[%s23113_s6 + $0xac4] ss:$16 sps:$4 sm:$0xff]  }
 0x62c   : > { %6086 = vmatprep.subr.bf16.mxu1 %v17057_v15  ;;  %v17099_v15 = vld [vmem:[%s23113_s6 + $0xacc] ss:$16 sps:$4 sm:$0xff]  }
 0x62e   : > { %5981 = vmatpush1.bf16.msra.mxu0 %v17052_v0  ;;  %v17106_v0 = vld [vmem:[%s23113_s6 + $0xb00] ss:$16 sps:$4 sm:$0xff]  }
 0x62f   : > { %6087 = vmatpush1.bf16.msra.mxu1 %v17055_v20  ;;  %6003 = vmatprep.subr.bf16.mxu0 %v17060_v5  ;;  %v17109_v20 = vld [vmem:[%s23113_s6 + $0xb08] ss:$16 sps:$4 sm:$0xff]   ;;  %v17114_v5 = vld [vmem:[%s23113_s6 + $0xb24] ss:$16 sps:$4 sm:$0xff]  }
 0x630   : > { %6109 = vmatprep.subr.bf16.mxu1 %v17063_v6  ;;  %v17115_v6 = vld [vmem:[%s23113_s6 + $0xb28] ss:$16 sps:$4 sm:$0xff]  }
 0x631   : > { %5983 = vmatmul.mubr.bf16.vlgmr.msra.gmra.mrb[16].mxu0 %v5173_v9 }
 0x632   : > { %6089 = vmatmul.mubr.bf16.vlgmr.msra.gmra.mrb[16].mxu1 %v5173_v9  ;;  %5992 = vmatprep.mubr.bf16.mxu0 %v5178_v17  ;;  %v17130_v9 = vld [vmem:[%s23113_s6 + $0xb80] ss:$16 sps:$4 sm:$0xff]  }
 0x633   : > { %6004 = vmatpush1.bf16.msra.mxu0 %v17058_v46  ;;  %6098 = vmatprep.mubr.bf16.mxu1 %v5178_v17  ;;  %v17133_v46 = vld [vmem:[%s23113_s6 + $0xb88] ss:$16 sps:$4 sm:$0xff]   ;;  %v5046_v17 = vld [vmem:[#allocation3 + $0x10] sm:$0xfc] }
 0x634   : > { %6110 = vmatpush1.bf16.msra.mxu1 %v17061_v27  ;;  %6005 = vmatprep.subr.bf16.mxu0 %v17066_v39  ;;  %v17136_v27 = vld [vmem:[%s23113_s6 + $0xba0] ss:$16 sps:$4 sm:$0xff]   ;;  %v5115_v29 = vrot.slane %v5046_v17, 2  ;;  %v6459_v17 = vld [vmem:[%s23119_s12 + $0x118] sm:$0xff] }
 0x635   : > { %6111 = vmatprep.subr.bf16.mxu1 %v17069_v48  ;;  %v5050_v39 = vld [vmem:[#allocation3 + $0x30] sm:$0x3]  ;;  %v17147_v48 = vld [vmem:[%s23113_s6 + $0xbcc] ss:$16 sps:$4 sm:$0xff]  }
 0x636   : > { %v5116_v60 = vrot.slane %v5050_v39, 2 }
 0x637   : > { %6006 = vmatpush1.bf16.msra.mxu0 %v17064_v16  ;;  %v5063_v16 = vld [vmem:[#allocation3 + $0x98] sm:$0xfc] }
 0x638   : > { %6112 = vmatpush1.bf16.msra.mxu1 %v17067_v21  ;;  %6007 = vmatprep.subr.bf16.mxu0 %v17072_v42  ;;  %v5067_v21 = vld [vmem:[#allocation3 + $0xb8] sm:$0x3] }
 0x639   : > { %5993 = vmatmul.mubr.bf16.gmra.mrb[20].mxu0 %v5177_v11  ;;  %6113 = vmatprep.subr.bf16.mxu1 %v17075_v19  ;;  %v5075_v42 = vld [vmem:[#allocation3 + $0xf8] sm:$0x3] }
 0x63a   : > { %6099 = vmatmul.mubr.bf16.gmra.mrb[20].mxu1 %v5177_v11  ;;  %6035 = vmatprep.mubr.bf16.mxu0 %v5176_v44  ;;  %v17145_v19 = vld [vmem:[%s23113_s6 + $0xbc8] ss:$16 sps:$4 sm:$0xff]   ;;  %v5128_v11 = vrot.slane %v5058_v2, 2 }
 0x63b   : > { %6008 = vmatpush1.bf16.msra.mxu0 %v17070_v51  ;;  %6141 = vmatprep.mubr.bf16.mxu1 %v5176_v44  ;;  %v17153_v51 = vld [vmem:[%s23113_s6 + $0xbec] ss:$16 sps:$4 sm:$0xff]  }
 0x63c   : > { %6114 = vmatpush1.bf16.msra.mxu1 %v17073_v33  ;;  %6009 = vmatprep.subr.bf16.mxu0 %v17078_v36  ;;  %v6440_v33 = vld [vmem:[%s23119_s12 + $0x80] sm:$0xff]  ;;  %v6441_v44 = vld [vmem:[%s23119_s12 + $0x88] sm:$0xff]  ;;  %v5142_v36 = vrot.slane %v5063_v16, 2 }
 0x63d   : > { %6115 = vmatprep.subr.bf16.mxu1 %v17081_v13  ;;  %v5143_v13 = vrot.slane %v5067_v21, 2  ;;  %v6477_v2 = vld [vmem:[%s23119_s12 + $0x1a8] sm:$0xff] }
 0x63f   : > { %6010 = vmatpush1.bf16.msra.mxu0 %v17076_v25  ;;  %v5154_v25 = vrot.slane %v5071_v49, 2  ;;  %v6461_v49 = vld [vmem:[%s23119_s12 + $0x128] sm:$0xff] }
 0x640   : > { %6116 = vmatpush1.bf16.msra.mxu1 %v17079_v50  ;;  %6011 = vmatprep.subr.bf16.mxu0 %v17084_v7  ;;  %v5155_v50 = vrot.slane %v5075_v42, 2  ;;  %v6472_v7 = vld [vmem:[%s23119_s12 + $0x180] sm:$0xff]  ;;  %v6446_v42 = vld [vmem:[%s23119_s12 + $0xb0] sm:$0xff] }
 0x641   : > { %6117 = vmatprep.subr.bf16.mxu1 %v17087_v23  ;;  %v6473_v23 = vld [vmem:[%s23119_s12 + $0x188] sm:$0xff] }
 0x643   : > { %6012 = vmatpush1.bf16.msra.mxu0 %v17082_v38  ;;  %v17148_v38 = vld [vmem:[%s23113_s6 + $0xbe0] ss:$16 sps:$4 sm:$0xff]  }
 0x644   : > { %6118 = vmatpush1.bf16.msra.mxu1 %v17085_v26  ;;  %6013 = vmatprep.subr.bf16.mxu0 %v17090_v34  ;;  %v5062_v26 = vld [vmem:[#allocation3 + $0x90] sm:$0xfc]  ;;  %v5066_v34 = vld [vmem:[#allocation3 + $0xb0] sm:$0x3] }
 0x645   : > { %6119 = vmatprep.subr.bf16.mxu1 %v17093_v43  ;;  %v17151_v43 = vld [vmem:[%s23113_s6 + $0xbe8] ss:$16 sps:$4 sm:$0xff]  }
 0x647   : > { %6014 = vmatpush1.bf16.msra.mxu0 %v17088_v53  ;;  %v5117_v53 = vsel %vm5108_vm15, %v5115_v29, %v5116_v60  ;;  %v6428_v29 = vld [vmem:[%s23119_s12 + $0x20] sm:$0xff]  ;;  %v6429_v60 = vld [vmem:[%s23119_s12 + $0x28] sm:$0xff] }
 0x648   : > { %6120 = vmatpush1.bf16.msra.mxu1 %v17091_v14  ;;  %6015 = vmatprep.subr.bf16.mxu0 %v17096_v45  ;;  %v5129_v14 = vsel %vm5108_vm15, %v5127_v59, %v5128_v11  ;;  %v5070_v45 = vld [vmem:[#allocation3 + $0xd0] sm:$0xfc]  ;;  %v20948_v21 = vpack.c.bf16 %v6429_v60, %v6428_v29  ;;  %v6479_v11 = vld [vmem:[%s23119_s12 + $0x1b8] sm:$0xff] }
 0x649   : > { %6121 = vmatprep.subr.bf16.mxu1 %v17099_v15  ;;  %v5074_v15 = vld [vmem:[#allocation3 + $0xf0] sm:$0x3]  ;;  %v6455_v29 = vld [vmem:[%s23119_s12 + $0xf8] sm:$0xff] }
 0x64a   : > { %v6478_v59 = vld [vmem:[%s23119_s12 + $0x1b0] sm:$0xff] }
 0x64b   : > { %6016 = vmatpush1.bf16.msra.mxu0 %v17094_v4  ;;  %v20862_v4 = vpack.c.bf16 %v6441_v44, %v6440_v33  ;;  %v20975_v33 = vpack.c.bf16 %v6479_v11, %v6478_v59  ;;  %v6430_v44 = vld [vmem:[%s23119_s12 + $0x30] sm:$0xff]  ;;  %v6439_v59 = vld [vmem:[%s23119_s12 + $0x78] sm:$0xff] }
 0x64c   : > { %6122 = vmatpush1.bf16.msra.mxu1 %v17097_v3  ;;  %6017 = vmatprep.subr.bf16.mxu0 %v17102_v12  ;;  %v20864_v3 = vpack.c.bf16 %v6473_v23, %v6472_v7  ;;  %v6424_v12 = vld [vmem:[%s23119_s12] sm:$0xff]  ;;  %v6486_v60 = vld [vmem:[%s23119_s12 + $0x1f0] sm:$0xff] }
 0x64d   : > { %6123 = vmatprep.subr.bf16.mxu1 %v17105_v24  ;;  %v6425_v24 = vld [vmem:[%s23119_s12 + $0x8] sm:$0xff]  ;;  %23411 = vst [vmem:[#allocation31_spill] sm:$0xff] %v20975_v33  ;;  %v6448_v23 = vld [vmem:[%s23119_s12 + $0xc0] sm:$0xff] }
 0x64f   : > { %6018 = vmatpush1.bf16.msra.mxu0 %v17100_v1  ;;  %v6456_v1 = vld [vmem:[%s23119_s12 + $0x100] sm:$0xff] }
 0x650   : > { %6124 = vmatpush1.bf16.msra.mxu1 %v17103_v40  ;;  %6019 = vmatprep.subr.bf16.mxu0 %v17108_v37  ;;  %v5144_v40 = vsel %vm5108_vm15, %v5142_v36, %v5143_v13  ;;  %v5156_v37 = vsel %vm5108_vm15, %v5154_v25, %v5155_v50  ;;  %v6431_v36 = vld [vmem:[%s23119_s12 + $0x38] sm:$0xff]  ;;  %v6462_v13 = vld [vmem:[%s23119_s12 + $0x130] sm:$0xff] }
 0x651   : > { %6125 = vmatprep.subr.bf16.mxu1 %v17111_v55  ;;  %v6457_v55 = vld [vmem:[%s23119_s12 + $0x108] sm:$0xff]  ;;  %v20989_v25 = vpack.c.bf16 %v6431_v36, %v6430_v44  ;;  %v6463_v50 = vld [vmem:[%s23119_s12 + $0x138] sm:$0xff]  ;;  %v6470_v44 = vld [vmem:[%s23119_s12 + $0x170] sm:$0xff] }
 0x652   : > { %v20994_v7 = vpack.c.bf16 %v6463_v50, %v6462_v13  ;;  %v6471_v36 = vld [vmem:[%s23119_s12 + $0x178] sm:$0xff] }
 0x653   : > { %6020 = vmatpush1.bf16.msra.mxu0 %v17106_v0  ;;  %v6442_v0 = vld [vmem:[%s23119_s12 + $0x90] sm:$0xff]  ;;  %23412 = vst [vmem:[#allocation34_spill] sm:$0xff] %v20989_v25  ;;  %v21137_v50 = vpack.c.bf16 %v6471_v36, %v6470_v44 }
 0x654   : > { %6126 = vmatpush1.bf16.msra.mxu1 %v17109_v20  ;;  %6021 = vmatprep.subr.bf16.mxu0 %v17114_v5  ;;  %v6443_v20 = vld [vmem:[%s23119_s12 + $0x98] sm:$0xff]  ;;  %v5175_v5 = vpack.c.bf16 %v5129_v14, %v5117_v53  ;;  %23413 = vst [vmem:[#allocation33_spill] sm:$0xff] %v20994_v7  ;;  %v6432_v53 = vld [vmem:[%s23119_s12 + $0x40] sm:$0xff]  ;;  %v6433_v14 = vld [vmem:[%s23119_s12 + $0x48] sm:$0xff] }
 0x655   : > { %6127 = vmatprep.subr.bf16.mxu1 %v17117_v35  ;;  %v6474_v35 = vld [vmem:[%s23119_s12 + $0x190] sm:$0xff]  ;;  %23429 = vst [vmem:[#allocation19_spill] sm:$0xff] %v21137_v50 }
 0x657   : > { %6022 = vmatpush1.bf16.msra.mxu0 %v17112_v31  ;;  %v6475_v31 = vld [vmem:[%s23119_s12 + $0x198] sm:$0xff] }
 0x658   : > { %6128 = vmatpush1.bf16.msra.mxu1 %v17115_v6  ;;  %6023 = vmatprep.subr.bf16.mxu0 %v17120_v54  ;;  %v5139_v6 = vrot.slane %v5062_v26, 2  ;;  %v5140_v54 = vrot.slane %v5066_v34, 2  ;;  %v6480_v26 = vld [vmem:[%s23119_s12 + $0x1c0] sm:$0xff] }
 0x659   : > { %6129 = vmatprep.subr.bf16.mxu1 %v17123_v47  ;;  %v5151_v47 = vrot.slane %v5070_v45, 2 }
 0x65b   : > { %6024 = vmatpush1.bf16.msra.mxu0 %v17118_v41  ;;  %v20893_v41 = vpack.c.bf16 %v6425_v24, %v6424_v12  ;;  %v6464_v12 = vld [vmem:[%s23119_s12 + $0x140] sm:$0xff]  ;;  %v6465_v24 = vld [vmem:[%s23119_s12 + $0x148] sm:$0xff] }
 0x65c   : > { %6130 = vmatpush1.bf16.msra.mxu1 %v17121_v30  ;;  %6025 = vmatprep.subr.bf16.mxu0 %v17126_v56  ;;  %v5180_v30 = vpack.c.bf16 %v5156_v37, %v5144_v40  ;;  %v5152_v56 = vrot.slane %v5074_v15, 2  ;;  %v21020_v15 = vpack.c.bf16 %v6433_v14, %v6432_v53  ;;  %v21032_v40 = vpack.c.bf16 %v6465_v24, %v6464_v12  ;;  %v6451_v37 = vld [vmem:[%s23119_s12 + $0xd8] sm:$0xff] }
 0x65d   : > { %6131 = vmatprep.subr.bf16.mxu1 %v17129_v61  ;;  %v20896_v61 = vpack.c.bf16 %v6457_v55, %v6456_v1  ;;  %v6450_v1 = vld [vmem:[%s23119_s12 + $0xd0] sm:$0xff] }
 0x65e   : > { %23416 = vst [vmem:[#allocation17_spill] sm:$0xff] %v21020_v15  ;;  %23417 = vst [vmem:[#allocation35_spill] sm:$0xff] %v21032_v40  ;;  %v6482_v55 = vld [vmem:[%s23119_s12 + $0x1d0] sm:$0xff] }
 0x65f   : > { %6026 = vmatpush1.bf16.msra.mxu0 %v17124_v8  ;;  %v20898_v8 = vpack.c.bf16 %v6443_v20, %v6442_v0  ;;  %v6483_v0 = vld [vmem:[%s23119_s12 + $0x1d8] sm:$0xff]  ;;  %v21045_v20 = vpack.c.bf16 %v6451_v37, %v6450_v1 }
 0x660   : > { %6132 = vmatpush1.bf16.msra.mxu1 %v17127_v62  ;;  %6027 = vmatprep.subr.bf16.mxu0 %v17132_v63  ;;  %v20900_v62 = vpack.c.bf16 %v6475_v31, %v6474_v35  ;;  %v5141_v63 = vsel %vm5108_vm15, %v5139_v6, %v5140_v54  ;;  %v6434_v35 = vld [vmem:[%s23119_s12 + $0x50] sm:$0xff]  ;;  %v6435_v31 = vld [vmem:[%s23119_s12 + $0x58] sm:$0xff] }
 0x661   : > { %6133 = vmatprep.subr.bf16.mxu1 %v17135_v58  ;;  %v5153_v58 = vsel %vm5108_vm15, %v5151_v47, %v5152_v56  ;;  %23418 = vst [vmem:[#allocation56_spill] sm:$0xff] %v21045_v20  ;;  %v6466_v6 = vld [vmem:[%s23119_s12 + $0x150] sm:$0xff]  ;;  %v21059_v54 = vpack.c.bf16 %v6435_v31, %v6434_v35  ;;  %v6467_v47 = vld [vmem:[%s23119_s12 + $0x158] sm:$0xff]  ;;  %v6453_v56 = vld [vmem:[%s23119_s12 + $0xe8] sm:$0xff] }
 0x662   : > { %v23432_v14 = vld [vmem:[#allocation37_spill] sm:$0xff]  ;;  %v23433_v1 = vld [vmem:[#allocation38_spill] sm:$0xff] }
 0x663   : > { %6028 = vmatpush1.bf16.msra.mxu0 %v17130_v9  ;;  %v5179_v9 = vpack.c.bf16 %v5153_v58, %v5141_v63  ;;  %23420 = vst [vmem:[#allocation58_spill] sm:$0xff] %v21059_v54  ;;  %v21072_v63 = vpack.c.bf16 %v6467_v47, %v6466_v6 }
 0x664   : > { %6134 = vmatpush1.bf16.msra.mxu1 %v17133_v46  ;;  %6029 = vmatprep.subr.bf16.mxu0 %v17138_v28  ;;  %v6426_v46 = vld [vmem:[%s23119_s12 + $0x10] sm:$0xff]  ;;  %v6427_v28 = vld [vmem:[%s23119_s12 + $0x18] sm:$0xff] }
 0x665   : > { %6135 = vmatprep.subr.bf16.mxu1 %v17141_v57  ;;  %v6458_v57 = vld [vmem:[%s23119_s12 + $0x110] sm:$0xff]  ;;  %23421 = vst [vmem:[#allocation59_spill] sm:$0xff] %v21072_v63 }
 0x666   : > { %v20922_v39 = vpack.c.bf16 %v6459_v17, %v6458_v57  ;;  %v6437_v17 = vld [vmem:[%s23119_s12 + $0x68] sm:$0xff] }
 0x667   : > { %6030 = vmatpush1.bf16.msra.mxu0 %v17136_v27  ;;  %v20917_v27 = vpack.c.bf16 %v6427_v28, %v6426_v46  ;;  %v6485_v46 = vld [vmem:[%s23119_s12 + $0x1e8] sm:$0xff]  ;;  %v6436_v28 = vld [vmem:[%s23119_s12 + $0x60] sm:$0xff] }
 0x668   : > { %6136 = vmatpush1.bf16.msra.mxu1 %v17139_v52  ;;  %6031 = vmatprep.subr.bf16.mxu0 %v17144_v18  ;;  %v6444_v52 = vld [vmem:[%s23119_s12 + $0xa0] sm:$0xff]  ;;  %v6445_v18 = vld [vmem:[%s23119_s12 + $0xa8] sm:$0xff] }
 0x669   : > { %6137 = vmatprep.subr.bf16.mxu1 %v17147_v48  ;;  %v6476_v48 = vld [vmem:[%s23119_s12 + $0x1a0] sm:$0xff]  ;;  %v20935_v10 = vpack.c.bf16 %v6445_v18, %v6444_v52  ;;  %v6469_v18 = vld [vmem:[%s23119_s12 + $0x168] sm:$0xff] }
 0x66a   : > { %v20946_v16 = vpack.c.bf16 %v6477_v2, %v6476_v48  ;;  %v6468_v52 = vld [vmem:[%s23119_s12 + $0x160] sm:$0xff]  ;;  %v21097_v48 = vpack.c.bf16 %v6437_v17, %v6436_v28  ;;  %v6454_v2 = vld [vmem:[%s23119_s12 + $0xf0] sm:$0xff] }
 0x66b   : > { %6032 = vmatpush1.bf16.msra.mxu0 %v17142_v32  ;;  %v6460_v32 = vld [vmem:[%s23119_s12 + $0x120] sm:$0xff] }
 0x66c   : > { %6138 = vmatpush1.bf16.msra.mxu1 %v17145_v19  ;;  %6033 = vmatprep.subr.bf16.mxu0 %v17150_v22  ;;  %v20960_v19 = vpack.c.bf16 %v6461_v49, %v6460_v32  ;;  %v6447_v22 = vld [vmem:[%s23119_s12 + $0xb8] sm:$0xff]  ;;  %23424 = vst [vmem:[#allocation62_spill] sm:$0xff] %v21097_v48  ;;  %v21110_v32 = vpack.c.bf16 %v6469_v18, %v6468_v52 }
 0x66d   : > { %6139 = vmatprep.subr.bf16.mxu1 %v17153_v51  ;;  %v20973_v51 = vpack.c.bf16 %v6447_v22, %v6446_v42  ;;  %v21112_v49 = vpack.c.bf16 %v6455_v29, %v6454_v2  ;;  %v6487_v42 = vld [vmem:[%s23119_s12 + $0x1f8] sm:$0xff]  ;;  %v6438_v22 = vld [vmem:[%s23119_s12 + $0x70] sm:$0xff] }
 0x66e   : > { %23425 = vst [vmem:[#allocation63_spill] sm:$0xff] %v21110_v32  ;;  %v21124_v11 = vpack.c.bf16 %v6487_v42, %v6486_v60  ;;  %v21133_v13 = vpack.c.bf16 %v6439_v59, %v6438_v22 }
 0x66f   : > { %6034 = vmatpush1.bf16.msra.mxu0 %v17148_v38  ;;  %23410 = vst [vmem:[#allocation68_spill] sm:$0xff] %v20973_v51  ;;  %v6449_v38 = vld [vmem:[%s23119_s12 + $0xc8] sm:$0xff]  ;;  %23426 = vst [vmem:[#allocation64_spill] sm:$0xff] %v21112_v49 }
 0x670   : > { %6140 = vmatpush1.bf16.msra.mxu1 %v17151_v43  ;;  %16155 = vmatprep.subr.bf16.mxu0 %v20862_v4  ;;  %v21007_v34 = vpack.c.bf16 %v6449_v38, %v6448_v23  ;;  %v6481_v43 = vld [vmem:[%s23119_s12 + $0x1c8] sm:$0xff]  ;;  %23427 = vst [vmem:[#allocation20_spill] sm:$0xff] %v21124_v11  ;;  %23428 = vst [vmem:[#allocation65_spill] sm:$0xff] %v21133_v13  ;;  %v6178_v23 = vld [vmem:[%s23114_s7] sm:$0xf] }
 0x671   : > { %16187 = vmatprep.subr.bf16.mxu1 %v20864_v3  ;;  %v21018_v45 = vpack.c.bf16 %v6481_v43, %v6480_v26  ;;  %v23430_v38 = vld [vmem:[#allocation15_spill] sm:$0xff]  ;;  %v23431_v43 = vld [vmem:[#allocation36_spill] sm:$0xff]  ;;  %v21154_v12 = vrot.slane %v6178_v23, %v23432_v14  ;;  %v21157_v37 = vrot.slane %v6178_v23, %v23433_v1 }
 0x672   : > { %6036 = vmatmul.mubr.bf16.vlgmr.msra.gmra.mrb[16].mxu0 %v5175_v5  ;;  %23414 = vst [vmem:[#allocation18_spill] sm:$0xff] %v21007_v34  ;;  %v21148_v26 = vrot.slane %v6178_v23, %v23430_v38  ;;  %v21151_v53 = vrot.slane %v6178_v23, %v23431_v43 }
 0x673   : > { %6142 = vmatmul.mubr.bf16.vlgmr.msra.gmra.mrb[16].mxu1 %v5175_v5  ;;  %6045 = vmatprep.mubr.bf16.mxu0 %v5180_v30  ;;  %23415 = vst [vmem:[#allocation49_spill] sm:$0xff] %v21018_v45  ;;  %v21047_v5 = vpack.c.bf16 %v6483_v0, %v6482_v55 }
 0x674   : > { %6151 = vmatprep.mubr.bf16.mxu1 %v5180_v30  ;;  %16157 = vmatpush3.bf16.msra.mxu0 %v20893_v41  ;;  %v6452_v30 = vld [vmem:[%s23119_s12 + $0xe0] sm:$0xff] }
 0x675   : > { %16189 = vmatpush3.bf16.msra.mxu1 %v20896_v61  ;;  %16159 = vmatprep.subr.bf16.mxu0 %v20898_v8  ;;  %23419 = vst [vmem:[#allocation57_spill] sm:$0xff] %v21047_v5  ;;  %v21074_v58 = vpack.c.bf16 %v6453_v56, %v6452_v30 }
 0x676   : > { %16191 = vmatprep.subr.bf16.mxu1 %v20900_v62 }
 0x677   : > { %23422 = vst [vmem:[#allocation60_spill] sm:$0xff] %v21074_v58 }
 0x678   : > { %16161 = vmatpush3.bf16.msra.mxu0 %v20917_v27 }
 0x679   : > { %16193 = vmatpush3.bf16.msra.mxu1 %v20922_v39  ;;  %16163 = vmatprep.subr.bf16.mxu0 %v20935_v10 }
 0x67a   : > { %6046 = vmatmul.mubr.bf16.gmra.mrb[20].mxu0 %v5179_v9  ;;  %16195 = vmatprep.subr.bf16.mxu1 %v20946_v16 }
 0x67b   : > { %6152 = vmatmul.mubr.bf16.gmra.mrb[20].mxu1 %v5179_v9  ;;  %v6484_v9 = vld [vmem:[%s23119_s12 + $0x1e0] sm:$0xff] }
 0x67c   : > { %16165 = vmatpush3.bf16.msra.mxu0 %v20948_v21  ;;  %v21085_v57 = vpack.c.bf16 %v6485_v46, %v6484_v9 }
 0x67d   : > { %16197 = vmatpush3.bf16.msra.mxu1 %v20960_v19  ;;  %16167 = vmatprep.subr.bf16.mxu0 %v20973_v51 }
 0x67e   : > { %16199 = vmatprep.subr.bf16.mxu1 %v20975_v33  ;;  %23423 = vst [vmem:[#allocation61_spill] sm:$0xff] %v21085_v57 }
 0x680   : > { %16169 = vmatpush3.bf16.msra.mxu0 %v20989_v25 }
 0x681   : > { %16201 = vmatpush3.bf16.msra.mxu1 %v20994_v7  ;;  %16171 = vmatprep.subr.bf16.mxu0 %v21007_v34 }
 0x682   : > { %16203 = vmatprep.subr.bf16.mxu1 %v21018_v45 }
 0x684   : > { %16173 = vmatpush3.bf16.msra.mxu0 %v21020_v15 }
 0x685   : > { %16205 = vmatpush3.bf16.msra.mxu1 %v21032_v40  ;;  %16175 = vmatprep.subr.bf16.mxu0 %v21045_v20 }
 0x686   : > { %16207 = vmatprep.subr.bf16.mxu1 %v21047_v5 }
 0x688   : > { %16177 = vmatpush3.bf16.msra.mxu0 %v21059_v54 }
 0x689   : > { %16209 = vmatpush3.bf16.msra.mxu1 %v21072_v63  ;;  %16179 = vmatprep.subr.bf16.mxu0 %v21074_v58 }
 0x68a   : > { %16211 = vmatprep.subr.bf16.mxu1 %v21085_v57 }
 0x68c   : > { %16181 = vmatpush3.bf16.msra.mxu0 %v21097_v48 }
 0x68d   : > { %16213 = vmatpush3.bf16.msra.mxu1 %v21110_v32  ;;  %16183 = vmatprep.subr.bf16.mxu0 %v21112_v49 }
 0x68e   : > { %16215 = vmatprep.subr.bf16.mxu1 %v21124_v11 }
 0x690   : > { %16185 = vmatpush3.bf16.msra.mxu0 %v21133_v13 }
 0x691   : > { %16217 = vmatpush3.bf16.msra.mxu1 %v21137_v50  ;;  %16219 = vmatprep.subr.bf16.mxu0 %v20862_v4 }
 0x692   : > { %16251 = vmatprep.subr.bf16.mxu1 %v20864_v3 }
 0x745   : > { %v6037_v24 = vpop.f32.mrb[16].mxu0 }
 0x746   : > { %v21160_v4 = vadd.f32 %v21148_v26, %v6037_v24  ;;  %v6143_v3 = vpop.f32.mrb[16].mxu1  ;;  %v6039_v55 = vpop.f32.mrb[17].mxu0 }
 0x747   : > { %v21163_v0 = vadd.f32 %v21151_v53, %v6143_v3  ;;  %v21166_v35 = vadd.f32 %v21154_v12, %v6039_v55  ;;  %v6145_v31 = vpop.f32.mrb[17].mxu1  ;;  %v6041_v6 = vpop.f32.mrb[18].mxu0 }
 0x748   : > { %23434 = vst [vmem:[#allocation66_spill] sm:$0xff] %v21160_v4  ;;  %v6216_v47 = vrot.slane %v21160_v4, 4  ;;  %v6147_v30 = vpop.f32.mrb[18].mxu1  ;;  %v6043_v56 = vpop.f32.mrb[19].mxu0  ;;  %v21170_v9 = vadd.f32 %v21157_v37, %v6145_v31  ;;  %v21182_v22 = vadd.f32 %v21148_v26, %v6041_v6 }
 0x749   : > { %23435 = vst [vmem:[#allocation22_spill] sm:$0xff] %v21163_v0  ;;  %23436 = vst [vmem:[#allocation21_spill] sm:$0xff] %v21166_v35  ;;  %v6149_v46 = vpop.f32.mrb[19].mxu1  ;;  %v6228_v28 = vrot.slane %v21163_v0, 4  ;;  %v6222_v17 = vrot.slane %v21166_v35, 4  ;;  %v6313_v18 = vmul.f32 %v21166_v35, %v21166_v35 }
 0x74a   : > { %23437 = vst [vmem:[#allocation67_spill] sm:$0xff] %v21170_v9  ;;  %v6217_v52 = vadd.f32 %v6216_v47, %v21160_v4  ;;  %v6234_v2 = vrot.slane %v21170_v9, 4  ;;  %v6315_v42 = vmul.f32 %v21170_v9, %v21170_v9  ;;  %23438 = vst [vmem:[#allocation24_spill] sm:$0xff] %v21182_v22  ;;  %v6240_v14 = vrot.slane %v21182_v22, 4 }
 0x74b   : > { %v6229_v60 = vadd.f32 %v6228_v28, %v21163_v0  ;;  %v6223_v36 = vadd.f32 %v6222_v17, %v21166_v35  ;;  %v6334_v55 = vrot.slane %v6313_v18, 4  ;;  %v21200_v17 = vadd.f32 %v21151_v53, %v6147_v30 }
 0x74c   : > { %v6218_v3 = vrot.slane %v6217_v52, 2  ;;  %v6235_v28 = vadd.f32 %v6234_v2, %v21170_v9  ;;  %v6346_v43 = vrot.slane %v6315_v42, 4  ;;  %v21203_v35 = vadd.f32 %v21154_v12, %v6043_v56 }
 0x74d   : > { %v6047_v29 = vpop.f32.mrb[20].mxu0  ;;  %v6230_v6 = vrot.slane %v6229_v60, 2  ;;  %v6224_v38 = vrot.slane %v6223_v36, 2  ;;  %23439 = vst [vmem:[#allocation23_spill] sm:$0xff] %v21200_v17  ;;  %v6335_v13 = vadd.f32 %v6334_v55, %v6313_v18  ;;  %v6241_v11 = vadd.f32 %v6240_v14, %v21182_v22 }
 0x74e   : > { %v6153_v59 = vpop.f32.mrb[20].mxu1  ;;  %v21184_v44 = vpop.f32.mrb[21].mxu0  ;;  %23440 = vst [vmem:[#allocation26_spill] sm:$0xff] %v21203_v35  ;;  %v6219_v50 = vadd.f32 %v6218_v3, %v6217_v52  ;;  %v21207_v49 = vadd.f32 %v21157_v37, %v6149_v46  ;;  %v21211_v2 = vmul.f32 %v21160_v4, %v21160_v4  ;;  %v6236_v9 = vrot.slane %v6235_v28, 2 }
 0x74f   : > { %v21187_v23 = vpop.f32.mrb[21].mxu1  ;;  %v21189_v24 = vpop.f32.mrb[22].mxu0  ;;  %v6252_v32 = vrot.slane %v21200_v17, 4  ;;  %v6246_v30 = vrot.slane %v21203_v35, 4  ;;  %v6231_v48 = vadd.f32 %v6230_v6, %v6229_v60  ;;  %v6347_v57 = vadd.f32 %v6346_v43, %v6315_v42 }
 0x750   : > { %v21191_v31 = vpop.f32.mrb[22].mxu1  ;;  %v21193_v47 = vpop.f32.mrb[23].mxu0  ;;  %23441 = vst [vmem:[#allocation25_spill] sm:$0xff] %v21207_v49  ;;  %v6317_v56 = vmul.f32 %v21203_v35, %v21203_v35  ;;  %v6258_v52 = vrot.slane %v21207_v49, 4  ;;  %v21220_v14 = vmul.f32 %v21163_v0, %v21163_v0  ;;  %v21222_v46 = vadd.f32 %v6224_v38, %v6223_v36 }
 0x751   : > { %v21196_v1 = vpop.f32.mrb[23].mxu1  ;;  %v6253_v18 = vadd.f32 %v6252_v32, %v21200_v17  ;;  %v6319_v3 = vmul.f32 %v21207_v49, %v21207_v49  ;;  %v6220_v55 = vrot.slane %v6219_v50, 1  ;;  %v6336_v4 = vrot.slane %v6335_v13, 2 }
 0x752   : > { %v6242_v60 = vrot.slane %v6241_v11, 2  ;;  %v6247_v43 = vadd.f32 %v6246_v30, %v21203_v35  ;;  %v21228_v42 = vadd.f32 %v6236_v9, %v6235_v28  ;;  %v6358_v6 = vrot.slane %v6317_v56, 4 }
 0x753   : > { %v6259_v58 = vadd.f32 %v6258_v52, %v21207_v49  ;;  %v21232_v0 = vadd.f32 %v21148_v26, %v6047_v29  ;;  %v6232_v36 = vrot.slane %v6231_v48, 1  ;;  %v6348_v32 = vrot.slane %v6347_v57, 2 }
 0x754   : > { %v6316_v63 = vmul.f32 %v21182_v22, %v21182_v22  ;;  %v6254_v5 = vrot.slane %v6253_v18, 2  ;;  %v6370_v20 = vrot.slane %v6319_v3, 4  ;;  %v21239_v9 = vadd.f32 %v21151_v53, %v6153_v59 }
 0x755   : > { %v21241_v28 = vadd.f32 %v6220_v55, %v6219_v50  ;;  %v21243_v30 = vadd.f32 %v6336_v4, %v6335_v13  ;;  %v6243_v29 = vadd.f32 %v6242_v60, %v6241_v11  ;;  %v6248_v52 = vrot.slane %v6247_v43, 2 }
 0x756   : > { %v6359_v49 = vadd.f32 %v6358_v6, %v6317_v56  ;;  %v6260_v35 = vrot.slane %v6259_v58, 2  ;;  %v6264_v40 = vrot.slane %v21232_v0, 4  ;;  %v21247_v22 = vadd.f32 %v6232_v36, %v6231_v48 }
 0x757   : > { %v21249_v54 = vadd.f32 %v6348_v32, %v6347_v57  ;;  %v6352_v15 = vrot.slane %v6316_v63, 4  ;;  %v21253_v59 = vmul.f32 %v21200_v17, %v21200_v17  ;;  %v6255_v50 = vadd.f32 %v6254_v5, %v6253_v18 }
 0x758   : > { %v6371_v13 = vadd.f32 %v6370_v20, %v6319_v3  ;;  %v6265_v11 = vadd.f32 %v6264_v40, %v21232_v0  ;;  %v6276_v4 = vrot.slane %v21239_v9, 4  ;;  %v6244_v55 = vrot.slane %v6243_v29, 1 }
 0x759   : > { %v6249_v56 = vadd.f32 %v6248_v52, %v6247_v43  ;;  %v21259_v60 = vadd.f32 %v21154_v12, %v21184_v44  ;;  %v21263_v57 = vadd.f32 %v21157_v37, %v21187_v23  ;;  %v6360_v48 = vrot.slane %v6359_v49, 2 }
 0x75a   : > { %v6261_v6 = vadd.f32 %v6260_v35, %v6259_v58  ;;  %v6266_v36 = vrot.slane %v6265_v11, 2  ;;  %v6277_v5 = vadd.f32 %v6276_v4, %v21239_v9  ;;  %v21272_v44 = vadd.f32 %v21148_v26, %v21189_v24 }
 0x75b   : > { %23442 = vst [vmem:[#allocation28_spill] sm:$0xff] %v21259_v60  ;;  %23443 = vst [vmem:[#allocation27_spill] sm:$0xff] %v21263_v57  ;;  %v6270_v20 = vrot.slane %v21259_v60, 4  ;;  %v6321_v40 = vmul.f32 %v21259_v60, %v21259_v60  ;;  %v6282_v18 = vrot.slane %v21263_v57, 4  ;;  %v6256_v3 = vrot.slane %v6255_v50, 1 }
 0x75c   : > { %v6372_v43 = vrot.slane %v6371_v13, 2  ;;  %v6278_v23 = vrot.slane %v6277_v5, 2  ;;  %v21276_v58 = vadd.f32 %v21151_v53, %v21191_v31  ;;  %v6245_v35 = vadd.f32 %v6244_v55, %v6243_v29 }
 0x75d   : > { %v21278_v32 = vadd.f32 %v6352_v15, %v6316_v63  ;;  %v6323_v4 = vmul.f32 %v21263_v57, %v21263_v57  ;;  %v6250_v38 = vrot.slane %v6249_v56, 1  ;;  %v6267_v17 = vadd.f32 %v6266_v36, %v6265_v11 }
 0x75e   : > { %v6271_v26 = vadd.f32 %v6270_v20, %v21259_v60  ;;  %v6382_v24 = vrot.slane %v6321_v40, 4  ;;  %v21284_v45 = vadd.f32 %v6360_v48, %v6359_v49  ;;  %v6262_v34 = vrot.slane %v6261_v6, 1 }
 0x75f   : > { %23444 = vst [vmem:[#allocation30_spill] sm:$0xff] %v21278_v32  ;;  %v6283_v7 = vadd.f32 %v6282_v18, %v21263_v57  ;;  %v6288_v53 = vrot.slane %v21272_v44, 4  ;;  %v6257_v31 = vadd.f32 %v6256_v3, %v6255_v50  ;;  %v21288_v15 = vadd.f32 %v6372_v43, %v6371_v13 }
 0x760   : > { %v6279_v63 = vadd.f32 %v6278_v23, %v6277_v5  ;;  %v6300_v29 = vrot.slane %v21276_v58, 4  ;;  %v6394_v55 = vrot.slane %v6323_v4, 4  ;;  %v21294_v11 = vadd.f32 %v21154_v12, %v21193_v47 }
 0x761   : > { %v6289_v52 = vadd.f32 %v6288_v53, %v21272_v44  ;;  %v21298_v49 = vadd.f32 %v21157_v37, %v21196_v1  ;;  %v6268_v48 = vrot.slane %v6267_v17, 1  ;;  %v6272_v36 = vrot.slane %v6271_v26, 2 }
 0x762   : > { %23445 = vst [vmem:[#allocation29_spill] sm:$0xff] %v21294_v11  ;;  %v6383_v20 = vadd.f32 %v6382_v24, %v6321_v40  ;;  %v6301_v50 = vadd.f32 %v6300_v29, %v21276_v58  ;;  %v6284_v13 = vrot.slane %v6283_v7, 2  ;;  %v6294_v18 = vrot.slane %v21294_v11, 4 }
 0x763   : > { %23446 = vst [vmem:[#allocation32_spill] sm:$0xff] %v21298_v49  ;;  %v6290_v5 = vrot.slane %v6289_v52, 2  ;;  %v6325_v3 = vmul.f32 %v21294_v11, %v21294_v11  ;;  %v6280_v43 = vrot.slane %v6279_v63, 1  ;;  %v6306_v12 = vrot.slane %v21298_v49, 4 }
 0x764   : > { %v6302_v23 = vrot.slane %v6301_v50, 2  ;;  %v6251_v47 = vadd.f32 %v6250_v38, %v6249_v56  ;;  %v21305_v53 = vadd.f32 %v6394_v55, %v6323_v4  ;;  %v6295_v37 = vadd.f32 %v6294_v18, %v21294_v11 }
 0x765   : > { %v6291_v1 = vadd.f32 %v6290_v5, %v6289_v52  ;;  %v23447_v40 = vrot.slane %v21222_v46, 1  ;;  %v6406_v29 = vrot.slane %v6325_v3, 4  ;;  %v6307_v57 = vadd.f32 %v6306_v12, %v21298_v49 }
 0x766   : > { %v6327_v60 = vmul.f32 %v21298_v49, %v21298_v49  ;;  %v6273_v25 = vadd.f32 %v6272_v36, %v6271_v26  ;;  %v6303_v33 = vadd.f32 %v6302_v23, %v6301_v50  ;;  %v6296_v32 = vrot.slane %v6295_v37, 2 }
 0x767   : > { %v6227_v24 = vadd.f32 %v23447_v40, %v21222_v46  ;;  %v23448_v38 = vrot.slane %v21228_v42, 1  ;;  %v6263_v52 = vadd.f32 %v6262_v34, %v6261_v6  ;;  %v6285_v5 = vadd.f32 %v6284_v13, %v6283_v7 }
 0x768   : > { %v6274_v4 = vrot.slane %v6273_v25, 1  ;;  %v6308_v18 = vrot.slane %v6307_v57, 2  ;;  %v6297_v46 = vadd.f32 %v6296_v32, %v6295_v37  ;;  %v6269_v12 = vadd.f32 %v6268_v48, %v6267_v17 }
 0x769   : > { %v6239_v56 = vadd.f32 %v23448_v38, %v21228_v42  ;;  %v6507_v55 = vsel %vm23236_vm2, %v6251_v47, %v6227_v24  ;;  %v6292_v11 = vrot.slane %v6291_v1, 1  ;;  %v6286_v49 = vrot.slane %v6285_v5, 1 }
 0x76a   : > { %v6275_v51 = vadd.f32 %v6274_v4, %v6273_v25  ;;  %v6309_v26 = vadd.f32 %v6308_v18, %v6307_v57  ;;  %v6504_v36 = vsel %vm23236_vm2, %v6245_v35, %v21241_v28  ;;  %v6298_v50 = vrot.slane %v6297_v46, 1 }
 0x76b   : > { %v6513_v40 = vsel %vm23236_vm2, %v6263_v52, %v6239_v56  ;;  %v6293_v23 = vadd.f32 %v6292_v11, %v6291_v1  ;;  %v6281_v42 = vadd.f32 %v6280_v43, %v6279_v63  ;;  %v6304_v34 = vrot.slane %v6303_v33, 1 }
 0x76c   : > { %v6508_v6 = vsel %vm23235_vm3, %v6275_v51, %v6507_v55  ;;  %v6287_v47 = vadd.f32 %v6286_v49, %v6285_v5  ;;  %v6310_v7 = vrot.slane %v6309_v26, 1  ;;  %v6510_v32 = vsel %vm23236_vm2, %v6257_v31, %v21247_v22 }
 0x76d   : > { %v6299_v13 = vadd.f32 %v6298_v50, %v6297_v46  ;;  %v6505_v17 = vsel %vm23235_vm3, %v6269_v12, %v6504_v36  ;;  %v6305_v25 = vadd.f32 %v6304_v34, %v6303_v33  ;;  %v6511_v57 = vsel %vm23235_vm3, %v6281_v42, %v6510_v32 }
 0x76e   : > { %v6418_v48 = vrot.slane %v6327_v60, 4  ;;  %v6311_v37 = vadd.f32 %v6310_v7, %v6309_v26  ;;  %v6514_v28 = vsel %vm23235_vm3, %v6287_v47, %v6513_v40  ;;  %v6362_v35 = vrot.slane %v21284_v45, 1 }
 0x76f   : > { %v6320_v51 = vmul.f32 %v21232_v0, %v21232_v0  ;;  %v6509_v63 = vsel %vm23449_vm6, %v6299_v13, %v6508_v6  ;;  %v6384_v11 = vrot.slane %v6383_v20, 2  ;;  %v6407_v49 = vadd.f32 %v6406_v29, %v6325_v3 }
 0x770   : > { %6584 = vmatprep.mubr.f32.mxu0 %v6509_v63  ;;  %v6515_v22 = vsel %vm23450_vm7, %v6311_v37, %v6514_v28  ;;  %v6506_v33 = vsel %vm23451_vm8, %v6293_v23, %v6505_v17  ;;  %v6512_v31 = vsel %vm23452_vm9, %v6305_v25, %v6511_v57  ;;  %v6338_v43 = vrot.slane %v21243_v30, 1  ;;  %v23457_v57 = vld [vmem:[#allocation30_spill] sm:$0xff] }
 0x771   : > { %6654 = vmatprep.mubr.f32.mxu1 %v6515_v22  ;;  %6585 = vmatmul.mubr.f32.vlgmr.msra.gmra.mrb[14].mxu0 %v6506_v33  ;;  %v6385_v1 = vadd.f32 %v6384_v11, %v6383_v20  ;;  %v6408_v24 = vrot.slane %v6407_v49, 2  ;;  %v6374_v38 = vrot.slane %v21288_v15, 1  ;;  %v6396_v56 = vrot.slane %v21305_v53, 2  ;;  %v23461_v22 = vld [vmem:[#allocation33_spill] sm:$0xff] }
 0x772   : > { %v6322_v3 = vmul.f32 %v21239_v9, %v21239_v9  ;;  %6655 = vmatmul.mubr.f32.vlgmr.msra.gmra.mrb[14].mxu1 %v6512_v31  ;;  %16221 = vmatpush3.bf16.msra.mxu0 %v20893_v41  ;;  %v6363_v29 = vadd.f32 %v6362_v35, %v21284_v45  ;;  %v6350_v52 = vrot.slane %v21249_v54, 1  ;;  %v6419_v4 = vadd.f32 %v6418_v48, %v6327_v60  ;;  %v23459_v35 = vld [vmem:[#allocation31_spill] sm:$0xff]  ;;  %v23463_v31 = vld [vmem:[#allocation49_spill] sm:$0xff] }
 0x773   : > { %v6376_v55 = vrot.slane %v6320_v51, 4  ;;  %16253 = vmatpush3.bf16.msra.mxu1 %v20896_v61  ;;  %v6386_v20 = vrot.slane %v6385_v1, 1  ;;  %v6409_v5 = vadd.f32 %v6408_v24, %v6407_v49  ;;  %v6397_v18 = vadd.f32 %v6396_v56, %v21305_v53  ;;  %16223 = vmatprep.subr.bf16.mxu0 %v20898_v8 }
 0x774   : > { %v6324_v46 = vmul.f32 %v21272_v44, %v21272_v44  ;;  %v6339_v40 = vadd.f32 %v6338_v43, %v21243_v30  ;;  %v6375_v41 = vadd.f32 %v6374_v38, %v21288_v15  ;;  %v6420_v45 = vrot.slane %v6419_v4, 2  ;;  %16255 = vmatprep.subr.bf16.mxu1 %v20900_v62 }
 0x775   : > { %v6326_v60 = vmul.f32 %v21276_v58, %v21276_v58  ;;  %v6387_v61 = vadd.f32 %v6386_v20, %v6385_v1  ;;  %v6410_v12 = vrot.slane %v6409_v5, 1  ;;  %v6398_v26 = vrot.slane %v6397_v18, 1  ;;  %v23467_v20 = vld [vmem:[#allocation57_spill] sm:$0xff] }
 0x776   : > { %v6388_v36 = vrot.slane %v6322_v3, 4  ;;  %v6679_v53 = vsel %vm23236_vm2, %v6363_v29, %v6339_v40  ;;  %v6351_v8 = vadd.f32 %v6350_v52, %v21249_v54  ;;  %v6421_v50 = vadd.f32 %v6420_v45, %v6419_v4  ;;  %16225 = vmatpush3.bf16.msra.mxu0 %v20917_v27  ;;  %v23465_v4 = vld [vmem:[#allocation35_spill] sm:$0xff]  ;;  %v23468_v45 = vld [vmem:[#allocation58_spill] sm:$0xff] }
 0x777   : > { %v6340_v30 = vrot.slane %v21220_v14, 4  ;;  %v6411_v15 = vadd.f32 %v6410_v12, %v6409_v5  ;;  %v6680_v23 = vsel %vm23235_vm3, %v6387_v61, %v6679_v53  ;;  %v6399_v62 = vadd.f32 %v6398_v26, %v6397_v18  ;;  %16257 = vmatpush3.bf16.msra.mxu1 %v20922_v39  ;;  %16227 = vmatprep.subr.bf16.mxu0 %v20935_v10  ;;  %v23469_v12 = vld [vmem:[#allocation59_spill] sm:$0xff]  ;;  %v23470_v26 = vld [vmem:[#allocation60_spill] sm:$0xff]  ;;  %v23471_v53 = vld [vmem:[#allocation61_spill] sm:$0xff] }
 0x778   : > { %v23453_v42 = vrot.slane %v21253_v59, 4  ;;  %v6400_v6 = vrot.slane %v6324_v46, 4  ;;  %v6422_v47 = vrot.slane %v6421_v50, 1  ;;  %v6685_v54 = vsel %vm23236_vm2, %v6375_v41, %v6351_v8  ;;  %16259 = vmatprep.subr.bf16.mxu1 %v20946_v16  ;;  %v23456_v16 = vld [vmem:[#allocation68_spill] sm:$0xff] }
 0x779   : > { %v6377_v27 = vadd.f32 %v6376_v55, %v6320_v51  ;;  %v6412_v7 = vrot.slane %v6326_v60, 4  ;;  %v6681_v32 = vsel %vm23454_vm10, %v6411_v15, %v6680_v23  ;;  %v6686_v13 = vsel %vm23235_vm3, %v6399_v62, %v6685_v54  ;;  %v23466_v55 = vld [vmem:[#allocation56_spill] sm:$0xff]  ;;  %v23472_v62 = vld [vmem:[#allocation62_spill] sm:$0xff] }
 0x77a   : > { %v6365_v34 = vadd.f32 %v23453_v42, %v21253_v59  ;;  %v23455_v39 = vrot.slane %v21211_v2, 4  ;;  %v6389_v17 = vadd.f32 %v6388_v36, %v6322_v3  ;;  %6756 = vmatprep.mubr.f32.mxu0 %v6681_v32  ;;  %v6423_v25 = vadd.f32 %v6422_v47, %v6421_v50  ;;  %16229 = vmatpush3.bf16.msra.mxu0 %v20948_v21  ;;  %v23460_v21 = vld [vmem:[#allocation34_spill] sm:$0xff]  ;;  %v23464_v3 = vld [vmem:[#allocation17_spill] sm:$0xff]  ;;  %v23474_v47 = vld [vmem:[#allocation64_spill] sm:$0xff] }
 0x77b   : > { %v6341_v59 = vadd.f32 %v6340_v30, %v21220_v14  ;;  %16261 = vmatpush3.bf16.msra.mxu1 %v20960_v19  ;;  %16231 = vmatprep.subr.bf16.mxu0 %v23456_v16  ;;  %v6354_v48 = vrot.slane %v23457_v57, 2  ;;  %v6401_v37 = vadd.f32 %v6400_v6, %v6324_v46  ;;  %v6413_v63 = vadd.f32 %v6412_v7, %v6326_v60  ;;  %v23462_v19 = vld [vmem:[#allocation18_spill] sm:$0xff]  ;;  %v23473_v6 = vld [vmem:[#allocation63_spill] sm:$0xff] }
 0x77c   : > { %v6329_v10 = vadd.f32 %v23455_v39, %v21211_v2  ;;  %v6687_v28 = vsel %vm23458_vm11, %v6423_v25, %v6686_v13  ;;  %16263 = vmatprep.subr.bf16.mxu1 %v23459_v35  ;;  %v6366_v51 = vrot.slane %v6365_v34, 2  ;;  %v6378_v2 = vrot.slane %v6377_v27, 2 }
 0x77d   : > { %6826 = vmatprep.mubr.f32.mxu1 %v6687_v28  ;;  %v6390_v49 = vrot.slane %v6389_v17, 2  ;;  %v6342_v14 = vrot.slane %v6341_v59, 2  ;;  %v6355_v33 = vadd.f32 %v6354_v48, %v23457_v57  ;;  %v6402_v43 = vrot.slane %v6401_v37, 2 }
 0x77e   : > { %v6330_v11 = vrot.slane %v6329_v10, 2  ;;  %16233 = vmatpush3.bf16.msra.mxu0 %v23460_v21  ;;  %v6367_v1 = vadd.f32 %v6366_v51, %v6365_v34  ;;  %v6379_v24 = vadd.f32 %v6378_v2, %v6377_v27  ;;  %v6414_v38 = vrot.slane %v6413_v63, 2  ;;  %v23475_v27 = vld [vmem:[#allocation20_spill] sm:$0xff] }
 0x77f   : > { %16265 = vmatpush3.bf16.msra.mxu1 %v23461_v22  ;;  %16235 = vmatprep.subr.bf16.mxu0 %v23462_v19  ;;  %v6391_v29 = vadd.f32 %v6390_v49, %v6389_v17  ;;  %v6343_v52 = vadd.f32 %v6342_v14, %v6341_v59  ;;  %v6356_v5 = vrot.slane %v6355_v33, 1  ;;  %v6403_v18 = vadd.f32 %v6402_v43, %v6401_v37  ;;  %v23476_v17 = vld [vmem:[#allocation65_spill] sm:$0xff]  ;;  %v23477_v59 = vld [vmem:[#allocation19_spill] sm:$0xff] }
 0x780   : > { %16267 = vmatprep.subr.bf16.mxu1 %v23463_v31  ;;  %v6331_v56 = vadd.f32 %v6330_v11, %v6329_v10  ;;  %v6380_v46 = vrot.slane %v6379_v24, 1  ;;  %v6368_v40 = vrot.slane %v6367_v1, 1  ;;  %v6415_v41 = vadd.f32 %v6414_v38, %v6413_v63 }
 0x781   : > { %v6392_v61 = vrot.slane %v6391_v29, 1  ;;  %v6344_v36 = vrot.slane %v6343_v52, 1  ;;  %v6357_v8 = vadd.f32 %v6356_v5, %v6355_v33  ;;  %v6404_v50 = vrot.slane %v6403_v18, 1  ;;  %v17156_v5 = vld [vmem:[#allocation4 + $0x404] ss:$16 sps:$4 sm:$0xff]  }
 0x782   : > { %16237 = vmatpush3.bf16.msra.mxu0 %v23464_v3  ;;  %v6332_v60 = vrot.slane %v6331_v56, 1  ;;  %v6381_v30 = vadd.f32 %v6380_v46, %v6379_v24  ;;  %v6369_v15 = vadd.f32 %v6368_v40, %v6367_v1  ;;  %v6416_v23 = vrot.slane %v6415_v41, 1  ;;  %v14705_v3 = vld [vmem:[%s23115_s8] ss:$0 sm:$0xff]  ;;  %v17157_v40 = vld [vmem:[#allocation4 + $0x408] ss:$16 sps:$4 sm:$0xff]  }
 0x783   : > { %16269 = vmatpush3.bf16.msra.mxu1 %v23465_v4  ;;  %16239 = vmatprep.subr.bf16.mxu0 %v23466_v55  ;;  %v6393_v34 = vadd.f32 %v6392_v61, %v6391_v29  ;;  %v6345_v54 = vadd.f32 %v6344_v36, %v6343_v52  ;;  %v6405_v7 = vadd.f32 %v6404_v50, %v6403_v18  ;;  %v14706_v4 = vld [vmem:[%s23116_s9] ss:$0 sm:$0xff]  ;;  %v17159_v18 = vld [vmem:[#allocation4 + $0x40c] ss:$16 sps:$4 sm:$0xff]   ;;  %v17163_v61 = vld [vmem:[#allocation4 + $0x428] ss:$16 sps:$4 sm:$0xff]  }
 0x784   : > { %16271 = vmatprep.subr.bf16.mxu1 %v23467_v20  ;;  %v6333_v42 = vadd.f32 %v6332_v60, %v6331_v56  ;;  %v6417_v39 = vadd.f32 %v6416_v23, %v6415_v41  ;;  %v17154_v46 = vld [vmem:[#allocation4 + $0x400] ss:$16 sps:$4 sm:$0xff]   ;;  %v17162_v41 = vld [vmem:[#allocation4 + $0x424] ss:$16 sps:$4 sm:$0xff]   ;;  %v17177_v50 = vld [vmem:[#allocation4 + $0x46c] ss:$16 sps:$4 sm:$0xff]  }
 0x785   : > { %v6682_v10 = vsel %vm23236_vm2, %v6369_v15, %v6345_v54  ;;  %v17160_v60 = vld [vmem:[#allocation4 + $0x420] ss:$16 sps:$4 sm:$0xff]   ;;  %v17175_v15 = vld [vmem:[#allocation4 + $0x468] ss:$16 sps:$4 sm:$0xff]   ;;  %v17180_v23 = vld [vmem:[#allocation4 + $0x484] ss:$16 sps:$4 sm:$0xff]  }
 0x786   : > { %16241 = vmatpush3.bf16.msra.mxu0 %v23468_v45  ;;  %v6676_v32 = vsel %vm23236_vm2, %v6357_v8, %v6333_v42  ;;  %v6683_v25 = vsel %vm23235_vm3, %v6393_v34, %v6682_v10  ;;  %v17165_v45 = vld [vmem:[#allocation4 + $0x42c] ss:$16 sps:$4 sm:$0xff]   ;;  %v17166_v36 = vld [vmem:[#allocation4 + $0x440] ss:$16 sps:$4 sm:$0xff]   ;;  %v17174_v8 = vld [vmem:[#allocation4 + $0x464] ss:$16 sps:$4 sm:$0xff]  }
 0x787   : > { %16273 = vmatpush3.bf16.msra.mxu1 %v23469_v12  ;;  %16243 = vmatprep.subr.bf16.mxu0 %v23470_v26  ;;  %v6677_v13 = vsel %vm23235_vm3, %v6381_v30, %v6676_v32  ;;  %v6684_v57 = vsel %vm23479_vm13, %v6417_v39, %v6683_v25  ;;  %v17168_v12 = vld [vmem:[#allocation4 + $0x444] ss:$16 sps:$4 sm:$0xff]   ;;  %v17171_v26 = vld [vmem:[#allocation4 + $0x44c] ss:$16 sps:$4 sm:$0xff]   ;;  %v17172_v30 = vld [vmem:[#allocation4 + $0x460] ss:$16 sps:$4 sm:$0xff]  }
 0x788   : > { %16275 = vmatprep.subr.bf16.mxu1 %v23471_v53  ;;  %v6678_v16 = vsel %vm23478_vm12, %v6405_v7, %v6677_v13  ;;  %v17169_v53 = vld [vmem:[#allocation4 + $0x448] ss:$16 sps:$4 sm:$0xff]   ;;  %v17178_v42 = vld [vmem:[#allocation4 + $0x480] ss:$16 sps:$4 sm:$0xff]   ;;  %v17189_v54 = vld [vmem:[#allocation4 + $0x4ac] ss:$16 sps:$4 sm:$0xff]  }
 0x789   : > { %v17181_v34 = vld [vmem:[#allocation4 + $0x488] ss:$16 sps:$4 sm:$0xff]   ;;  %v17184_v7 = vld [vmem:[#allocation4 + $0x4a0] ss:$16 sps:$4 sm:$0xff]   ;;  %v17192_v25 = vld [vmem:[#allocation4 + $0x4c4] ss:$16 sps:$4 sm:$0xff]  }
 0x78a   : > { %16245 = vmatpush3.bf16.msra.mxu0 %v23472_v62  ;;  %v17183_v62 = vld [vmem:[#allocation4 + $0x48c] ss:$16 sps:$4 sm:$0xff]   ;;  %v17187_v32 = vld [vmem:[#allocation4 + $0x4a8] ss:$16 sps:$4 sm:$0xff]  }
 0x78b   : > { %16277 = vmatpush3.bf16.msra.mxu1 %v23473_v6  ;;  %16247 = vmatprep.subr.bf16.mxu0 %v23474_v47  ;;  %v17186_v47 = vld [vmem:[#allocation4 + $0x4a4] ss:$16 sps:$4 sm:$0xff]   ;;  %v23481_v39 = vld [vmem:[#allocation16_spill] sm:$0xff] }
 0x78c   : > { %16279 = vmatprep.subr.bf16.mxu1 %v23475_v27 }
 0x78e   : > { %16249 = vmatpush3.bf16.msra.mxu0 %v23476_v17 }
 0x78f   : > { %16281 = vmatpush3.bf16.msra.mxu1 %v23477_v59  ;;  %8665 = vmatprep.subr.bf16.mxu0 %v17156_v5  ;;  %v17195_v59 = vld [vmem:[#allocation4 + $0x4cc] ss:$16 sps:$4 sm:$0xff]   ;;  %v17211_v5 = vld [vmem:[#allocation4 + $0x528] ss:$16 sps:$4 sm:$0xff]  }
 0x790   : > { %8771 = vmatprep.subr.bf16.mxu1 %v17159_v18  ;;  %v23486_v18 = vld [vmem:[#allocation38_spill] sm:$0xff] }
 0x791   : > { %6757 = vmatmul.mubr.f32.vlgmr.msra.gmra.mrb[24].mxu0 %v6678_v16  ;;  %v17190_v16 = vld [vmem:[#allocation4 + $0x4c0] ss:$16 sps:$4 sm:$0xff]  }
 0x792   : > { %6827 = vmatmul.mubr.f32.vlgmr.msra.gmra.mrb[24].mxu1 %v6684_v57  ;;  %8666 = vmatpush1.bf16.msra.mxu0 %v17154_v46  ;;  %v17193_v57 = vld [vmem:[#allocation4 + $0x4c8] ss:$16 sps:$4 sm:$0xff]  }
 0x793   : > { %8772 = vmatpush1.bf16.msra.mxu1 %v17157_v40  ;;  %8667 = vmatprep.subr.bf16.mxu0 %v17162_v41 }
 0x794   : > { %8773 = vmatprep.subr.bf16.mxu1 %v17165_v45 }
 0x796   : > { %8668 = vmatpush1.bf16.msra.mxu0 %v17160_v60 }
 0x797   : > { %8774 = vmatpush1.bf16.msra.mxu1 %v17163_v61  ;;  %8669 = vmatprep.subr.bf16.mxu0 %v17168_v12 }
 0x798   : > { %8775 = vmatprep.subr.bf16.mxu1 %v17171_v26 }
 0x79a   : > { %8670 = vmatpush1.bf16.msra.mxu0 %v17166_v36  ;;  %v17216_v36 = vld [vmem:[#allocation4 + $0x544] ss:$16 sps:$4 sm:$0xff]  }
 0x79b   : > { %8776 = vmatpush1.bf16.msra.mxu1 %v17169_v53  ;;  %8671 = vmatprep.subr.bf16.mxu0 %v17174_v8 }
 0x79c   : > { %8777 = vmatprep.subr.bf16.mxu1 %v17177_v50 }
 0x79e   : > { %8672 = vmatpush1.bf16.msra.mxu0 %v17172_v30 }
 0x79f   : > { %8778 = vmatpush1.bf16.msra.mxu1 %v17175_v15  ;;  %8673 = vmatprep.subr.bf16.mxu0 %v17180_v23  ;;  %v17214_v15 = vld [vmem:[#allocation4 + $0x540] ss:$16 sps:$4 sm:$0xff]   ;;  %v17219_v23 = vld [vmem:[#allocation4 + $0x54c] ss:$16 sps:$4 sm:$0xff]  }
 0x7a0   : > { %8779 = vmatprep.subr.bf16.mxu1 %v17183_v62 }
 0x7a2   : > { %8674 = vmatpush1.bf16.msra.mxu0 %v17178_v42 }
 0x7a3   : > { %8780 = vmatpush1.bf16.msra.mxu1 %v17181_v34  ;;  %8675 = vmatprep.subr.bf16.mxu0 %v17186_v47 }
 0x7a4   : > { %8781 = vmatprep.subr.bf16.mxu1 %v17189_v54  ;;  %v23487_v54 = vld [vmem:[#allocation66_spill] sm:$0xff] }
 0x7a6   : > { %8676 = vmatpush1.bf16.msra.mxu0 %v17184_v7  ;;  %v23488_v7 = vld [vmem:[#allocation21_spill] sm:$0xff] }
 0x7a7   : > { %8782 = vmatpush1.bf16.msra.mxu1 %v17187_v32  ;;  %8677 = vmatprep.subr.bf16.mxu0 %v17192_v25 }
 0x7a8   : > { %8783 = vmatprep.subr.bf16.mxu1 %v17195_v59  ;;  %v23490_v59 = vld [vmem:[#allocation67_spill] sm:$0xff] }
 0x7aa   : > { %8678 = vmatpush1.bf16.msra.mxu0 %v17190_v16 }
 0x7ab   : > { %8784 = vmatpush1.bf16.msra.mxu1 %v17193_v57  ;;  %v23491_v57 = vld [vmem:[#allocation24_spill] sm:$0xff] }
 0x844   : > { %v15532_v48 = vpop.f32.mrb[14].mxu0 }
 0x845   : > { %v15567_v37 = vpop.f32.mrb[14].mxu1  ;;  %v15533_v28 = vpop.f32.mrb[15].mxu0 }
 0x846   : > { %v15534_v35 = vadd.f32 %v15533_v28, %v15532_v48  ;;  %v15568_v51 = vpop.f32.mrb[15].mxu1 }
 0x847   : > { %v15569_v2 = vadd.f32 %v15568_v51, %v15567_v37  ;;  %v17201_v51 = vld [vmem:[#allocation4 + $0x4ec] ss:$16 sps:$4 sm:$0xff]  }
 0x848   : > { %8785 = vmatprep.subr.bf16.mxu1 %v17201_v51  ;;  %v23493_v51 = vld [vmem:[#allocation23_spill] sm:$0xff] }
 0x849   : > { %v6657_v63 = vadd.f32 %v15569_v2, %v15534_v35  ;;  %v17198_v35 = vld [vmem:[#allocation4 + $0x4e4] ss:$16 sps:$4 sm:$0xff]   ;;  %v17196_v2 = vld [vmem:[#allocation4 + $0x4e0] ss:$16 sps:$4 sm:$0xff]  }
 0x84a   : > { %8679 = vmatprep.subr.bf16.mxu0 %v17198_v35  ;;  %v17225_v35 = vld [vmem:[#allocation4 + $0x56c] ss:$16 sps:$4 sm:$0xff]  }
 0x84b   : > { %v6832_v19 = vmul.f32 0.0078125, %v6657_v63  ;;  %v17199_v63 = vld [vmem:[#allocation4 + $0x4e8] ss:$16 sps:$4 sm:$0xff]   ;;  %8680 = vmatpush1.bf16.msra.mxu0 %v17196_v2 }
 0x84c   : > { %8786 = vmatpush1.bf16.msra.mxu1 %v17199_v63  ;;  %v23494_v63 = vld [vmem:[#allocation25_spill] sm:$0xff] }
 0x84d   : > { %v6834_v43 = vmul.f32 %v6832_v19, %v6832_v19 }
 0x864   : > { %v15602_v11 = vpop.f32.mrb[24].mxu0 }
 0x865   : > { %v15637_v49 = vpop.f32.mrb[24].mxu1  ;;  %v15603_v21 = vpop.f32.mrb[25].mxu0 }
 0x866   : > { %v15604_v14 = vadd.f32 %v15603_v21, %v15602_v11  ;;  %v15638_v22 = vpop.f32.mrb[25].mxu1 }
 0x867   : > { %v15639_v33 = vadd.f32 %v15638_v22, %v15637_v49  ;;  %v17207_v22 = vld [vmem:[#allocation4 + $0x50c] ss:$16 sps:$4 sm:$0xff]  }
 0x868   : > { %8787 = vmatprep.subr.bf16.mxu1 %v17207_v22 }
 0x869   : > { %v6829_v31 = vadd.f32 %v15639_v33, %v15604_v14  ;;  %v17204_v14 = vld [vmem:[#allocation4 + $0x504] ss:$16 sps:$4 sm:$0xff]   ;;  %v17205_v33 = vld [vmem:[#allocation4 + $0x508] ss:$16 sps:$4 sm:$0xff]  }
 0x86a   : > { %8681 = vmatprep.subr.bf16.mxu0 %v17204_v14  ;;  %8788 = vmatpush1.bf16.msra.mxu1 %v17205_v33 }
 0x86b   : > { %v6833_v1 = vmul.f32 0.0078125, %v6829_v31 }
 0x86d   : > { %v6835_v24 = vsub.f32 %v6833_v1, %v6834_v43 }
 0x86f   : > { %v6836_v38 = vmax.f32 %v6835_v24, 0.0  ;;  %v17210_v24 = vld [vmem:[#allocation4 + $0x524] ss:$16 sps:$4 sm:$0xff]  }
 0x871   : > { %v6837_v56 = vadd.f32 1e-05, %v6836_v38  ;;  %v17213_v38 = vld [vmem:[#allocation4 + $0x52c] ss:$16 sps:$4 sm:$0xff]  }
 0x872   : > { %8789 = vmatprep.subr.bf16.mxu1 %v17213_v38 }
 0x873   : > { %18056 = vrsqrt.f32 %v6837_v56  ;;  %v23483_v56 = vld [vmem:[#allocation15_spill] sm:$0xff]  ;;  %8790 = vmatpush1.bf16.msra.mxu1 %v17211_v5  ;;  %v17231_v5 = vld [vmem:[#allocation4 + $0x58c] ss:$16 sps:$4 sm:$0xff]  }
 0x874   : > { %8791 = vmatprep.subr.bf16.mxu1 %v17219_v23 }
 0x87d   : > { %v18057_v29 = vpop.eup %18056 }
 0x87e   : > { %v6846_v52 = vmul.f32 %v18057_v29, %v14705_v3  ;;  %v23484_v29 = vld [vmem:[#allocation37_spill] sm:$0xff] }
 0x880   : > { %6857 = vrot.lane.b32.xlu0 %v6846_v52, %s18237_s16  ;;  %v6848_v55 = vmul.f32 %v6846_v52, %v6832_v19  ;;  %v17202_v19 = vld [vmem:[#allocation4 + $0x500] ss:$16 sps:$4 sm:$0xff]  }
 0x881   : > { %8682 = vmatpush1.bf16.msra.mxu0 %v17202_v19  ;;  %v23496_v19 = vld [vmem:[#allocation27_spill] sm:$0xff] }
 0x882   : > { %v21408_v20 = vsub.f32 %v14706_v4, %v6848_v55  ;;  %v23485_v4 = vld [vmem:[#allocation36_spill] sm:$0xff]  ;;  %8683 = vmatprep.subr.bf16.mxu0 %v17210_v24  ;;  %v23497_v24 = vld [vmem:[#allocation29_spill] sm:$0xff] }
 0x884   : > { %6985 = vrot.lane.b32.xlu1 %v21408_v20, %s18237_s16 }
 0x8f2   : > { %v6858_v6 = vpop.permute.xlu0 %6857 }
 0x8f3   : > { %v6860_v27 = vsel %vm23480_vm14, %v6846_v52, %v6858_v6  ;;  %v17217_v6 = vld [vmem:[#allocation4 + $0x548] ss:$16 sps:$4 sm:$0xff]  }
 0x8f4   : > { %v6862_v13 = vcombine.low %v6860_v27, %v6860_v27  ;;  %8792 = vmatpush1.bf16.msra.mxu1 %v17217_v6 }
 0x8f5   : > { %8793 = vmatprep.subr.bf16.mxu1 %v17225_v35  ;;  %v17235_v35 = vld [vmem:[#allocation4 + $0x5a8] ss:$16 sps:$4 sm:$0xff]  }
 0x8f6   : > { %v6869_v10 = vrot.slane %v6862_v13, %v23481_v39  ;;  %v6986_v17 = vpop.permute.xlu1 %6985 }
 0x8f7   : > { %v6988_v37 = vsel %vm23482_vm0, %v21408_v20, %v6986_v17  ;;  %v17208_v20 = vld [vmem:[#allocation4 + $0x520] ss:$16 sps:$4 sm:$0xff]  }
 0x8f8   : > { %v6870_v48 = vcombine.low %v6869_v10, %v6869_v10  ;;  %v6871_v28 = vcombine.high %v6869_v10, %v6869_v10  ;;  %v6990_v11 = vcombine.low %v6988_v37, %v6988_v37  ;;  %8684 = vmatpush1.bf16.msra.mxu0 %v17208_v20  ;;  %v17222_v10 = vld [vmem:[#allocation4 + $0x564] ss:$16 sps:$4 sm:$0xff]   ;;  %v23489_v17 = vld [vmem:[#allocation22_spill] sm:$0xff] }
 0x8f9   : > { %8685 = vmatprep.subr.bf16.mxu0 %v17216_v36  ;;  %v23492_v37 = vld [vmem:[#allocation26_spill] sm:$0xff]  ;;  %v17228_v20 = vld [vmem:[#allocation4 + $0x584] ss:$16 sps:$4 sm:$0xff]  }
 0x8fa   : > { %v6878_v49 = vrot.slane %v6870_v48, %v23481_v39  ;;  %v6885_v21 = vrot.slane %v6871_v28, %v23481_v39  ;;  %v6997_v31 = vrot.slane %v6990_v11, %v23481_v39 }
 0x8fc   : > { %v6886_v43 = vcombine.high %v6878_v49, %v6878_v49  ;;  %v6887_v1 = vcombine.high %v6885_v21, %v6885_v21  ;;  %v6891_v3 = vrot.slane %v6878_v49, %v23483_v56  ;;  %v6895_v52 = vrot.slane %v6878_v49, %v23484_v29  ;;  %8686 = vmatpush1.bf16.msra.mxu0 %v17214_v15 }
 0x8fd   : > { %v6899_v55 = vrot.slane %v6878_v49, %v23485_v4  ;;  %v6903_v46 = vrot.slane %v6878_v49, %v23486_v18  ;;  %v6907_v40 = vrot.slane %v6885_v21, %v23483_v56  ;;  %v6998_v41 = vcombine.low %v6997_v31, %v6997_v31  ;;  %8687 = vmatprep.subr.bf16.mxu0 %v17222_v10 }
 0x8fe   : > { %v6999_v45 = vcombine.high %v6997_v31, %v6997_v31  ;;  %v6911_v60 = vrot.slane %v6885_v21, %v23484_v29  ;;  %v6915_v61 = vrot.slane %v6885_v21, %v23485_v4  ;;  %v6919_v12 = vrot.slane %v6885_v21, %v23486_v18  ;;  %v23495_v21 = vld [vmem:[#allocation28_spill] sm:$0xff] }
 0x8ff   : > { %v6923_v26 = vrot.slane %v6886_v43, %v23483_v56  ;;  %v6927_v53 = vrot.slane %v6886_v43, %v23484_v29  ;;  %v6931_v8 = vrot.slane %v6886_v43, %v23485_v4  ;;  %v6935_v50 = vrot.slane %v6886_v43, %v23486_v18 }
 0x900   : > { %v6939_v30 = vrot.slane %v6887_v1, %v23483_v56  ;;  %v6943_v62 = vrot.slane %v6887_v1, %v23484_v29  ;;  %v6947_v42 = vrot.slane %v6887_v1, %v23485_v4  ;;  %v21435_v34 = vrot.slane %v6998_v41, %v23481_v39 }
 0x901   : > { %v6951_v47 = vrot.slane %v6887_v1, %v23486_v18  ;;  %v6968_v27 = vmul.f32 %v6891_v3, %v23487_v54  ;;  %v6969_v32 = vmul.f32 %v6895_v52, %v23488_v7  ;;  %v7013_v13 = vrot.slane %v6999_v45, %v23481_v39  ;;  %v17220_v39 = vld [vmem:[#allocation4 + $0x560] ss:$16 sps:$4 sm:$0xff]   ;;  %v17223_v1 = vld [vmem:[#allocation4 + $0x568] ss:$16 sps:$4 sm:$0xff]  }
 0x902   : > { %v6970_v25 = vmul.f32 %v6899_v55, %v23489_v17  ;;  %v6971_v16 = vmul.f32 %v6903_v46, %v23490_v59  ;;  %v6972_v48 = vmul.f32 %v6907_v40, %v23491_v57  ;;  %v6973_v28 = vmul.f32 %v6911_v60, %v23492_v37  ;;  %8688 = vmatpush1.bf16.msra.mxu0 %v17220_v39  ;;  %v17232_v17 = vld [vmem:[#allocation4 + $0x5a0] ss:$16 sps:$4 sm:$0xff]  }
 0x903   : > { %v6974_v2 = vmul.f32 %v6915_v61, %v23493_v51  ;;  %v6975_v11 = vmul.f32 %v6919_v12, %v23494_v63  ;;  %v6976_v49 = vmul.f32 %v6923_v26, %v21232_v0  ;;  %v6977_v14 = vmul.f32 %v6927_v53, %v23495_v21  ;;  %v23498_v0 = vld [vmem:[#allocation32_spill] sm:$0xff]  ;;  %8794 = vmatpush1.bf16.msra.mxu1 %v17223_v1  ;;  %v17240_v51 = vld [vmem:[#allocation4 + $0x5c4] ss:$16 sps:$4 sm:$0xff]  }
 0x904   : > { %v6978_v22 = vmul.f32 %v6931_v8, %v21239_v9  ;;  %v6979_v33 = vmul.f32 %v6935_v50, %v23496_v19  ;;  %v6980_v31 = vmul.f32 %v6939_v30, %v21272_v44  ;;  %v7014_v43 = vcombine.high %v21435_v34, %v21435_v34  ;;  %v17226_v61 = vld [vmem:[#allocation4 + $0x580] ss:$16 sps:$4 sm:$0xff]   ;;  %v17229_v8 = vld [vmem:[#allocation4 + $0x588] ss:$16 sps:$4 sm:$0xff]   ;;  %v17234_v50 = vld [vmem:[#allocation4 + $0x5a4] ss:$16 sps:$4 sm:$0xff]   ;;  %8689 = vmatprep.subr.bf16.mxu0 %v17228_v20 }
 0x905   : > { %v6981_v38 = vmul.f32 %v6943_v62, %v23497_v24  ;;  %v6982_v3 = vmul.f32 %v6947_v42, %v21276_v58  ;;  %v6983_v52 = vmul.f32 %v6951_v47, %v23498_v0  ;;  %v7015_v55 = vcombine.high %v7013_v13, %v7013_v13  ;;  %8795 = vmatprep.subr.bf16.mxu1 %v17231_v5  ;;  %v17237_v62 = vld [vmem:[#allocation4 + $0x5ac] ss:$16 sps:$4 sm:$0xff]   ;;  %v17246_v24 = vld [vmem:[#allocation4 + $0x5e4] ss:$16 sps:$4 sm:$0xff]  }
 0x906   : > { %v7019_v9 = vrot.slane %v21435_v34, %v23483_v56  ;;  %v7023_v44 = vrot.slane %v21435_v34, %v23484_v29  ;;  %v7027_v46 = vrot.slane %v21435_v34, %v23485_v4  ;;  %v7031_v40 = vrot.slane %v21435_v34, %v23486_v18  ;;  %8690 = vmatpush1.bf16.msra.mxu0 %v17226_v61  ;;  %v17249_v20 = vld [vmem:[#allocation4 + $0x5ec] ss:$16 sps:$4 sm:$0xff]  }
 0x907   : > { %v7035_v58 = vrot.slane %v7013_v13, %v23483_v56  ;;  %v7039_v41 = vrot.slane %v7013_v13, %v23484_v29  ;;  %v7043_v45 = vrot.slane %v7013_v13, %v23485_v4  ;;  %v7047_v60 = vrot.slane %v7013_v13, %v23486_v18  ;;  %8796 = vmatpush1.bf16.msra.mxu1 %v17229_v8  ;;  %v17255_v61 = vld [vmem:[#allocation4 + $0x60c] ss:$16 sps:$4 sm:$0xff]  }
 0x908   : > { %v7051_v12 = vrot.slane %v7014_v43, %v23483_v56  ;;  %v7055_v26 = vrot.slane %v7014_v43, %v23484_v29  ;;  %v7059_v36 = vrot.slane %v7014_v43, %v23485_v4  ;;  %v7063_v53 = vrot.slane %v7014_v43, %v23486_v18  ;;  %8691 = vmatprep.subr.bf16.mxu0 %v17234_v50 }
 0x909   : > { %v7067_v30 = vrot.slane %v7015_v55, %v23483_v56  ;;  %v7071_v15 = vrot.slane %v7015_v55, %v23484_v29  ;;  %v7075_v23 = vrot.slane %v7015_v55, %v23485_v4  ;;  %v7079_v42 = vrot.slane %v7015_v55, %v23486_v18  ;;  %8797 = vmatprep.subr.bf16.mxu1 %v17237_v62  ;;  %v17244_v55 = vld [vmem:[#allocation4 + $0x5e0] ss:$16 sps:$4 sm:$0xff]  }
 0x90a   : > { %v7096_v34 = vadd.f32 %v7019_v9, %v6968_v27  ;;  %v7097_v6 = vadd.f32 %v7023_v44, %v6969_v32  ;;  %v7098_v47 = vadd.f32 %v7027_v46, %v6970_v25  ;;  %v7099_v54 = vadd.f32 %v7031_v40, %v6971_v16  ;;  %v17243_v27 = vld [vmem:[#allocation4 + $0x5cc] ss:$16 sps:$4 sm:$0xff]   ;;  %8692 = vmatpush1.bf16.msra.mxu0 %v17232_v17  ;;  %v17247_v40 = vld [vmem:[#allocation4 + $0x5e8] ss:$16 sps:$4 sm:$0xff]  }
 0x90b   : > { %v7100_v7 = vadd.f32 %v7035_v58, %v6972_v48  ;;  %v7101_v13 = vadd.f32 %v7039_v41, %v6973_v28  ;;  %v7102_v10 = vadd.f32 %v7043_v45, %v6974_v2  ;;  %v7103_v59 = vadd.f32 %v7047_v60, %v6975_v11  ;;  %v17238_v28 = vld [vmem:[#allocation4 + $0x5c0] ss:$16 sps:$4 sm:$0xff]   ;;  %8798 = vmatpush1.bf16.msra.mxu1 %v17235_v35  ;;  %v17252_v58 = vld [vmem:[#allocation4 + $0x604] ss:$16 sps:$4 sm:$0xff]  }
 0x90c   : > { %v7104_v57 = vadd.f32 %v7051_v12, %v6976_v49  ;;  %v7105_v37 = vadd.f32 %v7055_v26, %v6977_v14  ;;  %v7106_v63 = vadd.f32 %v7059_v36, %v6978_v22  ;;  %v7107_v21 = vadd.f32 %v7063_v53, %v6979_v33  ;;  %v17241_v22 = vld [vmem:[#allocation4 + $0x5c8] ss:$16 sps:$4 sm:$0xff]   ;;  %8693 = vmatprep.subr.bf16.mxu0 %v17240_v51 }
 0x90d   : > { %v7108_v39 = vadd.f32 %v7067_v30, %v6980_v31  ;;  %v7109_v19 = vadd.f32 %v7071_v15, %v6981_v38  ;;  %v7110_v32 = vadd.f32 %v7075_v23, %v6982_v3  ;;  %v7111_v25 = vadd.f32 %v7079_v42, %v6983_v52  ;;  %8799 = vmatprep.subr.bf16.mxu1 %v17243_v27 }
 0x90e   : > { %v21477_v16 = vmul.f32 0.5, %v7096_v34  ;;  %v21479_v48 = vmul.f32 0.5, %v7097_v6  ;;  %v21481_v2 = vmul.f32 0.5, %v7098_v47  ;;  %v21483_v11 = vmul.f32 0.5, %v7099_v54  ;;  %8694 = vmatpush1.bf16.msra.mxu0 %v17238_v28 }
 0x90f   : > { %v21485_v49 = vmul.f32 0.5, %v7100_v7  ;;  %v21487_v14 = vmul.f32 0.5, %v7101_v13  ;;  %v21489_v33 = vmul.f32 0.5, %v7102_v10  ;;  %v21491_v31 = vmul.f32 0.5, %v7103_v59  ;;  %8800 = vmatpush1.bf16.msra.mxu1 %v17241_v22  ;;  %8695 = vmatprep.subr.bf16.mxu0 %v17246_v24 }
 0x910   : > { %23499 = vst [vmem:[#allocation68_spill] sm:$0xff] %v21477_v16  ;;  %23500 = vst [vmem:[#allocation30_spill] sm:$0xff] %v21479_v48  ;;  %v21493_v43 = vmul.f32 0.5, %v7104_v57  ;;  %v21495_v1 = vmul.f32 0.5, %v7105_v37  ;;  %v21497_v38 = vmul.f32 0.5, %v7106_v63  ;;  %v21499_v3 = vmul.f32 0.5, %v7107_v21  ;;  %8801 = vmatprep.subr.bf16.mxu1 %v17249_v20 }
 0x911   : > { %23501 = vst [vmem:[#allocation31_spill] sm:$0xff] %v21481_v2  ;;  %23502 = vst [vmem:[#allocation34_spill] sm:$0xff] %v21483_v11  ;;  %v21501_v0 = vmul.f32 0.5, %v7108_v39  ;;  %v21503_v52 = vmul.f32 0.5, %v7109_v19  ;;  %v21505_v5 = vmul.f32 0.5, %v7110_v32  ;;  %v21507_v9 = vmul.f32 0.5, %v7111_v25 }
 0x912   : > { %23503 = vst [vmem:[#allocation33_spill] sm:$0xff] %v21485_v49  ;;  %23504 = vst [vmem:[#allocation18_spill] sm:$0xff] %v21487_v14  ;;  %v7128_v44 = vmul.f32 0.70710677, %v7096_v34  ;;  %v7129_v46 = vmul.f32 0.70710677, %v7097_v6  ;;  %8696 = vmatpush1.bf16.msra.mxu0 %v17244_v55 }
 0x913   : > { %23505 = vst [vmem:[#allocation49_spill] sm:$0xff] %v21489_v33  ;;  %23506 = vst [vmem:[#allocation17_spill] sm:$0xff] %v21491_v31  ;;  %v7130_v41 = vmul.f32 0.70710677, %v7098_v47  ;;  %v7131_v45 = vmul.f32 0.70710677, %v7099_v54  ;;  %8802 = vmatpush1.bf16.msra.mxu1 %v17247_v40  ;;  %8718 = vmatprep.subr.bf16.mxu0 %v17252_v58 }
 0x914   : > { %23507 = vst [vmem:[#allocation35_spill] sm:$0xff] %v21493_v43  ;;  %23508 = vst [vmem:[#allocation56_spill] sm:$0xff] %v21495_v1  ;;  %v7132_v60 = vmul.f32 0.70710677, %v7100_v7  ;;  %v7133_v12 = vmul.f32 0.70710677, %v7101_v13  ;;  %8824 = vmatprep.subr.bf16.mxu1 %v17255_v61 }
 0x915   : > { %23509 = vst [vmem:[#allocation57_spill] sm:$0xff] %v21497_v38  ;;  %23510 = vst [vmem:[#allocation58_spill] sm:$0xff] %v21499_v3  ;;  %v7134_v26 = vmul.f32 0.70710677, %v7102_v10  ;;  %v7135_v36 = vmul.f32 0.70710677, %v7103_v59 }
 0x916   : > { %23511 = vst [vmem:[#allocation59_spill] sm:$0xff] %v21501_v0  ;;  %23512 = vst [vmem:[#allocation60_spill] sm:$0xff] %v21503_v52  ;;  %v7136_v53 = vmul.f32 0.70710677, %v7104_v57  ;;  %v7137_v8 = vmul.f32 0.70710677, %v7105_v37 }
 0x917   : > { %23513 = vst [vmem:[#allocation61_spill] sm:$0xff] %v21505_v5  ;;  %23514 = vst [vmem:[#allocation62_spill] sm:$0xff] %v21507_v9  ;;  %v7138_v50 = vmul.f32 0.70710677, %v7106_v63  ;;  %v7139_v30 = vmul.f32 0.70710677, %v7107_v21 }
 0x918   : > { %v7140_v15 = vmul.f32 0.70710677, %v7108_v39  ;;  %v7141_v23 = vmul.f32 0.70710677, %v7109_v19  ;;  %v21509_v62 = vmul.f32 0.70710677, %v7110_v32 }
 0x919   : > { %v21511_v42 = vmul.f32 0.70710677, %v7111_v25  ;;  %vm7144_vm5 = vcmp.ge.f32.partialorder %v7128_v44, 0.0  ;;  %vm7145_vm1 = vcmp.ge.f32.partialorder %v7129_v46, 0.0  ;;  %vm7146_vm6 = vcmp.ge.f32.partialorder %v7130_v41, 0.0 }
 0x91a   : > { %vm7147_vm7 = vcmp.ge.f32.partialorder %v7131_v45, 0.0  ;;  %vm7148_vm8 = vcmp.ge.f32.partialorder %v7132_v60, 0.0  ;;  %vm7149_vm9 = vcmp.ge.f32.partialorder %v7133_v12, 0.0  ;;  %vm7150_vm10 = vcmp.ge.f32.partialorder %v7134_v26, 0.0 }
 0x91b   : > { %vm7151_vm11 = vcmp.ge.f32.partialorder %v7135_v36, 0.0  ;;  %vm7152_vm12 = vcmp.ge.f32.partialorder %v7136_v53, 0.0  ;;  %vm7153_vm13 = vcmp.ge.f32.partialorder %v7137_v8, 0.0  ;;  %vm7154_vm14 = vcmp.ge.f32.partialorder %v7138_v50, 0.0 }
 0x91c   : > { %vm7155_vm0 = vcmp.ge.f32.partialorder %v7139_v30, 0.0  ;;  %vm7156_vm3 = vcmp.ge.f32.partialorder %v7140_v15, 0.0  ;;  %v23515_v34 = vmov -1.0   ;;  %vm7157_vm2 = vcmp.ge.f32.partialorder %v7141_v23, 0.0 }
 0x91d   : > { %v21515_v6 = vsel %vm7144_vm5, 1.0, %v23515_v34  ;;  %v21519_v47 = vsel %vm7145_vm1, 1.0, %v23515_v34  ;;  %v21523_v54 = vsel %vm7146_vm6, 1.0, %v23515_v34  ;;  %v21527_v7 = vsel %vm7147_vm7, 1.0, %v23515_v34 }
 0x91e   : > { %23516 = vst [vmem:[#allocation63_spill] sm:$0xff] %v21515_v6  ;;  %23517 = vst [vmem:[#allocation64_spill] sm:$0xff] %v21519_v47  ;;  %v21531_v13 = vsel %vm7148_vm8, 1.0, %v23515_v34  ;;  %vm7158_vm5 = vcmp.ge.f32.partialorder %v21509_v62, 0.0  ;;  %v21536_v10 = vsel %vm7149_vm9, 1.0, %v23515_v34  ;;  %v21540_v17 = vsel %vm7150_vm10, 1.0, %v23515_v34 }
 0x91f   : > { %23518 = vst [vmem:[#allocation20_spill] sm:$0xff] %v21523_v54  ;;  %23519 = vst [vmem:[#allocation65_spill] sm:$0xff] %v21527_v7  ;;  %v21544_v59 = vsel %vm7151_vm11, 1.0, %v23515_v34  ;;  %v21548_v57 = vsel %vm7152_vm12, 1.0, %v23515_v34  ;;  %vm7159_vm1 = vcmp.ge.f32.partialorder %v21511_v42, 0.0  ;;  %v21553_v37 = vsel %vm7153_vm13, 1.0, %v23515_v34 }
 0x920   : > { %23520 = vst [vmem:[#allocation19_spill] sm:$0xff] %v21531_v13  ;;  %23521 = vst [vmem:[#allocation16_spill] sm:$0xff] %v21536_v10  ;;  %v21557_v35 = vsel %vm7154_vm14, 1.0, %v23515_v34  ;;  %v21561_v51 = vsel %vm7155_vm0, 1.0, %v23515_v34  ;;  %v21563_v63 = vand.u32 2147483647, %v7128_v44 }
 0x921   : > { %23522 = vst [vmem:[#allocation66_spill] sm:$0xff] %v21540_v17  ;;  %23523 = vst [vmem:[#allocation21_spill] sm:$0xff] %v21544_v59  ;;  %v21565_v21 = vand.u32 2147483647, %v7129_v46  ;;  %v21567_v39 = vand.u32 2147483647, %v7130_v41 }
 0x922   : > { %23524 = vst [vmem:[#allocation22_spill] sm:$0xff] %v21548_v57  ;;  %23525 = vst [vmem:[#allocation67_spill] sm:$0xff] %v21553_v37  ;;  %v21569_v19 = vand.u32 2147483647, %v7131_v45  ;;  %v21571_v27 = vand.u32 2147483647, %v7132_v60 }
 0x923   : > { %23526 = vst [vmem:[#allocation24_spill] sm:$0xff] %v21557_v35  ;;  %23527 = vst [vmem:[#allocation26_spill] sm:$0xff] %v21561_v51  ;;  %v21573_v32 = vand.u32 2147483647, %v7133_v12  ;;  %v21575_v25 = vand.u32 2147483647, %v7134_v26 }
 0x924   : > { %v21577_v28 = vand.u32 2147483647, %v7135_v36  ;;  %v21579_v22 = vand.u32 2147483647, %v7136_v53  ;;  %v21581_v24 = vand.u32 2147483647, %v7137_v8 }
 0x925   : > { %v21583_v55 = vand.u32 2147483647, %v7138_v50  ;;  %v21585_v20 = vand.u32 2147483647, %v7139_v30  ;;  %v7192_v44 = vmul.f32 0.3275911, %v21563_v63 }
 0x926   : > { %v21588_v46 = vand.u32 2147483647, %v7140_v15  ;;  %v21590_v40 = vand.u32 2147483647, %v7141_v23  ;;  %v7193_v58 = vmul.f32 0.3275911, %v21565_v21 }
 0x927   : > { %v21594_v41 = vand.u32 2147483647, %v21509_v62  ;;  %v21597_v45 = vand.u32 2147483647, %v21511_v42  ;;  %v7194_v60 = vmul.f32 0.3275911, %v21567_v39 }
 0x928   : > { %v7195_v61 = vmul.f32 0.3275911, %v21569_v19  ;;  %v7196_v12 = vmul.f32 0.3275911, %v21571_v27  ;;  %v7197_v26 = vmul.f32 0.3275911, %v21573_v32 }
 0x929   : > { %v21605_v36 = vsel %vm7156_vm3, 1.0, %v23515_v34  ;;  %v7198_v53 = vmul.f32 0.3275911, %v21575_v25  ;;  %v7199_v8 = vmul.f32 0.3275911, %v21577_v28  ;;  %v7208_v50 = vadd.f32 1.0, %v7192_v44 }
 0x92a   : > { %23528 = vst [vmem:[#allocation23_spill] sm:$0xff] %v21605_v36  ;;  %v21611_v30 = vsel %vm7157_vm2, 1.0, %v23515_v34  ;;  %v7200_v18 = vmul.f32 0.3275911, %v21579_v22  ;;  %v7201_v29 = vmul.f32 0.3275911, %v21581_v24 }
 0x92b   : > { %23529 = vst [vmem:[#allocation25_spill] sm:$0xff] %v21611_v30  ;;  %v7209_v4 = vadd.f32 1.0, %v7193_v58  ;;  %v21618_v15 = vsel %vm7158_vm5, 1.0, %v23515_v34  ;;  %v7202_v56 = vmul.f32 0.3275911, %v21583_v55  ;;  %v7210_v5 = vadd.f32 1.0, %v7194_v60 }
 0x92c   : > { %23530 = vst [vmem:[#allocation28_spill] sm:$0xff] %v21618_v15  ;;  %v7203_v9 = vmul.f32 0.3275911, %v21585_v20  ;;  %v21625_v23 = vsel %vm7159_vm1, 1.0, %v23515_v34  ;;  %v7204_v44 = vmul.f32 0.3275911, %v21588_v46  ;;  %18058 = vrcp.f32 %v7208_v50 }
 0x92d   : > { %23531 = vst [vmem:[#allocation27_spill] sm:$0xff] %v21625_v23  ;;  %v7205_v52 = vmul.f32 0.3275911, %v21590_v40  ;;  %v7211_v58 = vadd.f32 1.0, %v7195_v61  ;;  %v7206_v0 = vmul.f32 0.3275911, %v21594_v41  ;;  %18060 = vrcp.f32 %v7209_v4 }
 0x92e   : > { %v7207_v62 = vmul.f32 0.3275911, %v21597_v45  ;;  %v7212_v3 = vadd.f32 1.0, %v7196_v12  ;;  %v7213_v38 = vadd.f32 1.0, %v7197_v26  ;;  %v7214_v1 = vadd.f32 1.0, %v7198_v53 }
 0x92f   : > { %v7215_v43 = vadd.f32 1.0, %v7199_v8  ;;  %v7216_v60 = vadd.f32 1.0, %v7200_v18  ;;  %v7217_v31 = vadd.f32 1.0, %v7201_v29  ;;  %v7218_v42 = vadd.f32 1.0, %v7202_v56 }
 0x930   : > { %18062 = vrcp.f32 %v7210_v5  ;;  %v7219_v34 = vadd.f32 1.0, %v7203_v9  ;;  %v7220_v23 = vadd.f32 1.0, %v7204_v44  ;;  %v7221_v33 = vadd.f32 1.0, %v7205_v52 }
 0x931   : > { %18064 = vrcp.f32 %v7211_v58  ;;  %v7222_v14 = vadd.f32 1.0, %v7206_v0  ;;  %v7223_v61 = vadd.f32 1.0, %v7207_v62  ;;  %v7384_v15 = vsub.f32 0.0, %v21563_v63 }
 0x932   : > { %18066 = vrcp.f32 %v7212_v3  ;;  %v7385_v12 = vsub.f32 0.0, %v21565_v21  ;;  %v7386_v26 = vsub.f32 0.0, %v21567_v39  ;;  %v7387_v4 = vsub.f32 0.0, %v21569_v19 }
 0x933   : > { %18068 = vrcp.f32 %v7213_v38  ;;  %v7388_v56 = vsub.f32 0.0, %v21571_v27  ;;  %v7389_v29 = vsub.f32 0.0, %v21573_v32  ;;  %v7390_v18 = vsub.f32 0.0, %v21575_v25 }
 0x934   : > { %18070 = vrcp.f32 %v7214_v1  ;;  %v7391_v0 = vsub.f32 0.0, %v21577_v28  ;;  %v7392_v3 = vsub.f32 0.0, %v21579_v22  ;;  %v7393_v38 = vsub.f32 0.0, %v21581_v24 }
 0x935   : > { %18072 = vrcp.f32 %v7215_v43  ;;  %v7394_v52 = vsub.f32 0.0, %v21583_v55  ;;  %v7395_v5 = vsub.f32 0.0, %v21585_v20  ;;  %v7396_v1 = vsub.f32 0.0, %v21588_v46 }
 0x936   : > { %18074 = vrcp.f32 %v7216_v60  ;;  %v7397_v9 = vsub.f32 0.0, %v21590_v40  ;;  %v7398_v53 = vsub.f32 0.0, %v21594_v41  ;;  %v21647_v8 = vpop.eup %18058  ;;  %v7400_v50 = vmul.f32 %v7384_v15, %v21563_v63 }
 0x937   : > { %18076 = vrcp.f32 %v7217_v31  ;;  %v7401_v44 = vmul.f32 %v7385_v12, %v21565_v21  ;;  %v7402_v58 = vmul.f32 %v7386_v26, %v21567_v39  ;;  %v21652_v62 = vpop.eup %18060  ;;  %v7240_v31 = vmul.f32 1.0614054, %v21647_v8 }
 0x938   : > { %18078 = vrcp.f32 %v7218_v42  ;;  %v7403_v60 = vmul.f32 %v7387_v4, %v21569_v19  ;;  %v7404_v49 = vmul.f32 %v7388_v56, %v21571_v27  ;;  %v7405_v42 = vmul.f32 %v7389_v29, %v21573_v32 }
 0x939   : > { %18080 = vrcp.f32 %v7219_v34  ;;  %v7406_v63 = vmul.f32 %v7390_v18, %v21575_v25  ;;  %v21662_v21 = vmul.f32 %v7391_v0, %v21577_v28  ;;  %v7241_v15 = vmul.f32 1.0614054, %v21652_v62 }
 0x93a   : > { %v21657_v30 = vpop.eup %18062  ;;  %18082 = vrcp.f32 %v7220_v23  ;;  %v7256_v34 = vadd.f32 -1.4531521, %v7240_v31  ;;  %v21668_v19 = vmul.f32 %v7392_v3, %v21579_v22  ;;  %v21673_v23 = vmul.f32 %v7393_v38, %v21581_v24 }
 0x93b   : > { %v21664_v39 = vpop.eup %18064  ;;  %18084 = vrcp.f32 %v7221_v33  ;;  %v21676_v32 = vmul.f32 %v7394_v52, %v21583_v55  ;;  %v7416_v25 = vmul.f32 1.442695, %v7400_v50  ;;  %v7242_v33 = vmul.f32 1.0614054, %v21657_v30 }
 0x93c   : > { %v21670_v27 = vpop.eup %18066  ;;  %18086 = vrcp.f32 %v7222_v14  ;;  %v21681_v12 = vmul.f32 1.442695, %v7401_v44  ;;  %v21683_v26 = vmul.f32 1.442695, %v7402_v58  ;;  %v7243_v14 = vmul.f32 1.0614054, %v21664_v39 }
 0x93d   : > { %v21678_v28 = vpop.eup %18068  ;;  %18088 = vrcp.f32 %v7223_v61  ;;  %v7244_v24 = vmul.f32 1.0614054, %v21670_v27  ;;  %v21690_v4 = vmul.f32 %v7395_v5, %v21585_v20  ;;  %v21692_v55 = vmul.f32 1.442695, %v7403_v60 }
 0x93e   : > { %v21685_v22 = vpop.eup %18070  ;;  %v7245_v61 = vmul.f32 1.0614054, %v21678_v28  ;;  %v7257_v29 = vadd.f32 -1.4531521, %v7241_v15  ;;  %v7272_v18 = vmul.f32 %v21647_v8, %v7256_v34  ;;  %v21698_v0 = vmul.f32 1.442695, %v7404_v49 }
 0x93f   : > { %v21694_v56 = vpop.eup %18072  ;;  %v7246_v38 = vmul.f32 1.0614054, %v21685_v22  ;;  %v21705_v20 = vmul.f32 %v7396_v1, %v21588_v46  ;;  %v21707_v5 = vmul.f32 1.442695, %v7405_v42  ;;  %v7258_v58 = vadd.f32 -1.4531521, %v7242_v33 }
 0x940   : > { %v21700_v3 = vpop.eup %18074  ;;  %v7247_v52 = vmul.f32 1.0614054, %v21694_v56  ;;  %v21713_v31 = vmul.f32 %v7397_v9, %v21590_v40  ;;  %v21715_v49 = vmul.f32 1.442695, %v7406_v63  ;;  %v7259_v34 = vadd.f32 -1.4531521, %v7243_v14 }
 0x941   : > { %v21709_v50 = vpop.eup %18076  ;;  %v7248_v44 = vmul.f32 1.0614054, %v21700_v3  ;;  %v7260_v43 = vadd.f32 -1.4531521, %v7244_v24  ;;  %v21721_v46 = vmul.f32 %v7398_v53, %v21594_v41  ;;  %v7261_v11 = vadd.f32 -1.4531521, %v7245_v61 }
 0x942   : > { %v21717_v60 = vpop.eup %18078  ;;  %v7249_v15 = vmul.f32 1.0614054, %v21709_v50  ;;  %v7273_v33 = vmul.f32 %v21652_v62, %v7257_v29  ;;  %v7288_v40 = vadd.f32 1.4214138, %v7272_v18  ;;  %v7262_v36 = vadd.f32 -1.4531521, %v7246_v38 }
 0x943   : > { %v21723_v1 = vpop.eup %18080  ;;  %v7250_v42 = vmul.f32 1.0614054, %v21717_v60  ;;  %v7263_v51 = vadd.f32 -1.4531521, %v7247_v52  ;;  %v23532_v14 = vsub.f32 0.0, %v21597_v45  ;;  %18090 = vpow2.f32 %v7416_v25 }
 0x944   : > { %v21727_v9 = vpop.eup %18082  ;;  %v7251_v63 = vmul.f32 1.0614054, %v21723_v1  ;;  %v7264_v35 = vadd.f32 -1.4531521, %v7248_v44  ;;  %v7265_v61 = vadd.f32 -1.4531521, %v7249_v15  ;;  %v7274_v38 = vmul.f32 %v21657_v30, %v7258_v58 }
 0x945   : > { %v21733_v24 = vmul.f32 %v23532_v14, %v21597_v45  ;;  %v21735_v41 = vpop.eup %18084  ;;  %v7252_v53 = vmul.f32 1.0614054, %v21727_v9  ;;  %v7266_v37 = vadd.f32 -1.4531521, %v7250_v42  ;;  %v7275_v59 = vmul.f32 %v21664_v39, %v7259_v34 }
 0x946   : > { %v21738_v29 = vpop.eup %18086  ;;  %v7253_v18 = vmul.f32 1.0614054, %v21735_v41  ;;  %v7267_v57 = vadd.f32 -1.4531521, %v7251_v63  ;;  %v7289_v17 = vadd.f32 1.4214138, %v7273_v33  ;;  %v7276_v25 = vmul.f32 %v21670_v27, %v7260_v43 }
 0x947   : > { %23533 = vst [vmem:[#allocation29_spill] sm:$0xff] %v21733_v24  ;;  %v21742_v52 = vpop.eup %18088  ;;  %v7254_v45 = vmul.f32 1.0614054, %v21738_v29  ;;  %v7268_v14 = vadd.f32 -1.4531521, %v7252_v53  ;;  %v7277_v10 = vmul.f32 %v21678_v28, %v7261_v11  ;;  %v7278_v42 = vmul.f32 %v21685_v22, %v7262_v36 }
 0x948   : > { %v7255_v44 = vmul.f32 1.0614054, %v21742_v52  ;;  %v7269_v15 = vadd.f32 -1.4531521, %v7253_v18  ;;  %v7279_v58 = vmul.f32 %v21694_v56, %v7263_v51  ;;  %v7280_v63 = vmul.f32 %v21700_v3, %v7264_v35 }
 0x949   : > { %v7270_v13 = vadd.f32 -1.4531521, %v7254_v45  ;;  %v7281_v53 = vmul.f32 %v21709_v50, %v7265_v61  ;;  %v7282_v34 = vmul.f32 %v21717_v60, %v7266_v37  ;;  %v7283_v33 = vmul.f32 %v21723_v1, %v7267_v57 }
 0x94a   : > { %v7271_v7 = vadd.f32 -1.4531521, %v7255_v44  ;;  %v7284_v18 = vmul.f32 %v21727_v9, %v7268_v14  ;;  %v7285_v43 = vmul.f32 %v21735_v41, %v7269_v15  ;;  %v7290_v45 = vadd.f32 1.4214138, %v7274_v38 }
 0x94b   : > { %v7286_v11 = vmul.f32 %v21738_v29, %v7270_v13  ;;  %v7291_v2 = vadd.f32 1.4214138, %v7275_v59  ;;  %v7292_v51 = vadd.f32 1.4214138, %v7276_v25  ;;  %v7293_v48 = vadd.f32 1.4214138, %v7277_v10 }
 0x94c   : > { %v7287_v36 = vmul.f32 %v21742_v52, %v7271_v7  ;;  %v7294_v35 = vadd.f32 1.4214138, %v7278_v42  ;;  %v7295_v44 = vadd.f32 1.4214138, %v7279_v58  ;;  %v7296_v16 = vadd.f32 1.4214138, %v7280_v63 }
 0x94d   : > { %v7304_v61 = vmul.f32 %v21647_v8, %v7288_v40  ;;  %v7297_v37 = vadd.f32 1.4214138, %v7281_v53  ;;  %v7298_v54 = vadd.f32 1.4214138, %v7282_v34  ;;  %v7299_v57 = vadd.f32 1.4214138, %v7283_v33  ;;  %v21761_v47 = vpop.eup %18090 }
 0x94e   : > { %v7305_v14 = vmul.f32 %v21652_v62, %v7289_v17  ;;  %v7300_v15 = vadd.f32 1.4214138, %v7284_v18  ;;  %v7301_v13 = vadd.f32 1.4214138, %v7285_v43  ;;  %v7302_v38 = vadd.f32 1.4214138, %v7286_v11 }
 0x94f   : > { %v7306_v7 = vmul.f32 %v21657_v30, %v7290_v45  ;;  %v7303_v59 = vadd.f32 1.4214138, %v7287_v36  ;;  %v7307_v10 = vmul.f32 %v21664_v39, %v7291_v2  ;;  %v7308_v25 = vmul.f32 %v21670_v27, %v7292_v51 }
 0x950   : > { %v7309_v42 = vmul.f32 %v21678_v28, %v7293_v48  ;;  %v7310_v40 = vmul.f32 %v21685_v22, %v7294_v35  ;;  %v7311_v58 = vmul.f32 %v21694_v56, %v7295_v44  ;;  %v7312_v17 = vmul.f32 %v21700_v3, %v7296_v16 }
 0x951   : > { %v7320_v63 = vadd.f32 -0.28449672, %v7304_v61  ;;  %v7313_v53 = vmul.f32 %v21709_v50, %v7297_v37  ;;  %v7314_v34 = vmul.f32 %v21717_v60, %v7298_v54  ;;  %v7315_v33 = vmul.f32 %v21723_v1, %v7299_v57 }
 0x952   : > { %v7321_v18 = vadd.f32 -0.28449672, %v7305_v14  ;;  %v7316_v2 = vmul.f32 %v21727_v9, %v7300_v15  ;;  %v7317_v43 = vmul.f32 %v21735_v41, %v7301_v13  ;;  %v7318_v48 = vmul.f32 %v21738_v29, %v7302_v38 }
 0x953   : > { %v7322_v11 = vadd.f32 -0.28449672, %v7306_v7  ;;  %v7319_v45 = vmul.f32 %v21742_v52, %v7303_v59  ;;  %v7323_v36 = vadd.f32 -0.28449672, %v7307_v10  ;;  %v7324_v51 = vadd.f32 -0.28449672, %v7308_v25 }
 0x954   : > { %v7325_v16 = vadd.f32 -0.28449672, %v7309_v42  ;;  %v7326_v35 = vadd.f32 -0.28449672, %v7310_v40  ;;  %v7327_v44 = vadd.f32 -0.28449672, %v7311_v58  ;;  %v7336_v54 = vmul.f32 %v21647_v8, %v7320_v63 }
 0x955   : > { %v7328_v61 = vadd.f32 -0.28449672, %v7312_v17  ;;  %v7329_v37 = vadd.f32 -0.28449672, %v7313_v53  ;;  %v7330_v57 = vadd.f32 -0.28449672, %v7314_v34  ;;  %v7337_v15 = vmul.f32 %v21652_v62, %v7321_v18 }
 0x956   : > { %v7331_v14 = vadd.f32 -0.28449672, %v7315_v33  ;;  %v7332_v24 = vadd.f32 -0.28449672, %v7316_v2  ;;  %v7333_v13 = vadd.f32 -0.28449672, %v7317_v43  ;;  %v7338_v38 = vmul.f32 %v21657_v30, %v7322_v11 }
 0x957   : > { %v7334_v6 = vadd.f32 -0.28449672, %v7318_v48  ;;  %v7335_v7 = vadd.f32 -0.28449672, %v7319_v45  ;;  %v7339_v59 = vmul.f32 %v21664_v39, %v7323_v36  ;;  %v7340_v10 = vmul.f32 %v21670_v27, %v7324_v51 }
 0x958   : > { %18092 = vpow2.f32 %v21681_v12  ;;  %v7341_v25 = vmul.f32 %v21678_v28, %v7325_v16  ;;  %v7342_v42 = vmul.f32 %v21685_v22, %v7326_v35  ;;  %v7343_v40 = vmul.f32 %v21694_v56, %v7327_v44 }
 0x959   : > { %18094 = vpow2.f32 %v21683_v26  ;;  %v7344_v58 = vmul.f32 %v21700_v3, %v7328_v61  ;;  %v7345_v17 = vmul.f32 %v21709_v50, %v7329_v37  ;;  %v7346_v63 = vmul.f32 %v21717_v60, %v7330_v57 }
 0x95a   : > { %v7352_v53 = vadd.f32 0.2548296, %v7336_v54  ;;  %v7347_v34 = vmul.f32 %v21723_v1, %v7331_v14  ;;  %v7348_v33 = vmul.f32 %v21727_v9, %v7332_v24  ;;  %v7349_v12 = vmul.f32 %v21735_v41, %v7333_v13 }
 0x95b   : > { %v7353_v18 = vadd.f32 0.2548296, %v7337_v15  ;;  %v7350_v2 = vmul.f32 %v21738_v29, %v7334_v6  ;;  %v7354_v43 = vadd.f32 0.2548296, %v7338_v38  ;;  %v7355_v48 = vadd.f32 0.2548296, %v7339_v59 }
 0x95c   : > { %v7356_v11 = vadd.f32 0.2548296, %v7340_v10  ;;  %v7351_v26 = vmul.f32 %v21742_v52, %v7335_v7  ;;  %v7357_v45 = vadd.f32 0.2548296, %v7341_v25  ;;  %v7358_v36 = vadd.f32 0.2548296, %v7342_v42 }
 0x95d   : > { %v7359_v51 = vadd.f32 0.2548296, %v7343_v40  ;;  %v7360_v16 = vadd.f32 0.2548296, %v7344_v58  ;;  %v7361_v35 = vadd.f32 0.2548296, %v7345_v17  ;;  %v7368_v61 = vmul.f32 %v21647_v8, %v7352_v53 }
 0x95e   : > { %v7362_v44 = vadd.f32 0.2548296, %v7346_v63  ;;  %v7363_v54 = vadd.f32 0.2548296, %v7347_v34  ;;  %v7364_v24 = vadd.f32 0.2548296, %v7348_v33  ;;  %v7369_v57 = vmul.f32 %v21652_v62, %v7353_v18 }
 0x95f   : > { %v7365_v37 = vadd.f32 0.2548296, %v7349_v12  ;;  %v21797_v14 = vadd.f32 0.2548296, %v7350_v2  ;;  %v7370_v6 = vmul.f32 %v21657_v30, %v7354_v43  ;;  %18096 = vpow2.f32 %v21692_v55  ;;  %v23534_v42 = vld [vmem:[#allocation63_spill] sm:$0xff]  ;;  %v23535_v40 = vld [vmem:[#allocation29_spill] sm:$0xff] }
 0x960   : > { %v7430_v15 = vmul.f32 1.442695, %v21662_v21  ;;  %v21802_v13 = vadd.f32 0.2548296, %v7351_v26  ;;  %v7371_v38 = vmul.f32 %v21664_v39, %v7355_v48  ;;  %18098 = vpow2.f32 %v21698_v0  ;;  %v23537_v63 = vld [vmem:[#allocation20_spill] sm:$0xff] }
 0x961   : > { %v7432_v8 = vmul.f32 1.442695, %v21668_v19  ;;  %v7372_v59 = vmul.f32 %v21670_v27, %v7356_v11  ;;  %v7373_v62 = vmul.f32 %v21678_v28, %v7357_v45  ;;  %18100 = vpow2.f32 %v21707_v5  ;;  %v23538_v48 = vld [vmem:[#allocation68_spill] sm:$0xff]  ;;  %v23539_v45 = vld [vmem:[#allocation30_spill] sm:$0xff] }
 0x962   : > { %v18093_v7 = vpop.eup %18092  ;;  %v7434_v30 = vmul.f32 1.442695, %v21673_v23  ;;  %v7374_v21 = vmul.f32 %v21685_v22, %v7358_v36  ;;  %18102 = vpow2.f32 %v21715_v49  ;;  %v7436_v39 = vmul.f32 1.442695, %v21676_v32  ;;  %v23540_v36 = vld [vmem:[#allocation31_spill] sm:$0xff] }
 0x963   : > { %v18095_v55 = vpop.eup %18094  ;;  %v7448_v0 = vmul.f32 %v21761_v47, %v7368_v61  ;;  %18104 = vpow2.f32 %v7430_v15  ;;  %v7438_v19 = vmul.f32 1.442695, %v21690_v4  ;;  %v7449_v10 = vmul.f32 %v18093_v7, %v7369_v57 }
 0x964   : > { %v7450_v27 = vmul.f32 %v18095_v55, %v7370_v6  ;;  %v7375_v28 = vmul.f32 %v21694_v56, %v7359_v51  ;;  %18106 = vpow2.f32 %v7432_v8  ;;  %v7440_v5 = vmul.f32 1.442695, %v21705_v20  ;;  %v23536_v56 = vld [vmem:[#allocation64_spill] sm:$0xff] }
 0x965   : > { %v7464_v23 = vsub.f32 1.0, %v7448_v0  ;;  %18108 = vpow2.f32 %v7434_v30  ;;  %v7442_v22 = vmul.f32 1.442695, %v21713_v31  ;;  %v7465_v25 = vsub.f32 1.0, %v7449_v10 }
 0x966   : > { %v7466_v49 = vsub.f32 1.0, %v7450_v27  ;;  %v7376_v32 = vmul.f32 %v21700_v3, %v7360_v16  ;;  %18110 = vpow2.f32 %v7436_v39  ;;  %v7444_v47 = vmul.f32 1.442695, %v21721_v46 }
 0x967   : > { %v7480_v4 = vmul.f32 %v7464_v23, %v23534_v42  ;;  %18112 = vpow2.f32 %v7438_v19  ;;  %v7446_v58 = vmul.f32 1.442695, %v23535_v40  ;;  %v7481_v17 = vmul.f32 %v7465_v25, %v23536_v56  ;;  %v23543_v19 = vld [vmem:[#allocation16_spill] sm:$0xff] }
 0x968   : > { %v7482_v20 = vmul.f32 %v7466_v49, %v23537_v63  ;;  %v7377_v53 = vmul.f32 %v21709_v50, %v7361_v35  ;;  %v7378_v31 = vmul.f32 %v21717_v60, %v7362_v44  ;;  %18114 = vpow2.f32 %v7440_v5 }
 0x969   : > { %v7496_v34 = vadd.f32 1.0, %v7480_v4  ;;  %v18097_v33 = vpop.eup %18096  ;;  %v7379_v3 = vmul.f32 %v21723_v1, %v7363_v54  ;;  %18116 = vpow2.f32 %v7442_v22  ;;  %v7497_v46 = vadd.f32 1.0, %v7481_v17  ;;  %v23544_v22 = vld [vmem:[#allocation66_spill] sm:$0xff] }
 0x96a   : > { %v7498_v12 = vadd.f32 1.0, %v7482_v20  ;;  %v18099_v18 = vpop.eup %18098  ;;  %v7380_v2 = vmul.f32 %v21727_v9, %v7364_v24  ;;  %18118 = vpow2.f32 %v7444_v47  ;;  %v7451_v43 = vmul.f32 %v18097_v33, %v7371_v38  ;;  %v23545_v47 = vld [vmem:[#allocation21_spill] sm:$0xff]  ;;  %v23546_v17 = vld [vmem:[#allocation22_spill] sm:$0xff] }
 0x96b   : > { %v7512_v11 = vmul.f32 %v7496_v34, %v23538_v48  ;;  %v18101_v26 = vpop.eup %18100  ;;  %18120 = vpow2.f32 %v7446_v58  ;;  %v7452_v50 = vmul.f32 %v18099_v18, %v7372_v59  ;;  %v7513_v60 = vmul.f32 %v7497_v46, %v23539_v45  ;;  %v23541_v59 = vld [vmem:[#allocation65_spill] sm:$0xff] }
 0x96c   : > { %v7514_v51 = vmul.f32 %v7498_v12, %v23540_v36  ;;  %v18103_v16 = vpop.eup %18102  ;;  %v7381_v1 = vmul.f32 %v21735_v41, %v7365_v37  ;;  %v7453_v35 = vmul.f32 %v18101_v26, %v7373_v62  ;;  %v7467_v44 = vsub.f32 1.0, %v7451_v43 }
 0x96d   : > { %v7544_v61 = vrot.slane %v7512_v11, 7  ;;  %v18105_v54 = vpop.eup %18104  ;;  %v7454_v57 = vmul.f32 %v18103_v16, %v7374_v21  ;;  %v7468_v9 = vsub.f32 1.0, %v7452_v50  ;;  %v7545_v24 = vrot.slane %v7513_v60, 7  ;;  %v23542_v21 = vld [vmem:[#allocation19_spill] sm:$0xff]  ;;  %v23549_v60 = vld [vmem:[#allocation26_spill] sm:$0xff] }
 0x96e   : > { %v7546_v6 = vrot.slane %v7514_v51, 7  ;;  %v18107_v15 = vpop.eup %18106  ;;  %v7382_v38 = vmul.f32 %v21738_v29, %v21797_v14  ;;  %v7455_v8 = vmul.f32 %v18105_v54, %v7375_v28  ;;  %v7469_v7 = vsub.f32 1.0, %v7453_v35  ;;  %v23550_v16 = vld [vmem:[#allocation23_spill] sm:$0xff] }
 0x96f   : > { %v7483_v30 = vmul.f32 %v7467_v44, %v23541_v59  ;;  %7576 = vst [vmem:[#allocation3] sm:$0xfe] %v7544_v61  ;;  %7580 = vst [vmem:[#allocation3 + $0x20] sm:$0x1] %v7544_v61  ;;  %v18109_v55 = vpop.eup %18108  ;;  %v7383_v41 = vmul.f32 %v21742_v52, %v21802_v13  ;;  %v7456_v37 = vmul.f32 %v18107_v15, %v7376_v32  ;;  %v7470_v62 = vsub.f32 1.0, %v7454_v57  ;;  %v23552_v57 = vld [vmem:[#allocation25_spill] sm:$0xff] }
 0x970   : > { %v7484_v39 = vmul.f32 %v7468_v9, %v23542_v21  ;;  %7578 = vst [vmem:[#allocation3 + $0x10] sm:$0xfe] %v7546_v6  ;;  %7581 = vst [vmem:[#allocation3 + $0x28] sm:$0x1] %v7545_v24  ;;  %v18111_v0 = vpop.eup %18110  ;;  %v7457_v29 = vmul.f32 %v18109_v55, %v7377_v53  ;;  %v7471_v14 = vsub.f32 1.0, %v7455_v8  ;;  %v7485_v10 = vmul.f32 %v7469_v7, %v23543_v19  ;;  %v23555_v59 = vld [vmem:[#allocation18_spill] sm:$0xff] }
 0x971   : > { %7582 = vst [vmem:[#allocation3 + $0x30] sm:$0x1] %v7546_v6  ;;  %7577 = vst [vmem:[#allocation3 + $0x8] sm:$0xfe] %v7545_v24  ;;  %v7499_v27 = vadd.f32 1.0, %v7483_v30  ;;  %v18113_v28 = vpop.eup %18112  ;;  %v7458_v5 = vmul.f32 %v18111_v0, %v7378_v31  ;;  %v7472_v23 = vsub.f32 1.0, %v7456_v37  ;;  %v7486_v25 = vmul.f32 %v7470_v62, %v23544_v22 }
 0x972   : > { %v7500_v52 = vadd.f32 1.0, %v7484_v39  ;;  %v18115_v13 = vpop.eup %18114  ;;  %v7459_v49 = vmul.f32 %v18113_v28, %v7379_v3  ;;  %v7473_v32 = vsub.f32 1.0, %v7457_v29  ;;  %v7487_v42 = vmul.f32 %v7471_v14, %v23545_v47  ;;  %v23547_v31 = vld [vmem:[#allocation67_spill] sm:$0xff]  ;;  %v23548_v3 = vld [vmem:[#allocation24_spill] sm:$0xff]  ;;  %v23553_v6 = vld [vmem:[#allocation33_spill] sm:$0xff] }
 0x973   : > { %v7501_v4 = vadd.f32 1.0, %v7485_v10  ;;  %v18117_v40 = vpop.eup %18116  ;;  %v7460_v58 = vmul.f32 %v18115_v13, %v7380_v2  ;;  %v7474_v56 = vsub.f32 1.0, %v7458_v5  ;;  %v7488_v63 = vmul.f32 %v7472_v23, %v23546_v17  ;;  %v23556_v55 = vld [vmem:[#allocation49_spill] sm:$0xff]  ;;  %v23557_v37 = vld [vmem:[#allocation27_spill] sm:$0xff]  ;;  %v23560_v10 = vld [vmem:[#allocation56_spill] sm:$0xff] }
 0x974   : > { %v7502_v20 = vadd.f32 1.0, %v7486_v25  ;;  %v18119_v53 = vpop.eup %18118  ;;  %v7461_v34 = vmul.f32 %v18117_v40, %v7381_v1  ;;  %v7475_v33 = vsub.f32 1.0, %v7459_v49  ;;  %v7489_v46 = vmul.f32 %v7473_v32, %v23547_v31  ;;  %v23551_v1 = vld [vmem:[#allocation34_spill] sm:$0xff]  ;;  %v23558_v39 = vld [vmem:[#allocation17_spill] sm:$0xff]  ;;  %v23559_v29 = vld [vmem:[#allocation35_spill] sm:$0xff] }
 0x975   : > { %v7503_v12 = vadd.f32 1.0, %v7487_v42  ;;  %v18121_v18 = vpop.eup %18120  ;;  %v7462_v43 = vmul.f32 %v18119_v53, %v7382_v38  ;;  %v7476_v48 = vsub.f32 1.0, %v7460_v58  ;;  %v7490_v11 = vmul.f32 %v7474_v56, %v23548_v3  ;;  %v23554_v38 = vld [vmem:[#allocation28_spill] sm:$0xff]  ;;  %v23561_v28 = vld [vmem:[#allocation57_spill] sm:$0xff]  ;;  %v23562_v23 = vld [vmem:[#allocation58_spill] sm:$0xff] }
 0x976   : > { %v7504_v26 = vadd.f32 1.0, %v7488_v63  ;;  %v7463_v50 = vmul.f32 %v18121_v18, %v7383_v41  ;;  %v7477_v45 = vsub.f32 1.0, %v7461_v34  ;;  %v7491_v2 = vmul.f32 %v7475_v33, %v23549_v60  ;;  %v23564_v49 = vld [vmem:[#allocation60_spill] sm:$0xff]  ;;  %v23565_v42 = vld [vmem:[#allocation61_spill] sm:$0xff]  ;;  %v23566_v17 = vld [vmem:[#allocation62_spill] sm:$0xff] }
 0x977   : > { %v7505_v36 = vadd.f32 1.0, %v7489_v46  ;;  %v7478_v51 = vsub.f32 1.0, %v7462_v43  ;;  %v7492_v35 = vmul.f32 %v7476_v48, %v23550_v16  ;;  %v7506_v44 = vadd.f32 1.0, %v7490_v11  ;;  %v7765_v3 = vld [vmem:[#allocation3 + $0x28] sm:$0x1] }
 0x978   : > { %v7515_v61 = vmul.f32 %v7499_v27, %v23551_v1  ;;  %v7479_v54 = vsub.f32 1.0, %v7463_v50  ;;  %v7493_v9 = vmul.f32 %v7477_v45, %v23552_v57  ;;  %v7507_v24 = vadd.f32 1.0, %v7491_v2  ;;  %v7761_v48 = vld [vmem:[#allocation3 + $0x8] sm:$0xfe]  ;;  %v7760_v11 = vld [vmem:[#allocation3] sm:$0xfe] }
 0x979   : > { %v7516_v15 = vmul.f32 %v7500_v52, %v23553_v6  ;;  %v7494_v8 = vmul.f32 %v7478_v51, %v23554_v38  ;;  %v7508_v7 = vadd.f32 1.0, %v7492_v35  ;;  %v7517_v30 = vmul.f32 %v7501_v4, %v23555_v59  ;;  %v23563_v52 = vld [vmem:[#allocation59_spill] sm:$0xff] }
 0x97a   : > { %v7518_v41 = vmul.f32 %v7502_v20, %v23556_v55  ;;  %v7495_v62 = vmul.f32 %v7479_v54, %v23557_v37  ;;  %v7509_v21 = vadd.f32 1.0, %v7493_v9  ;;  %v7519_v0 = vmul.f32 %v7503_v12, %v23558_v39  ;;  %v17250_v57 = vld [vmem:[#allocation4 + $0x600] ss:$16 sps:$4 sm:$0xff]   ;;  %v17253_v9 = vld [vmem:[#allocation4 + $0x608] ss:$16 sps:$4 sm:$0xff]  }
 0x97b   : > { %v7520_v14 = vmul.f32 %v7504_v26, %v23559_v29  ;;  %v7510_v19 = vadd.f32 1.0, %v7494_v8  ;;  %v7521_v27 = vmul.f32 %v7505_v36, %v23560_v10  ;;  %v7522_v5 = vmul.f32 %v7506_v44, %v23561_v28  ;;  %v7764_v26 = vld [vmem:[#allocation3 + $0x20] sm:$0x1]  ;;  %v17258_v29 = vld [vmem:[#allocation4 + $0x624] ss:$16 sps:$4 sm:$0xff]  }
 0x97c   : > { %v7523_v22 = vmul.f32 %v7507_v24, %v23562_v23  ;;  %v7511_v25 = vadd.f32 1.0, %v7495_v62  ;;  %v7524_v13 = vmul.f32 %v7508_v7, %v23563_v52  ;;  %v7525_v32 = vmul.f32 %v7509_v21, %v23564_v49 }
 0x97d   : > { %v7547_v47 = vrot.slane %v7515_v61, 7  ;;  %v7526_v4 = vmul.f32 %v7510_v19, %v23565_v42  ;;  %v7548_v40 = vrot.slane %v7516_v15, 7  ;;  %v7549_v58 = vrot.slane %v7517_v30, 7 }
 0x97e   : > { %v7550_v56 = vrot.slane %v7518_v41, 7  ;;  %v7527_v63 = vmul.f32 %v7511_v25, %v23566_v17  ;;  %v7551_v20 = vrot.slane %v7519_v0, 7  ;;  %v7552_v53 = vrot.slane %v7520_v14, 7  ;;  %v17261_v14 = vld [vmem:[#allocation4 + $0x62c] ss:$16 sps:$4 sm:$0xff]  }
 0x97f   : > { %v7553_v34 = vrot.slane %v7521_v27, 7  ;;  %7583 = vst [vmem:[#allocation3 + $0x38] sm:$0x1] %v7547_v47  ;;  %7579 = vst [vmem:[#allocation3 + $0x18] sm:$0xfe] %v7547_v47  ;;  %v7554_v33 = vrot.slane %v7522_v5, 7 }
 0x980   : > { %v7555_v31 = vrot.slane %v7523_v22, 7  ;;  %v7556_v46 = vrot.slane %v7524_v13, 7  ;;  %v7557_v12 = vrot.slane %v7525_v32, 7  ;;  %7584 = vst [vmem:[#allocation3 + $0x40] sm:$0xfe] %v7548_v40  ;;  %v7558_v18 = vrot.slane %v7526_v4, 7 }
 0x981   : > { %7586 = vst [vmem:[#allocation3 + $0x50] sm:$0xfe] %v7550_v56  ;;  %7588 = vst [vmem:[#allocation3 + $0x60] sm:$0x1] %v7548_v40  ;;  %v7559_v43 = vrot.slane %v7527_v63, 7  ;;  %v7827_v50 = vrot.slane %v7761_v48, 1 }
 0x982   : > { %7589 = vst [vmem:[#allocation3 + $0x68] sm:$0x1] %v7549_v58  ;;  %7590 = vst [vmem:[#allocation3 + $0x70] sm:$0x1] %v7550_v56  ;;  %v7828_v45 = vrot.slane %v7765_v3, 1  ;;  %v7824_v60 = vrot.slane %v7760_v11, 1 }
 0x983   : > { %7585 = vst [vmem:[#allocation3 + $0x48] sm:$0xfe] %v7549_v58  ;;  %7591 = vst [vmem:[#allocation3 + $0x78] sm:$0x1] %v7551_v20  ;;  %v7825_v2 = vrot.slane %v7764_v26, 1  ;;  %vm23579_vm2 = vcmask 1041409  }
 0x984   : > { %7587 = vst [vmem:[#allocation3 + $0x58] sm:$0xfe] %v7551_v20  ;;  %7592 = vst [vmem:[#allocation3 + $0x80] sm:$0xfe] %v7552_v53  ;;  %v7829_v35 = vsel %vm3138_vm4, %v7827_v50, %v7828_v45  ;;  %v17256_v4 = vld [vmem:[#allocation4 + $0x620] ss:$16 sps:$4 sm:$0xff]  }
 0x985   : > { %7593 = vst [vmem:[#allocation3 + $0x88] sm:$0xfe] %v7553_v34  ;;  %7596 = vst [vmem:[#allocation3 + $0xa0] sm:$0x1] %v7552_v53  ;;  %v7826_v24 = vsel %vm3138_vm4, %v7824_v60, %v7825_v2  ;;  %v17259_v40 = vld [vmem:[#allocation4 + $0x628] ss:$16 sps:$4 sm:$0xff]  }
 0x986   : > { %7597 = vst [vmem:[#allocation3 + $0xa8] sm:$0x1] %v7553_v34  ;;  %7594 = vst [vmem:[#allocation3 + $0x90] sm:$0xfe] %v7554_v33  ;;  %v7763_v41 = vld [vmem:[#allocation3 + $0x18] sm:$0xfe] }
 0x987   : > { %7595 = vst [vmem:[#allocation3 + $0x98] sm:$0xfe] %v7555_v31  ;;  %7598 = vst [vmem:[#allocation3 + $0xb0] sm:$0x1] %v7554_v33  ;;  %v7768_v16 = vld [vmem:[#allocation3 + $0x40] sm:$0xfe] }
 0x988   : > { %7599 = vst [vmem:[#allocation3 + $0xb8] sm:$0x1] %v7555_v31  ;;  %7600 = vst [vmem:[#allocation3 + $0xc0] sm:$0xfe] %v7556_v46  ;;  %v7772_v61 = vld [vmem:[#allocation3 + $0x60] sm:$0x1] }
 0x989   : > { %7601 = vst [vmem:[#allocation3 + $0xc8] sm:$0xfe] %v7557_v12  ;;  %7604 = vst [vmem:[#allocation3 + $0xe0] sm:$0x1] %v7556_v46  ;;  %v7773_v51 = vld [vmem:[#allocation3 + $0x68] sm:$0x1] }
 0x98a   : > { %7605 = vst [vmem:[#allocation3 + $0xe8] sm:$0x1] %v7557_v12  ;;  %7602 = vst [vmem:[#allocation3 + $0xd0] sm:$0xfe] %v7558_v18  ;;  %v7769_v36 = vld [vmem:[#allocation3 + $0x48] sm:$0xfe] }
 0x98b   : > { %7603 = vst [vmem:[#allocation3 + $0xd8] sm:$0xfe] %v7559_v43  ;;  %7606 = vst [vmem:[#allocation3 + $0xf0] sm:$0x1] %v7558_v18  ;;  %v7839_v44 = vrot.slane %v7769_v36, 1  ;;  %v7840_v1 = vrot.slane %v7773_v51, 1 }
 0x98c   : > { %7607 = vst [vmem:[#allocation3 + $0xf8] sm:$0x1] %v7559_v43  ;;  %v7836_v54 = vrot.slane %v7768_v16, 1  ;;  %v7837_v6 = vrot.slane %v7772_v61, 1  ;;  %v7777_v15 = vld [vmem:[#allocation3 + $0x88] sm:$0xfe]  ;;  %vm23580_vm3 = vmmov %vm23579_vm2 }
 0x98d   : > { %v7781_v38 = vld [vmem:[#allocation3 + $0xa8] sm:$0x1]  ;;  %v7841_v8 = vsel %vm3138_vm4, %v7839_v44, %v7840_v1  ;;  %v7851_v30 = vrot.slane %v7777_v15, 1  ;;  %v7767_v37 = vld [vmem:[#allocation3 + $0x38] sm:$0x1]  ;;  %v7833_v58 = vrot.slane %v7763_v41, 1  ;;  %vm23583_vm6 = vmmov %vm23579_vm2 }
 0x98e   : > { %v7852_v55 = vrot.slane %v7781_v38, 1  ;;  %v7889_v62 = vpack.c.bf16 %v7841_v8, %v7829_v35  ;;  %v7838_v21 = vsel %vm3138_vm4, %v7836_v54, %v7837_v6  ;;  %v7776_v19 = vld [vmem:[#allocation3 + $0x80] sm:$0xfe]  ;;  %v7780_v10 = vld [vmem:[#allocation3 + $0xa0] sm:$0x1]  ;;  %v7834_v56 = vrot.slane %v7767_v37, 1  ;;  %vm23584_vm7 = vmmov %vm23579_vm2 }
 0x98f   : > { %v7888_v27 = vpack.c.bf16 %v7838_v21, %v7826_v24  ;;  %v7784_v5 = vld [vmem:[#allocation3 + $0xc0] sm:$0xfe]  ;;  %v7848_v22 = vrot.slane %v7776_v19, 1  ;;  %v7849_v25 = vrot.slane %v7780_v10, 1  ;;  %v7771_v32 = vld [vmem:[#allocation3 + $0x58] sm:$0xfe]  ;;  %vm23585_vm8 = vmmov %vm23579_vm2 }
 0x990   : > { %v7785_v7 = vld [vmem:[#allocation3 + $0xc8] sm:$0xfe]  ;;  %v7853_v28 = vsel %vm3138_vm4, %v7851_v30, %v7852_v55  ;;  %v7788_v23 = vld [vmem:[#allocation3 + $0xe0] sm:$0x1]  ;;  %8697 = vmatprep.mubr.bf16.mxu0 %v7889_v62  ;;  %8803 = vmatprep.mubr.bf16.mxu1 %v7889_v62  ;;  %v7860_v13 = vrot.slane %v7784_v5, 1  ;;  %v7845_v17 = vrot.slane %v7771_v32, 1  ;;  %v7835_v12 = vsel %vm3138_vm4, %v7833_v58, %v7834_v56  ;;  %vm23587_vm9 = vmmov %vm23579_vm2 }
 0x991   : > { %v7789_v59 = vld [vmem:[#allocation3 + $0xe8] sm:$0x1]  ;;  %v7863_v39 = vrot.slane %v7785_v7, 1  ;;  %v7861_v49 = vrot.slane %v7788_v23, 1  ;;  %v7775_v47 = vld [vmem:[#allocation3 + $0x78] sm:$0x1]  ;;  %8698 = vmatmul.mubr.bf16.vlgmr.msra.gmra.mrb[28].mxu0 %v7888_v27  ;;  %8804 = vmatmul.mubr.bf16.vlgmr.msra.gmra.mrb[28].mxu1 %v7888_v27  ;;  %v7850_v34 = vsel %vm3138_vm4, %v7848_v22, %v7849_v25 }
 0x992   : > { %v7864_v0 = vrot.slane %v7789_v59, 1  ;;  %8719 = vmatpush1.bf16.msra.mxu0 %v17250_v57  ;;  %8825 = vmatpush1.bf16.msra.mxu1 %v17253_v9  ;;  %v7846_v63 = vrot.slane %v7775_v47, 1  ;;  %v17264_v20 = vld [vmem:[#allocation4 + $0x644] ss:$16 sps:$4 sm:$0xff]   ;;  %v17267_v53 = vld [vmem:[#allocation4 + $0x64c] ss:$16 sps:$4 sm:$0xff]  }
 0x993   : > { %8720 = vmatprep.subr.bf16.mxu0 %v17258_v29  ;;  %8826 = vmatprep.subr.bf16.mxu1 %v17261_v14  ;;  %v7862_v33 = vsel %vm3138_vm4, %v7860_v13, %v7861_v49  ;;  %v17262_v31 = vld [vmem:[#allocation4 + $0x640] ss:$16 sps:$4 sm:$0xff]   ;;  %v17265_v46 = vld [vmem:[#allocation4 + $0x648] ss:$16 sps:$4 sm:$0xff]   ;;  %v17270_v48 = vld [vmem:[#allocation4 + $0x664] ss:$16 sps:$4 sm:$0xff]  }
 0x994   : > { %v7865_v52 = vsel %vm3138_vm4, %v7863_v39, %v7864_v0  ;;  %v7847_v18 = vsel %vm3138_vm4, %v7845_v17, %v7846_v63  ;;  %v7892_v43 = vpack.c.bf16 %v7862_v33, %v7850_v34  ;;  %v17273_v3 = vld [vmem:[#allocation4 + $0x66c] ss:$16 sps:$4 sm:$0xff]   ;;  %v17268_v26 = vld [vmem:[#allocation4 + $0x660] ss:$16 sps:$4 sm:$0xff]   ;;  %v17271_v50 = vld [vmem:[#allocation4 + $0x668] ss:$16 sps:$4 sm:$0xff]  }
 0x995   : > { %v7893_v42 = vpack.c.bf16 %v7865_v52, %v7853_v28  ;;  %v7891_v11 = vpack.c.bf16 %v7847_v18, %v7835_v12  ;;  %v17276_v45 = vld [vmem:[#allocation4 + $0x684] ss:$16 sps:$4 sm:$0xff]   ;;  %v17279_v60 = vld [vmem:[#allocation4 + $0x68c] ss:$16 sps:$4 sm:$0xff]   ;;  %v17274_v2 = vld [vmem:[#allocation4 + $0x680] ss:$16 sps:$4 sm:$0xff]  }
 0x996   : > { %8721 = vmatpush1.bf16.msra.mxu0 %v17256_v4  ;;  %8827 = vmatpush1.bf16.msra.mxu1 %v17259_v40  ;;  %v17277_v36 = vld [vmem:[#allocation4 + $0x688] ss:$16 sps:$4 sm:$0xff]   ;;  %v17282_v51 = vld [vmem:[#allocation4 + $0x6a4] ss:$16 sps:$4 sm:$0xff]   ;;  %v17285_v16 = vld [vmem:[#allocation4 + $0x6ac] ss:$16 sps:$4 sm:$0xff]  }
 0x997   : > { %8707 = vmatprep.mubr.bf16.mxu0 %v7893_v42  ;;  %8813 = vmatprep.mubr.bf16.mxu1 %v7893_v42  ;;  %v17280_v35 = vld [vmem:[#allocation4 + $0x6a0] ss:$16 sps:$4 sm:$0xff]   ;;  %v17283_v44 = vld [vmem:[#allocation4 + $0x6a8] ss:$16 sps:$4 sm:$0xff]   ;;  %v17288_v1 = vld [vmem:[#allocation4 + $0x6c4] ss:$16 sps:$4 sm:$0xff]  }
 0x998   : > { %8722 = vmatprep.subr.bf16.mxu0 %v17264_v20  ;;  %8828 = vmatprep.subr.bf16.mxu1 %v17267_v53  ;;  %v17291_v61 = vld [vmem:[#allocation4 + $0x6cc] ss:$16 sps:$4 sm:$0xff]   ;;  %v17286_v54 = vld [vmem:[#allocation4 + $0x6c0] ss:$16 sps:$4 sm:$0xff]   ;;  %v17289_v57 = vld [vmem:[#allocation4 + $0x6c8] ss:$16 sps:$4 sm:$0xff]  }
 0x999   : > { %8708 = vmatmul.mubr.bf16.gmra.mrb[32].mxu0 %v7892_v43  ;;  %8814 = vmatmul.mubr.bf16.gmra.mrb[32].mxu1 %v7892_v43  ;;  %v17294_v9 = vld [vmem:[#allocation4 + $0x6e4] ss:$16 sps:$4 sm:$0xff]   ;;  %v17297_v24 = vld [vmem:[#allocation4 + $0x6ec] ss:$16 sps:$4 sm:$0xff]   ;;  %v17292_v6 = vld [vmem:[#allocation4 + $0x6e0] ss:$16 sps:$4 sm:$0xff]  }
 0x99a   : > { %8723 = vmatpush1.bf16.msra.mxu0 %v17262_v31  ;;  %8829 = vmatpush1.bf16.msra.mxu1 %v17265_v46  ;;  %v17295_v15 = vld [vmem:[#allocation4 + $0x6e8] ss:$16 sps:$4 sm:$0xff]   ;;  %v17300_v38 = vld [vmem:[#allocation4 + $0x704] ss:$16 sps:$4 sm:$0xff]   ;;  %v17303_v8 = vld [vmem:[#allocation4 + $0x70c] ss:$16 sps:$4 sm:$0xff]  }
 0x99b   : > { %8750 = vmatprep.mubr.bf16.mxu0 %v7891_v11  ;;  %8856 = vmatprep.mubr.bf16.mxu1 %v7891_v11  ;;  %v17298_v7 = vld [vmem:[#allocation4 + $0x700] ss:$16 sps:$4 sm:$0xff]   ;;  %v17301_v59 = vld [vmem:[#allocation4 + $0x708] ss:$16 sps:$4 sm:$0xff]   ;;  %v17306_v30 = vld [vmem:[#allocation4 + $0x724] ss:$16 sps:$4 sm:$0xff]  }
 0x99c   : > { %8724 = vmatprep.subr.bf16.mxu0 %v17270_v48  ;;  %8830 = vmatprep.subr.bf16.mxu1 %v17273_v3  ;;  %v17309_v55 = vld [vmem:[#allocation4 + $0x72c] ss:$16 sps:$4 sm:$0xff]   ;;  %v17304_v41 = vld [vmem:[#allocation4 + $0x720] ss:$16 sps:$4 sm:$0xff]   ;;  %v17307_v37 = vld [vmem:[#allocation4 + $0x728] ss:$16 sps:$4 sm:$0xff]  }
 0x99d   : > { %v17312_v62 = vld [vmem:[#allocation4 + $0x744] ss:$16 sps:$4 sm:$0xff]   ;;  %v17315_v21 = vld [vmem:[#allocation4 + $0x74c] ss:$16 sps:$4 sm:$0xff]   ;;  %v17310_v39 = vld [vmem:[#allocation4 + $0x740] ss:$16 sps:$4 sm:$0xff]  }
 0x99e   : > { %8725 = vmatpush1.bf16.msra.mxu0 %v17268_v26  ;;  %8831 = vmatpush1.bf16.msra.mxu1 %v17271_v50  ;;  %v17313_v0 = vld [vmem:[#allocation4 + $0x748] ss:$16 sps:$4 sm:$0xff]   ;;  %v17318_v29 = vld [vmem:[#allocation4 + $0x764] ss:$16 sps:$4 sm:$0xff]   ;;  %v17321_v14 = vld [vmem:[#allocation4 + $0x76c] ss:$16 sps:$4 sm:$0xff]  }
 0x99f   : > { %8726 = vmatprep.subr.bf16.mxu0 %v17276_v45  ;;  %8832 = vmatprep.subr.bf16.mxu1 %v17279_v60  ;;  %v17316_v19 = vld [vmem:[#allocation4 + $0x760] ss:$16 sps:$4 sm:$0xff]   ;;  %v17319_v10 = vld [vmem:[#allocation4 + $0x768] ss:$16 sps:$4 sm:$0xff]   ;;  %v17324_v27 = vld [vmem:[#allocation4 + $0x784] ss:$16 sps:$4 sm:$0xff]  }
 0x9a0   : > { %v17327_v28 = vld [vmem:[#allocation4 + $0x78c] ss:$16 sps:$4 sm:$0xff]   ;;  %v17322_v5 = vld [vmem:[#allocation4 + $0x780] ss:$16 sps:$4 sm:$0xff]   ;;  %v17325_v23 = vld [vmem:[#allocation4 + $0x788] ss:$16 sps:$4 sm:$0xff]  }
 0x9a1   : > { %v17330_v22 = vld [vmem:[#allocation4 + $0x7a4] ss:$16 sps:$4 sm:$0xff]   ;;  %v17333_v25 = vld [vmem:[#allocation4 + $0x7ac] ss:$16 sps:$4 sm:$0xff]   ;;  %v17328_v52 = vld [vmem:[#allocation4 + $0x7a0] ss:$16 sps:$4 sm:$0xff]  }
 0x9a2   : > { %8727 = vmatpush1.bf16.msra.mxu0 %v17274_v2  ;;  %8833 = vmatpush1.bf16.msra.mxu1 %v17277_v36  ;;  %v17331_v13 = vld [vmem:[#allocation4 + $0x7a8] ss:$16 sps:$4 sm:$0xff]   ;;  %v17336_v49 = vld [vmem:[#allocation4 + $0x7c4] ss:$16 sps:$4 sm:$0xff]   ;;  %v17339_v32 = vld [vmem:[#allocation4 + $0x7cc] ss:$16 sps:$4 sm:$0xff]  }
 0x9a3   : > { %8728 = vmatprep.subr.bf16.mxu0 %v17282_v51  ;;  %8834 = vmatprep.subr.bf16.mxu1 %v17285_v16  ;;  %v17334_v47 = vld [vmem:[#allocation4 + $0x7c0] ss:$16 sps:$4 sm:$0xff]   ;;  %v17337_v42 = vld [vmem:[#allocation4 + $0x7c8] ss:$16 sps:$4 sm:$0xff]   ;;  %v17342_v34 = vld [vmem:[#allocation4 + $0x7e4] ss:$16 sps:$4 sm:$0xff]  }
 0x9a4   : > { %v7762_v4 = vld [vmem:[#allocation3 + $0x10] sm:$0xfe]  ;;  %v7766_v40 = vld [vmem:[#allocation3 + $0x30] sm:$0x1]  ;;  %v7779_v17 = vld [vmem:[#allocation3 + $0x98] sm:$0xfe] }
 0x9a5   : > { %v7770_v58 = vld [vmem:[#allocation3 + $0x50] sm:$0xfe]  ;;  %v7774_v56 = vld [vmem:[#allocation3 + $0x70] sm:$0x1]  ;;  %v7783_v63 = vld [vmem:[#allocation3 + $0xb8] sm:$0x1] }
 0x9a6   : > { %8729 = vmatpush1.bf16.msra.mxu0 %v17280_v35  ;;  %8835 = vmatpush1.bf16.msra.mxu1 %v17283_v44  ;;  %v7787_v20 = vld [vmem:[#allocation3 + $0xd8] sm:$0xfe]  ;;  %v7791_v53 = vld [vmem:[#allocation3 + $0xf8] sm:$0x1]  ;;  %v7830_v31 = vrot.slane %v7762_v4, 1  ;;  %v7831_v46 = vrot.slane %v7766_v40, 1 }
 0x9a7   : > { %8730 = vmatprep.subr.bf16.mxu0 %v17288_v1  ;;  %8836 = vmatprep.subr.bf16.mxu1 %v17291_v61  ;;  %v17345_v33 = vld [vmem:[#allocation4 + $0x7ec] ss:$16 sps:$4 sm:$0xff]   ;;  %v7842_v12 = vrot.slane %v7770_v58, 1  ;;  %v7843_v18 = vrot.slane %v7774_v56, 1  ;;  %v7857_v43 = vrot.slane %v7779_v17, 1  ;;  %v7858_v48 = vrot.slane %v7783_v63, 1 }
 0x9a8   : > { %v7869_v3 = vrot.slane %v7787_v20, 1  ;;  %v7870_v11 = vrot.slane %v7791_v53, 1  ;;  %v17340_v26 = vld [vmem:[#allocation4 + $0x7e0] ss:$16 sps:$4 sm:$0xff]   ;;  %v17343_v50 = vld [vmem:[#allocation4 + $0x7e8] ss:$16 sps:$4 sm:$0xff]   ;;  %v7832_v2 = vsel %vm3138_vm4, %v7830_v31, %v7831_v46 }
 0x9a9   : > { %v17348_v45 = vld [vmem:[#allocation4 + $0x4] ss:$16 sps:$4 sm:$0xff]   ;;  %v17351_v60 = vld [vmem:[#allocation4 + $0xc] ss:$16 sps:$4 sm:$0xff]   ;;  %v7844_v36 = vsel %vm3138_vm4, %v7842_v12, %v7843_v18  ;;  %v7859_v16 = vsel %vm3138_vm4, %v7857_v43, %v7858_v48  ;;  %v7782_v44 = vld [vmem:[#allocation3 + $0xb0] sm:$0x1] }
 0x9aa   : > { %8731 = vmatpush1.bf16.msra.mxu0 %v17286_v54  ;;  %8837 = vmatpush1.bf16.msra.mxu1 %v17289_v57  ;;  %v7778_v51 = vld [vmem:[#allocation3 + $0x90] sm:$0xfe]  ;;  %v7871_v35 = vsel %vm3138_vm4, %v7869_v3, %v7870_v11  ;;  %v7790_v61 = vld [vmem:[#allocation3 + $0xf0] sm:$0x1]  ;;  %v7890_v57 = vpack.c.bf16 %v7844_v36, %v7832_v2  ;;  %v17387_v40 = vld [vmem:[#allocation4 + $0xcc] ss:$16 sps:$4 sm:$0xff]  }
 0x9ab   : > { %8732 = vmatprep.subr.bf16.mxu0 %v17294_v9  ;;  %8838 = vmatprep.subr.bf16.mxu1 %v17297_v24  ;;  %v7786_v1 = vld [vmem:[#allocation3 + $0xd0] sm:$0xfe]  ;;  %v17349_v9 = vld [vmem:[#allocation4 + $0x8] ss:$16 sps:$4 sm:$0xff]   ;;  %v17393_v63 = vld [vmem:[#allocation4 + $0xec] ss:$16 sps:$4 sm:$0xff]  }
 0x9ac   : > { %v17346_v54 = vld [vmem:[#allocation4] ss:$16 sps:$4 sm:$0xff]   ;;  %v17354_v24 = vld [vmem:[#allocation4 + $0x24] ss:$16 sps:$4 sm:$0xff]   ;;  %v17385_v56 = vld [vmem:[#allocation4 + $0xc8] ss:$16 sps:$4 sm:$0xff]  }
 0x9ad   : > { %v17384_v4 = vld [vmem:[#allocation4 + $0xc4] ss:$16 sps:$4 sm:$0xff]   ;;  %v17382_v58 = vld [vmem:[#allocation4 + $0xc0] ss:$16 sps:$4 sm:$0xff]   ;;  %v17391_v53 = vld [vmem:[#allocation4 + $0xe8] ss:$16 sps:$4 sm:$0xff]  }
 0x9ae   : > { %8733 = vmatpush1.bf16.msra.mxu0 %v17292_v6  ;;  %8839 = vmatpush1.bf16.msra.mxu1 %v17295_v15  ;;  %v7854_v6 = vrot.slane %v7778_v51, 1  ;;  %v7895_v15 = vpack.c.bf16 %v7871_v35, %v7859_v16  ;;  %v17390_v17 = vld [vmem:[#allocation4 + $0xe4] ss:$16 sps:$4 sm:$0xff]   ;;  %v17388_v20 = vld [vmem:[#allocation4 + $0xe0] ss:$16 sps:$4 sm:$0xff]   ;;  %vm23595_vm10 = vcmask 1042434  }
 0x9af   : > { %8734 = vmatprep.subr.bf16.mxu0 %v17300_v38  ;;  %8840 = vmatprep.subr.bf16.mxu1 %v17303_v8  ;;  %v17357_v38 = vld [vmem:[#allocation4 + $0x2c] ss:$16 sps:$4 sm:$0xff]   ;;  %v7855_v8 = vrot.slane %v7782_v44, 1  ;;  %v17394_v31 = vld [vmem:[#allocation4 + $0x100] ss:$16 sps:$4 sm:$0xff]   ;;  %vm23596_vm11 = vmmov %vm23595_vm10  ;;  %vm23599_vm14 = vcmask 1043459  }
 0x9b0   : > { %v17397_v46 = vld [vmem:[#allocation4 + $0x108] ss:$16 sps:$4 sm:$0xff]   ;;  %v17402_v12 = vld [vmem:[#allocation4 + $0x124] ss:$16 sps:$4 sm:$0xff]   ;;  %v17405_v18 = vld [vmem:[#allocation4 + $0x12c] ss:$16 sps:$4 sm:$0xff]  }
 0x9b1   : > { %v17400_v43 = vld [vmem:[#allocation4 + $0x120] ss:$16 sps:$4 sm:$0xff]   ;;  %v17403_v48 = vld [vmem:[#allocation4 + $0x128] ss:$16 sps:$4 sm:$0xff]   ;;  %v17408_v3 = vld [vmem:[#allocation4 + $0x144] ss:$16 sps:$4 sm:$0xff]  }
 0x9b2   : > { %8735 = vmatpush1.bf16.msra.mxu0 %v17298_v7  ;;  %8841 = vmatpush1.bf16.msra.mxu1 %v17301_v59  ;;  %v7866_v7 = vrot.slane %v7786_v1, 1  ;;  %v7867_v59 = vrot.slane %v7790_v61, 1  ;;  %v17411_v11 = vld [vmem:[#allocation4 + $0x14c] ss:$16 sps:$4 sm:$0xff]   ;;  %v17412_v2 = vld [vmem:[#allocation4 + $0x160] ss:$16 sps:$4 sm:$0xff]   ;;  %vm23597_vm12 = vmmov %vm23595_vm10 }
 0x9b3   : > { %8736 = vmatprep.subr.bf16.mxu0 %v17306_v30  ;;  %8842 = vmatprep.subr.bf16.mxu1 %v17309_v55  ;;  %v17352_v30 = vld [vmem:[#allocation4 + $0x20] ss:$16 sps:$4 sm:$0xff]   ;;  %v17355_v55 = vld [vmem:[#allocation4 + $0x28] ss:$16 sps:$4 sm:$0xff]   ;;  %v17420_v51 = vld [vmem:[#allocation4 + $0x184] ss:$16 sps:$4 sm:$0xff]  }
 0x9b4   : > { %v17415_v36 = vld [vmem:[#allocation4 + $0x168] ss:$16 sps:$4 sm:$0xff]   ;;  %v17423_v16 = vld [vmem:[#allocation4 + $0x18c] ss:$16 sps:$4 sm:$0xff]   ;;  %v17418_v35 = vld [vmem:[#allocation4 + $0x180] ss:$16 sps:$4 sm:$0xff]  }
 0x9b5   : > { %v17421_v44 = vld [vmem:[#allocation4 + $0x188] ss:$16 sps:$4 sm:$0xff]   ;;  %v17426_v1 = vld [vmem:[#allocation4 + $0x1a4] ss:$16 sps:$4 sm:$0xff]   ;;  %v17429_v61 = vld [vmem:[#allocation4 + $0x1ac] ss:$16 sps:$4 sm:$0xff]  }
 0x9b6   : > { %8737 = vmatpush1.bf16.msra.mxu0 %v17304_v41  ;;  %8843 = vmatpush1.bf16.msra.mxu1 %v17307_v37  ;;  %v7856_v41 = vsel %vm3138_vm4, %v7854_v6, %v7855_v8  ;;  %v7868_v37 = vsel %vm3138_vm4, %v7866_v7, %v7867_v59  ;;  %v17430_v6 = vld [vmem:[#allocation4 + $0x1c0] ss:$16 sps:$4 sm:$0xff]   ;;  %v17441_v8 = vld [vmem:[#allocation4 + $0x1ec] ss:$16 sps:$4 sm:$0xff]   ;;  %v17439_v59 = vld [vmem:[#allocation4 + $0x1e8] ss:$16 sps:$4 sm:$0xff]  }
 0x9b7   : > { %8738 = vmatprep.subr.bf16.mxu0 %v17312_v62  ;;  %8844 = vmatprep.subr.bf16.mxu1 %v17315_v21  ;;  %v17360_v62 = vld [vmem:[#allocation4 + $0x44] ss:$16 sps:$4 sm:$0xff]   ;;  %v17363_v21 = vld [vmem:[#allocation4 + $0x4c] ss:$16 sps:$4 sm:$0xff]   ;;  %v17436_v7 = vld [vmem:[#allocation4 + $0x1e0] ss:$16 sps:$4 sm:$0xff]  }
 0x9b8   : > { %vm23581_vm4 = vmmov %vm23579_vm2 }
 0x9b9   : > { %vm23598_vm13 = vmmov %vm23595_vm10 }
 0x9ba   : > { %8739 = vmatpush1.bf16.msra.mxu0 %v17310_v39  ;;  %8845 = vmatpush1.bf16.msra.mxu1 %v17313_v0  ;;  %v7609_v39 = vld [vmem:[#allocation3 + $0x8] sm:$0xff]  ;;  %vm23600_vm0 = vmmov %vm23599_vm14 }
 0x9bb   : > { %8740 = vmatprep.subr.bf16.mxu0 %v17318_v29  ;;  %8846 = vmatprep.subr.bf16.mxu1 %v17321_v14  ;;  %v7613_v0 = vld [vmem:[#allocation3 + $0x48] sm:$0xff]  ;;  %v7894_v29 = vpack.c.bf16 %v7868_v37, %v7856_v41  ;;  %v17358_v14 = vld [vmem:[#allocation4 + $0x40] ss:$16 sps:$4 sm:$0xff]   ;;  %vm23601_vm5 = vmmov %vm23600_vm0 }
 0x9bc   : > { %v7608_v41 = vld [vmem:[#allocation3] sm:$0xff]  ;;  %vm23602_vm1 = vmmov %vm23600_vm0 }
 0x9bd   : > { %v7612_v37 = vld [vmem:[#allocation3 + $0x40] sm:$0xff] }
 0x9be   : > { %8741 = vmatpush1.bf16.msra.mxu0 %v17316_v19  ;;  %8847 = vmatpush1.bf16.msra.mxu1 %v17319_v10  ;;  %v17361_v19 = vld [vmem:[#allocation4 + $0x48] ss:$16 sps:$4 sm:$0xff]   ;;  %v7625_v10 = vpack.c.bf16 %v7613_v0, %v7609_v39  ;;  %v17442_v39 = vld [vmem:[#allocation4 + $0x200] ss:$16 sps:$4 sm:$0xff]   ;;  %v7624_v0 = vpack.c.bf16 %v7612_v37, %v7608_v41 }
 0x9bf   : > { %8742 = vmatprep.subr.bf16.mxu0 %v17324_v27  ;;  %8848 = vmatprep.subr.bf16.mxu1 %v17327_v28  ;;  %v17366_v27 = vld [vmem:[#allocation4 + $0x64] ss:$16 sps:$4 sm:$0xff]   ;;  %v17369_v28 = vld [vmem:[#allocation4 + $0x6c] ss:$16 sps:$4 sm:$0xff]   ;;  %v17520_v41 = vld [vmem:[#allocation4 + $0x3a0] ss:$16 sps:$4 sm:$0xff]  }
 0x9c0   : > { %v17523_v37 = vld [vmem:[#allocation4 + $0x3a8] ss:$16 sps:$4 sm:$0xff]  }
 0x9c2   : > { %8743 = vmatpush1.bf16.msra.mxu0 %v17322_v5  ;;  %8849 = vmatpush1.bf16.msra.mxu1 %v17325_v23  ;;  %v17364_v5 = vld [vmem:[#allocation4 + $0x60] ss:$16 sps:$4 sm:$0xff]   ;;  %v17367_v23 = vld [vmem:[#allocation4 + $0x68] ss:$16 sps:$4 sm:$0xff]  }
 0x9c3   : > { %8744 = vmatprep.subr.bf16.mxu0 %v17330_v22  ;;  %8850 = vmatprep.subr.bf16.mxu1 %v17333_v25  ;;  %v17372_v22 = vld [vmem:[#allocation4 + $0x84] ss:$16 sps:$4 sm:$0xff]   ;;  %v17375_v25 = vld [vmem:[#allocation4 + $0x8c] ss:$16 sps:$4 sm:$0xff]  }
 0x9c6   : > { %8745 = vmatpush1.bf16.msra.mxu0 %v17328_v52  ;;  %8851 = vmatpush1.bf16.msra.mxu1 %v17331_v13  ;;  %v17370_v52 = vld [vmem:[#allocation4 + $0x80] ss:$16 sps:$4 sm:$0xff]   ;;  %v17373_v13 = vld [vmem:[#allocation4 + $0x88] ss:$16 sps:$4 sm:$0xff]  }
 0x9c7   : > { %8746 = vmatprep.subr.bf16.mxu0 %v17336_v49  ;;  %8852 = vmatprep.subr.bf16.mxu1 %v17339_v32  ;;  %v17378_v49 = vld [vmem:[#allocation4 + $0xa4] ss:$16 sps:$4 sm:$0xff]   ;;  %v17381_v32 = vld [vmem:[#allocation4 + $0xac] ss:$16 sps:$4 sm:$0xff]  }
 0x9ca   : > { %8747 = vmatpush1.bf16.msra.mxu0 %v17334_v47  ;;  %8853 = vmatpush1.bf16.msra.mxu1 %v17337_v42  ;;  %v17376_v47 = vld [vmem:[#allocation4 + $0xa0] ss:$16 sps:$4 sm:$0xff]   ;;  %v17379_v42 = vld [vmem:[#allocation4 + $0xa8] ss:$16 sps:$4 sm:$0xff]  }
 0x9cb   : > { %8748 = vmatprep.subr.bf16.mxu0 %v17342_v34  ;;  %8854 = vmatprep.subr.bf16.mxu1 %v17345_v33  ;;  %v17396_v34 = vld [vmem:[#allocation4 + $0x104] ss:$16 sps:$4 sm:$0xff]   ;;  %v17399_v33 = vld [vmem:[#allocation4 + $0x10c] ss:$16 sps:$4 sm:$0xff]  }
 0x9ce   : > { %8749 = vmatpush1.bf16.msra.mxu0 %v17340_v26  ;;  %8855 = vmatpush1.bf16.msra.mxu1 %v17343_v50  ;;  %v17406_v26 = vld [vmem:[#allocation4 + $0x140] ss:$16 sps:$4 sm:$0xff]   ;;  %v17409_v50 = vld [vmem:[#allocation4 + $0x148] ss:$16 sps:$4 sm:$0xff]  }
 0x9cf   : > { %9517 = vmatprep.subr.bf16.mxu0 %v17348_v45  ;;  %9623 = vmatprep.subr.bf16.mxu1 %v17351_v60  ;;  %v17414_v45 = vld [vmem:[#allocation4 + $0x164] ss:$16 sps:$4 sm:$0xff]   ;;  %v17417_v60 = vld [vmem:[#allocation4 + $0x16c] ss:$16 sps:$4 sm:$0xff]  }
 0x9d1   : > { %8751 = vmatmul.mubr.bf16.vlgmr.msra.gmra.mrb[28].mxu0 %v7890_v57  ;;  %8857 = vmatmul.mubr.bf16.vlgmr.msra.gmra.mrb[28].mxu1 %v7890_v57  ;;  %v17427_v57 = vld [vmem:[#allocation4 + $0x1a8] ss:$16 sps:$4 sm:$0xff]  }
 0x9d2   : > { %8760 = vmatprep.mubr.bf16.mxu0 %v7895_v15  ;;  %8866 = vmatprep.mubr.bf16.mxu1 %v7895_v15  ;;  %v17433_v15 = vld [vmem:[#allocation4 + $0x1c8] ss:$16 sps:$4 sm:$0xff]  }
 0x9d3   : > { %9518 = vmatpush1.bf16.msra.mxu0 %v17346_v54  ;;  %9624 = vmatpush1.bf16.msra.mxu1 %v17349_v9  ;;  %v17424_v54 = vld [vmem:[#allocation4 + $0x1a0] ss:$16 sps:$4 sm:$0xff]   ;;  %v17432_v9 = vld [vmem:[#allocation4 + $0x1c4] ss:$16 sps:$4 sm:$0xff]  }
 0x9d4   : > { %9519 = vmatprep.subr.bf16.mxu0 %v17354_v24  ;;  %9625 = vmatprep.subr.bf16.mxu1 %v17357_v38  ;;  %v17435_v24 = vld [vmem:[#allocation4 + $0x1cc] ss:$16 sps:$4 sm:$0xff]   ;;  %v17438_v38 = vld [vmem:[#allocation4 + $0x1e4] ss:$16 sps:$4 sm:$0xff]  }
 0x9d7   : > { %9520 = vmatpush1.bf16.msra.mxu0 %v17352_v30  ;;  %9626 = vmatpush1.bf16.msra.mxu1 %v17355_v55  ;;  %v17444_v30 = vld [vmem:[#allocation4 + $0x204] ss:$16 sps:$4 sm:$0xff]   ;;  %v17447_v55 = vld [vmem:[#allocation4 + $0x20c] ss:$16 sps:$4 sm:$0xff]  }
 0x9d8   : > { %9521 = vmatprep.subr.bf16.mxu0 %v17360_v62  ;;  %9627 = vmatprep.subr.bf16.mxu1 %v17363_v21  ;;  %v7617_v62 = vld [vmem:[#allocation3 + $0x88] sm:$0xff] }
 0x9d9   : > { %8761 = vmatmul.mubr.bf16.gmra.mrb[32].mxu0 %v7894_v29  ;;  %8867 = vmatmul.mubr.bf16.gmra.mrb[32].mxu1 %v7894_v29  ;;  %v7621_v21 = vld [vmem:[#allocation3 + $0xc8] sm:$0xff] }
 0x9da   : > { %9549 = vmatprep.mubr.bf16.mxu0 %v7625_v10  ;;  %9655 = vmatprep.mubr.bf16.mxu1 %v7625_v10  ;;  %v17445_v29 = vld [vmem:[#allocation4 + $0x208] ss:$16 sps:$4 sm:$0xff]   ;;  %v17453_v10 = vld [vmem:[#allocation4 + $0x22c] ss:$16 sps:$4 sm:$0xff]  }
 0x9db   : > { %9522 = vmatpush1.bf16.msra.mxu0 %v17358_v14  ;;  %9628 = vmatpush1.bf16.msra.mxu1 %v17361_v19  ;;  %v7629_v14 = vpack.c.bf16 %v7621_v21, %v7617_v62  ;;  %v17450_v19 = vld [vmem:[#allocation4 + $0x224] ss:$16 sps:$4 sm:$0xff]   ;;  %v17531_v21 = vld [vmem:[#allocation4 + $0x3cc] ss:$16 sps:$4 sm:$0xff]  }
 0x9dc   : > { %9523 = vmatprep.subr.bf16.mxu0 %v17366_v27  ;;  %9629 = vmatprep.subr.bf16.mxu1 %v17369_v28  ;;  %v17448_v27 = vld [vmem:[#allocation4 + $0x220] ss:$16 sps:$4 sm:$0xff]   ;;  %v17451_v28 = vld [vmem:[#allocation4 + $0x228] ss:$16 sps:$4 sm:$0xff]   ;;  %v17528_v62 = vld [vmem:[#allocation4 + $0x3c4] ss:$16 sps:$4 sm:$0xff]  }
 0x9df   : > { %9524 = vmatpush1.bf16.msra.mxu0 %v17364_v5  ;;  %9630 = vmatpush1.bf16.msra.mxu1 %v17367_v23  ;;  %v17456_v5 = vld [vmem:[#allocation4 + $0x244] ss:$16 sps:$4 sm:$0xff]  }
 0x9e0   : > { %9525 = vmatprep.subr.bf16.mxu0 %v17372_v22  ;;  %9631 = vmatprep.subr.bf16.mxu1 %v17375_v25  ;;  %v7616_v23 = vld [vmem:[#allocation3 + $0x80] sm:$0xff]  ;;  %v17459_v25 = vld [vmem:[#allocation4 + $0x24c] ss:$16 sps:$4 sm:$0xff]  }
 0x9e1   : > { %v7620_v22 = vld [vmem:[#allocation3 + $0xc0] sm:$0xff] }
 0x9e3   : > { %9526 = vmatpush1.bf16.msra.mxu0 %v17370_v52  ;;  %9632 = vmatpush1.bf16.msra.mxu1 %v17373_v13  ;;  %v7611_v52 = vld [vmem:[#allocation3 + $0x18] sm:$0xff] }
 0x9e4   : > { %9527 = vmatprep.subr.bf16.mxu0 %v17378_v49  ;;  %9633 = vmatprep.subr.bf16.mxu1 %v17381_v32  ;;  %v7615_v13 = vld [vmem:[#allocation3 + $0x58] sm:$0xff]  ;;  %v17454_v49 = vld [vmem:[#allocation4 + $0x240] ss:$16 sps:$4 sm:$0xff]   ;;  %v7628_v32 = vpack.c.bf16 %v7620_v22, %v7616_v23 }
 0x9e5   : > { %v17543_v23 = vld [vmem:[#allocation4 + $0x80c] ss:$16 sps:$4 sm:$0xff]  }
 0x9e6   : > { %v7619_v22 = vld [vmem:[#allocation3 + $0x98] sm:$0xff] }
 0x9e7   : > { %9528 = vmatpush1.bf16.msra.mxu0 %v17376_v47  ;;  %9634 = vmatpush1.bf16.msra.mxu1 %v17379_v42  ;;  %v17457_v47 = vld [vmem:[#allocation4 + $0x248] ss:$16 sps:$4 sm:$0xff]   ;;  %v7627_v42 = vpack.c.bf16 %v7615_v13, %v7611_v52 }
 0x9e8   : > { %9529 = vmatprep.subr.bf16.mxu0 %v17384_v4  ;;  %9635 = vmatprep.subr.bf16.mxu1 %v17387_v40  ;;  %v17462_v4 = vld [vmem:[#allocation4 + $0x264] ss:$16 sps:$4 sm:$0xff]   ;;  %v17465_v40 = vld [vmem:[#allocation4 + $0x26c] ss:$16 sps:$4 sm:$0xff]   ;;  %v9734_v13 = vld [vmem:[#allocation3 + $0x28] sm:$0x3] }
 0x9e9   : > { %v9730_v52 = vld [vmem:[#allocation3 + $0x8] sm:$0xfc] }
 0x9eb   : > { %9530 = vmatpush1.bf16.msra.mxu0 %v17382_v58  ;;  %9636 = vmatpush1.bf16.msra.mxu1 %v17385_v56  ;;  %v17460_v58 = vld [vmem:[#allocation4 + $0x260] ss:$16 sps:$4 sm:$0xff]   ;;  %v17463_v56 = vld [vmem:[#allocation4 + $0x268] ss:$16 sps:$4 sm:$0xff]  }
 0x9ec   : > { %9531 = vmatprep.subr.bf16.mxu0 %v17390_v17  ;;  %9637 = vmatprep.subr.bf16.mxu1 %v17393_v63  ;;  %v17468_v17 = vld [vmem:[#allocation4 + $0x284] ss:$16 sps:$4 sm:$0xff]   ;;  %v17471_v63 = vld [vmem:[#allocation4 + $0x28c] ss:$16 sps:$4 sm:$0xff]  }
 0x9ef   : > { %9532 = vmatpush1.bf16.msra.mxu0 %v17388_v20  ;;  %9638 = vmatpush1.bf16.msra.mxu1 %v17391_v53  ;;  %v17466_v20 = vld [vmem:[#allocation4 + $0x280] ss:$16 sps:$4 sm:$0xff]   ;;  %v17469_v53 = vld [vmem:[#allocation4 + $0x288] ss:$16 sps:$4 sm:$0xff]  }
 0x9f0   : > { %9533 = vmatprep.subr.bf16.mxu0 %v17396_v34  ;;  %9639 = vmatprep.subr.bf16.mxu1 %v17399_v33  ;;  %v17474_v34 = vld [vmem:[#allocation4 + $0x2a4] ss:$16 sps:$4 sm:$0xff]   ;;  %v17477_v33 = vld [vmem:[#allocation4 + $0x2ac] ss:$16 sps:$4 sm:$0xff]  }
 0x9f3   : > { %9534 = vmatpush1.bf16.msra.mxu0 %v17394_v31  ;;  %9640 = vmatpush1.bf16.msra.mxu1 %v17397_v46  ;;  %v17472_v31 = vld [vmem:[#allocation4 + $0x2a0] ss:$16 sps:$4 sm:$0xff]   ;;  %v17475_v46 = vld [vmem:[#allocation4 + $0x2a8] ss:$16 sps:$4 sm:$0xff]  }
 0x9f4   : > { %9535 = vmatprep.subr.bf16.mxu0 %v17402_v12  ;;  %9641 = vmatprep.subr.bf16.mxu1 %v17405_v18  ;;  %v17480_v12 = vld [vmem:[#allocation4 + $0x2c4] ss:$16 sps:$4 sm:$0xff]   ;;  %v17483_v18 = vld [vmem:[#allocation4 + $0x2cc] ss:$16 sps:$4 sm:$0xff]  }
 0x9f7   : > { %9536 = vmatpush1.bf16.msra.mxu0 %v17400_v43  ;;  %9642 = vmatpush1.bf16.msra.mxu1 %v17403_v48  ;;  %v17478_v43 = vld [vmem:[#allocation4 + $0x2c0] ss:$16 sps:$4 sm:$0xff]   ;;  %v17481_v48 = vld [vmem:[#allocation4 + $0x2c8] ss:$16 sps:$4 sm:$0xff]  }
 0x9f8   : > { %9537 = vmatprep.subr.bf16.mxu0 %v17408_v3  ;;  %9643 = vmatprep.subr.bf16.mxu1 %v17411_v11  ;;  %v17486_v3 = vld [vmem:[#allocation4 + $0x2e4] ss:$16 sps:$4 sm:$0xff]   ;;  %v17489_v11 = vld [vmem:[#allocation4 + $0x2ec] ss:$16 sps:$4 sm:$0xff]  }
 0x9fb   : > { %9538 = vmatpush1.bf16.msra.mxu0 %v17406_v26  ;;  %9644 = vmatpush1.bf16.msra.mxu1 %v17409_v50  ;;  %v17484_v26 = vld [vmem:[#allocation4 + $0x2e0] ss:$16 sps:$4 sm:$0xff]   ;;  %v17487_v50 = vld [vmem:[#allocation4 + $0x2e8] ss:$16 sps:$4 sm:$0xff]  }
 0x9fc   : > { %9539 = vmatprep.subr.bf16.mxu0 %v17414_v45  ;;  %9645 = vmatprep.subr.bf16.mxu1 %v17417_v60  ;;  %v17492_v45 = vld [vmem:[#allocation4 + $0x304] ss:$16 sps:$4 sm:$0xff]   ;;  %v17495_v60 = vld [vmem:[#allocation4 + $0x30c] ss:$16 sps:$4 sm:$0xff]  }
 0x9ff   : > { %9540 = vmatpush1.bf16.msra.mxu0 %v17412_v2  ;;  %9646 = vmatpush1.bf16.msra.mxu1 %v17415_v36  ;;  %v17490_v2 = vld [vmem:[#allocation4 + $0x300] ss:$16 sps:$4 sm:$0xff]   ;;  %v17493_v36 = vld [vmem:[#allocation4 + $0x308] ss:$16 sps:$4 sm:$0xff]  }
 0xa00   : > { %9541 = vmatprep.subr.bf16.mxu0 %v17420_v51  ;;  %9647 = vmatprep.subr.bf16.mxu1 %v17423_v16  ;;  %v17498_v51 = vld [vmem:[#allocation4 + $0x324] ss:$16 sps:$4 sm:$0xff]   ;;  %v17501_v16 = vld [vmem:[#allocation4 + $0x32c] ss:$16 sps:$4 sm:$0xff]  }
 0xa03   : > { %9542 = vmatpush1.bf16.msra.mxu0 %v17418_v35  ;;  %9648 = vmatpush1.bf16.msra.mxu1 %v17421_v44  ;;  %v17496_v35 = vld [vmem:[#allocation4 + $0x320] ss:$16 sps:$4 sm:$0xff]   ;;  %v17499_v44 = vld [vmem:[#allocation4 + $0x328] ss:$16 sps:$4 sm:$0xff]  }
 0xa04   : > { %9543 = vmatprep.subr.bf16.mxu0 %v17426_v1  ;;  %9649 = vmatprep.subr.bf16.mxu1 %v17429_v61  ;;  %v17504_v1 = vld [vmem:[#allocation4 + $0x344] ss:$16 sps:$4 sm:$0xff]   ;;  %v17507_v61 = vld [vmem:[#allocation4 + $0x34c] ss:$16 sps:$4 sm:$0xff]  }
 0xa07   : > { %9544 = vmatpush1.bf16.msra.mxu0 %v17424_v54  ;;  %9650 = vmatpush1.bf16.msra.mxu1 %v17427_v57  ;;  %v17502_v54 = vld [vmem:[#allocation4 + $0x340] ss:$16 sps:$4 sm:$0xff]   ;;  %v17505_v57 = vld [vmem:[#allocation4 + $0x348] ss:$16 sps:$4 sm:$0xff]  }
 0xa08   : > { %9545 = vmatprep.subr.bf16.mxu0 %v17432_v9  ;;  %9651 = vmatprep.subr.bf16.mxu1 %v17435_v24  ;;  %v17510_v9 = vld [vmem:[#allocation4 + $0x364] ss:$16 sps:$4 sm:$0xff]   ;;  %v17513_v24 = vld [vmem:[#allocation4 + $0x36c] ss:$16 sps:$4 sm:$0xff]  }
 0xa0b   : > { %9546 = vmatpush1.bf16.msra.mxu0 %v17430_v6  ;;  %9652 = vmatpush1.bf16.msra.mxu1 %v17433_v15  ;;  %v17508_v6 = vld [vmem:[#allocation4 + $0x360] ss:$16 sps:$4 sm:$0xff]   ;;  %v17511_v15 = vld [vmem:[#allocation4 + $0x368] ss:$16 sps:$4 sm:$0xff]  }
 0xa0c   : > { %9547 = vmatprep.subr.bf16.mxu0 %v17438_v38  ;;  %9653 = vmatprep.subr.bf16.mxu1 %v17441_v8  ;;  %v17516_v38 = vld [vmem:[#allocation4 + $0x384] ss:$16 sps:$4 sm:$0xff]   ;;  %v17519_v8 = vld [vmem:[#allocation4 + $0x38c] ss:$16 sps:$4 sm:$0xff]  }
 0xa0f   : > { %9548 = vmatpush1.bf16.msra.mxu0 %v17436_v7  ;;  %9654 = vmatpush1.bf16.msra.mxu1 %v17439_v59  ;;  %v17514_v7 = vld [vmem:[#allocation4 + $0x380] ss:$16 sps:$4 sm:$0xff]   ;;  %v17517_v59 = vld [vmem:[#allocation4 + $0x388] ss:$16 sps:$4 sm:$0xff]  }
 0xa10   : > { %9570 = vmatprep.subr.bf16.mxu0 %v17444_v30  ;;  %9676 = vmatprep.subr.bf16.mxu1 %v17447_v55  ;;  %v17522_v30 = vld [vmem:[#allocation4 + $0x3a4] ss:$16 sps:$4 sm:$0xff]   ;;  %v17525_v55 = vld [vmem:[#allocation4 + $0x3ac] ss:$16 sps:$4 sm:$0xff]  }
 0xa12   : > { %9550 = vmatmul.mubr.bf16.vlgmr.msra.gmra.mrb[28].mxu0 %v7624_v0  ;;  %9656 = vmatmul.mubr.bf16.vlgmr.msra.gmra.mrb[28].mxu1 %v7624_v0  ;;  %v17529_v0 = vld [vmem:[#allocation4 + $0x3c8] ss:$16 sps:$4 sm:$0xff]  }
 0xa13   : > { %9559 = vmatprep.mubr.bf16.mxu0 %v7629_v14  ;;  %9571 = vmatpush1.bf16.msra.mxu0 %v17442_v39  ;;  %v17526_v39 = vld [vmem:[#allocation4 + $0x3c0] ss:$16 sps:$4 sm:$0xff]  }
 0xa14   : > { %9665 = vmatprep.mubr.bf16.mxu1 %v7629_v14  ;;  %9677 = vmatpush1.bf16.msra.mxu1 %v17445_v29  ;;  %v17534_v29 = vld [vmem:[#allocation4 + $0x3e4] ss:$16 sps:$4 sm:$0xff]   ;;  %v17537_v14 = vld [vmem:[#allocation4 + $0x3ec] ss:$16 sps:$4 sm:$0xff]  }
 0xa15   : > { %9572 = vmatprep.subr.bf16.mxu0 %v17450_v19  ;;  %9678 = vmatprep.subr.bf16.mxu1 %v17453_v10  ;;  %v17532_v19 = vld [vmem:[#allocation4 + $0x3e0] ss:$16 sps:$4 sm:$0xff]   ;;  %v17535_v10 = vld [vmem:[#allocation4 + $0x3e8] ss:$16 sps:$4 sm:$0xff]  }
 0xa17   : > { %9573 = vmatpush1.bf16.msra.mxu0 %v17448_v27  ;;  %v17540_v27 = vld [vmem:[#allocation4 + $0x804] ss:$16 sps:$4 sm:$0xff]  }
 0xa18   : > { %9679 = vmatpush1.bf16.msra.mxu1 %v17451_v28  ;;  %9574 = vmatprep.subr.bf16.mxu0 %v17456_v5  ;;  %v7610_v28 = vld [vmem:[#allocation3 + $0x10] sm:$0xff] }
 0xa19   : > { %9680 = vmatprep.subr.bf16.mxu1 %v17459_v25  ;;  %v7614_v5 = vld [vmem:[#allocation3 + $0x50] sm:$0xff]  ;;  %v7623_v25 = vld [vmem:[#allocation3 + $0xd8] sm:$0xff] }
 0xa1a   : > { %9560 = vmatmul.mubr.bf16.gmra.mrb[32].mxu0 %v7628_v32  ;;  %9666 = vmatmul.mubr.bf16.gmra.mrb[32].mxu1 %v7628_v32  ;;  %v9742_v32 = vld [vmem:[#allocation3 + $0x68] sm:$0x3] }
 0xa1b   : > { %9575 = vmatpush1.bf16.msra.mxu0 %v17454_v49  ;;  %9602 = vmatprep.mubr.bf16.mxu0 %v7627_v42  ;;  %v9738_v49 = vld [vmem:[#allocation3 + $0x48] sm:$0xfc] }
 0xa1c   : > { %9681 = vmatpush1.bf16.msra.mxu1 %v17457_v47  ;;  %9708 = vmatprep.mubr.bf16.mxu1 %v7627_v42  ;;  %v7626_v47 = vpack.c.bf16 %v7614_v5, %v7610_v28  ;;  %v17538_v42 = vld [vmem:[#allocation4 + $0x800] ss:$16 sps:$4 sm:$0xff]   ;;  %v17609_v28 = vld [vmem:[#allocation4 + $0x96c] ss:$16 sps:$4 sm:$0xff]  }
 0xa1d   : > { %9576 = vmatprep.subr.bf16.mxu0 %v17462_v4  ;;  %9682 = vmatprep.subr.bf16.mxu1 %v17465_v40  ;;  %v17541_v4 = vld [vmem:[#allocation4 + $0x808] ss:$16 sps:$4 sm:$0xff]   ;;  %v7631_v40 = vpack.c.bf16 %v7623_v25, %v7619_v22  ;;  %v17604_v5 = vld [vmem:[#allocation4 + $0x960] ss:$16 sps:$4 sm:$0xff]   ;;  %v17612_v22 = vld [vmem:[#allocation4 + $0x984] ss:$16 sps:$4 sm:$0xff]  }
 0xa1e   : > { %v17615_v25 = vld [vmem:[#allocation4 + $0x98c] ss:$16 sps:$4 sm:$0xff]  }
 0xa1f   : > { %9577 = vmatpush1.bf16.msra.mxu0 %v17460_v58  ;;  %v17546_v58 = vld [vmem:[#allocation4 + $0x824] ss:$16 sps:$4 sm:$0xff]  }
 0xa20   : > { %9683 = vmatpush1.bf16.msra.mxu1 %v17463_v56  ;;  %9578 = vmatprep.subr.bf16.mxu0 %v17468_v17  ;;  %v17549_v56 = vld [vmem:[#allocation4 + $0x82c] ss:$16 sps:$4 sm:$0xff]   ;;  %v9796_v17 = vrot.slane %v9730_v52, 2  ;;  %v17610_v52 = vld [vmem:[#allocation4 + $0x980] ss:$16 sps:$4 sm:$0xff]  }
 0xa21   : > { %9684 = vmatprep.subr.bf16.mxu1 %v17471_v63  ;;  %v9797_v63 = vrot.slane %v9734_v13, 2  ;;  %v17613_v13 = vld [vmem:[#allocation4 + $0x988] ss:$16 sps:$4 sm:$0xff]  }
 0xa23   : > { %9579 = vmatpush1.bf16.msra.mxu0 %v17466_v20  ;;  %v9808_v20 = vrot.slane %v9738_v49, 2  ;;  %v17618_v49 = vld [vmem:[#allocation4 + $0x9a4] ss:$16 sps:$4 sm:$0xff]  }
 0xa24   : > { %9685 = vmatpush1.bf16.msra.mxu1 %v17469_v53  ;;  %9580 = vmatprep.subr.bf16.mxu0 %v17474_v34  ;;  %v9809_v53 = vrot.slane %v9742_v32, 2  ;;  %v17544_v34 = vld [vmem:[#allocation4 + $0x820] ss:$16 sps:$4 sm:$0xff]   ;;  %v17621_v32 = vld [vmem:[#allocation4 + $0x9ac] ss:$16 sps:$4 sm:$0xff]  }
 0xa25   : > { %9686 = vmatprep.subr.bf16.mxu1 %v17477_v33  ;;  %v7618_v33 = vld [vmem:[#allocation3 + $0x90] sm:$0xff] }
 0xa27   : > { %9581 = vmatpush1.bf16.msra.mxu0 %v17472_v31  ;;  %v17547_v31 = vld [vmem:[#allocation4 + $0x828] ss:$16 sps:$4 sm:$0xff]  }
 0xa28   : > { %9687 = vmatpush1.bf16.msra.mxu1 %v17475_v46  ;;  %9582 = vmatprep.subr.bf16.mxu0 %v17480_v12  ;;  %v7622_v46 = vld [vmem:[#allocation3 + $0xd0] sm:$0xff] }
 0xa29   : > { %9688 = vmatprep.subr.bf16.mxu1 %v17483_v18  ;;  %v17552_v12 = vld [vmem:[#allocation4 + $0x844] ss:$16 sps:$4 sm:$0xff]   ;;  %v17555_v18 = vld [vmem:[#allocation4 + $0x84c] ss:$16 sps:$4 sm:$0xff]  }
 0xa2b   : > { %9583 = vmatpush1.bf16.msra.mxu0 %v17478_v43  ;;  %v9798_v43 = vsel %vm5108_vm15, %v9796_v17, %v9797_v63  ;;  %v9737_v17 = vld [vmem:[#allocation3 + $0x40] sm:$0xfc]  ;;  %v9741_v63 = vld [vmem:[#allocation3 + $0x60] sm:$0x3] }
 0xa2c   : > { %9689 = vmatpush1.bf16.msra.mxu1 %v17481_v48  ;;  %9584 = vmatprep.subr.bf16.mxu0 %v17486_v3  ;;  %v9810_v48 = vsel %vm5108_vm15, %v9808_v20, %v9809_v53  ;;  %v7630_v3 = vpack.c.bf16 %v7622_v46, %v7618_v33  ;;  %v9746_v20 = vld [vmem:[#allocation3 + $0x88] sm:$0xfc]  ;;  %v9750_v53 = vld [vmem:[#allocation3 + $0xa8] sm:$0x3] }
 0xa2d   : > { %9690 = vmatprep.subr.bf16.mxu1 %v17489_v11  ;;  %v17550_v11 = vld [vmem:[#allocation4 + $0x840] ss:$16 sps:$4 sm:$0xff]   ;;  %v9754_v33 = vld [vmem:[#allocation3 + $0xc8] sm:$0xfc] }
 0xa2e   : > { %v17625_v46 = vld [vmem:[#allocation4 + $0x9c8] ss:$16 sps:$4 sm:$0xff]  }
 0xa2f   : > { %9585 = vmatpush1.bf16.msra.mxu0 %v17484_v26  ;;  %v17553_v26 = vld [vmem:[#allocation4 + $0x848] ss:$16 sps:$4 sm:$0xff]  }
 0xa30   : > { %9691 = vmatpush1.bf16.msra.mxu1 %v17487_v50  ;;  %9586 = vmatprep.subr.bf16.mxu0 %v17492_v45  ;;  %v9858_v50 = vpack.c.bf16 %v9810_v48, %v9798_v43  ;;  %v17558_v45 = vld [vmem:[#allocation4 + $0x864] ss:$16 sps:$4 sm:$0xff]  }
 0xa31   : > { %9692 = vmatprep.subr.bf16.mxu1 %v17495_v60  ;;  %v17561_v60 = vld [vmem:[#allocation4 + $0x86c] ss:$16 sps:$4 sm:$0xff]  }
 0xa33   : > { %9587 = vmatpush1.bf16.msra.mxu0 %v17490_v2  ;;  %v17556_v2 = vld [vmem:[#allocation4 + $0x860] ss:$16 sps:$4 sm:$0xff]  }
 0xa34   : > { %9693 = vmatpush1.bf16.msra.mxu1 %v17493_v36  ;;  %9588 = vmatprep.subr.bf16.mxu0 %v17498_v51  ;;  %v17559_v36 = vld [vmem:[#allocation4 + $0x868] ss:$16 sps:$4 sm:$0xff]   ;;  %v17564_v51 = vld [vmem:[#allocation4 + $0x884] ss:$16 sps:$4 sm:$0xff]  }
 0xa35   : > { %9694 = vmatprep.subr.bf16.mxu1 %v17501_v16  ;;  %v17567_v16 = vld [vmem:[#allocation4 + $0x88c] ss:$16 sps:$4 sm:$0xff]  }
 0xa37   : > { %9589 = vmatpush1.bf16.msra.mxu0 %v17496_v35  ;;  %v17562_v35 = vld [vmem:[#allocation4 + $0x880] ss:$16 sps:$4 sm:$0xff]  }
 0xa38   : > { %9695 = vmatpush1.bf16.msra.mxu1 %v17499_v44  ;;  %9590 = vmatprep.subr.bf16.mxu0 %v17504_v1  ;;  %v17565_v44 = vld [vmem:[#allocation4 + $0x888] ss:$16 sps:$4 sm:$0xff]   ;;  %v17570_v1 = vld [vmem:[#allocation4 + $0x8a4] ss:$16 sps:$4 sm:$0xff]  }
 0xa39   : > { %9696 = vmatprep.subr.bf16.mxu1 %v17507_v61  ;;  %v17573_v61 = vld [vmem:[#allocation4 + $0x8ac] ss:$16 sps:$4 sm:$0xff]  }
 0xa3b   : > { %9591 = vmatpush1.bf16.msra.mxu0 %v17502_v54  ;;  %v17568_v54 = vld [vmem:[#allocation4 + $0x8a0] ss:$16 sps:$4 sm:$0xff]  }
 0xa3c   : > { %9697 = vmatpush1.bf16.msra.mxu1 %v17505_v57  ;;  %9592 = vmatprep.subr.bf16.mxu0 %v17510_v9  ;;  %v17571_v57 = vld [vmem:[#allocation4 + $0x8a8] ss:$16 sps:$4 sm:$0xff]   ;;  %v17576_v9 = vld [vmem:[#allocation4 + $0x8c4] ss:$16 sps:$4 sm:$0xff]  }
 0xa3d   : > { %9698 = vmatprep.subr.bf16.mxu1 %v17513_v24  ;;  %v17579_v24 = vld [vmem:[#allocation4 + $0x8cc] ss:$16 sps:$4 sm:$0xff]  }
 0xa3f   : > { %9593 = vmatpush1.bf16.msra.mxu0 %v17508_v6  ;;  %v17574_v6 = vld [vmem:[#allocation4 + $0x8c0] ss:$16 sps:$4 sm:$0xff]  }
 0xa40   : > { %9699 = vmatpush1.bf16.msra.mxu1 %v17511_v15  ;;  %9594 = vmatprep.subr.bf16.mxu0 %v17516_v38  ;;  %v17577_v15 = vld [vmem:[#allocation4 + $0x8c8] ss:$16 sps:$4 sm:$0xff]   ;;  %v17582_v38 = vld [vmem:[#allocation4 + $0x8e4] ss:$16 sps:$4 sm:$0xff]  }
 0xa41   : > { %9700 = vmatprep.subr.bf16.mxu1 %v17519_v8  ;;  %v17585_v8 = vld [vmem:[#allocation4 + $0x8ec] ss:$16 sps:$4 sm:$0xff]  }
 0xa43   : > { %9595 = vmatpush1.bf16.msra.mxu0 %v17514_v7  ;;  %v17580_v7 = vld [vmem:[#allocation4 + $0x8e0] ss:$16 sps:$4 sm:$0xff]  }
 0xa44   : > { %9701 = vmatpush1.bf16.msra.mxu1 %v17517_v59  ;;  %9596 = vmatprep.subr.bf16.mxu0 %v17522_v30  ;;  %v17583_v59 = vld [vmem:[#allocation4 + $0x8e8] ss:$16 sps:$4 sm:$0xff]   ;;  %v17588_v30 = vld [vmem:[#allocation4 + $0x904] ss:$16 sps:$4 sm:$0xff]  }
 0xa45   : > { %9702 = vmatprep.subr.bf16.mxu1 %v17525_v55  ;;  %v17591_v55 = vld [vmem:[#allocation4 + $0x90c] ss:$16 sps:$4 sm:$0xff]  }
 0xa47   : > { %9597 = vmatpush1.bf16.msra.mxu0 %v17520_v41  ;;  %v17586_v41 = vld [vmem:[#allocation4 + $0x900] ss:$16 sps:$4 sm:$0xff]  }
 0xa48   : > { %9703 = vmatpush1.bf16.msra.mxu1 %v17523_v37  ;;  %9598 = vmatprep.subr.bf16.mxu0 %v17528_v62  ;;  %v17589_v37 = vld [vmem:[#allocation4 + $0x908] ss:$16 sps:$4 sm:$0xff]   ;;  %v17594_v62 = vld [vmem:[#allocation4 + $0x924] ss:$16 sps:$4 sm:$0xff]  }
 0xa49   : > { %9704 = vmatprep.subr.bf16.mxu1 %v17531_v21  ;;  %v17597_v21 = vld [vmem:[#allocation4 + $0x92c] ss:$16 sps:$4 sm:$0xff]  }
 0xa4b   : > { %9599 = vmatpush1.bf16.msra.mxu0 %v17526_v39  ;;  %v17592_v39 = vld [vmem:[#allocation4 + $0x920] ss:$16 sps:$4 sm:$0xff]  }
 0xa4c   : > { %9705 = vmatpush1.bf16.msra.mxu1 %v17529_v0  ;;  %9600 = vmatprep.subr.bf16.mxu0 %v17534_v29  ;;  %v17595_v0 = vld [vmem:[#allocation4 + $0x928] ss:$16 sps:$4 sm:$0xff]   ;;  %v17600_v29 = vld [vmem:[#allocation4 + $0x944] ss:$16 sps:$4 sm:$0xff]  }
 0xa4d   : > { %9706 = vmatprep.subr.bf16.mxu1 %v17537_v14  ;;  %v17603_v14 = vld [vmem:[#allocation4 + $0x94c] ss:$16 sps:$4 sm:$0xff]  }
 0xa4f   : > { %9601 = vmatpush1.bf16.msra.mxu0 %v17532_v19  ;;  %v17598_v19 = vld [vmem:[#allocation4 + $0x940] ss:$16 sps:$4 sm:$0xff]  }
 0xa50   : > { %9707 = vmatpush1.bf16.msra.mxu1 %v17535_v10  ;;  %10634 = vmatprep.subr.bf16.mxu0 %v17540_v27  ;;  %v17601_v10 = vld [vmem:[#allocation4 + $0x948] ss:$16 sps:$4 sm:$0xff]   ;;  %v17606_v27 = vld [vmem:[#allocation4 + $0x964] ss:$16 sps:$4 sm:$0xff]  }
 0xa51   : > { %10740 = vmatprep.subr.bf16.mxu1 %v17543_v23  ;;  %v17607_v23 = vld [vmem:[#allocation4 + $0x968] ss:$16 sps:$4 sm:$0xff]  }
 0xa52   : > { %9603 = vmatmul.mubr.bf16.vlgmr.msra.gmra.mrb[28].mxu0 %v7626_v47 }
 0xa53   : > { %9709 = vmatmul.mubr.bf16.vlgmr.msra.gmra.mrb[28].mxu1 %v7626_v47  ;;  %9612 = vmatprep.mubr.bf16.mxu0 %v7631_v40  ;;  %v17616_v47 = vld [vmem:[#allocation4 + $0x9a0] ss:$16 sps:$4 sm:$0xff]  }
 0xa54   : > { %9718 = vmatprep.mubr.bf16.mxu1 %v7631_v40  ;;  %10635 = vmatpush1.bf16.msra.mxu0 %v17538_v42  ;;  %v17619_v42 = vld [vmem:[#allocation4 + $0x9a8] ss:$16 sps:$4 sm:$0xff]   ;;  %v9729_v40 = vld [vmem:[#allocation3] sm:$0xfc] }
 0xa55   : > { %10741 = vmatpush1.bf16.msra.mxu1 %v17541_v4  ;;  %10636 = vmatprep.subr.bf16.mxu0 %v17546_v58  ;;  %v17624_v4 = vld [vmem:[#allocation4 + $0x9c4] ss:$16 sps:$4 sm:$0xff]   ;;  %v17627_v58 = vld [vmem:[#allocation4 + $0x9cc] ss:$16 sps:$4 sm:$0xff]   ;;  %v9793_v43 = vrot.slane %v9729_v40, 2 }
 0xa56   : > { %10742 = vmatprep.subr.bf16.mxu1 %v17549_v56  ;;  %v9733_v56 = vld [vmem:[#allocation3 + $0x20] sm:$0x3]  ;;  %v17657_v40 = vld [vmem:[#allocation4 + $0xa6c] ss:$16 sps:$4 sm:$0xff]  }
 0xa57   : > { %v9794_v48 = vrot.slane %v9733_v56, 2  ;;  %v17655_v56 = vld [vmem:[#allocation4 + $0xa68] ss:$16 sps:$4 sm:$0xff]  }
 0xa58   : > { %10637 = vmatpush1.bf16.msra.mxu0 %v17544_v34  ;;  %v17622_v34 = vld [vmem:[#allocation4 + $0x9c0] ss:$16 sps:$4 sm:$0xff]  }
 0xa59   : > { %10743 = vmatpush1.bf16.msra.mxu1 %v17547_v31  ;;  %10638 = vmatprep.subr.bf16.mxu0 %v17552_v12  ;;  %v9758_v31 = vld [vmem:[#allocation3 + $0xe8] sm:$0x3]  ;;  %v17630_v12 = vld [vmem:[#allocation4 + $0x9e4] ss:$16 sps:$4 sm:$0xff]  }
 0xa5a   : > { %9613 = vmatmul.mubr.bf16.gmra.mrb[32].mxu0 %v7630_v3  ;;  %10744 = vmatprep.subr.bf16.mxu1 %v17555_v18  ;;  %v17633_v18 = vld [vmem:[#allocation4 + $0x9ec] ss:$16 sps:$4 sm:$0xff]  }
 0xa5b   : > { %9719 = vmatmul.mubr.bf16.gmra.mrb[32].mxu1 %v7630_v3  ;;  %10666 = vmatprep.mubr.bf16.mxu0 %v9858_v50  ;;  %v9805_v3 = vrot.slane %v9737_v17, 2  ;;  %v17660_v17 = vld [vmem:[#allocation4 + $0xa84] ss:$16 sps:$4 sm:$0xff]  }
 0xa5c   : > { %10639 = vmatpush1.bf16.msra.mxu0 %v17550_v11  ;;  %10772 = vmatprep.mubr.bf16.mxu1 %v9858_v50  ;;  %v9806_v11 = vrot.slane %v9741_v63, 2  ;;  %v9821_v50 = vrot.slane %v9750_v53, 2  ;;  %v17663_v63 = vld [vmem:[#allocation4 + $0xa8c] ss:$16 sps:$4 sm:$0xff]   ;;  %v17661_v53 = vld [vmem:[#allocation4 + $0xa88] ss:$16 sps:$4 sm:$0xff]  }
 0xa5d   : > { %10745 = vmatpush1.bf16.msra.mxu1 %v17553_v26  ;;  %10640 = vmatprep.subr.bf16.mxu0 %v17558_v45  ;;  %v9820_v26 = vrot.slane %v9746_v20, 2  ;;  %v9832_v45 = vrot.slane %v9754_v33, 2  ;;  %v17658_v20 = vld [vmem:[#allocation4 + $0xa80] ss:$16 sps:$4 sm:$0xff]   ;;  %v17669_v33 = vld [vmem:[#allocation4 + $0xaac] ss:$16 sps:$4 sm:$0xff]  }
 0xa5e   : > { %10746 = vmatprep.subr.bf16.mxu1 %v17561_v60  ;;  %v9833_v60 = vrot.slane %v9758_v31, 2  ;;  %v17664_v31 = vld [vmem:[#allocation4 + $0xaa0] ss:$16 sps:$4 sm:$0xff]  }
 0xa60   : > { %10641 = vmatpush1.bf16.msra.mxu0 %v17556_v2  ;;  %v17628_v2 = vld [vmem:[#allocation4 + $0x9e0] ss:$16 sps:$4 sm:$0xff]  }
 0xa61   : > { %10747 = vmatpush1.bf16.msra.mxu1 %v17559_v36  ;;  %10642 = vmatprep.subr.bf16.mxu0 %v17564_v51  ;;  %v17631_v36 = vld [vmem:[#allocation4 + $0x9e8] ss:$16 sps:$4 sm:$0xff]   ;;  %v17636_v51 = vld [vmem:[#allocation4 + $0xa04] ss:$16 sps:$4 sm:$0xff]  }
 0xa62   : > { %10748 = vmatprep.subr.bf16.mxu1 %v17567_v16  ;;  %v9795_v16 = vsel %vm5108_vm15, %v9793_v43, %v9794_v48  ;;  %v17670_v43 = vld [vmem:[#allocation4 + $0xac0] ss:$16 sps:$4 sm:$0xff]   ;;  %v17673_v48 = vld [vmem:[#allocation4 + $0xac8] ss:$16 sps:$4 sm:$0xff]  }
 0xa64   : > { %10643 = vmatpush1.bf16.msra.mxu0 %v17562_v35  ;;  %v9807_v35 = vsel %vm5108_vm15, %v9805_v3, %v9806_v11  ;;  %v17678_v3 = vld [vmem:[#allocation4 + $0xae4] ss:$16 sps:$4 sm:$0xff]   ;;  %v17681_v11 = vld [vmem:[#allocation4 + $0xaec] ss:$16 sps:$4 sm:$0xff]  }
 0xa65   : > { %10749 = vmatpush1.bf16.msra.mxu1 %v17565_v44  ;;  %10644 = vmatprep.subr.bf16.mxu0 %v17570_v1  ;;  %v17639_v44 = vld [vmem:[#allocation4 + $0xa0c] ss:$16 sps:$4 sm:$0xff]   ;;  %v9745_v1 = vld [vmem:[#allocation3 + $0x80] sm:$0xfc] }
 0xa66   : > { %10750 = vmatprep.subr.bf16.mxu1 %v17573_v61  ;;  %v9749_v61 = vld [vmem:[#allocation3 + $0xa0] sm:$0x3] }
 0xa68   : > { %10645 = vmatpush1.bf16.msra.mxu0 %v17568_v54  ;;  %v9822_v54 = vsel %vm5108_vm15, %v9820_v26, %v9821_v50  ;;  %v17676_v26 = vld [vmem:[#allocation4 + $0xae0] ss:$16 sps:$4 sm:$0xff]   ;;  %v17679_v50 = vld [vmem:[#allocation4 + $0xae8] ss:$16 sps:$4 sm:$0xff]  }
 0xa69   : > { %10751 = vmatpush1.bf16.msra.mxu1 %v17571_v57  ;;  %10646 = vmatprep.subr.bf16.mxu0 %v17576_v9  ;;  %v9834_v57 = vsel %vm5108_vm15, %v9832_v45, %v9833_v60  ;;  %v9753_v9 = vld [vmem:[#allocation3 + $0xc0] sm:$0xfc]  ;;  %v17687_v60 = vld [vmem:[#allocation4 + $0xb0c] ss:$16 sps:$4 sm:$0xff]  }
 0xa6a   : > { %10752 = vmatprep.subr.bf16.mxu1 %v17579_v24  ;;  %v9757_v24 = vld [vmem:[#allocation3 + $0xe0] sm:$0x3]  ;;  %v17684_v45 = vld [vmem:[#allocation4 + $0xb04] ss:$16 sps:$4 sm:$0xff]  }
 0xa6c   : > { %10647 = vmatpush1.bf16.msra.mxu0 %v17574_v6  ;;  %v9732_v6 = vld [vmem:[#allocation3 + $0x18] sm:$0xfc] }
 0xa6d   : > { %10753 = vmatpush1.bf16.msra.mxu1 %v17577_v15  ;;  %10648 = vmatprep.subr.bf16.mxu0 %v17582_v38  ;;  %v9736_v15 = vld [vmem:[#allocation3 + $0x38] sm:$0x3]  ;;  %v9740_v38 = vld [vmem:[#allocation3 + $0x58] sm:$0xfc] }
 0xa6e   : > { %10754 = vmatprep.subr.bf16.mxu1 %v17585_v8  ;;  %v9744_v8 = vld [vmem:[#allocation3 + $0x78] sm:$0x3] }
 0xa70   : > { %10649 = vmatpush1.bf16.msra.mxu0 %v17580_v7  ;;  %v9857_v7 = vpack.c.bf16 %v9807_v35, %v9795_v16  ;;  %v17693_v16 = vld [vmem:[#allocation4 + $0xb2c] ss:$16 sps:$4 sm:$0xff]   ;;  %v17688_v35 = vld [vmem:[#allocation4 + $0xb20] ss:$16 sps:$4 sm:$0xff]  }
 0xa71   : > { %10755 = vmatpush1.bf16.msra.mxu1 %v17583_v59  ;;  %10650 = vmatprep.subr.bf16.mxu0 %v17588_v30  ;;  %v17634_v59 = vld [vmem:[#allocation4 + $0xa00] ss:$16 sps:$4 sm:$0xff]   ;;  %v9817_v30 = vrot.slane %v9745_v1, 2  ;;  %v17696_v1 = vld [vmem:[#allocation4 + $0xb44] ss:$16 sps:$4 sm:$0xff]  }
 0xa72   : > { %10756 = vmatprep.subr.bf16.mxu1 %v17591_v55  ;;  %v9818_v55 = vrot.slane %v9749_v61, 2  ;;  %v17699_v61 = vld [vmem:[#allocation4 + $0xb4c] ss:$16 sps:$4 sm:$0xff]  }
 0xa74   : > { %10651 = vmatpush1.bf16.msra.mxu0 %v17586_v41  ;;  %v17637_v41 = vld [vmem:[#allocation4 + $0xa08] ss:$16 sps:$4 sm:$0xff]  }
 0xa75   : > { %10757 = vmatpush1.bf16.msra.mxu1 %v17589_v37  ;;  %10652 = vmatprep.subr.bf16.mxu0 %v17594_v62  ;;  %v9862_v37 = vpack.c.bf16 %v9834_v57, %v9822_v54  ;;  %v17642_v62 = vld [vmem:[#allocation4 + $0xa24] ss:$16 sps:$4 sm:$0xff]   ;;  %v17694_v54 = vld [vmem:[#allocation4 + $0xb40] ss:$16 sps:$4 sm:$0xff]   ;;  %v17697_v57 = vld [vmem:[#allocation4 + $0xb48] ss:$16 sps:$4 sm:$0xff]  }
 0xa76   : > { %10758 = vmatprep.subr.bf16.mxu1 %v17597_v21  ;;  %v9829_v21 = vrot.slane %v9753_v9, 2  ;;  %v17702_v9 = vld [vmem:[#allocation4 + $0xb64] ss:$16 sps:$4 sm:$0xff]  }
 0xa78   : > { %10653 = vmatpush1.bf16.msra.mxu0 %v17592_v39  ;;  %v9830_v39 = vrot.slane %v9757_v24, 2  ;;  %v17705_v24 = vld [vmem:[#allocation4 + $0xb6c] ss:$16 sps:$4 sm:$0xff]  }
 0xa79   : > { %10759 = vmatpush1.bf16.msra.mxu1 %v17595_v0  ;;  %10654 = vmatprep.subr.bf16.mxu0 %v17600_v29  ;;  %v17645_v0 = vld [vmem:[#allocation4 + $0xa2c] ss:$16 sps:$4 sm:$0xff]   ;;  %v9802_v29 = vrot.slane %v9732_v6, 2  ;;  %v17700_v6 = vld [vmem:[#allocation4 + $0xb60] ss:$16 sps:$4 sm:$0xff]  }
 0xa7a   : > { %10760 = vmatprep.subr.bf16.mxu1 %v17603_v14  ;;  %v9803_v14 = vrot.slane %v9736_v15, 2  ;;  %v17703_v15 = vld [vmem:[#allocation4 + $0xb68] ss:$16 sps:$4 sm:$0xff]  }
 0xa7c   : > { %10655 = vmatpush1.bf16.msra.mxu0 %v17598_v19  ;;  %v9814_v19 = vrot.slane %v9740_v38, 2  ;;  %v17708_v38 = vld [vmem:[#allocation4 + $0xb84] ss:$16 sps:$4 sm:$0xff]  }
 0xa7d   : > { %10761 = vmatpush1.bf16.msra.mxu1 %v17601_v10  ;;  %10656 = vmatprep.subr.bf16.mxu0 %v17606_v27  ;;  %v9815_v10 = vrot.slane %v9744_v8, 2  ;;  %v17640_v27 = vld [vmem:[#allocation4 + $0xa20] ss:$16 sps:$4 sm:$0xff]   ;;  %v17711_v8 = vld [vmem:[#allocation4 + $0xb8c] ss:$16 sps:$4 sm:$0xff]  }
 0xa7e   : > { %10762 = vmatprep.subr.bf16.mxu1 %v17609_v28  ;;  %v17643_v28 = vld [vmem:[#allocation4 + $0xa28] ss:$16 sps:$4 sm:$0xff]  }
 0xa80   : > { %10657 = vmatpush1.bf16.msra.mxu0 %v17604_v5  ;;  %v9819_v5 = vsel %vm5108_vm15, %v9817_v30, %v9818_v55  ;;  %v17714_v30 = vld [vmem:[#allocation4 + $0xba4] ss:$16 sps:$4 sm:$0xff]   ;;  %v17717_v55 = vld [vmem:[#allocation4 + $0xbac] ss:$16 sps:$4 sm:$0xff]  }
 0xa81   : > { %10763 = vmatpush1.bf16.msra.mxu1 %v17607_v23  ;;  %10658 = vmatprep.subr.bf16.mxu0 %v17612_v22  ;;  %v9831_v23 = vsel %vm5108_vm15, %v9829_v21, %v9830_v39  ;;  %v17648_v22 = vld [vmem:[#allocation4 + $0xa44] ss:$16 sps:$4 sm:$0xff]   ;;  %v17723_v39 = vld [vmem:[#allocation4 + $0xbcc] ss:$16 sps:$4 sm:$0xff]  }
 0xa82   : > { %10764 = vmatprep.subr.bf16.mxu1 %v17615_v25  ;;  %v17651_v25 = vld [vmem:[#allocation4 + $0xa4c] ss:$16 sps:$4 sm:$0xff]   ;;  %v9731_v21 = vld [vmem:[#allocation3 + $0x10] sm:$0xfc] }
 0xa84   : > { %10659 = vmatpush1.bf16.msra.mxu0 %v17610_v52  ;;  %v9804_v52 = vsel %vm5108_vm15, %v9802_v29, %v9803_v14  ;;  %v9739_v29 = vld [vmem:[#allocation3 + $0x50] sm:$0xfc]  ;;  %v9743_v14 = vld [vmem:[#allocation3 + $0x70] sm:$0x3] }
 0xa85   : > { %10765 = vmatpush1.bf16.msra.mxu1 %v17613_v13  ;;  %10660 = vmatprep.subr.bf16.mxu0 %v17618_v49  ;;  %v9816_v13 = vsel %vm5108_vm15, %v9814_v19, %v9815_v10  ;;  %v9861_v49 = vpack.c.bf16 %v9831_v23, %v9819_v5  ;;  %v9748_v19 = vld [vmem:[#allocation3 + $0x98] sm:$0xfc]  ;;  %v9752_v10 = vld [vmem:[#allocation3 + $0xb8] sm:$0x3] }
 0xa86   : > { %10766 = vmatprep.subr.bf16.mxu1 %v17621_v32  ;;  %v17646_v32 = vld [vmem:[#allocation4 + $0xa40] ss:$16 sps:$4 sm:$0xff]   ;;  %v9760_v5 = vld [vmem:[#allocation3 + $0xf8] sm:$0x3] }
 0xa87   : > { %v17721_v23 = vld [vmem:[#allocation4 + $0xbc8] ss:$16 sps:$4 sm:$0xff]  }
 0xa88   : > { %10661 = vmatpush1.bf16.msra.mxu0 %v17616_v47  ;;  %v17649_v47 = vld [vmem:[#allocation4 + $0xa48] ss:$16 sps:$4 sm:$0xff]  }
 0xa89   : > { %10767 = vmatpush1.bf16.msra.mxu1 %v17619_v42  ;;  %10662 = vmatprep.subr.bf16.mxu0 %v17624_v4  ;;  %v9860_v42 = vpack.c.bf16 %v9816_v13, %v9804_v52  ;;  %v17654_v4 = vld [vmem:[#allocation4 + $0xa64] ss:$16 sps:$4 sm:$0xff]   ;;  %v9799_v52 = vrot.slane %v9731_v21, 2 }
 0xa8a   : > { %10768 = vmatprep.subr.bf16.mxu1 %v17627_v58  ;;  %v17652_v58 = vld [vmem:[#allocation4 + $0xa60] ss:$16 sps:$4 sm:$0xff]  }
 0xa8b   : > { %v17754_v21 = vld [vmem:[%s23120_s13 + $0x70] sm:$0xff]  }
 0xa8c   : > { %10663 = vmatpush1.bf16.msra.mxu0 %v17622_v34  ;;  %v17666_v34 = vld [vmem:[#allocation4 + $0xaa4] ss:$16 sps:$4 sm:$0xff]  }
 0xa8d   : > { %10769 = vmatpush1.bf16.msra.mxu1 %v17625_v46  ;;  %10664 = vmatprep.subr.bf16.mxu0 %v17630_v12  ;;  %v17667_v46 = vld [vmem:[#allocation4 + $0xaa8] ss:$16 sps:$4 sm:$0xff]   ;;  %v17672_v12 = vld [vmem:[#allocation4 + $0xac4] ss:$16 sps:$4 sm:$0xff]  }
 0xa8e   : > { %10770 = vmatprep.subr.bf16.mxu1 %v17633_v18  ;;  %v17675_v18 = vld [vmem:[#allocation4 + $0xacc] ss:$16 sps:$4 sm:$0xff]  }
 0xa90   : > { %10665 = vmatpush1.bf16.msra.mxu0 %v17628_v2  ;;  %v17682_v2 = vld [vmem:[#allocation4 + $0xb00] ss:$16 sps:$4 sm:$0xff]  }
 0xa91   : > { %10771 = vmatpush1.bf16.msra.mxu1 %v17631_v36  ;;  %10687 = vmatprep.subr.bf16.mxu0 %v17636_v51  ;;  %v17685_v36 = vld [vmem:[#allocation4 + $0xb08] ss:$16 sps:$4 sm:$0xff]   ;;  %v17690_v51 = vld [vmem:[#allocation4 + $0xb24] ss:$16 sps:$4 sm:$0xff]  }
 0xa92   : > { %10793 = vmatprep.subr.bf16.mxu1 %v17639_v44  ;;  %v17691_v44 = vld [vmem:[#allocation4 + $0xb28] ss:$16 sps:$4 sm:$0xff]  }
 0xa93   : > { %10667 = vmatmul.mubr.bf16.vlgmr.msra.gmra.mrb[28].mxu0 %v9857_v7 }
 0xa94   : > { %10773 = vmatmul.mubr.bf16.vlgmr.msra.gmra.mrb[28].mxu1 %v9857_v7  ;;  %10676 = vmatprep.mubr.bf16.mxu0 %v9862_v37  ;;  %v17706_v7 = vld [vmem:[#allocation4 + $0xb80] ss:$16 sps:$4 sm:$0xff]  }
 0xa95   : > { %10688 = vmatpush1.bf16.msra.mxu0 %v17634_v59  ;;  %10782 = vmatprep.mubr.bf16.mxu1 %v9862_v37  ;;  %v17709_v59 = vld [vmem:[#allocation4 + $0xb88] ss:$16 sps:$4 sm:$0xff]  }
 0xa96   : > { %10794 = vmatpush1.bf16.msra.mxu1 %v17637_v41  ;;  %10689 = vmatprep.subr.bf16.mxu0 %v17642_v62  ;;  %v17712_v41 = vld [vmem:[#allocation4 + $0xba0] ss:$16 sps:$4 sm:$0xff]   ;;  %v17715_v37 = vld [vmem:[#allocation4 + $0xba8] ss:$16 sps:$4 sm:$0xff]   ;;  %v17720_v62 = vld [vmem:[#allocation4 + $0xbc4] ss:$16 sps:$4 sm:$0xff]  }
 0xa97   : > { %10795 = vmatprep.subr.bf16.mxu1 %v17645_v0  ;;  %v9735_v0 = vld [vmem:[#allocation3 + $0x30] sm:$0x3] }
 0xa98   : > { %v9800_v13 = vrot.slane %v9735_v0, 2  ;;  %v17756_v0 = vld [vmem:[%s23120_s13 + $0x30] sm:$0xff]  }
 0xa99   : > { %10690 = vmatpush1.bf16.msra.mxu0 %v17640_v27  ;;  %v17718_v27 = vld [vmem:[#allocation4 + $0xbc0] ss:$16 sps:$4 sm:$0xff]  }
 0xa9a   : > { %10796 = vmatpush1.bf16.msra.mxu1 %v17643_v28  ;;  %10691 = vmatprep.subr.bf16.mxu0 %v17648_v22  ;;  %v9756_v28 = vld [vmem:[#allocation3 + $0xd8] sm:$0xfc]  ;;  %v17726_v22 = vld [vmem:[#allocation4 + $0xbe4] ss:$16 sps:$4 sm:$0xff]  }
 0xa9b   : > { %10677 = vmatmul.mubr.bf16.gmra.mrb[32].mxu0 %v9861_v49  ;;  %10797 = vmatprep.subr.bf16.mxu1 %v17651_v25  ;;  %v17729_v25 = vld [vmem:[#allocation4 + $0xbec] ss:$16 sps:$4 sm:$0xff]  }
 0xa9c   : > { %10783 = vmatmul.mubr.bf16.gmra.mrb[32].mxu1 %v9861_v49  ;;  %10719 = vmatprep.mubr.bf16.mxu0 %v9860_v42  ;;  %v9811_v49 = vrot.slane %v9739_v29, 2  ;;  %v17757_v29 = vld [vmem:[%s23120_s13 + $0xb0] sm:$0xff]  }
 0xa9d   : > { %10692 = vmatpush1.bf16.msra.mxu0 %v17646_v32  ;;  %10825 = vmatprep.mubr.bf16.mxu1 %v9860_v42  ;;  %v9812_v32 = vrot.slane %v9743_v14, 2  ;;  %v9827_v42 = vrot.slane %v9752_v10, 2  ;;  %v17758_v14 = vld [vmem:[%s23120_s13 + $0x78] sm:$0xff]  }
 0xa9e   : > { %10798 = vmatpush1.bf16.msra.mxu1 %v17649_v47  ;;  %10693 = vmatprep.subr.bf16.mxu0 %v17654_v4  ;;  %v9826_v47 = vrot.slane %v9748_v19, 2  ;;  %v9838_v4 = vrot.slane %v9756_v28, 2  ;;  %v17759_v19 = vld [vmem:[%s23120_s13 + $0xf8] sm:$0xff]   ;;  %v17762_v28 = vld [vmem:[%s23120_s13 + $0x140] sm:$0xff]  }
 0xa9f   : > { %10799 = vmatprep.subr.bf16.mxu1 %v17657_v40  ;;  %v9839_v40 = vrot.slane %v9760_v5, 2  ;;  %v17760_v10 = vld [vmem:[%s23120_s13 + $0x38] sm:$0xff]   ;;  %v17763_v5 = vld [vmem:[%s23120_s13 + $0x1c0] sm:$0xff]  }
 0xaa1   : > { %10694 = vmatpush1.bf16.msra.mxu0 %v17652_v58  ;;  %v17724_v58 = vld [vmem:[#allocation4 + $0xbe0] ss:$16 sps:$4 sm:$0xff]  }
 0xaa2   : > { %10800 = vmatpush1.bf16.msra.mxu1 %v17655_v56  ;;  %10695 = vmatprep.subr.bf16.mxu0 %v17660_v17  ;;  %v17727_v56 = vld [vmem:[#allocation4 + $0xbe8] ss:$16 sps:$4 sm:$0xff]   ;;  %v17730_v17 = vld [vmem:[%s23120_s13 + $0x40] sm:$0xff]  }
 0xaa3   : > { %10801 = vmatprep.subr.bf16.mxu1 %v17663_v63  ;;  %v9801_v63 = vsel %vm5108_vm15, %v9799_v52, %v9800_v13  ;;  %v23568_v52 = vld [vmem:[#allocation36_spill] sm:$0xff] }
 0xaa5   : > { %10696 = vmatpush1.bf16.msra.mxu0 %v17658_v20  ;;  %v9813_v20 = vsel %vm5108_vm15, %v9811_v49, %v9812_v32  ;;  %v23569_v49 = vld [vmem:[#allocation37_spill] sm:$0xff] }
 0xaa6   : > { %10802 = vmatpush1.bf16.msra.mxu1 %v17661_v53  ;;  %10697 = vmatprep.subr.bf16.mxu0 %v17666_v34  ;;  %v9747_v53 = vld [vmem:[#allocation3 + $0x90] sm:$0xfc]  ;;  %v17731_v34 = vld [vmem:[%s23120_s13 + $0xc0] sm:$0xff]  }
 0xaa7   : > { %10803 = vmatprep.subr.bf16.mxu1 %v17669_v33  ;;  %v9828_v33 = vsel %vm5108_vm15, %v9826_v47, %v9827_v42  ;;  %v23570_v47 = vld [vmem:[#allocation38_spill] sm:$0xff] }
 0xaa9   : > { %10698 = vmatpush1.bf16.msra.mxu0 %v17664_v31  ;;  %v9840_v31 = vsel %vm5108_vm15, %v9838_v4, %v9839_v40 }
 0xaaa   : > { %10804 = vmatpush1.bf16.msra.mxu1 %v17667_v46  ;;  %10699 = vmatprep.subr.bf16.mxu0 %v17672_v12  ;;  %v9751_v46 = vld [vmem:[#allocation3 + $0xb0] sm:$0x3]  ;;  %v9755_v12 = vld [vmem:[#allocation3 + $0xd0] sm:$0xfc] }
 0xaab   : > { %10805 = vmatprep.subr.bf16.mxu1 %v17675_v18  ;;  %v9759_v18 = vld [vmem:[#allocation3 + $0xf0] sm:$0x3] }
 0xaad   : > { %10700 = vmatpush1.bf16.msra.mxu0 %v17670_v43  ;;  %v9859_v43 = vpack.c.bf16 %v9813_v20, %v9801_v63 }
 0xaae   : > { %10806 = vmatpush1.bf16.msra.mxu1 %v17673_v48  ;;  %10701 = vmatprep.subr.bf16.mxu0 %v17678_v3  ;;  %v9823_v48 = vrot.slane %v9747_v53, 2  ;;  %v17732_v3 = vld [vmem:[%s23120_s13] sm:$0xff]  }
 0xaaf   : > { %10807 = vmatprep.subr.bf16.mxu1 %v17681_v11  ;;  %v9864_v11 = vpack.c.bf16 %v9840_v31, %v9828_v33 }
 0xab1   : > { %10702 = vmatpush1.bf16.msra.mxu0 %v17676_v26  ;;  %v9824_v26 = vrot.slane %v9751_v46, 2 }
 0xab2   : > { %10808 = vmatpush1.bf16.msra.mxu1 %v17679_v50  ;;  %10703 = vmatprep.subr.bf16.mxu0 %v17684_v45  ;;  %v9835_v50 = vrot.slane %v9755_v12, 2  ;;  %v9836_v45 = vrot.slane %v9759_v18, 2 }
 0xab3   : > { %10809 = vmatprep.subr.bf16.mxu1 %v17687_v60  ;;  %v17733_v60 = vld [vmem:[%s23120_s13 + $0x80] sm:$0xff]  }
 0xab5   : > { %10704 = vmatpush1.bf16.msra.mxu0 %v17682_v2  ;;  %v17734_v2 = vld [vmem:[%s23120_s13 + $0x48] sm:$0xff]  }
 0xab6   : > { %10810 = vmatpush1.bf16.msra.mxu1 %v17685_v36  ;;  %10705 = vmatprep.subr.bf16.mxu0 %v17690_v51  ;;  %v17735_v36 = vld [vmem:[%s23120_s13 + $0xc8] sm:$0xff]  }
 0xab7   : > { %10811 = vmatprep.subr.bf16.mxu1 %v17693_v16  ;;  %v17736_v51 = vld [vmem:[%s23120_s13 + $0x8] sm:$0xff]   ;;  %v9825_v16 = vsel %vm5108_vm15, %v9823_v48, %v9824_v26 }
 0xab9   : > { %10706 = vmatpush1.bf16.msra.mxu0 %v17688_v35  ;;  %v9837_v35 = vsel %vm5108_vm15, %v9835_v50, %v9836_v45  ;;  %vm23582_vm15 = vmmov %vm23579_vm2 }
 0xaba   : > { %10812 = vmatpush1.bf16.msra.mxu1 %v17691_v44  ;;  %10707 = vmatprep.subr.bf16.mxu0 %v17696_v1  ;;  %v17737_v44 = vld [vmem:[%s23120_s13 + $0x88] sm:$0xff]   ;;  %v17738_v1 = vld [vmem:[%s23120_s13 + $0x50] sm:$0xff]  }
 0xabb   : > { %10813 = vmatprep.subr.bf16.mxu1 %v17699_v61  ;;  %v17739_v61 = vld [vmem:[%s23120_s13 + $0xd0] sm:$0xff]  }
 0xabd   : > { %10708 = vmatpush1.bf16.msra.mxu0 %v17694_v54  ;;  %v9863_v54 = vpack.c.bf16 %v9837_v35, %v9825_v16 }
 0xabe   : > { %10814 = vmatpush1.bf16.msra.mxu1 %v17697_v57  ;;  %10709 = vmatprep.subr.bf16.mxu0 %v17702_v9  ;;  %v17740_v57 = vld [vmem:[%s23120_s13 + $0x10] sm:$0xff]  }
 0xabf   : > { %10815 = vmatprep.subr.bf16.mxu1 %v17705_v24  ;;  %v17741_v9 = vld [vmem:[%s23120_s13 + $0x90] sm:$0xff]   ;;  %v17742_v24 = vld [vmem:[%s23120_s13 + $0x58] sm:$0xff]  }
 0xac1   : > { %10710 = vmatpush1.bf16.msra.mxu0 %v17700_v6  ;;  %v17743_v6 = vld [vmem:[%s23120_s13 + $0xd8] sm:$0xff]  }
 0xac2   : > { %10816 = vmatpush1.bf16.msra.mxu1 %v17703_v15  ;;  %10711 = vmatprep.subr.bf16.mxu0 %v17708_v38  ;;  %v17744_v15 = vld [vmem:[%s23120_s13 + $0x18] sm:$0xff]  }
 0xac3   : > { %10817 = vmatprep.subr.bf16.mxu1 %v17711_v8  ;;  %v17745_v38 = vld [vmem:[%s23120_s13 + $0x98] sm:$0xff]   ;;  %v17746_v8 = vld [vmem:[%s23120_s13 + $0x60] sm:$0xff]  }
 0xac5   : > { %10712 = vmatpush1.bf16.msra.mxu0 %v17706_v7  ;;  %v17747_v7 = vld [vmem:[%s23120_s13 + $0xe0] sm:$0xff]  }
 0xac6   : > { %10818 = vmatpush1.bf16.msra.mxu1 %v17709_v59  ;;  %10713 = vmatprep.subr.bf16.mxu0 %v17714_v30  ;;  %v17748_v59 = vld [vmem:[%s23120_s13 + $0x20] sm:$0xff]  }
 0xac7   : > { %10819 = vmatprep.subr.bf16.mxu1 %v17717_v55  ;;  %v17749_v30 = vld [vmem:[%s23120_s13 + $0xa0] sm:$0xff]   ;;  %v17750_v55 = vld [vmem:[%s23120_s13 + $0x68] sm:$0xff]  }
 0xac9   : > { %10714 = vmatpush1.bf16.msra.mxu0 %v17712_v41  ;;  %v17751_v41 = vld [vmem:[%s23120_s13 + $0xe8] sm:$0xff]  }
 0xaca   : > { %10820 = vmatpush1.bf16.msra.mxu1 %v17715_v37  ;;  %10715 = vmatprep.subr.bf16.mxu0 %v17720_v62  ;;  %v17752_v37 = vld [vmem:[%s23120_s13 + $0x28] sm:$0xff]  }
 0xacb   : > { %10821 = vmatprep.subr.bf16.mxu1 %v17723_v39  ;;  %v17753_v62 = vld [vmem:[%s23120_s13 + $0xa8] sm:$0xff]   ;;  %v17755_v39 = vld [vmem:[%s23120_s13 + $0xf0] sm:$0xff]  }
 0xacd   : > { %10716 = vmatpush1.bf16.msra.mxu0 %v17718_v27  ;;  %v17761_v27 = vld [vmem:[%s23120_s13 + $0xb8] sm:$0xff]  }
 0xace   : > { %10822 = vmatpush1.bf16.msra.mxu1 %v17721_v23  ;;  %10717 = vmatprep.subr.bf16.mxu0 %v17726_v22  ;;  %v10862_v23 = vld [vmem:[%s23118_s11] sm:$0xf] }
 0xacf   : > { %10823 = vmatprep.subr.bf16.mxu1 %v17729_v25  ;;  %v23567_v22 = vld [vmem:[#allocation15_spill] sm:$0xff]  ;;  %v10875_v13 = vrot.slane %v10862_v23, %v23568_v52  ;;  %v10871_v32 = vrot.slane %v10862_v23, %v23569_v49  ;;  %v10879_v42 = vrot.slane %v10862_v23, %v23570_v47 }
 0xad0   : > { %v10867_v25 = vrot.slane %v10862_v23, %v23567_v22  ;;  %v23586_v23 = vld [vmem:[#allocation47_spill] sm:$0xff] }
 0xad1   : > { %10718 = vmatpush1.bf16.msra.mxu0 %v17724_v58 }
 0xad2   : > { %10824 = vmatpush1.bf16.msra.mxu1 %v17727_v56  ;;  %15640 = vmatprep.subr.bf16.mxu0 %v17730_v17 }
 0xad3   : > { %15662 = vmatprep.subr.bf16.mxu1 %v17731_v34  ;;  %v23571_v34 = vld [vmem:[#allocation39_spill] sm:$0xff] }
 0xad4   : > { %10720 = vmatmul.mubr.bf16.vlgmr.msra.gmra.mrb[28].mxu0 %v9859_v43 }
 0xad5   : > { %10826 = vmatmul.mubr.bf16.vlgmr.msra.gmra.mrb[28].mxu1 %v9859_v43  ;;  %10729 = vmatprep.mubr.bf16.mxu0 %v9864_v11  ;;  %v23572_v43 = vld [vmem:[#allocation40_spill] sm:$0xff] }
 0xad6   : > { %10835 = vmatprep.mubr.bf16.mxu1 %v9864_v11  ;;  %15641 = vmatpush3.bf16.msra.mxu0 %v17732_v3  ;;  %v23573_v3 = vld [vmem:[#allocation41_spill] sm:$0xff] }
 0xad7   : > { %15663 = vmatpush3.bf16.msra.mxu1 %v17733_v60  ;;  %15642 = vmatprep.subr.bf16.mxu0 %v17734_v2  ;;  %v23574_v60 = vld [vmem:[#allocation42_spill] sm:$0xff] }
 0xad8   : > { %15664 = vmatprep.subr.bf16.mxu1 %v17735_v36  ;;  %v23575_v36 = vld [vmem:[#allocation43_spill] sm:$0xff] }
 0xada   : > { %15643 = vmatpush3.bf16.msra.mxu0 %v17736_v51 }
 0xadb   : > { %15665 = vmatpush3.bf16.msra.mxu1 %v17737_v44  ;;  %15644 = vmatprep.subr.bf16.mxu0 %v17738_v1  ;;  %v23576_v44 = vld [vmem:[#allocation44_spill] sm:$0xff] }
 0xadc   : > { %10730 = vmatmul.mubr.bf16.gmra.mrb[32].mxu0 %v9863_v54  ;;  %15666 = vmatprep.subr.bf16.mxu1 %v17739_v61  ;;  %v23577_v61 = vld [vmem:[#allocation45_spill] sm:$0xff] }
 0xadd   : > { %10836 = vmatmul.mubr.bf16.gmra.mrb[32].mxu1 %v9863_v54 }
 0xade   : > { %15645 = vmatpush3.bf16.msra.mxu0 %v17740_v57 }
 0xadf   : > { %15667 = vmatpush3.bf16.msra.mxu1 %v17741_v9  ;;  %15646 = vmatprep.subr.bf16.mxu0 %v17742_v24  ;;  %v23578_v24 = vld [vmem:[#allocation46_spill] sm:$0xff] }
 0xae0   : > { %15668 = vmatprep.subr.bf16.mxu1 %v17743_v6 }
 0xae2   : > { %15647 = vmatpush3.bf16.msra.mxu0 %v17744_v15 }
 0xae3   : > { %15669 = vmatpush3.bf16.msra.mxu1 %v17745_v38  ;;  %15648 = vmatprep.subr.bf16.mxu0 %v17746_v8 }
 0xae4   : > { %15670 = vmatprep.subr.bf16.mxu1 %v17747_v7 }
 0xae6   : > { %15649 = vmatpush3.bf16.msra.mxu0 %v17748_v59 }
 0xae7   : > { %15671 = vmatpush3.bf16.msra.mxu1 %v17749_v30  ;;  %15650 = vmatprep.subr.bf16.mxu0 %v17750_v55 }
 0xae8   : > { %15672 = vmatprep.subr.bf16.mxu1 %v17751_v41 }
 0xaea   : > { %15651 = vmatpush3.bf16.msra.mxu0 %v17752_v37 }
 0xaeb   : > { %15673 = vmatpush3.bf16.msra.mxu1 %v17753_v62  ;;  %15652 = vmatprep.subr.bf16.mxu0 %v17754_v21 }
 0xaec   : > { %15674 = vmatprep.subr.bf16.mxu1 %v17755_v39 }
 0xaee   : > { %15653 = vmatpush3.bf16.msra.mxu0 %v17756_v0 }
 0xaef   : > { %15675 = vmatpush3.bf16.msra.mxu1 %v17757_v29  ;;  %15654 = vmatprep.subr.bf16.mxu0 %v17758_v14 }
 0xaf0   : > { %15676 = vmatprep.subr.bf16.mxu1 %v17759_v19 }
 0xaf2   : > { %15655 = vmatpush3.bf16.msra.mxu0 %v17760_v10 }
 0xaf3   : > { %15677 = vmatpush3.bf16.msra.mxu1 %v17761_v27  ;;  %15684 = vmatprep.subr.bf16.mxu0 %v17762_v28 }
 0xaf4   : > { %15706 = vmatprep.subr.bf16.mxu1 %v17763_v5 }
 0xba7   : > { %v10721_v4 = vpop.f32.mrb[28].mxu0 }
 0xba8   : > { %v10884_v40 = vadd.f32 %v10867_v25, %v10721_v4  ;;  %v10827_v58 = vpop.f32.mrb[28].mxu1  ;;  %v10723_v56 = vpop.f32.mrb[29].mxu0 }
 0xba9   : > { %v10886_v17 = vadd.f32 %v10875_v13, %v10827_v58  ;;  %v10885_v63 = vadd.f32 %v10871_v32, %v10723_v56  ;;  %v10829_v20 = vpop.f32.mrb[29].mxu1  ;;  %v10725_v53 = vpop.f32.mrb[30].mxu0  ;;  %v23588_v58 = vld [vmem:[#allocation48_spill] sm:$0xff] }
 0xbaa   : > { %v22005_v33 = vadd.f32 %v10884_v40, %v23571_v34  ;;  %v10887_v31 = vadd.f32 %v10879_v42, %v10829_v20  ;;  %v10888_v46 = vadd.f32 %v10867_v25, %v10725_v53  ;;  %v10831_v12 = vpop.f32.mrb[30].mxu1  ;;  %v10727_v18 = vpop.f32.mrb[31].mxu0 }
 0xbab   : > { %v22008_v48 = vadd.f32 %v10886_v17, %v23572_v43  ;;  %v22011_v11 = vadd.f32 %v10885_v63, %v23573_v3  ;;  %v10890_v26 = vadd.f32 %v10875_v13, %v10831_v12  ;;  %v10889_v50 = vadd.f32 %v10871_v32, %v10727_v18  ;;  %v10833_v45 = vpop.f32.mrb[31].mxu1  ;;  %v23589_v17 = vld [vmem:[#allocation50_spill] sm:$0xff]  ;;  %v23591_v12 = vld [vmem:[#allocation52_spill] sm:$0xff]  ;;  %v23592_v3 = vld [vmem:[#allocation53_spill] sm:$0xff] }
 0xbac   : > { %v22014_v2 = vadd.f32 %v10887_v31, %v23574_v60  ;;  %v22017_v51 = vadd.f32 %v10888_v46, %v23575_v36  ;;  %v10891_v16 = vadd.f32 %v10879_v42, %v10833_v45  ;;  %v10960_v35 = vrot.slane %v22005_v33, 1  ;;  %v23590_v31 = vld [vmem:[#allocation51_spill] sm:$0xff] }
 0xbad   : > { %v22021_v1 = vadd.f32 %v10890_v26, %v23576_v44  ;;  %v22024_v54 = vadd.f32 %v10889_v50, %v23577_v61  ;;  %v10966_v57 = vrot.slane %v22011_v11, 1  ;;  %v10972_v9 = vrot.slane %v22008_v48, 1  ;;  %v23593_v50 = vld [vmem:[#allocation54_spill] sm:$0xff] }
 0xbae   : > { %v22029_v6 = vadd.f32 %v10891_v16, %v23578_v24  ;;  %v10932_v15 = vrot.slane %v22017_v51, 7  ;;  %v10978_v38 = vrot.slane %v22014_v2, 1  ;;  %v22035_v8 = vsel %vm23579_vm2, %v22017_v51, %v10960_v35  ;;  %vm23603_vm2 = vmmov %vm23595_vm10 }
 0xbaf   : > { %v10731_v7 = vpop.f32.mrb[32].mxu0  ;;  %v10938_v59 = vrot.slane %v22024_v54, 7  ;;  %v10944_v30 = vrot.slane %v22021_v1, 7  ;;  %v10967_v55 = vsel %vm23580_vm3, %v22024_v54, %v10966_v57  ;;  %v22043_v41 = vsel %vm23581_vm4, %v22021_v1, %v10972_v9  ;;  %vm23604_vm3 = vmmov %vm23600_vm0 }
 0xbb0   : > { %v10892_v37 = vadd.f32 %v10867_v25, %v10731_v7  ;;  %v10837_v62 = vpop.f32.mrb[32].mxu1  ;;  %v10733_v21 = vpop.f32.mrb[33].mxu0  ;;  %v10950_v39 = vrot.slane %v22029_v6, 7  ;;  %v10933_v0 = vsel %vm23582_vm15, %v10932_v15, %v22005_v33  ;;  %v10979_v29 = vsel %vm23583_vm6, %v22029_v6, %v10978_v38  ;;  %vm23605_vm4 = vmmov %vm23603_vm2 }
 0xbb1   : > { %v10894_v14 = vadd.f32 %v10875_v13, %v10837_v62  ;;  %v10893_v19 = vadd.f32 %v10871_v32, %v10733_v21  ;;  %v10839_v10 = vpop.f32.mrb[33].mxu1  ;;  %v10735_v27 = vpop.f32.mrb[34].mxu0  ;;  %v10939_v28 = vsel %vm23584_vm7, %v10938_v59, %v22011_v11  ;;  %v10945_v5 = vsel %vm23585_vm8, %v10944_v30, %v22008_v48  ;;  %vm23606_vm15 = vmmov %vm23600_vm0 }
 0xbb2   : > { %v22055_v22 = vadd.f32 %v10892_v37, %v23586_v23  ;;  %v10895_v52 = vadd.f32 %v10879_v42, %v10839_v10  ;;  %v10896_v49 = vadd.f32 %v10867_v25, %v10735_v27  ;;  %v10841_v47 = vpop.f32.mrb[34].mxu1  ;;  %v10737_v4 = vpop.f32.mrb[35].mxu0  ;;  %v10951_v40 = vsel %vm23587_vm9, %v10950_v39, %v22014_v2  ;;  %v17765_v27 = vld [vmem:[%s23120_s13 + $0x180] sm:$0xff]   ;;  %vm23607_vm6 = vmmov %vm23603_vm2 }
 0xbb3   : > { %v22060_v56 = vadd.f32 %v10894_v14, %v23588_v58  ;;  %v22063_v63 = vadd.f32 %v10893_v19, %v23589_v17  ;;  %v10898_v20 = vadd.f32 %v10875_v13, %v10841_v47  ;;  %v10897_v53 = vadd.f32 %v10871_v32, %v10737_v4  ;;  %v10843_v34 = vpop.f32.mrb[35].mxu1  ;;  %v23594_v32 = vld [vmem:[#allocation55_spill] sm:$0xff]  ;;  %vm23608_vm7 = vmmov %vm23603_vm2 }
 0xbb4   : > { %v22066_v46 = vadd.f32 %v10895_v52, %v23590_v31  ;;  %v22069_v18 = vadd.f32 %v10896_v49, %v23591_v12  ;;  %v10899_v25 = vadd.f32 %v10879_v42, %v10843_v34  ;;  %v10934_v43 = vrot.slane %v22055_v22, 6  ;;  %v17764_v14 = vld [vmem:[%s23120_s13 + $0x100] sm:$0xff]   ;;  %v17766_v49 = vld [vmem:[%s23120_s13 + $0x148] sm:$0xff]   ;;  %vm23609_vm8 = vmmov %vm23600_vm0 }
 0xbb5   : > { %v22073_v26 = vadd.f32 %v10898_v20, %v23592_v3  ;;  %v22076_v45 = vadd.f32 %v10897_v53, %v23593_v50  ;;  %v10940_v60 = vrot.slane %v22063_v63, 6  ;;  %v10946_v13 = vrot.slane %v22060_v56, 6  ;;  %v17768_v31 = vld [vmem:[%s23120_s13 + $0x108] sm:$0xff]   ;;  %v17770_v50 = vld [vmem:[%s23120_s13 + $0x150] sm:$0xff]   ;;  %vm23610_vm9 = vmmov %vm23600_vm0 }
 0xbb6   : > { %v22081_v36 = vadd.f32 %v10899_v25, %v23594_v32  ;;  %v10952_v16 = vrot.slane %v22066_v46, 6  ;;  %v10935_v35 = vsel %vm23595_vm10, %v10934_v43, %v10933_v0  ;;  %v10936_v42 = vrot.slane %v22069_v18, 5  ;;  %v17769_v3 = vld [vmem:[%s23120_s13 + $0x188] sm:$0xff]  }
 0xbb7   : > { %v10941_v44 = vsel %vm23596_vm11, %v10940_v60, %v10939_v28  ;;  %v10942_v61 = vrot.slane %v22076_v45, 5  ;;  %v10947_v57 = vsel %vm23597_vm12, %v10946_v13, %v10945_v5  ;;  %v10948_v9 = vrot.slane %v22073_v26, 5  ;;  %vm23612_vm11 = vmmov %vm23603_vm2 }
 0xbb8   : > { %v10953_v24 = vsel %vm23598_vm13, %v10952_v16, %v10951_v40  ;;  %v10954_v15 = vrot.slane %v22081_v36, 5  ;;  %v10937_v38 = vsel %vm23599_vm14, %v10936_v42, %v10935_v35  ;;  %v10968_v7 = vrot.slane %v22063_v63, 7  ;;  %vm23613_vm12 = vmmov %vm23600_vm0 }
 0xbb9   : > { %v10943_v59 = vsel %vm23600_vm0, %v10942_v61, %v10941_v44  ;;  %v11172_v30 = vpack.c.bf16 %v10937_v38, %v10937_v38  ;;  %v10949_v37 = vsel %vm23601_vm5, %v10948_v9, %v10947_v57  ;;  %v10970_v62 = vrot.slane %v22076_v45, 6  ;;  %v17772_v57 = vld [vmem:[%s23120_s13 + $0x110] sm:$0xff]   ;;  %vm23615_vm14 = vmmov %vm23603_vm2 }
 0xbba   : > { %v11173_v21 = vpack.c.bf16 %v10943_v59, %v10943_v59  ;;  %v10955_v39 = vsel %vm23602_vm1, %v10954_v15, %v10953_v24  ;;  %v11174_v0 = vpack.c.bf16 %v10949_v37, %v10949_v37  ;;  %v10969_v19 = vsel %vm23603_vm2, %v10968_v7, %v10967_v55  ;;  %v17767_v55 = vld [vmem:[%s23120_s13 + $0x1c8] sm:$0xff]   ;;  %v17773_v38 = vld [vmem:[%s23120_s13 + $0x190] sm:$0xff]   ;;  %v17774_v7 = vld [vmem:[%s23120_s13 + $0x158] sm:$0xff]  }
 0xbbb   : > { %v11175_v10 = vpack.c.bf16 %v10955_v39, %v10955_v39  ;;  %v10971_v28 = vsel %vm23604_vm3, %v10970_v62, %v10969_v19  ;;  %v10980_v5 = vrot.slane %v22066_v46, 7  ;;  %v10982_v23 = vrot.slane %v22081_v36, 6  ;;  %vm23617_vm5 = vmmov %vm23602_vm1 }
 0xbbc   : > { %13284 = vmatprep.mubr.bf16.mxu0 %v11173_v21  ;;  %v11177_v52 = vpack.c.bf16 %v10971_v28, %v10971_v28  ;;  %v10962_v47 = vrot.slane %v22055_v22, 7  ;;  %v10964_v4 = vrot.slane %v22069_v18, 6  ;;  %v10974_v40 = vrot.slane %v22060_v56, 7  ;;  %v17775_v21 = vld [vmem:[%s23120_s13 + $0x1d8] sm:$0xff]   ;;  %vm23618_vm1 = vmmov %vm23603_vm2 }
 0xbbd   : > { %13324 = vmatprep.mubr.bf16.mxu1 %v11175_v10  ;;  %13285 = vmatmul.mubr.bf16.vlgmr.msra.gmra.mrb[36].mxu0 %v11172_v30  ;;  %v10981_v58 = vsel %vm23605_vm4, %v10980_v5, %v10979_v29  ;;  %v10976_v17 = vrot.slane %v22073_v26, 6  ;;  %v10994_v20 = vrot.slane %v22011_v11, 2  ;;  %v10995_v53 = vrot.slane %v22024_v54, 1  ;;  %vm23619_vm2 = vmmov %vm23604_vm3  ;;  %v17776_v5 = vld [vmem:[%s23120_s13 + $0x118] sm:$0xff]  }
 0xbbe   : > { %13325 = vmatmul.mubr.bf16.vlgmr.msra.gmra.mrb[36].mxu1 %v11174_v0  ;;  %15685 = vmatpush3.bf16.msra.mxu0 %v17764_v14  ;;  %v10983_v34 = vsel %vm23606_vm15, %v10982_v23, %v10981_v58  ;;  %v10963_v12 = vsel %vm23607_vm6, %v10962_v47, %v22035_v8  ;;  %v10975_v29 = vsel %vm23608_vm7, %v10974_v40, %v22043_v41  ;;  %v10998_v25 = vrot.slane %v22076_v45, 7  ;;  %v17771_v41 = vld [vmem:[%s23120_s13 + $0x1d0] sm:$0xff]   ;;  %vm23621_vm4 = vmmov %vm23618_vm1  ;;  %v17778_v47 = vld [vmem:[%s23120_s13 + $0x160] sm:$0xff]  }
 0xbbf   : > { %15707 = vmatpush3.bf16.msra.mxu1 %v17765_v27  ;;  %13364 = vmatprep.mubr.bf16.mxu0 %v11177_v52  ;;  %v11179_v43 = vpack.c.bf16 %v10983_v34, %v10983_v34  ;;  %v22137_v60 = vsel %vm23609_vm8, %v10964_v4, %v10963_v12  ;;  %v22140_v8 = vsel %vm23610_vm9, %v10976_v17, %v10975_v29  ;;  %vm23611_vm10 = vcmask 1041409   ;;  %vm23622_vm15 = vmmov %vm23619_vm2 }
 0xbc0   : > { %15686 = vmatprep.subr.bf16.mxu0 %v17766_v49  ;;  %15708 = vmatprep.subr.bf16.mxu1 %v17767_v55  ;;  %v10996_v13 = vsel %vm23611_vm10, %v10995_v53, %v10994_v20  ;;  %v11006_v32 = vrot.slane %v22014_v2, 2  ;;  %v11007_v16 = vrot.slane %v22029_v6, 1  ;;  %v11010_v42 = vrot.slane %v22081_v36, 7  ;;  %vm23614_vm13 = vmmov %vm23611_vm10  ;;  %v17777_v55 = vld [vmem:[%s23120_s13 + $0x198] sm:$0xff]   ;;  %v17779_v20 = vld [vmem:[%s23120_s13 + $0x1e0] sm:$0xff]  }
 0xbc1   : > { %13404 = vmatprep.mubr.bf16.mxu1 %v11179_v43  ;;  %v10997_v35 = vsel %vm23612_vm11, %v22063_v63, %v10996_v13  ;;  %v10988_v44 = vrot.slane %v22005_v33, 2  ;;  %v10989_v61 = vrot.slane %v22017_v51, 1  ;;  %v10992_v15 = vrot.slane %v22069_v18, 7  ;;  %vm23616_vm0 = vmmov %vm23611_vm10  ;;  %v17780_v43 = vld [vmem:[%s23120_s13 + $0x120] sm:$0xff]  }
 0xbc2   : > { %15687 = vmatpush3.bf16.msra.mxu0 %v17768_v31  ;;  %v22157_v9 = vsel %vm23613_vm12, %v10998_v25, %v10997_v35  ;;  %v11008_v24 = vsel %vm23614_vm13, %v11007_v16, %v11006_v32  ;;  %v11000_v37 = vrot.slane %v22008_v48, 2  ;;  %v11001_v62 = vrot.slane %v22021_v1, 1  ;;  %vm23620_vm3 = vmmov %vm23616_vm0  ;;  %v17781_v32 = vld [vmem:[%s23120_s13 + $0x1a0] sm:$0xff]   ;;  %v17782_v16 = vld [vmem:[%s23120_s13 + $0x168] sm:$0xff]  }
 0xbc3   : > { %15709 = vmatpush3.bf16.msra.mxu1 %v17769_v3  ;;  %15688 = vmatprep.subr.bf16.mxu0 %v17770_v50  ;;  %v11009_v59 = vsel %vm23615_vm14, %v22066_v46, %v11008_v24  ;;  %v10990_v30 = vsel %vm23616_vm0, %v10989_v61, %v10988_v44  ;;  %v11004_v14 = vrot.slane %v22073_v26, 7  ;;  %v11022_v27 = vrot.slane %v22011_v11, 3  ;;  %vm23623_vm6 = vmmov %vm23616_vm0  ;;  %v17783_v61 = vld [vmem:[%s23120_s13 + $0x1e8] sm:$0xff]  }
 0xbc4   : > { %15710 = vmatprep.subr.bf16.mxu1 %v17771_v41  ;;  %v22176_v39 = vsel %vm23617_vm5, %v11010_v42, %v11009_v59  ;;  %v10991_v0 = vsel %vm23618_vm1, %v22055_v22, %v10990_v30  ;;  %v11002_v10 = vsel %vm23620_vm3, %v11001_v62, %v11000_v37  ;;  %v11023_v28 = vrot.slane %v22024_v54, 2  ;;  %vm23624_vm7 = vmmov %vm23618_vm1  ;;  %v17784_v37 = vld [vmem:[%s23120_s13 + $0x128] sm:$0xff]  }
 0xbc5   : > { %v22182_v19 = vsel %vm23619_vm2, %v10992_v15, %v10991_v0  ;;  %v11003_v23 = vsel %vm23621_vm4, %v22060_v56, %v11002_v10  ;;  %v11025_v52 = vrot.slane %v22063_v63, 1  ;;  %v11034_v49 = vrot.slane %v22014_v2, 3  ;;  %vm23625_vm8 = vmmov %vm23619_vm2  ;;  %v17785_v10 = vld [vmem:[%s23120_s13 + $0x1a8] sm:$0xff]  }
 0xbc6   : > { %15689 = vmatpush3.bf16.msra.mxu0 %v17772_v57  ;;  %v22201_v4 = vsel %vm23622_vm15, %v11004_v14, %v11003_v23  ;;  %v11024_v40 = vsel %vm23623_vm6, %v11023_v28, %v11022_v27  ;;  %v11035_v58 = vrot.slane %v22029_v6, 2  ;;  %v11037_v17 = vrot.slane %v22066_v46, 1  ;;  %vm23626_vm9 = vmmov %vm23616_vm0  ;;  %v17786_v27 = vld [vmem:[%s23120_s13 + $0x170] sm:$0xff]  }
 0xbc7   : > { %15711 = vmatpush3.bf16.msra.mxu1 %v17773_v38  ;;  %15690 = vmatprep.subr.bf16.mxu0 %v17774_v7  ;;  %v11026_v53 = vsel %vm23624_vm7, %v11025_v52, %v11024_v40  ;;  %v11016_v34 = vrot.slane %v22005_v33, 3  ;;  %v11017_v31 = vrot.slane %v22017_v51, 2  ;;  %v11019_v25 = vrot.slane %v22055_v22, 1  ;;  %vm23627_vm10 = vmmov %vm23618_vm1  ;;  %v17787_v52 = vld [vmem:[%s23120_s13 + $0x1f0] sm:$0xff]  }
 0xbc8   : > { %15712 = vmatprep.subr.bf16.mxu1 %v17775_v21  ;;  %v22214_v12 = vsel %vm23625_vm8, %v22076_v45, %v11026_v53  ;;  %v11036_v29 = vsel %vm23626_vm9, %v11035_v58, %v11034_v49  ;;  %vm23628_vm11 = vmmov %vm23616_vm0  ;;  %v11028_v41 = vrot.slane %v22008_v48, 3  ;;  %v11029_v13 = vrot.slane %v22021_v1, 2  ;;  %v17788_v53 = vld [vmem:[%s23120_s13 + $0x130] sm:$0xff]  }
 0xbc9   : > { %v11038_v3 = vsel %vm23627_vm10, %v11037_v17, %v11036_v29  ;;  %v11018_v50 = vsel %vm23628_vm11, %v11017_v31, %v11016_v34  ;;  %vm23629_vm12 = vmmov %vm23619_vm2  ;;  %v11031_v44 = vrot.slane %v22060_v56, 1  ;;  %v11051_v15 = vrot.slane %v22011_v11, 4 }
 0xbca   : > { %15691 = vmatpush3.bf16.msra.mxu0 %v17776_v5  ;;  %v22233_v35 = vsel %vm23629_vm12, %v22081_v36, %v11038_v3  ;;  %vm23630_vm13 = vmmov %vm23618_vm1  ;;  %v11030_v24 = vsel %vm23616_vm0, %v11029_v13, %v11028_v41  ;;  %v11052_v38 = vrot.slane %v22024_v54, 3  ;;  %v11054_v59 = vrot.slane %v22063_v63, 2  ;;  %v17790_v3 = vld [vmem:[%s23120_s13 + $0x178] sm:$0xff]  }
 0xbcb   : > { %15713 = vmatpush3.bf16.msra.mxu1 %v17777_v55  ;;  %15692 = vmatprep.subr.bf16.mxu0 %v17778_v47  ;;  %v11020_v42 = vsel %vm23630_vm13, %v11019_v25, %v11018_v50  ;;  %vm23631_vm14 = vmmov %vm23619_vm2  ;;  %v11056_v30 = vrot.slane %v22076_v45, 1  ;;  %v11065_v0 = vrot.slane %v22014_v2, 4  ;;  %v11066_v14 = vrot.slane %v22029_v6, 3 }
 0xbcc   : > { %15714 = vmatprep.subr.bf16.mxu1 %v17779_v20  ;;  %v22242_v57 = vsel %vm23631_vm14, %v22069_v18, %v11020_v42  ;;  %vm23632_vm5 = vmmov %vm23618_vm1  ;;  %v11068_v5 = vrot.slane %v22066_v46, 2  ;;  %v11070_v23 = vrot.slane %v22081_v36, 1  ;;  %v11044_v47 = vrot.slane %v22005_v33, 4 }
 0xbcd   : > { %v11032_v7 = vsel %vm23632_vm5, %v11031_v44, %v11030_v24  ;;  %vm23633_vm1 = vmmov %vm23619_vm2  ;;  %v11045_v40 = vrot.slane %v22017_v51, 3  ;;  %v11047_v17 = vrot.slane %v22055_v22, 2  ;;  %v11049_v20 = vrot.slane %v22069_v18, 1 }
 0xbce   : > { %15693 = vmatpush3.bf16.msra.mxu0 %v17780_v43  ;;  %v22255_v62 = vsel %vm23633_vm1, %v22073_v26, %v11032_v7  ;;  %vm23634_vm2 = vmmov %vm23616_vm0  ;;  %v11058_v29 = vrot.slane %v22008_v48, 4  ;;  %v11059_v25 = vrot.slane %v22021_v1, 3  ;;  %v17789_v43 = vld [vmem:[%s23120_s13 + $0x1b0] sm:$0xff]   ;;  %v11061_v41 = vrot.slane %v22060_v56, 2  ;;  %v17792_v7 = vld [vmem:[%s23120_s13 + $0x138] sm:$0xff]  }
 0xbcf   : > { %v11053_v21 = vsel %vm23634_vm2, %v11052_v38, %v11051_v15  ;;  %15715 = vmatpush3.bf16.msra.mxu1 %v17781_v32  ;;  %15694 = vmatprep.subr.bf16.mxu0 %v17782_v16  ;;  %vm23635_vm3 = vmmov %vm23621_vm4  ;;  %v11063_v13 = vrot.slane %v22073_v26, 1  ;;  %v17791_v32 = vld [vmem:[%s23120_s13 + $0x1f8] sm:$0xff]   ;;  %v11083_v44 = vrot.slane %v22011_v11, 5  ;;  %v11086_v15 = vrot.slane %v22063_v63, 3 }
 0xbd0   : > { %v11055_v28 = vsel %vm23635_vm3, %v11054_v59, %v11053_v21  ;;  %15716 = vmatprep.subr.bf16.mxu1 %v17783_v61  ;;  %vm23636_vm4 = vmmov %vm23633_vm1  ;;  %v11084_v61 = vrot.slane %v22024_v54, 4  ;;  %v11088_v38 = vrot.slane %v22076_v45, 2  ;;  %v11098_v21 = vrot.slane %v22029_v6, 4 }
 0xbd1   : > { %v22273_v49 = vsel %vm23636_vm4, %v11056_v30, %v11055_v28  ;;  %vm23637_vm15 = vmmov %vm23616_vm0  ;;  %v11100_v28 = vrot.slane %v22066_v46, 3 }
 0xbd2   : > { %v11067_v55 = vsel %vm23637_vm15, %v11066_v14, %v11065_v0  ;;  %vm23638_vm6 = vmmov %vm23635_vm3  ;;  %15695 = vmatpush3.bf16.msra.mxu0 %v17784_v37  ;;  %v11097_v37 = vrot.slane %v22014_v2, 5  ;;  %v17793_v0 = vld [vmem:[%s23120_s13 + $0x1b8] sm:$0xff]   ;;  %v11176_v14 = vpack.c.bf16 %v22137_v60, %v22137_v60 }
 0xbd3   : > { %v11069_v58 = vsel %vm23638_vm6, %v11068_v5, %v11067_v55  ;;  %vm23639_vm7 = vmmov %vm23633_vm1  ;;  %15717 = vmatpush3.bf16.msra.mxu1 %v17785_v10  ;;  %15696 = vmatprep.subr.bf16.mxu0 %v17786_v27  ;;  %v17794_v10 = vld [vmem:[%s23120_s13 + $0x240] sm:$0xff]   ;;  %v11102_v5 = vrot.slane %v22081_v36, 2  ;;  %v11076_v55 = vrot.slane %v22005_v33, 5 }
 0xbd4   : > { %v22285_v34 = vsel %vm23639_vm7, %v11070_v23, %v11069_v58  ;;  %vm23640_vm8 = vmmov %vm23616_vm0  ;;  %15718 = vmatprep.subr.bf16.mxu1 %v17787_v52  ;;  %v17795_v23 = vld [vmem:[%s23120_s13 + $0x2c0] sm:$0xff]  }
 0xbd5   : > { %v11046_v31 = vsel %vm23640_vm8, %v11045_v40, %v11044_v47  ;;  %vm23641_vm9 = vmmov %vm23635_vm3  ;;  %v11077_v47 = vrot.slane %v22017_v51, 4  ;;  %v11178_v40 = vpack.c.bf16 %v22140_v8, %v22140_v8  ;;  %v11091_v8 = vrot.slane %v22021_v1, 4 }
 0xbd6   : > { %v11048_v50 = vsel %vm23641_vm9, %v11047_v17, %v11046_v31  ;;  %vm23642_vm10 = vmmov %vm23633_vm1  ;;  %15697 = vmatpush3.bf16.msra.mxu0 %v17788_v53  ;;  %v11079_v17 = vrot.slane %v22055_v22, 3  ;;  %v17796_v53 = vld [vmem:[%s23120_s13 + $0x200] sm:$0xff]  }
 0xbd7   : > { %v22303_v16 = vsel %vm23642_vm10, %v11049_v20, %v11048_v50  ;;  %vm23643_vm11 = vmmov %vm23616_vm0  ;;  %15719 = vmatpush3.bf16.msra.mxu1 %v17789_v43  ;;  %15698 = vmatprep.subr.bf16.mxu0 %v17790_v3  ;;  %v11081_v20 = vrot.slane %v22069_v18, 2  ;;  %v11181_v43 = vpack.c.bf16 %v22157_v9, %v22157_v9  ;;  %v17797_v3 = vld [vmem:[%s23120_s13 + $0x280] sm:$0xff]  }
 0xbd8   : > { %v11060_v42 = vsel %vm23643_vm11, %v11059_v25, %v11058_v29  ;;  %vm23644_vm12 = vmmov %vm23635_vm3  ;;  %15720 = vmatprep.subr.bf16.mxu1 %v17791_v32  ;;  %v11090_v25 = vrot.slane %v22008_v48, 5  ;;  %v17798_v32 = vld [vmem:[%s23120_s13 + $0x248] sm:$0xff]  }
 0xbd9   : > { %v11062_v24 = vsel %vm23644_vm12, %v11061_v41, %v11060_v42  ;;  %vm23645_vm13 = vmmov %vm23633_vm1  ;;  %v11093_v41 = vrot.slane %v22060_v56, 3 }
 0xbda   : > { %v22315_v59 = vsel %vm23645_vm13, %v11063_v13, %v11062_v24  ;;  %vm23646_vm14 = vmmov %vm23616_vm0  ;;  %15699 = vmatpush3.bf16.msra.mxu0 %v17792_v7  ;;  %v11095_v13 = vrot.slane %v22073_v26, 2  ;;  %v11183_v24 = vpack.c.bf16 %v22176_v39, %v22176_v39  ;;  %v11118_v7 = vrot.slane %v22063_v63, 4 }
 0xbdb   : > { %v11085_v30 = vsel %vm23646_vm14, %v11084_v61, %v11083_v44  ;;  %vm23647_vm0 = vmmov %vm23635_vm3  ;;  %15721 = vmatpush3.bf16.msra.mxu1 %v17793_v0  ;;  %15728 = vmatprep.subr.bf16.mxu0 %v17794_v10  ;;  %v11115_v44 = vrot.slane %v22011_v11, 6  ;;  %v11116_v61 = vrot.slane %v22024_v54, 5  ;;  %v11129_v0 = vrot.slane %v22014_v2, 6  ;;  %v17801_v10 = vld [vmem:[%s23120_s13 + $0x288] sm:$0xff]  }
 0xbdc   : > { %v11087_v27 = vsel %vm23647_vm0, %v11086_v15, %v11085_v30  ;;  %vm23648_vm5 = vmmov %vm23633_vm1  ;;  %15750 = vmatprep.subr.bf16.mxu1 %v17795_v23  ;;  %v17799_v15 = vld [vmem:[%s23120_s13 + $0x2c8] sm:$0xff]   ;;  %v11120_v30 = vrot.slane %v22076_v45, 3  ;;  %v11134_v23 = vrot.slane %v22081_v36, 3 }
 0xbdd   : > { %v22335_v52 = vsel %vm23648_vm5, %v11088_v38, %v11087_v27  ;;  %vm23649_vm1 = vmmov %vm23634_vm2  ;;  %13365 = vmatmul.mubr.bf16.vlgmr.msra.gmra.mrb[40].mxu0 %v11176_v14  ;;  %v11130_v14 = vrot.slane %v22029_v6, 5  ;;  %v17802_v27 = vld [vmem:[%s23120_s13 + $0x250] sm:$0xff]  }
 0xbde   : > { %v11099_v60 = vsel %vm23649_vm1, %v11098_v21, %v11097_v37  ;;  %vm23650_vm2 = vmmov %vm23647_vm0  ;;  %13405 = vmatmul.mubr.bf16.vlgmr.msra.gmra.mrb[40].mxu1 %v11178_v40  ;;  %15729 = vmatpush3.bf16.msra.mxu0 %v17796_v53  ;;  %v17800_v37 = vld [vmem:[%s23120_s13 + $0x208] sm:$0xff]   ;;  %v11108_v40 = vrot.slane %v22005_v33, 6  ;;  %v11113_v53 = vrot.slane %v22069_v18, 3 }
 0xbdf   : > { %v11101_v58 = vsel %vm23650_vm2, %v11100_v28, %v11099_v60  ;;  %vm23651_vm3 = vmmov %vm23636_vm4  ;;  %13444 = vmatprep.mubr.bf16.mxu0 %v11181_v43  ;;  %15751 = vmatpush3.bf16.msra.mxu1 %v17797_v3  ;;  %v17803_v60 = vld [vmem:[%s23120_s13 + $0x2d0] sm:$0xff]   ;;  %v11122_v43 = vrot.slane %v22008_v48, 6  ;;  %v11123_v3 = vrot.slane %v22021_v1, 5 }
 0xbe0   : > { %v22349_v31 = vsel %vm23651_vm3, %v11102_v5, %v11101_v58  ;;  %vm23652_vm4 = vmmov %vm23649_vm1  ;;  %v11132_v5 = vrot.slane %v22066_v46, 4  ;;  %13484 = vmatprep.mubr.bf16.mxu1 %v11183_v24  ;;  %15730 = vmatprep.subr.bf16.mxu0 %v17798_v32  ;;  %v11109_v58 = vrot.slane %v22017_v51, 5  ;;  %v11125_v32 = vrot.slane %v22060_v56, 4 }
 0xbe1   : > { %v11078_v29 = vsel %vm23652_vm4, %v11077_v47, %v11076_v55  ;;  %vm23653_vm15 = vmmov %vm23647_vm0  ;;  %15752 = vmatprep.subr.bf16.mxu1 %v17799_v15  ;;  %v11147_v15 = vrot.slane %v22011_v11, 7  ;;  %v11161_v11 = vrot.slane %v22014_v2, 7  ;;  %v17811_v2 = vld [vmem:[%s23120_s13 + $0x2e0] sm:$0xff]  }
 0xbe2   : > { %v11080_v50 = vsel %vm23653_vm15, %v11079_v17, %v11078_v29  ;;  %vm23654_vm6 = vmmov %vm23651_vm3  ;;  %15731 = vmatpush3.bf16.msra.mxu0 %v17800_v37  ;;  %v17804_v29 = vld [vmem:[%s23120_s13 + $0x210] sm:$0xff]   ;;  %v11152_v37 = vrot.slane %v22076_v45, 4  ;;  %v17810_v45 = vld [vmem:[%s23120_s13 + $0x260] sm:$0xff]  }
 0xbe3   : > { %v22366_v42 = vsel %vm23654_vm6, %v11081_v20, %v11080_v50  ;;  %vm23655_vm7 = vmmov %vm23649_vm1  ;;  %v11111_v20 = vrot.slane %v22055_v22, 4  ;;  %15753 = vmatpush3.bf16.msra.mxu1 %v17801_v10  ;;  %15732 = vmatprep.subr.bf16.mxu0 %v17802_v27  ;;  %v17805_v50 = vld [vmem:[%s23120_s13 + $0x290] sm:$0xff]   ;;  %v11164_v27 = vrot.slane %v22066_v46, 5  ;;  %v11143_v46 = vrot.slane %v22055_v22, 5  ;;  %v17813_v22 = vld [vmem:[%s23120_s13 + $0x2a0] sm:$0xff]  }
 0xbe4   : > { %v11092_v9 = vsel %vm23655_vm7, %v11091_v8, %v11090_v25  ;;  %vm23656_vm8 = vmmov %vm23647_vm0  ;;  %15754 = vmatprep.subr.bf16.mxu1 %v17803_v60  ;;  %v11141_v60 = vrot.slane %v22017_v51, 6  ;;  %v11155_v51 = vrot.slane %v22021_v1, 6 }
 0xbe5   : > { %v11094_v38 = vsel %vm23656_vm8, %v11093_v41, %v11092_v9  ;;  %vm23657_vm9 = vmmov %vm23651_vm3  ;;  %v17806_v41 = vld [vmem:[%s23120_s13 + $0x258] sm:$0xff]   ;;  %v11127_v9 = vrot.slane %v22073_v26, 3 }
 0xbe6   : > { %v22383_v21 = vsel %vm23657_vm9, %v11095_v13, %v11094_v38  ;;  %vm23658_vm10 = vmmov %vm23649_vm1  ;;  %v11148_v38 = vrot.slane %v22024_v54, 6  ;;  %15733 = vmatpush3.bf16.msra.mxu0 %v17804_v29  ;;  %v11162_v54 = vrot.slane %v22029_v6, 6  ;;  %v11159_v29 = vrot.slane %v22073_v26, 4  ;;  %v17817_v26 = vld [vmem:[%s23120_s13 + $0x2a8] sm:$0xff]  }
 0xbe7   : > { %v11117_v39 = vsel %vm23658_vm10, %v11116_v61, %v11115_v44  ;;  %vm23659_vm11 = vmmov %vm23647_vm0  ;;  %v17807_v44 = vld [vmem:[%s23120_s13 + $0x2d8] sm:$0xff]   ;;  %15755 = vmatpush3.bf16.msra.mxu1 %v17805_v50  ;;  %15734 = vmatprep.subr.bf16.mxu0 %v17806_v41  ;;  %v17818_v50 = vld [vmem:[%s23120_s13 + $0x270] sm:$0xff]  }
 0xbe8   : > { %v11119_v28 = vsel %vm23659_vm11, %v11118_v7, %v11117_v39  ;;  %vm23660_vm12 = vmmov %vm23651_vm3  ;;  %v17808_v39 = vld [vmem:[%s23120_s13 + $0x218] sm:$0xff]   ;;  %15756 = vmatprep.subr.bf16.mxu1 %v17807_v44  ;;  %v17819_v41 = vld [vmem:[%s23120_s13 + $0x2f0] sm:$0xff]  }
 0xbe9   : > { %v22401_v55 = vsel %vm23660_vm12, %v11120_v30, %v11119_v28  ;;  %vm23661_vm13 = vmmov %vm23649_vm1  ;;  %v11150_v30 = vrot.slane %v22063_v63, 5  ;;  %v17809_v63 = vld [vmem:[%s23120_s13 + $0x298] sm:$0xff]   ;;  %v11166_v28 = vrot.slane %v22081_v36, 4  ;;  %v11145_v36 = vrot.slane %v22069_v18, 4  ;;  %v17814_v18 = vld [vmem:[%s23120_s13 + $0x268] sm:$0xff]  }
 0xbea   : > { %v11131_v47 = vsel %vm23661_vm13, %v11130_v14, %v11129_v0  ;;  %vm23662_vm14 = vmmov %vm23647_vm0  ;;  %15735 = vmatpush3.bf16.msra.mxu0 %v17808_v39  ;;  %v17823_v44 = vld [vmem:[%s23120_s13 + $0x2f8] sm:$0xff]   ;;  %v17829_v39 = vld [vmem:[%s23120_s13 + $0x380] sm:$0xff]  }
 0xbeb   : > { %v11133_v17 = vsel %vm23662_vm14, %v11132_v5, %v11131_v47  ;;  %vm23663_vm0 = vmmov %vm23651_vm3  ;;  %15757 = vmatpush3.bf16.msra.mxu1 %v17809_v63  ;;  %15736 = vmatprep.subr.bf16.mxu0 %v17810_v45  ;;  %v11187_v63 = vpack.c.bf16 %v22233_v35, %v22233_v35  ;;  %v17833_v45 = vld [vmem:[%s23120_s13 + $0x388] sm:$0xff]   ;;  %v17835_v35 = vld [vmem:[%s23120_s13 + $0x3d0] sm:$0xff]  }
 0xbec   : > { %v22413_v25 = vsel %vm23663_vm0, %v11134_v23, %v11133_v17  ;;  %vm23664_vm5 = vmmov %vm23649_vm1  ;;  %v11140_v23 = vrot.slane %v22005_v33, 7  ;;  %v11154_v33 = vrot.slane %v22008_v48, 7  ;;  %15758 = vmatprep.subr.bf16.mxu1 %v17811_v2  ;;  %v17815_v48 = vld [vmem:[%s23120_s13 + $0x2e8] sm:$0xff]   ;;  %v17839_v2 = vld [vmem:[%s23120_s13 + $0x3d8] sm:$0xff]  }
 0xbed   : > { %v11110_v8 = vsel %vm23664_vm5, %v11109_v58, %v11108_v40  ;;  %vm23665_vm1 = vmmov %vm23650_vm2  ;;  %v17812_v40 = vld [vmem:[%s23120_s13 + $0x220] sm:$0xff]  }
 0xbee   : > { %v11112_v13 = vsel %vm23665_vm1, %v11111_v20, %v11110_v8  ;;  %vm23666_vm2 = vmmov %vm23663_vm0  ;;  %15737 = vmatpush3.bf16.msra.mxu0 %v17812_v40  ;;  %v17846_v40 = vld [vmem:[%s23120_s13 + $0x368] sm:$0xff]  }
 0xbef   : > { %v22431_v61 = vsel %vm23666_vm2, %v11113_v53, %v11112_v13  ;;  %vm23667_vm3 = vmmov %vm23652_vm4  ;;  %v11157_v53 = vrot.slane %v22060_v56, 5  ;;  %15759 = vmatpush3.bf16.msra.mxu1 %v17813_v22  ;;  %15738 = vmatprep.subr.bf16.mxu0 %v17814_v18  ;;  %v17820_v13 = vld [vmem:[%s23120_s13 + $0x230] sm:$0xff]  }
 0xbf0   : > { %v11124_v24 = vsel %vm23667_vm3, %v11123_v3, %v11122_v43  ;;  %vm23668_vm4 = vmmov %vm23665_vm1  ;;  %v17816_v3 = vld [vmem:[%s23120_s13 + $0x228] sm:$0xff]   ;;  %15760 = vmatprep.subr.bf16.mxu1 %v17815_v48  ;;  %v17850_v22 = vld [vmem:[%s23120_s13 + $0x370] sm:$0xff]  }
 0xbf1   : > { %v11126_v7 = vsel %vm23668_vm4, %v11125_v32, %v11124_v24  ;;  %vm23669_vm15 = vmmov %vm23663_vm0  ;;  %v17821_v32 = vld [vmem:[%s23120_s13 + $0x2b0] sm:$0xff]   ;;  %v17824_v24 = vld [vmem:[%s23120_s13 + $0x238] sm:$0xff]   ;;  %vm23683_vm4 = vcmask 523264  }
 0xbf2   : > { %v22443_v0 = vsel %vm23669_vm15, %v11127_v9, %v11126_v7  ;;  %vm23670_vm6 = vmmov %vm23667_vm3  ;;  %15739 = vmatpush3.bf16.msra.mxu0 %v17816_v3  ;;  %v17822_v9 = vld [vmem:[%s23120_s13 + $0x278] sm:$0xff]   ;;  %v17827_v7 = vld [vmem:[%s23120_s13 + $0x3c0] sm:$0xff]  }
 0xbf3   : > { %v11149_v14 = vsel %vm23670_vm6, %v11148_v38, %v11147_v15  ;;  %vm23671_vm7 = vmmov %vm23665_vm1  ;;  %15761 = vmatpush3.bf16.msra.mxu1 %v17817_v26  ;;  %15740 = vmatprep.subr.bf16.mxu0 %v17818_v50  ;;  %v17825_v15 = vld [vmem:[%s23120_s13 + $0x2b8] sm:$0xff]   ;;  %v17826_v38 = vld [vmem:[%s23120_s13 + $0x340] sm:$0xff]  }
 0xbf4   : > { %v11151_v10 = vsel %vm23671_vm7, %v11150_v30, %v11149_v14  ;;  %vm23672_vm8 = vmmov %vm23663_vm0  ;;  %15762 = vmatprep.subr.bf16.mxu1 %v17819_v41  ;;  %v17828_v30 = vld [vmem:[%s23120_s13 + $0x300] sm:$0xff]   ;;  %v11182_v14 = vpack.c.bf16 %v22201_v4, %v22201_v4  ;;  %v17832_v4 = vld [vmem:[%s23120_s13 + $0x308] sm:$0xff]   ;;  %v11184_v41 = vpack.c.bf16 %v22242_v57, %v22242_v57 }
 0xbf5   : > { %v22461_v6 = vsel %vm23672_vm8, %v11152_v37, %v11151_v10  ;;  %vm23673_vm9 = vmmov %vm23667_vm3  ;;  %v11180_v37 = vpack.c.bf16 %v22182_v19, %v22182_v19  ;;  %v17831_v19 = vld [vmem:[%s23120_s13 + $0x3c8] sm:$0xff]   ;;  %v17836_v10 = vld [vmem:[%s23120_s13 + $0x310] sm:$0xff]  }
 0xbf6   : > { %v11163_v5 = vsel %vm23673_vm9, %v11162_v54, %v11161_v11  ;;  %vm23674_vm10 = vmmov %vm23665_vm1  ;;  %15741 = vmatpush3.bf16.msra.mxu0 %v17820_v13  ;;  %v17830_v11 = vld [vmem:[%s23120_s13 + $0x348] sm:$0xff]   ;;  %v11185_v54 = vpack.c.bf16 %v22214_v12, %v22214_v12  ;;  %v17834_v12 = vld [vmem:[%s23120_s13 + $0x350] sm:$0xff]  }
 0xbf7   : > { %v11165_v47 = vsel %vm23674_vm10, %v11164_v27, %v11163_v5  ;;  %vm23675_vm11 = vmmov %vm23663_vm0  ;;  %15763 = vmatpush3.bf16.msra.mxu1 %v17821_v32  ;;  %15742 = vmatprep.subr.bf16.mxu0 %v17822_v9  ;;  %v17837_v27 = vld [vmem:[%s23120_s13 + $0x390] sm:$0xff]   ;;  %v17840_v5 = vld [vmem:[%s23120_s13 + $0x318] sm:$0xff]   ;;  %v11186_v32 = vpack.c.bf16 %v22255_v62, %v22255_v62 }
 0xbf8   : > { %v22473_v58 = vsel %vm23675_vm11, %v11166_v28, %v11165_v47  ;;  %vm23676_vm12 = vmmov %vm23667_vm3  ;;  %15764 = vmatprep.subr.bf16.mxu1 %v17823_v44  ;;  %v17838_v28 = vld [vmem:[%s23120_s13 + $0x358] sm:$0xff]   ;;  %v17843_v47 = vld [vmem:[%s23120_s13 + $0x3e0] sm:$0xff]   ;;  %v11189_v44 = vpack.c.bf16 %v22273_v49, %v22273_v49 }
 0xbf9   : > { %v11142_v17 = vsel %vm23676_vm12, %v11141_v60, %v11140_v23  ;;  %vm23677_vm13 = vmmov %vm23665_vm1  ;;  %v17841_v23 = vld [vmem:[%s23120_s13 + $0x398] sm:$0xff]   ;;  %v17842_v60 = vld [vmem:[%s23120_s13 + $0x360] sm:$0xff]  }
 0xbfa   : > { %v11144_v20 = vsel %vm23677_vm13, %v11143_v46, %v11142_v17  ;;  %vm23678_vm14 = vmmov %vm23663_vm0  ;;  %15743 = vmatpush3.bf16.msra.mxu0 %v17824_v24  ;;  %v17844_v46 = vld [vmem:[%s23120_s13 + $0x320] sm:$0xff]   ;;  %v17847_v17 = vld [vmem:[%s23120_s13 + $0x3e8] sm:$0xff]   ;;  %v11191_v24 = vpack.c.bf16 %v22285_v34, %v22285_v34 }
 0xbfb   : > { %v22491_v1 = vsel %vm23678_vm14, %v11145_v36, %v11144_v20  ;;  %vm23679_vm0 = vmmov %vm23667_vm3  ;;  %15765 = vmatpush3.bf16.msra.mxu1 %v17825_v15  ;;  %15772 = vmatprep.subr.bf16.mxu0 %v17826_v38  ;;  %v17845_v36 = vld [vmem:[%s23120_s13 + $0x3a0] sm:$0xff]   ;;  %v17851_v18 = vld [vmem:[%s23120_s13 + $0x3f0] sm:$0xff]   ;;  %vm13907_vm3 = vcmask 785408  }
 0xbfc   : > { %v11156_v8 = vsel %vm23679_vm0, %v11155_v51, %v11154_v33  ;;  %vm23680_vm5 = vmmov %vm23665_vm1  ;;  %15794 = vmatprep.subr.bf16.mxu1 %v17827_v7  ;;  %v17848_v33 = vld [vmem:[%s23120_s13 + $0x328] sm:$0xff]   ;;  %v17852_v20 = vld [vmem:[%s23120_s13 + $0x330] sm:$0xff]  }
 0xbfd   : > { %v11158_v43 = vsel %vm23680_vm5, %v11157_v53, %v11156_v8  ;;  %vm23681_vm1 = vmmov %vm23666_vm2  ;;  %13445 = vmatmul.mubr.bf16.vlgmr.msra.gmra.mrb[44].mxu0 %v11180_v37  ;;  %v17849_v51 = vld [vmem:[%s23120_s13 + $0x3a8] sm:$0xff]   ;;  %v17853_v53 = vld [vmem:[%s23120_s13 + $0x3b0] sm:$0xff]   ;;  %vm23682_vm2 = vcmask 261120  }
 0xbfe   : > { %v22499_v56 = vsel %vm23681_vm1, %v11159_v29, %v11158_v43  ;;  %13485 = vmatmul.mubr.bf16.vlgmr.msra.gmra.mrb[44].mxu1 %v11182_v14  ;;  %15773 = vmatpush3.bf16.msra.mxu0 %v17828_v30  ;;  %v17854_v29 = vld [vmem:[%s23120_s13 + $0x378] sm:$0xff]   ;;  %v17858_v3 = vld [vmem:[%s23120_s13 + $0x440] sm:$0xff]   ;;  %v17862_v9 = vld [vmem:[%s23120_s13 + $0x448] sm:$0xff]  }
 0xbff   : > { %13524 = vmatprep.mubr.bf16.mxu0 %v11185_v54  ;;  %15795 = vmatpush3.bf16.msra.mxu1 %v17829_v39  ;;  %v17855_v48 = vld [vmem:[%s23120_s13 + $0x3f8] sm:$0xff]   ;;  %v17859_v26 = vld [vmem:[%s23120_s13 + $0x4c0] sm:$0xff]   ;;  %v17863_v57 = vld [vmem:[%s23120_s13 + $0x4c8] sm:$0xff]  }
 0xc00   : > { %13564 = vmatprep.mubr.bf16.mxu1 %v11187_v63  ;;  %15774 = vmatprep.subr.bf16.mxu0 %v17830_v11  ;;  %v17856_v8 = vld [vmem:[%s23120_s13 + $0x338] sm:$0xff]   ;;  %v17860_v50 = vld [vmem:[%s23120_s13 + $0x400] sm:$0xff]   ;;  %v17864_v62 = vld [vmem:[%s23120_s13 + $0x408] sm:$0xff]  }
 0xc01   : > { %15796 = vmatprep.subr.bf16.mxu1 %v17831_v19  ;;  %v17857_v43 = vld [vmem:[%s23120_s13 + $0x3b8] sm:$0xff]   ;;  %v17861_v13 = vld [vmem:[%s23120_s13 + $0x480] sm:$0xff]   ;;  %v17865_v15 = vld [vmem:[%s23120_s13 + $0x488] sm:$0xff]  }
 0xc02   : > { %15775 = vmatpush3.bf16.msra.mxu0 %v17832_v4  ;;  %v17866_v49 = vld [vmem:[%s23120_s13 + $0x450] sm:$0xff]   ;;  %v17870_v30 = vld [vmem:[%s23120_s13 + $0x458] sm:$0xff]   ;;  %v17874_v11 = vld [vmem:[%s23120_s13 + $0x460] sm:$0xff]  }
 0xc03   : > { %15797 = vmatpush3.bf16.msra.mxu1 %v17833_v45  ;;  %15776 = vmatprep.subr.bf16.mxu0 %v17834_v12  ;;  %v17867_v34 = vld [vmem:[%s23120_s13 + $0x4d0] sm:$0xff]   ;;  %v17871_v37 = vld [vmem:[%s23120_s13 + $0x4d8] sm:$0xff]   ;;  %v17875_v54 = vld [vmem:[%s23120_s13 + $0x4e0] sm:$0xff]  }
 0xc04   : > { %15798 = vmatprep.subr.bf16.mxu1 %v17835_v35  ;;  %v17868_v38 = vld [vmem:[%s23120_s13 + $0x410] sm:$0xff]   ;;  %v17872_v39 = vld [vmem:[%s23120_s13 + $0x418] sm:$0xff]   ;;  %v17876_v19 = vld [vmem:[%s23120_s13 + $0x420] sm:$0xff]  }
 0xc05   : > { %v17869_v7 = vld [vmem:[%s23120_s13 + $0x490] sm:$0xff]   ;;  %v17873_v14 = vld [vmem:[%s23120_s13 + $0x498] sm:$0xff]   ;;  %v17877_v63 = vld [vmem:[%s23120_s13 + $0x4a0] sm:$0xff]  }
 0xc06   : > { %15777 = vmatpush3.bf16.msra.mxu0 %v17836_v10  ;;  %v17878_v4 = vld [vmem:[%s23120_s13 + $0x468] sm:$0xff]   ;;  %v17882_v10 = vld [vmem:[%s23120_s13 + $0x470] sm:$0xff]  }
 0xc07   : > { %15799 = vmatpush3.bf16.msra.mxu1 %v17837_v27  ;;  %15778 = vmatprep.subr.bf16.mxu0 %v17838_v28  ;;  %v17879_v45 = vld [vmem:[%s23120_s13 + $0x4e8] sm:$0xff]   ;;  %v17883_v27 = vld [vmem:[%s23120_s13 + $0x4f0] sm:$0xff]  }
 0xc08   : > { %15800 = vmatprep.subr.bf16.mxu1 %v17839_v2  ;;  %v17880_v12 = vld [vmem:[%s23120_s13 + $0x428] sm:$0xff]   ;;  %v17884_v28 = vld [vmem:[%s23120_s13 + $0x430] sm:$0xff]  }
 0xc09   : > { %v17881_v35 = vld [vmem:[%s23120_s13 + $0x4a8] sm:$0xff]   ;;  %v17885_v2 = vld [vmem:[%s23120_s13 + $0x4b0] sm:$0xff]  }
 0xc0a   : > { %15779 = vmatpush3.bf16.msra.mxu0 %v17840_v5  ;;  %v17886_v5 = vld [vmem:[%s23120_s13 + $0x478] sm:$0xff]  }
 0xc0b   : > { %15801 = vmatpush3.bf16.msra.mxu1 %v17841_v23  ;;  %15780 = vmatprep.subr.bf16.mxu0 %v17842_v60  ;;  %v17887_v23 = vld [vmem:[%s23120_s13 + $0x4f8] sm:$0xff]  }
 0xc0c   : > { %15802 = vmatprep.subr.bf16.mxu1 %v17843_v47  ;;  %v17888_v60 = vld [vmem:[%s23120_s13 + $0x438] sm:$0xff]  }
 0xc0d   : > { %v17889_v47 = vld [vmem:[%s23120_s13 + $0x4b8] sm:$0xff]  }
 0xc0e   : > { %15781 = vmatpush3.bf16.msra.mxu0 %v17844_v46  ;;  %v17890_v46 = vld [vmem:[%s23120_s13 + $0x540] sm:$0xff]  }
 0xc0f   : > { %15803 = vmatpush3.bf16.msra.mxu1 %v17845_v36  ;;  %15782 = vmatprep.subr.bf16.mxu0 %v17846_v40  ;;  %v17891_v36 = vld [vmem:[%s23120_s13 + $0x5c0] sm:$0xff]  }
 0xc10   : > { %15804 = vmatprep.subr.bf16.mxu1 %v17847_v17  ;;  %v17892_v40 = vld [vmem:[%s23120_s13 + $0x500] sm:$0xff]   ;;  %v11188_v17 = vpack.c.bf16 %v22303_v16, %v22303_v16  ;;  %v17895_v16 = vld [vmem:[%s23120_s13 + $0x5c8] sm:$0xff]  }
 0xc12   : > { %15783 = vmatpush3.bf16.msra.mxu0 %v17848_v33  ;;  %v17893_v33 = vld [vmem:[%s23120_s13 + $0x580] sm:$0xff]  }
 0xc13   : > { %15805 = vmatpush3.bf16.msra.mxu1 %v17849_v51  ;;  %15784 = vmatprep.subr.bf16.mxu0 %v17850_v22  ;;  %v11190_v51 = vpack.c.bf16 %v22315_v59, %v22315_v59  ;;  %v17894_v22 = vld [vmem:[%s23120_s13 + $0x548] sm:$0xff]  }
 0xc14   : > { %15806 = vmatprep.subr.bf16.mxu1 %v17851_v18  ;;  %v11193_v18 = vpack.c.bf16 %v22335_v52, %v22335_v52  ;;  %v17896_v59 = vld [vmem:[%s23120_s13 + $0x508] sm:$0xff]   ;;  %v17898_v52 = vld [vmem:[%s23120_s13 + $0x550] sm:$0xff]  }
 0xc16   : > { %15785 = vmatpush3.bf16.msra.mxu0 %v17852_v20  ;;  %v11195_v20 = vpack.c.bf16 %v22349_v31, %v22349_v31  ;;  %v17899_v31 = vld [vmem:[%s23120_s13 + $0x5d0] sm:$0xff]  }
 0xc17   : > { %15807 = vmatpush3.bf16.msra.mxu1 %v17853_v53  ;;  %15786 = vmatprep.subr.bf16.mxu0 %v17854_v29  ;;  %v17897_v53 = vld [vmem:[%s23120_s13 + $0x588] sm:$0xff]   ;;  %v17900_v29 = vld [vmem:[%s23120_s13 + $0x510] sm:$0xff]  }
 0xc18   : > { %15808 = vmatprep.subr.bf16.mxu1 %v17855_v48  ;;  %v17901_v48 = vld [vmem:[%s23120_s13 + $0x590] sm:$0xff]  }
 0xc1a   : > { %15787 = vmatpush3.bf16.msra.mxu0 %v17856_v8  ;;  %v17902_v8 = vld [vmem:[%s23120_s13 + $0x558] sm:$0xff]  }
 0xc1b   : > { %15809 = vmatpush3.bf16.msra.mxu1 %v17857_v43  ;;  %15816 = vmatprep.subr.bf16.mxu0 %v17858_v3  ;;  %v17903_v43 = vld [vmem:[%s23120_s13 + $0x5d8] sm:$0xff]  }
 0xc1c   : > { %15838 = vmatprep.subr.bf16.mxu1 %v17859_v26  ;;  %v17904_v3 = vld [vmem:[%s23120_s13 + $0x518] sm:$0xff]  }
 0xc1d   : > { %13525 = vmatmul.mubr.bf16.vlgmr.msra.gmra.mrb[48].mxu0 %v11184_v41  ;;  %v17905_v26 = vld [vmem:[%s23120_s13 + $0x598] sm:$0xff]   ;;  %v17907_v41 = vld [vmem:[%s23120_s13 + $0x5e0] sm:$0xff]  }
 0xc1e   : > { %13565 = vmatmul.mubr.bf16.vlgmr.msra.gmra.mrb[48].mxu1 %v11186_v32  ;;  %15817 = vmatpush3.bf16.msra.mxu0 %v17860_v50  ;;  %v17906_v50 = vld [vmem:[%s23120_s13 + $0x560] sm:$0xff]  }
 0xc1f   : > { %13604 = vmatprep.mubr.bf16.mxu0 %v11189_v44  ;;  %15839 = vmatpush3.bf16.msra.mxu1 %v17861_v13  ;;  %v17908_v13 = vld [vmem:[%s23120_s13 + $0x520] sm:$0xff]   ;;  %v17911_v44 = vld [vmem:[%s23120_s13 + $0x5e8] sm:$0xff]  }
 0xc20   : > { %13644 = vmatprep.mubr.bf16.mxu1 %v11191_v24  ;;  %15818 = vmatprep.subr.bf16.mxu0 %v17862_v9  ;;  %v17909_v32 = vld [vmem:[%s23120_s13 + $0x5a0] sm:$0xff]   ;;  %v17910_v9 = vld [vmem:[%s23120_s13 + $0x568] sm:$0xff]  }
 0xc21   : > { %15840 = vmatprep.subr.bf16.mxu1 %v17863_v57  ;;  %v17912_v57 = vld [vmem:[%s23120_s13 + $0x528] sm:$0xff]  }
 0xc22   : > { %15819 = vmatpush3.bf16.msra.mxu0 %v17864_v62  ;;  %v17913_v24 = vld [vmem:[%s23120_s13 + $0x5a8] sm:$0xff]   ;;  %v17914_v62 = vld [vmem:[%s23120_s13 + $0x570] sm:$0xff]  }
 0xc23   : > { %15841 = vmatpush3.bf16.msra.mxu1 %v17865_v15  ;;  %15820 = vmatprep.subr.bf16.mxu0 %v17866_v49  ;;  %v17915_v15 = vld [vmem:[%s23120_s13 + $0x5f0] sm:$0xff]  }
 0xc24   : > { %15842 = vmatprep.subr.bf16.mxu1 %v17867_v34  ;;  %v17916_v49 = vld [vmem:[%s23120_s13 + $0x530] sm:$0xff]  }
 0xc25   : > { %v17917_v34 = vld [vmem:[%s23120_s13 + $0x5b0] sm:$0xff]  }
 0xc26   : > { %15821 = vmatpush3.bf16.msra.mxu0 %v17868_v38  ;;  %v17918_v38 = vld [vmem:[%s23120_s13 + $0x578] sm:$0xff]  }
 0xc27   : > { %15843 = vmatpush3.bf16.msra.mxu1 %v17869_v7  ;;  %15822 = vmatprep.subr.bf16.mxu0 %v17870_v30  ;;  %v17919_v7 = vld [vmem:[%s23120_s13 + $0x5f8] sm:$0xff]  }
 0xc28   : > { %15844 = vmatprep.subr.bf16.mxu1 %v17871_v37  ;;  %v17920_v30 = vld [vmem:[%s23120_s13 + $0x538] sm:$0xff]  }
 0xc29   : > { %v17921_v37 = vld [vmem:[%s23120_s13 + $0x5b8] sm:$0xff]  }
 0xc2a   : > { %15823 = vmatpush3.bf16.msra.mxu0 %v17872_v39  ;;  %v17922_v39 = vld [vmem:[%s23120_s13 + $0x640] sm:$0xff]  }
 0xc2b   : > { %15845 = vmatpush3.bf16.msra.mxu1 %v17873_v14  ;;  %15824 = vmatprep.subr.bf16.mxu0 %v17874_v11  ;;  %v17923_v14 = vld [vmem:[%s23120_s13 + $0x6c0] sm:$0xff]  }
 0xc2c   : > { %15846 = vmatprep.subr.bf16.mxu1 %v17875_v54  ;;  %v17924_v11 = vld [vmem:[%s23120_s13 + $0x600] sm:$0xff]   ;;  %v11192_v54 = vpack.c.bf16 %v22366_v42, %v22366_v42  ;;  %v17927_v42 = vld [vmem:[%s23120_s13 + $0x6c8] sm:$0xff]  }
 0xc2e   : > { %15825 = vmatpush3.bf16.msra.mxu0 %v17876_v19  ;;  %v17925_v19 = vld [vmem:[%s23120_s13 + $0x680] sm:$0xff]  }
 0xc2f   : > { %15847 = vmatpush3.bf16.msra.mxu1 %v17877_v63  ;;  %15826 = vmatprep.subr.bf16.mxu0 %v17878_v4  ;;  %v11194_v63 = vpack.c.bf16 %v22383_v21, %v22383_v21  ;;  %v17926_v4 = vld [vmem:[%s23120_s13 + $0x648] sm:$0xff]  }
 0xc30   : > { %15848 = vmatprep.subr.bf16.mxu1 %v17879_v45  ;;  %v11197_v45 = vpack.c.bf16 %v22401_v55, %v22401_v55  ;;  %v17928_v21 = vld [vmem:[%s23120_s13 + $0x608] sm:$0xff]   ;;  %v17930_v55 = vld [vmem:[%s23120_s13 + $0x650] sm:$0xff]  }
 0xc32   : > { %15827 = vmatpush3.bf16.msra.mxu0 %v17880_v12  ;;  %v11199_v12 = vpack.c.bf16 %v22413_v25, %v22413_v25  ;;  %v17931_v25 = vld [vmem:[%s23120_s13 + $0x6d0] sm:$0xff]  }
 0xc33   : > { %15849 = vmatpush3.bf16.msra.mxu1 %v17881_v35  ;;  %15828 = vmatprep.subr.bf16.mxu0 %v17882_v10  ;;  %v17929_v35 = vld [vmem:[%s23120_s13 + $0x688] sm:$0xff]   ;;  %v17932_v10 = vld [vmem:[%s23120_s13 + $0x610] sm:$0xff]  }
 0xc34   : > { %15850 = vmatprep.subr.bf16.mxu1 %v17883_v27  ;;  %v17933_v27 = vld [vmem:[%s23120_s13 + $0x690] sm:$0xff]  }
 0xc36   : > { %15829 = vmatpush3.bf16.msra.mxu0 %v17884_v28  ;;  %v17934_v28 = vld [vmem:[%s23120_s13 + $0x658] sm:$0xff]  }
 0xc37   : > { %15851 = vmatpush3.bf16.msra.mxu1 %v17885_v2  ;;  %15830 = vmatprep.subr.bf16.mxu0 %v17886_v5  ;;  %v17935_v2 = vld [vmem:[%s23120_s13 + $0x6d8] sm:$0xff]  }
 0xc38   : > { %15852 = vmatprep.subr.bf16.mxu1 %v17887_v23  ;;  %v17936_v5 = vld [vmem:[%s23120_s13 + $0x618] sm:$0xff]  }
 0xc39   : > { %v17937_v23 = vld [vmem:[%s23120_s13 + $0x698] sm:$0xff]  }
 0xc3a   : > { %15831 = vmatpush3.bf16.msra.mxu0 %v17888_v60  ;;  %v17938_v60 = vld [vmem:[%s23120_s13 + $0x660] sm:$0xff]  }
 0xc3b   : > { %15853 = vmatpush3.bf16.msra.mxu1 %v17889_v47  ;;  %15860 = vmatprep.subr.bf16.mxu0 %v17890_v46  ;;  %v17939_v47 = vld [vmem:[%s23120_s13 + $0x6e0] sm:$0xff]  }
 0xc3c   : > { %15882 = vmatprep.subr.bf16.mxu1 %v17891_v36  ;;  %v17940_v46 = vld [vmem:[%s23120_s13 + $0x620] sm:$0xff]  }
 0xc3d   : > { %13605 = vmatmul.mubr.bf16.vlgmr.msra.gmra.mrb[52].mxu0 %v11188_v17  ;;  %v17941_v36 = vld [vmem:[%s23120_s13 + $0x6a0] sm:$0xff]   ;;  %v17943_v17 = vld [vmem:[%s23120_s13 + $0x6e8] sm:$0xff]  }
 0xc3e   : > { %13645 = vmatmul.mubr.bf16.vlgmr.msra.gmra.mrb[52].mxu1 %v11190_v51  ;;  %15861 = vmatpush3.bf16.msra.mxu0 %v17892_v40  ;;  %v17942_v40 = vld [vmem:[%s23120_s13 + $0x668] sm:$0xff]  }
 0xc3f   : > { %13684 = vmatprep.mubr.bf16.mxu0 %v11193_v18  ;;  %15883 = vmatpush3.bf16.msra.mxu1 %v17893_v33  ;;  %v17944_v33 = vld [vmem:[%s23120_s13 + $0x628] sm:$0xff]   ;;  %v17947_v18 = vld [vmem:[%s23120_s13 + $0x6f0] sm:$0xff]  }
 0xc40   : > { %13724 = vmatprep.mubr.bf16.mxu1 %v11195_v20  ;;  %15862 = vmatprep.subr.bf16.mxu0 %v17894_v22  ;;  %v17945_v51 = vld [vmem:[%s23120_s13 + $0x6a8] sm:$0xff]   ;;  %v17946_v22 = vld [vmem:[%s23120_s13 + $0x670] sm:$0xff]  }
 0xc41   : > { %15884 = vmatprep.subr.bf16.mxu1 %v17895_v16  ;;  %v17948_v16 = vld [vmem:[%s23120_s13 + $0x630] sm:$0xff]  }
 0xc42   : > { %15863 = vmatpush3.bf16.msra.mxu0 %v17896_v59  ;;  %v17949_v20 = vld [vmem:[%s23120_s13 + $0x6b0] sm:$0xff]   ;;  %v17950_v59 = vld [vmem:[%s23120_s13 + $0x678] sm:$0xff]  }
 0xc43   : > { %15885 = vmatpush3.bf16.msra.mxu1 %v17897_v53  ;;  %15864 = vmatprep.subr.bf16.mxu0 %v17898_v52  ;;  %v17951_v53 = vld [vmem:[%s23120_s13 + $0x6f8] sm:$0xff]  }
 0xc44   : > { %15886 = vmatprep.subr.bf16.mxu1 %v17899_v31  ;;  %v17952_v52 = vld [vmem:[%s23120_s13 + $0x638] sm:$0xff]  }
 0xc45   : > { %v17953_v31 = vld [vmem:[%s23120_s13 + $0x6b8] sm:$0xff]  }
 0xc46   : > { %15865 = vmatpush3.bf16.msra.mxu0 %v17900_v29  ;;  %v17954_v29 = vld [vmem:[%s23120_s13 + $0x740] sm:$0xff]  }
 0xc47   : > { %15887 = vmatpush3.bf16.msra.mxu1 %v17901_v48  ;;  %15866 = vmatprep.subr.bf16.mxu0 %v17902_v8  ;;  %v17955_v48 = vld [vmem:[%s23120_s13 + $0x7c0] sm:$0xff]  }
 0xc48   : > { %15888 = vmatprep.subr.bf16.mxu1 %v17903_v43  ;;  %v17956_v8 = vld [vmem:[%s23120_s13 + $0x700] sm:$0xff]   ;;  %v11196_v43 = vpack.c.bf16 %v22431_v61, %v22431_v61  ;;  %v17959_v61 = vld [vmem:[%s23120_s13 + $0x7c8] sm:$0xff]  }
 0xc4a   : > { %15867 = vmatpush3.bf16.msra.mxu0 %v17904_v3  ;;  %v17957_v3 = vld [vmem:[%s23120_s13 + $0x780] sm:$0xff]  }
 0xc4b   : > { %15889 = vmatpush3.bf16.msra.mxu1 %v17905_v26  ;;  %15868 = vmatprep.subr.bf16.mxu0 %v17906_v50  ;;  %v11198_v26 = vpack.c.bf16 %v22443_v0, %v22443_v0  ;;  %v17958_v50 = vld [vmem:[%s23120_s13 + $0x748] sm:$0xff]  }
 0xc4c   : > { %15890 = vmatprep.subr.bf16.mxu1 %v17907_v41  ;;  %v11201_v41 = vpack.c.bf16 %v22461_v6, %v22461_v6  ;;  %v17960_v0 = vld [vmem:[%s23120_s13 + $0x708] sm:$0xff]   ;;  %v17962_v6 = vld [vmem:[%s23120_s13 + $0x750] sm:$0xff]  }
 0xc4e   : > { %15869 = vmatpush3.bf16.msra.mxu0 %v17908_v13  ;;  %v11203_v13 = vpack.c.bf16 %v22473_v58, %v22473_v58  ;;  %v17963_v58 = vld [vmem:[%s23120_s13 + $0x7d0] sm:$0xff]  }
 0xc4f   : > { %15891 = vmatpush3.bf16.msra.mxu1 %v17909_v32  ;;  %15870 = vmatprep.subr.bf16.mxu0 %v17910_v9  ;;  %v17961_v32 = vld [vmem:[%s23120_s13 + $0x788] sm:$0xff]   ;;  %v17964_v9 = vld [vmem:[%s23120_s13 + $0x710] sm:$0xff]  }
 0xc50   : > { %15892 = vmatprep.subr.bf16.mxu1 %v17911_v44  ;;  %v17965_v44 = vld [vmem:[%s23120_s13 + $0x790] sm:$0xff]  }
 0xc52   : > { %15871 = vmatpush3.bf16.msra.mxu0 %v17912_v57  ;;  %v17966_v57 = vld [vmem:[%s23120_s13 + $0x758] sm:$0xff]  }
 0xc53   : > { %15893 = vmatpush3.bf16.msra.mxu1 %v17913_v24  ;;  %15872 = vmatprep.subr.bf16.mxu0 %v17914_v62  ;;  %v17967_v24 = vld [vmem:[%s23120_s13 + $0x7d8] sm:$0xff]  }
 0xc54   : > { %15894 = vmatprep.subr.bf16.mxu1 %v17915_v15  ;;  %v17968_v62 = vld [vmem:[%s23120_s13 + $0x718] sm:$0xff]  }
 0xc55   : > { %v17969_v15 = vld [vmem:[%s23120_s13 + $0x798] sm:$0xff]  }
 0xc56   : > { %15873 = vmatpush3.bf16.msra.mxu0 %v17916_v49  ;;  %v17970_v49 = vld [vmem:[%s23120_s13 + $0x760] sm:$0xff]  }
 0xc57   : > { %15895 = vmatpush3.bf16.msra.mxu1 %v17917_v34  ;;  %15874 = vmatprep.subr.bf16.mxu0 %v17918_v38  ;;  %v17971_v34 = vld [vmem:[%s23120_s13 + $0x7e0] sm:$0xff]  }
 0xc58   : > { %15896 = vmatprep.subr.bf16.mxu1 %v17919_v7  ;;  %v17972_v38 = vld [vmem:[%s23120_s13 + $0x720] sm:$0xff]  }
 0xc59   : > { %v17973_v7 = vld [vmem:[%s23120_s13 + $0x7a0] sm:$0xff]  }
 0xc5a   : > { %15875 = vmatpush3.bf16.msra.mxu0 %v17920_v30  ;;  %v17974_v30 = vld [vmem:[%s23120_s13 + $0x768] sm:$0xff]  }
 0xc5b   : > { %15897 = vmatpush3.bf16.msra.mxu1 %v17921_v37  ;;  %15904 = vmatprep.subr.bf16.mxu0 %v17922_v39  ;;  %v17975_v37 = vld [vmem:[%s23120_s13 + $0x7e8] sm:$0xff]  }
 0xc5c   : > { %15926 = vmatprep.subr.bf16.mxu1 %v17923_v14  ;;  %v17976_v39 = vld [vmem:[%s23120_s13 + $0x728] sm:$0xff]  }
 0xc5d   : > { %13685 = vmatmul.mubr.bf16.vlgmr.msra.gmra.mrb[56].mxu0 %v11192_v54  ;;  %v17977_v14 = vld [vmem:[%s23120_s13 + $0x7a8] sm:$0xff]  }
 0xc5e   : > { %13725 = vmatmul.mubr.bf16.vlgmr.msra.gmra.mrb[56].mxu1 %v11194_v63  ;;  %15905 = vmatpush3.bf16.msra.mxu0 %v17924_v11  ;;  %v17978_v11 = vld [vmem:[%s23120_s13 + $0x770] sm:$0xff]  }
 0xc5f   : > { %13764 = vmatprep.mubr.bf16.mxu0 %v11197_v45  ;;  %15927 = vmatpush3.bf16.msra.mxu1 %v17925_v19  ;;  %v17979_v19 = vld [vmem:[%s23120_s13 + $0x7f0] sm:$0xff]  }
 0xc60   : > { %13804 = vmatprep.mubr.bf16.mxu1 %v11199_v12  ;;  %15906 = vmatprep.subr.bf16.mxu0 %v17926_v4 }
 0xc61   : > { %15928 = vmatprep.subr.bf16.mxu1 %v17927_v42 }
 0xc62   : > { %15907 = vmatpush3.bf16.msra.mxu0 %v17928_v21  ;;  %v17980_v21 = vld [vmem:[%s23120_s13 + $0x730] sm:$0xff]  }
 0xc63   : > { %15929 = vmatpush3.bf16.msra.mxu1 %v17929_v35  ;;  %15908 = vmatprep.subr.bf16.mxu0 %v17930_v55 }
 0xc64   : > { %15930 = vmatprep.subr.bf16.mxu1 %v17931_v25 }
 0xc66   : > { %15909 = vmatpush3.bf16.msra.mxu0 %v17932_v10  ;;  %v17981_v10 = vld [vmem:[%s23120_s13 + $0x7b0] sm:$0xff]  }
 0xc67   : > { %15931 = vmatpush3.bf16.msra.mxu1 %v17933_v27  ;;  %15910 = vmatprep.subr.bf16.mxu0 %v17934_v28  ;;  %v17982_v27 = vld [vmem:[%s23120_s13 + $0x778] sm:$0xff]  }
 0xc68   : > { %15932 = vmatprep.subr.bf16.mxu1 %v17935_v2  ;;  %v17983_v2 = vld [vmem:[%s23120_s13 + $0x7f8] sm:$0xff]  }
 0xc6a   : > { %15911 = vmatpush3.bf16.msra.mxu0 %v17936_v5 }
 0xc6b   : > { %15933 = vmatpush3.bf16.msra.mxu1 %v17937_v23  ;;  %15912 = vmatprep.subr.bf16.mxu0 %v17938_v60  ;;  %v17984_v23 = vld [vmem:[%s23120_s13 + $0x738] sm:$0xff]  }
 0xc6c   : > { %15934 = vmatprep.subr.bf16.mxu1 %v17939_v47  ;;  %v17985_v60 = vld [vmem:[%s23120_s13 + $0x7b8] sm:$0xff]   ;;  %v11200_v47 = vpack.c.bf16 %v22491_v1, %v22491_v1 }
 0xc6e   : > { %15913 = vmatpush3.bf16.msra.mxu0 %v17940_v46  ;;  %v11202_v46 = vpack.c.bf16 %v22499_v56, %v22499_v56 }
 0xc6f   : > { %15935 = vmatpush3.bf16.msra.mxu1 %v17941_v36  ;;  %15914 = vmatprep.subr.bf16.mxu0 %v17942_v40 }
 0xc70   : > { %15936 = vmatprep.subr.bf16.mxu1 %v17943_v17 }
 0xc72   : > { %15915 = vmatpush3.bf16.msra.mxu0 %v17944_v33 }
 0xc73   : > { %15937 = vmatpush3.bf16.msra.mxu1 %v17945_v51  ;;  %15916 = vmatprep.subr.bf16.mxu0 %v17946_v22 }
 0xc74   : > { %15938 = vmatprep.subr.bf16.mxu1 %v17947_v18 }
 0xc76   : > { %15917 = vmatpush3.bf16.msra.mxu0 %v17948_v16 }
 0xc77   : > { %15939 = vmatpush3.bf16.msra.mxu1 %v17949_v20  ;;  %15918 = vmatprep.subr.bf16.mxu0 %v17950_v59 }
 0xc78   : > { %15940 = vmatprep.subr.bf16.mxu1 %v17951_v53 }
 0xc7a   : > { %15919 = vmatpush3.bf16.msra.mxu0 %v17952_v52 }
 0xc7b   : > { %15941 = vmatpush3.bf16.msra.mxu1 %v17953_v31  ;;  %15948 = vmatprep.subr.bf16.mxu0 %v17954_v29 }
 0xc7c   : > { %15970 = vmatprep.subr.bf16.mxu1 %v17955_v48 }
 0xc7d   : > { %13765 = vmatmul.mubr.bf16.vlgmr.msra.gmra.mrb[60].mxu0 %v11196_v43 }
 0xc7e   : > { %13805 = vmatmul.mubr.bf16.vlgmr.msra.gmra.mrb[60].mxu1 %v11198_v26  ;;  %15949 = vmatpush3.bf16.msra.mxu0 %v17956_v8 }
 0xc7f   : > { %13844 = vmatprep.mubr.bf16.mxu0 %v11201_v41  ;;  %15971 = vmatpush3.bf16.msra.mxu1 %v17957_v3 }
 0xc80   : > { %13884 = vmatprep.mubr.bf16.mxu1 %v11203_v13  ;;  %15950 = vmatprep.subr.bf16.mxu0 %v17958_v50 }
 0xc81   : > { %15972 = vmatprep.subr.bf16.mxu1 %v17959_v61 }
 0xc82   : > { %15951 = vmatpush3.bf16.msra.mxu0 %v17960_v0 }
 0xc83   : > { %15973 = vmatpush3.bf16.msra.mxu1 %v17961_v32  ;;  %15952 = vmatprep.subr.bf16.mxu0 %v17962_v6 }
 0xc84   : > { %15974 = vmatprep.subr.bf16.mxu1 %v17963_v58 }
 0xc86   : > { %15953 = vmatpush3.bf16.msra.mxu0 %v17964_v9 }
 0xc87   : > { %15975 = vmatpush3.bf16.msra.mxu1 %v17965_v44  ;;  %15954 = vmatprep.subr.bf16.mxu0 %v17966_v57 }
 0xc88   : > { %15976 = vmatprep.subr.bf16.mxu1 %v17967_v24 }
 0xc8a   : > { %15955 = vmatpush3.bf16.msra.mxu0 %v17968_v62 }
 0xc8b   : > { %15977 = vmatpush3.bf16.msra.mxu1 %v17969_v15  ;;  %15956 = vmatprep.subr.bf16.mxu0 %v17970_v49 }
 0xc8c   : > { %15978 = vmatprep.subr.bf16.mxu1 %v17971_v34 }
 0xc8e   : > { %15957 = vmatpush3.bf16.msra.mxu0 %v17972_v38 }
 0xc8f   : > { %15979 = vmatpush3.bf16.msra.mxu1 %v17973_v7  ;;  %15958 = vmatprep.subr.bf16.mxu0 %v17974_v30 }
 0xc90   : > { %v15656_v54 = vpop.f32.mrb[36].mxu0  ;;  %15980 = vmatprep.subr.bf16.mxu1 %v17975_v37 }
 0xc91   : > { %v15678_v63 = vpop.f32.mrb[36].mxu1  ;;  %v15657_v4 = vpop.f32.mrb[37].mxu0 }
 0xc92   : > { %v15658_v45 = vadd.f32 %v15657_v4, %v15656_v54  ;;  %v15679_v42 = vpop.f32.mrb[37].mxu1  ;;  %15959 = vmatpush3.bf16.msra.mxu0 %v17976_v39  ;;  %v15659_v12 = vpop.f32.mrb[38].mxu0 }
 0xc93   : > { %v15680_v35 = vadd.f32 %v15679_v42, %v15678_v63  ;;  %15981 = vmatpush3.bf16.msra.mxu1 %v17977_v14  ;;  %v15681_v55 = vpop.f32.mrb[38].mxu1  ;;  %v15660_v25 = vpop.f32.mrb[39].mxu0  ;;  %15960 = vmatprep.subr.bf16.mxu0 %v17978_v11 }
 0xc94   : > { %v15682_v28 = vpop.f32.mrb[39].mxu1  ;;  %15982 = vmatprep.subr.bf16.mxu1 %v17979_v19 }
 0xc95   : > { %v13327_v5 = vadd.f32 %v15680_v35, %v15658_v45 }
 0xc96   : > { %15961 = vmatpush3.bf16.msra.mxu0 %v17980_v21 }
 0xc97   : > { %15983 = vmatpush3.bf16.msra.mxu1 %v17981_v10  ;;  %15962 = vmatprep.subr.bf16.mxu0 %v17982_v27 }
 0xc98   : > { %15984 = vmatprep.subr.bf16.mxu1 %v17983_v2 }
 0xc9a   : > { %15963 = vmatpush3.bf16.msra.mxu0 %v17984_v23 }
 0xc9b   : > { %15985 = vmatpush3.bf16.msra.mxu1 %v17985_v60 }
 0xc9d   : > { %13845 = vmatmul.mubr.bf16.vlgmr.msra.gmra.mrb[64].mxu0 %v11200_v47 }
 0xc9e   : > { %13885 = vmatmul.mubr.bf16.vlgmr.msra.gmra.mrb[64].mxu1 %v11202_v46 }
 0xcb0   : > { %v15700_v36 = vpop.f32.mrb[40].mxu0 }
 0xcb1   : > { %v15722_v40 = vpop.f32.mrb[40].mxu1  ;;  %v15701_v17 = vpop.f32.mrb[41].mxu0 }
 0xcb2   : > { %v15702_v33 = vadd.f32 %v15701_v17, %v15700_v36  ;;  %v15723_v51 = vpop.f32.mrb[41].mxu1  ;;  %v15703_v22 = vpop.f32.mrb[42].mxu0 }
 0xcb3   : > { %v15724_v18 = vadd.f32 %v15723_v51, %v15722_v40  ;;  %v15725_v16 = vpop.f32.mrb[42].mxu1  ;;  %v15704_v20 = vpop.f32.mrb[43].mxu0 }
 0xcb4   : > { %v13367_v59 = vadd.f32 %v15702_v33, %v13327_v5  ;;  %v15726_v53 = vpop.f32.mrb[43].mxu1 }
 0xcb6   : > { %v13407_v52 = vadd.f32 %v15724_v18, %v13367_v59 }
 0xcd0   : > { %v15744_v31 = vpop.f32.mrb[44].mxu0 }
 0xcd1   : > { %v15766_v29 = vpop.f32.mrb[44].mxu1  ;;  %v15745_v1 = vpop.f32.mrb[45].mxu0 }
 0xcd2   : > { %v15746_v48 = vadd.f32 %v15745_v1, %v15744_v31  ;;  %v15767_v8 = vpop.f32.mrb[45].mxu1  ;;  %v15747_v56 = vpop.f32.mrb[46].mxu0 }
 0xcd3   : > { %v15768_v43 = vadd.f32 %v15767_v8, %v15766_v29  ;;  %v15769_v3 = vpop.f32.mrb[46].mxu1  ;;  %v15748_v26 = vpop.f32.mrb[47].mxu0 }
 0xcd4   : > { %v13447_v50 = vadd.f32 %v15746_v48, %v13407_v52  ;;  %v15770_v41 = vpop.f32.mrb[47].mxu1 }
 0xcd6   : > { %v13487_v61 = vadd.f32 %v15768_v43, %v13447_v50 }
 0xcf0   : > { %v15788_v13 = vpop.f32.mrb[48].mxu0 }
 0xcf1   : > { %v15810_v0 = vpop.f32.mrb[48].mxu1  ;;  %v15789_v32 = vpop.f32.mrb[49].mxu0 }
 0xcf2   : > { %v15790_v6 = vadd.f32 %v15789_v32, %v15788_v13  ;;  %v15811_v58 = vpop.f32.mrb[49].mxu1  ;;  %v15791_v9 = vpop.f32.mrb[50].mxu0  ;;  %v13909_v32 = vld [vmem:[%s522_s26] sm:$0x1] }
 0xcf3   : > { %v15812_v44 = vadd.f32 %v15811_v58, %v15810_v0  ;;  %v15813_v57 = vpop.f32.mrb[50].mxu1  ;;  %v15792_v24 = vpop.f32.mrb[51].mxu0 }
 0xcf4   : > { %v13527_v62 = vadd.f32 %v15790_v6, %v13487_v61  ;;  %v15814_v15 = vpop.f32.mrb[51].mxu1 }
 0xcf6   : > { %v13567_v49 = vadd.f32 %v15812_v44, %v13527_v62 }
 0xd10   : > { %v15832_v34 = vpop.f32.mrb[52].mxu0 }
 0xd11   : > { %v15854_v38 = vpop.f32.mrb[52].mxu1  ;;  %v15833_v7 = vpop.f32.mrb[53].mxu0 }
 0xd12   : > { %v15834_v30 = vadd.f32 %v15833_v7, %v15832_v34  ;;  %v15855_v37 = vpop.f32.mrb[53].mxu1  ;;  %v15835_v39 = vpop.f32.mrb[54].mxu0 }
 0xd13   : > { %v15856_v14 = vadd.f32 %v15855_v37, %v15854_v38  ;;  %v15857_v11 = vpop.f32.mrb[54].mxu1  ;;  %v15836_v54 = vpop.f32.mrb[55].mxu0 }
 0xd14   : > { %v13607_v19 = vadd.f32 %v15834_v30, %v13567_v49  ;;  %v15858_v63 = vpop.f32.mrb[55].mxu1 }
 0xd16   : > { %v13647_v4 = vadd.f32 %v15856_v14, %v13607_v19 }
 0xd30   : > { %v15876_v45 = vpop.f32.mrb[56].mxu0 }
 0xd31   : > { %v15898_v42 = vpop.f32.mrb[56].mxu1  ;;  %v15877_v12 = vpop.f32.mrb[57].mxu0 }
 0xd32   : > { %v15878_v21 = vadd.f32 %v15877_v12, %v15876_v45  ;;  %v15899_v35 = vpop.f32.mrb[57].mxu1  ;;  %v15879_v55 = vpop.f32.mrb[58].mxu0 }
 0xd33   : > { %v15900_v25 = vadd.f32 %v15899_v35, %v15898_v42  ;;  %v15901_v10 = vpop.f32.mrb[58].mxu1  ;;  %v15880_v27 = vpop.f32.mrb[59].mxu0 }
 0xd34   : > { %v13687_v28 = vadd.f32 %v15878_v21, %v13647_v4  ;;  %v15902_v2 = vpop.f32.mrb[59].mxu1 }
 0xd36   : > { %v13727_v5 = vadd.f32 %v15900_v25, %v13687_v28 }
 0xd50   : > { %v15920_v23 = vpop.f32.mrb[60].mxu0 }
 0xd51   : > { %v15942_v60 = vpop.f32.mrb[60].mxu1  ;;  %v15921_v47 = vpop.f32.mrb[61].mxu0 }
 0xd52   : > { %v15922_v46 = vadd.f32 %v15921_v47, %v15920_v23  ;;  %v15943_v36 = vpop.f32.mrb[61].mxu1  ;;  %v15923_v40 = vpop.f32.mrb[62].mxu0 }
 0xd53   : > { %v15944_v17 = vadd.f32 %v15943_v36, %v15942_v60  ;;  %v15945_v33 = vpop.f32.mrb[62].mxu1  ;;  %v15924_v51 = vpop.f32.mrb[63].mxu0 }
 0xd54   : > { %v13767_v22 = vadd.f32 %v15922_v46, %v13727_v5  ;;  %v15946_v18 = vpop.f32.mrb[63].mxu1 }
 0xd56   : > { %v13807_v16 = vadd.f32 %v15944_v17, %v13767_v22 }
 0xd70   : > { %v15964_v20 = vpop.f32.mrb[64].mxu0 }
 0xd71   : > { %v15986_v59 = vpop.f32.mrb[64].mxu1  ;;  %v15965_v53 = vpop.f32.mrb[65].mxu0 }
 0xd72   : > { %v15966_v52 = vadd.f32 %v15965_v53, %v15964_v20  ;;  %v15987_v31 = vpop.f32.mrb[65].mxu1  ;;  %v15967_v29 = vpop.f32.mrb[66].mxu0 }
 0xd73   : > { %v15988_v1 = vadd.f32 %v15987_v31, %v15986_v59  ;;  %v15989_v48 = vpop.f32.mrb[66].mxu1  ;;  %v15968_v8 = vpop.f32.mrb[67].mxu0 }
 0xd74   : > { %v13847_v56 = vadd.f32 %v15966_v52, %v13807_v16  ;;  %v15990_v43 = vpop.f32.mrb[67].mxu1 }
 0xd76   : > { %v13887_v3 = vadd.f32 %v15988_v1, %v13847_v56 }
 0xd78   : > { %v13897_v26 = vrot.slane %v13887_v3, 2  ;;  %v13893_v50 = vrot.slane %v13887_v3, 1  ;;  %v13901_v41 = vrot.slane %v13887_v3, 3 }
 0xd7a   : > { %13898 = vrot.lane.b32.xlu1 %v13897_v26, %s18237_s16  ;;  %13894 = vrot.lane.b32.xlu0 %v13893_v50, %s18239_s29  ;;  %s15347_s16 = sshll.u32 %s18343_s22, 4  ;;  %s18154_s22 = scalar_lea.vmem %s23067_s0, 16 }
 0xd7b   : > { %s23065_s29 = scalar_lea.hbm %s23122_s15, %s15347_s16  ;;  %p18155_p9 = scmp.ne.s32.totalorder %s23067_s0, %s18154_s22 }
 0xd7c   : > { %p18162_p4 = scmp.lt.s32.totalorder %s18160_s25, %s18154_s22 }
 0xd7d   : > { %p18156_p12 = pnand %p18155_p9, %p23684_p10 }
 0xd7e   : > { %13902 = vrot.lane.b32.xlu0 %v13901_v41, %s18240_s30  ;;  %s13913_s30 = scalar_lea.sflag [#allocation6], %s512_s20  ;;  %p18163_p7 = por %p18162_p4, %p18161_p3 }
 0xd7f   : > { %p18157_p2 = pneg %p18156_p12 }
 0xd81   : > { %p18164_p8 = pnand %p18163_p7, %p18157_p2 }
 0xdec   : > { %v13895_v61 = vpop.permute.xlu0 %13894  ;;  %v13899_v13 = vpop.permute.xlu1 %13898 }
 0xded   : > { %v13905_v0 = vsel %vm23682_vm2, %v13887_v3, %v13895_v61 }
 0xdee   : > { %v13906_v6 = vsel %vm23683_vm4, %v13905_v0, %v13899_v13 }
 0xdf0   : > { %v13903_v58 = vpop.permute.xlu0 %13902 }
 0xdf1   : > { %v13908_v9 = vsel %vm13907_vm3, %v13906_v6, %v13903_v58 }
 0xdf2   : > { %v13910_v44 = vadd.f32 %v13909_v32, %v13908_v9 }
 0xdf4   : > { %13911 = vst [vmem:[%s513_s18] sm:$0x1] %v13910_v44 }
 0xdf5   : > { %18167 = shalt.err (!%p18164_p8)
}
 0xdf6   : > { %s18168_s20 = scalar_lea.hbm %s23065_s29, 16  ;;  %s18172_s18 = scalar_lea.hbm %s23122_s15, 32 }
 0xdf7   : > { %p18169_p11 = scmp.ne.s32.totalorder %s23065_s29, %s18168_s20  ;;  %p18173_p0 = scmp.lt.u32.totalorder %s23065_s29, %s23122_s15 }
 0xdf8   : > { %p18174_p5 = scmp.lt.u32.totalorder %s18172_s18, %s18168_s20  ;;  %p18176_p9 = scmp.lt.u32.totalorder %s18168_s20, %s23065_s29 }
 0xdf9   : > { %p18170_p13 = pnand %p18169_p11, %p23684_p10 }
 0xdfa   : > { %p18175_p6 = por %p18174_p5, %p18173_p0 }
 0xdfb   : > { %p18171_p1 = pneg %p18170_p13 }
 0xdfc   : > { %p18177_p12 = por %p18176_p9, %p18175_p6 }
 0xdfe   : > { %p18178_p2 = pnand %p18177_p12, %p18171_p1 }
 0xe00   : > { %18181 = shalt.err (!%p18178_p2)
}
 0xe01   : > { %16478 = dma.vmem_to_hbm [thread:$0]  (%p23684_p10), %s23067_s0, 16, %s23065_s29, %s13913_s30  }
 0xe02 PF: > { %s23685_s22 = sld [smem:[#allocation10_spill]]  ;;  %s23686_s23 = sld [smem:[#allocation14_spill]] }
 0xe03   : > { %p16490_p3 = scmp.ge.s32.totalorder %s18220_s21, 2 }
 0xe08   : > { %s13937_s24 = sand.u32 1, %s23685_s22   ;;  %p23687_p4 = scmp.ne.s32.totalorder %s23686_s23, 0 }
 0xe09   : > { %s13938_s25 = scalar_lea.sflag [#allocation6], %s13937_s24 }
 0xe0a   : > { %p16485_p7 = pnand %p16490_p3, %p23687_p4 }
 0xe0c   : > { %18203 = dma.done.wait (!%p16485_p7), %s13938_s25, 16  }
 0xe0d   : > { %18205 = vsyncadd (!%p16485_p7), %s13938_s25, 4294967280  ;;  %s23688_s21 = sld [smem:[#allocation12_spill]]  ;;  %s23689_s20 = sld [smem:[#allocation11_spill]] }
 0xe0e   : > { %s23690_s26 = sld [smem:[#allocation13_spill]]  ;;  %s23691_s18 = smov %s18212_s19 }
 0xe13   : > { %p26_p8 = scmp.ge.s32.totalorder %s23688_s21, 4   ;;  %s23692_s19 = smov %s23689_s20 }
 0xe14   : > { %s23693_s20 = smov %s23690_s26 }
 0xe15   :  { %28 = sbr.rel (!%p26_p8) target bundleno = 6 (0x6), region = 136 }
 0xe1c   :  { %13942 = vsyncpa [#allocation5], 1 }
 0xe1d   :  { %13944 = vsyncpa [#allocation5 + $0x1], 1 }
 0xe1e   :  { %13945 = vsyncpa [#allocation6], 1 }
 0xe1f   :  { %13947 = vsyncpa [#allocation6 + $0x1], 1 }

</bundles_post_ra>
